<compile_context>
chip_gen: v7x
topology: tpu7x:2x2x1
jax: 0.10.0
libtpu: 0.0.40
codegen_flags: <defaults>
</compile_context>

<pallas_src>
import functools

import jax
import jax.numpy as jnp
from jax import lax
from jax.experimental import pallas as pl
from jax.experimental.pallas import tpu as pltpu

RELU_SLOPE = 0.1
EPS = 1e-5


def _unet_conv_block_kernel(
    x_ref,       # (1, H, W, Cin)        bf16, unpadded input (one batch elem)
    w1_ref,      # (3, 3*Cin, Cout)      bf16, conv_1 weights, dx-fused per dy
    b1_ref,      # (1, Cout)             f32
    gamma_ref,   # (1, Cout)             f32, IN weight padded with 1s
    beta_ref,    # (1, Cout)             f32, IN bias   padded with 0s
    w2_ref,      # (3, 3*Cout, Cout)     bf16, conv_2 weights, dx-fused per dy
    b2_ref,      # (1, Cout)             f32
    wid_ref,     # (Cin, Cout)           bf16, identity 1x1 conv weights
    bid_ref,     # (1, Cout)             f32
    out_ref,     # (1, H, W, Cout)       f32
    pad_s,       # VMEM (H+2, W+2, Cmax) bf16 scratch, shared by both convs
):
    H = out_ref.shape[1]
    W = out_ref.shape[2]
    Cin = x_ref.shape[3]
    Cout = out_ref.shape[3]
    half = Cout // 2
    Cmax = pad_s.shape[2]

    # Only the 1-pixel border needs zeros (interior is overwritten before each
    # use).  Zero it once across all Cmax channels; it stays valid for both
    # convs.  Redone every grid step (tiny) so a core-split batch axis is safe.
    zrow = jnp.zeros((1, W + 2, Cmax), pad_s.dtype)
    zcol = jnp.zeros((H, 1, Cmax), pad_s.dtype)
    pad_s[0:1, :, :] = zrow
    pad_s[H + 1:H + 2, :, :] = zrow
    pad_s[1:H + 1, 0:1, :] = zcol
    pad_s[1:H + 1, W + 1:W + 2, :] = zcol

    # Stage the unpadded input into the padded VMEM scratch (in-kernel pad).
    x_c = x_ref[0]                                     # (H, W, Cin) bf16
    pad_s[1:H + 1, 1:W + 1, 0:Cin] = x_c

    def im2row(dy, C):
        # Concatenate the three dx taps along the channel (lane) axis so each
        # conv kernel row becomes one fat-K MXU matmul (K = 3*C).
        taps = [pad_s[dy:dy + H, dx:dx + W, 0:C].reshape(H * W, C)
                for dx in range(3)]
        return jnp.concatenate(taps, axis=-1)          # (H*W, 3*C) bf16

    # ---- conv_1: 3x3, padding=1 -> 3 matmuls, K = 3*Cin ----
    acc = jnp.dot(im2row(0, Cin), w1_ref[0],
                  preferred_element_type=jnp.float32) + b1_ref[...]
    acc = acc + jnp.dot(im2row(1, Cin), w1_ref[1],
                        preferred_element_type=jnp.float32)
    acc = acc + jnp.dot(im2row(2, Cin), w1_ref[2],
                        preferred_element_type=jnp.float32)

    # ---- HIN: instance norm (per image, per channel, over H*W) on the first
    #      half of the channels, identity on the rest.  Stats are computed
    #      full-width (extra half is discarded via the lane mask) and folded
    #      into a (1, Cout) scale/shift -> one fused mul+add over the tile. ----
    inv_n = 1.0 / float(H * W)
    s1 = jnp.sum(acc, axis=0, keepdims=True)           # (1, Cout)
    s2 = jnp.sum(acc * acc, axis=0, keepdims=True)     # (1, Cout)
    mean = s1 * inv_n
    var = jnp.maximum(s2 * inv_n - mean * mean, 0.0)
    inv_std = lax.rsqrt(var + EPS)
    first = lax.broadcasted_iota(jnp.int32, (1, Cout), 1) < half
    g = gamma_ref[...] * inv_std                       # (1, Cout)
    scale = jnp.where(first, g, 1.0)
    shift = jnp.where(first, beta_ref[...] - mean * g, 0.0)
    feat = acc * scale + shift

    # ---- relu_1 (LeakyReLU 0.1) ----
    feat = jnp.where(feat >= 0, feat, RELU_SLOPE * feat)

    # ---- stage mid feature (bf16) into the shared padded scratch ----
    pad_s[1:H + 1, 1:W + 1, 0:Cout] = (
        feat.astype(jnp.bfloat16).reshape(H, W, Cout))

    # ---- conv_2: 3x3, padding=1 -> 3 matmuls, K = 3*Cout ----
    acc2 = jnp.dot(im2row(0, Cout), w2_ref[0],
                   preferred_element_type=jnp.float32) + b2_ref[...]
    acc2 = acc2 + jnp.dot(im2row(1, Cout), w2_ref[1],
                          preferred_element_type=jnp.float32)
    acc2 = acc2 + jnp.dot(im2row(2, Cout), w2_ref[2],
                          preferred_element_type=jnp.float32)

    # ---- relu_2 (LeakyReLU 0.1) ----
    acc2 = jnp.where(acc2 >= 0, acc2, RELU_SLOPE * acc2)

    # ---- identity: 1x1 conv on the already-resident unpadded input ----
    ident = jnp.dot(x_c.reshape(H * W, Cin), wid_ref[...],
                    preferred_element_type=jnp.float32) + bid_ref[...]

    out_ref[...] = (acc2 + ident).reshape(1, H, W, Cout).astype(out_ref.dtype)


def _vmem_limit_bytes(H, W, Cin, Cout):
    bf16, f32 = 2, 4
    cmax = max(Cin, Cout)
    blocks = 2 * H * W * Cin * bf16 + 2 * H * W * Cout * f32   # dbl-buffered io
    weights = 2 * (9 * Cin * Cout + 9 * Cout * Cout + Cin * Cout) * bf16
    weights += 2 * 5 * Cout * f32
    scratch = (H + 2) * (W + 2) * cmax * bf16
    temps = 4 * H * W * Cout * f32 + 2 * H * W * 3 * cmax * bf16
    est = blocks + weights + scratch + temps
    return int(max(32 << 20, min(3 * est + (8 << 20), 64 << 20)))


@functools.partial(jax.jit, static_argnames=())
def unet_conv_block(x_nchw, params):
    """Forward of UNetConvBlock(in_size, out_size, 0.1, use_HIN=True).

    x_nchw: (B, Cin, H, W) float32 -> (B, Cout, H, W) float32.
    """
    x = jnp.transpose(x_nchw, (0, 2, 3, 1))            # NCHW -> NHWC
    B, H, W, Cin = x.shape
    Cout = params["w1"].shape[-1]
    half = Cout // 2
    Cmax = max(Cin, Cout)

    # bf16 matmul operands (MXU fast path, half the HBM/VMEM bytes).
    x_bf = x.astype(jnp.bfloat16)
    w1r = params["w1"].astype(jnp.bfloat16).reshape(3, 3 * Cin, Cout)
    w2r = params["w2"].astype(jnp.bfloat16).reshape(3, 3 * Cout, Cout)
    wid = params["wid"].astype(jnp.bfloat16)

    # Pad the InstanceNorm affine params to full Cout width (identity on the
    # second half) so the kernel never lane-slices the half-width group.
    gamma_full = jnp.concatenate(
        [params["gamma"], jnp.ones((1, Cout - half), jnp.float32)], axis=-1)
    beta_full = jnp.concatenate(
        [params["beta"], jnp.zeros((1, Cout - half), jnp.float32)], axis=-1)

    flops = 2 * B * H * W * (9 * Cin * Cout + 9 * Cout * Cout + Cin * Cout)
    bytes_accessed = (x_bf.size * 2 + B * H * W * Cout * 4
                      + (w1r.size + w2r.size + wid.size) * 2
                      + 5 * Cout * 4)
    cost = pl.CostEstimate(flops=flops, transcendentals=B * Cout,
                           bytes_accessed=bytes_accessed)

    out_nhwc = pl.pallas_call(
        _unet_conv_block_kernel,
        out_shape=jax.ShapeDtypeStruct((B, H, W, Cout), jnp.float32),
        grid_spec=pltpu.PrefetchScalarGridSpec(
            num_scalar_prefetch=0,
            grid=(B,),
            in_specs=[
                pl.BlockSpec((1, H, W, Cin), lambda b: (b, 0, 0, 0)),
                pl.BlockSpec((3, 3 * Cin, Cout), lambda b: (0, 0, 0)),
                pl.BlockSpec((1, Cout), lambda b: (0, 0)),
                pl.BlockSpec((1, Cout), lambda b: (0, 0)),
                pl.BlockSpec((1, Cout), lambda b: (0, 0)),
                pl.BlockSpec((3, 3 * Cout, Cout), lambda b: (0, 0, 0)),
                pl.BlockSpec((1, Cout), lambda b: (0, 0)),
                pl.BlockSpec((Cin, Cout), lambda b: (0, 0)),
                pl.BlockSpec((1, Cout), lambda b: (0, 0)),
            ],
            out_specs=pl.BlockSpec((1, H, W, Cout), lambda b: (b, 0, 0, 0)),
            scratch_shapes=[
                pltpu.VMEM((H + 2, W + 2, Cmax), jnp.bfloat16),
            ],
        ),
        compiler_params=pltpu.CompilerParams(
            dimension_semantics=("parallel",),
            vmem_limit_bytes=_vmem_limit_bytes(H, W, Cin, Cout)),
        cost_estimate=cost,
    )(x_bf, w1r, params["b1"], gamma_full, beta_full,
      w2r, params["b2"], wid, params["bid"])

    return jnp.transpose(out_nhwc, (0, 3, 1, 2))       # NHWC -> NCHW


def _reference_forward(x_nchw, p):
    """Pure-JAX f32 reference (mirrors the PyTorch forward) for verification."""
    x = jnp.transpose(x_nchw, (0, 2, 3, 1))
    dn = ("NHWC", "HWIO", "NHWC")
    o = lax.conv_general_dilated(x, p["w1"], (1, 1), [(1, 1), (1, 1)],
                                 dimension_numbers=dn) + p["b1"][0]
    half = o.shape[-1] // 2
    o1, o2 = o[..., :half], o[..., half:]
    mean = jnp.mean(o1, axis=(1, 2), keepdims=True)
    var = jnp.mean((o1 - mean) ** 2, axis=(1, 2), keepdims=True)
    o1 = (o1 - mean) * lax.rsqrt(var + EPS) * p["gamma"][0] + p["beta"][0]
    o = jnp.concatenate([o1, o2], axis=-1)
    o = jnp.where(o >= 0, o, RELU_SLOPE * o)
    o = lax.conv_general_dilated(o, p["w2"], (1, 1), [(1, 1), (1, 1)],
                                 dimension_numbers=dn) + p["b2"][0]
    o = jnp.where(o >= 0, o, RELU_SLOPE * o)
    ident = jnp.einsum("nhwc,cd->nhwd", x, p["wid"]) + p["bid"][0]
    return jnp.transpose(o + ident, (0, 3, 1, 2))


def _init_params(key, in_size, out_size):
    ks = jax.random.split(key, 8)
    half = out_size // 2
    return {
        "w1": 0.1 * jax.random.normal(ks[0], (3, 3, in_size, out_size), jnp.float32),
        "b1": 0.1 * jax.random.normal(ks[1], (1, out_size), jnp.float32),
        "gamma": 1.0 + 0.1 * jax.random.normal(ks[2], (1, half), jnp.float32),
        "beta": 0.1 * jax.random.normal(ks[3], (1, half), jnp.float32),
        "w2": 0.1 * jax.random.normal(ks[4], (3, 3, out_size, out_size), jnp.float32),
        "b2": 0.1 * jax.random.normal(ks[5], (1, out_size), jnp.float32),
        "wid": 0.1 * jax.random.normal(ks[6], (in_size, out_size), jnp.float32),
        "bid": 0.1 * jax.random.normal(ks[7], (1, out_size), jnp.float32),
    }


if __name__ == "__main__":
    key = jax.random.PRNGKey(0)
    k_x, k_p = jax.random.split(key)

    B, Cin, Cout, H, W = 2, 4, 8, 16, 16
    x = jax.random.normal(k_x, (B, Cin, H, W), jnp.float32)
    params = _init_params(k_p, Cin, Cout)

    out = jax.block_until_ready(unet_conv_block(x, params))
    ref = jax.block_until_ready(_reference_forward(x, params))

    assert out.shape == (B, Cout, H, W)
    # bf16 matmul inputs -> loosened tolerance vs the f32 reference.
    assert jnp.allclose(out, ref, atol=1e-1, rtol=1e-1), "mismatch vs reference"

    print("KERNEL_OK")
</pallas_src>

<mosaic_0001>
module attributes {stable_mosaic.version = 11 : i64} {
  func.func @_unet_conv_block_kernel(%arg0: i32, %arg1: memref<1x16x16x4xbf16, #tpu.memory_space<vmem>>, %arg2: memref<3x12x8xbf16, #tpu.memory_space<vmem>>, %arg3: memref<1x8xf32, #tpu.memory_space<vmem>>, %arg4: memref<1x8xf32, #tpu.memory_space<vmem>>, %arg5: memref<1x8xf32, #tpu.memory_space<vmem>>, %arg6: memref<3x24x8xbf16, #tpu.memory_space<vmem>>, %arg7: memref<1x8xf32, #tpu.memory_space<vmem>>, %arg8: memref<4x8xbf16, #tpu.memory_space<vmem>>, %arg9: memref<1x8xf32, #tpu.memory_space<vmem>>, %arg10: memref<1x16x16x8xf32, #tpu.memory_space<vmem>>, %arg11: memref<18x18x8xbf16, #tpu.memory_space<vmem>>) attributes {dimension_semantics = [#tpu.dimension_semantics<parallel>], iteration_bounds = array<i64: 2>, scalar_prefetch = 0 : i64, scratch_operands = 1 : i64, tpu.core_type = #tpu.core_type<tc>, window_params = [{transform_indices = @transform_0, window_bounds = array<i64: 1, 16, 16, 4>}, {pipeline_mode = #tpu.pipeline_mode<synchronous>, transform_indices = @transform_1, window_bounds = array<i64: 3, 12, 8>}, {pipeline_mode = #tpu.pipeline_mode<synchronous>, transform_indices = @transform_2, window_bounds = array<i64: 1, 8>}, {pipeline_mode = #tpu.pipeline_mode<synchronous>, transform_indices = @transform_3, window_bounds = array<i64: 1, 8>}, {pipeline_mode = #tpu.pipeline_mode<synchronous>, transform_indices = @transform_4, window_bounds = array<i64: 1, 8>}, {pipeline_mode = #tpu.pipeline_mode<synchronous>, transform_indices = @transform_5, window_bounds = array<i64: 3, 24, 8>}, {pipeline_mode = #tpu.pipeline_mode<synchronous>, transform_indices = @transform_6, window_bounds = array<i64: 1, 8>}, {pipeline_mode = #tpu.pipeline_mode<synchronous>, transform_indices = @transform_7, window_bounds = array<i64: 4, 8>}, {pipeline_mode = #tpu.pipeline_mode<synchronous>, transform_indices = @transform_8, window_bounds = array<i64: 1, 8>}, {transform_indices = @transform_9, window_bounds = array<i64: 1, 16, 16, 8>}]} {
    %cst = arith.constant 0.000000e+00 : bf16
    %0 = vector.broadcast %cst : bf16 to vector<1x18x8xbf16>
    %cst_0 = arith.constant 0.000000e+00 : bf16
    %1 = vector.broadcast %cst_0 : bf16 to vector<16x1x8xbf16>
    %c0 = arith.constant 0 : index
    %c0_1 = arith.constant 0 : index
    %c0_2 = arith.constant 0 : index
    %2 = vector.load %arg11[%c0, %c0_1, %c0_2] : memref<18x18x8xbf16, #tpu.memory_space<vmem>>, vector<1x18x8xbf16>
    tpu.vector_store %arg11[%c0, %c0_1, %c0_2], %0 {strides = array<i32>} : memref<18x18x8xbf16, #tpu.memory_space<vmem>>, vector<1x18x8xbf16>,
    %c17 = arith.constant 17 : index
    %c0_3 = arith.constant 0 : index
    %c0_4 = arith.constant 0 : index
    %3 = vector.load %arg11[%c17, %c0_3, %c0_4] : memref<18x18x8xbf16, #tpu.memory_space<vmem>>, vector<1x18x8xbf16>
    tpu.vector_store %arg11[%c17, %c0_3, %c0_4], %0 {strides = array<i32>} : memref<18x18x8xbf16, #tpu.memory_space<vmem>>, vector<1x18x8xbf16>,
    %c1 = arith.constant 1 : index
    %c0_5 = arith.constant 0 : index
    %c0_6 = arith.constant 0 : index
    %4 = vector.load %arg11[%c1, %c0_5, %c0_6] : memref<18x18x8xbf16, #tpu.memory_space<vmem>>, vector<16x1x8xbf16>
    tpu.vector_store %arg11[%c1, %c0_5, %c0_6], %1 {strides = array<i32>} : memref<18x18x8xbf16, #tpu.memory_space<vmem>>, vector<16x1x8xbf16>,
    %c1_7 = arith.constant 1 : index
    %c17_8 = arith.constant 17 : index
    %c0_9 = arith.constant 0 : index
    %5 = vector.load %arg11[%c1_7, %c17_8, %c0_9] : memref<18x18x8xbf16, #tpu.memory_space<vmem>>, vector<16x1x8xbf16>
    tpu.vector_store %arg11[%c1_7, %c17_8, %c0_9], %1 {strides = array<i32>} : memref<18x18x8xbf16, #tpu.memory_space<vmem>>, vector<16x1x8xbf16>,
    %c0_10 = arith.constant 0 : index
    %c0_11 = arith.constant 0 : index
    %c0_12 = arith.constant 0 : index
    %c0_13 = arith.constant 0 : index
    %6 = vector.load %arg1[%c0_10, %c0_11, %c0_12, %c0_13] : memref<1x16x16x4xbf16, #tpu.memory_space<vmem>>, vector<1x16x16x4xbf16>
    %7 = vector.shape_cast %6 : vector<1x16x16x4xbf16> to vector<16x16x4xbf16>
    %c1_14 = arith.constant 1 : index
    %c1_15 = arith.constant 1 : index
    %c0_16 = arith.constant 0 : index
    %8 = vector.load %arg11[%c1_14, %c1_15, %c0_16] : memref<18x18x8xbf16, #tpu.memory_space<vmem>>, vector<16x16x4xbf16>
    tpu.vector_store %arg11[%c1_14, %c1_15, %c0_16], %7 {strides = array<i32>} : memref<18x18x8xbf16, #tpu.memory_space<vmem>>, vector<16x16x4xbf16>,
    %c0_17 = arith.constant 0 : index
    %c0_18 = arith.constant 0 : index
    %c0_19 = arith.constant 0 : index
    %9 = vector.load %arg11[%c0_17, %c0_18, %c0_19] : memref<18x18x8xbf16, #tpu.memory_space<vmem>>, vector<16x16x4xbf16>
    %10 = vector.shape_cast %9 : vector<16x16x4xbf16> to vector<256x4xbf16>
    %c0_20 = arith.constant 0 : index
    %c1_21 = arith.constant 1 : index
    %c0_22 = arith.constant 0 : index
    %11 = vector.load %arg11[%c0_20, %c1_21, %c0_22] : memref<18x18x8xbf16, #tpu.memory_space<vmem>>, vector<16x16x4xbf16>
    %12 = vector.shape_cast %11 : vector<16x16x4xbf16> to vector<256x4xbf16>
    %c0_23 = arith.constant 0 : index
    %c2 = arith.constant 2 : index
    %c0_24 = arith.constant 0 : index
    %13 = vector.load %arg11[%c0_23, %c2, %c0_24] : memref<18x18x8xbf16, #tpu.memory_space<vmem>>, vector<16x16x4xbf16>
    %14 = vector.shape_cast %13 : vector<16x16x4xbf16> to vector<256x4xbf16>
    %15 = tpu.concatenate %10, %12, %14 in 1 : vector<256x4xbf16>, vector<256x4xbf16>, vector<256x4xbf16> -> vector<256x12xbf16>
    %c0_25 = arith.constant 0 : index
    %c0_26 = arith.constant 0 : index
    %c0_27 = arith.constant 0 : index
    %16 = vector.load %arg2[%c0_25, %c0_26, %c0_27] : memref<3x12x8xbf16, #tpu.memory_space<vmem>>, vector<1x12x8xbf16>
    %17 = vector.shape_cast %16 : vector<1x12x8xbf16> to vector<12x8xbf16>
    %cst_28 = arith.constant dense<0.000000e+00> : vector<256x8xf32>
    %18 = tpu.matmul %15, %17, %cst_28 {dimension_numbers = #tpu.dot_dimension_numbers<[1], [0], [0], [1], [0, 0, 1, 1], [], []>} : vector<256x12xbf16>, vector<12x8xbf16>, vector<256x8xf32> -> vector<256x8xf32>
    %c0_29 = arith.constant 0 : index
    %c0_30 = arith.constant 0 : index
    %19 = vector.load %arg3[%c0_29, %c0_30] : memref<1x8xf32, #tpu.memory_space<vmem>>, vector<1x8xf32>
    %20 = vector.broadcast %19 : vector<1x8xf32> to vector<256x8xf32>
    %21 = arith.addf %18, %20 : vector<256x8xf32>
    %c1_31 = arith.constant 1 : index
    %c0_32 = arith.constant 0 : index
    %c0_33 = arith.constant 0 : index
    %22 = vector.load %arg11[%c1_31, %c0_32, %c0_33] : memref<18x18x8xbf16, #tpu.memory_space<vmem>>, vector<16x16x4xbf16>
    %23 = vector.shape_cast %22 : vector<16x16x4xbf16> to vector<256x4xbf16>
    %c1_34 = arith.constant 1 : index
    %c1_35 = arith.constant 1 : index
    %c0_36 = arith.constant 0 : index
    %24 = vector.load %arg11[%c1_34, %c1_35, %c0_36] : memref<18x18x8xbf16, #tpu.memory_space<vmem>>, vector<16x16x4xbf16>
    %25 = vector.shape_cast %24 : vector<16x16x4xbf16> to vector<256x4xbf16>
    %c1_37 = arith.constant 1 : index
    %c2_38 = arith.constant 2 : index
    %c0_39 = arith.constant 0 : index
    %26 = vector.load %arg11[%c1_37, %c2_38, %c0_39] : memref<18x18x8xbf16, #tpu.memory_space<vmem>>, vector<16x16x4xbf16>
    %27 = vector.shape_cast %26 : vector<16x16x4xbf16> to vector<256x4xbf16>
    %28 = tpu.concatenate %23, %25, %27 in 1 : vector<256x4xbf16>, vector<256x4xbf16>, vector<256x4xbf16> -> vector<256x12xbf16>
    %c1_40 = arith.constant 1 : index
    %c0_41 = arith.constant 0 : index
    %c0_42 = arith.constant 0 : index
    %29 = vector.load %arg2[%c1_40, %c0_41, %c0_42] : memref<3x12x8xbf16, #tpu.memory_space<vmem>>, vector<1x12x8xbf16>
    %30 = vector.shape_cast %29 : vector<1x12x8xbf16> to vector<12x8xbf16>
    %cst_43 = arith.constant dense<0.000000e+00> : vector<256x8xf32>
    %31 = tpu.matmul %28, %30, %cst_43 {dimension_numbers = #tpu.dot_dimension_numbers<[1], [0], [0], [1], [0, 0, 1, 1], [], []>} : vector<256x12xbf16>, vector<12x8xbf16>, vector<256x8xf32> -> vector<256x8xf32>
    %32 = arith.addf %21, %31 : vector<256x8xf32>
    %c2_44 = arith.constant 2 : index
    %c0_45 = arith.constant 0 : index
    %c0_46 = arith.constant 0 : index
    %33 = vector.load %arg11[%c2_44, %c0_45, %c0_46] : memref<18x18x8xbf16, #tpu.memory_space<vmem>>, vector<16x16x4xbf16>
    %34 = vector.shape_cast %33 : vector<16x16x4xbf16> to vector<256x4xbf16>
    %c2_47 = arith.constant 2 : index
    %c1_48 = arith.constant 1 : index
    %c0_49 = arith.constant 0 : index
    %35 = vector.load %arg11[%c2_47, %c1_48, %c0_49] : memref<18x18x8xbf16, #tpu.memory_space<vmem>>, vector<16x16x4xbf16>
    %36 = vector.shape_cast %35 : vector<16x16x4xbf16> to vector<256x4xbf16>
    %c2_50 = arith.constant 2 : index
    %c2_51 = arith.constant 2 : index
    %c0_52 = arith.constant 0 : index
    %37 = vector.load %arg11[%c2_50, %c2_51, %c0_52] : memref<18x18x8xbf16, #tpu.memory_space<vmem>>, vector<16x16x4xbf16>
    %38 = vector.shape_cast %37 : vector<16x16x4xbf16> to vector<256x4xbf16>
    %39 = tpu.concatenate %34, %36, %38 in 1 : vector<256x4xbf16>, vector<256x4xbf16>, vector<256x4xbf16> -> vector<256x12xbf16>
    %c2_53 = arith.constant 2 : index
    %c0_54 = arith.constant 0 : index
    %c0_55 = arith.constant 0 : index
    %40 = vector.load %arg2[%c2_53, %c0_54, %c0_55] : memref<3x12x8xbf16, #tpu.memory_space<vmem>>, vector<1x12x8xbf16>
    %41 = vector.shape_cast %40 : vector<1x12x8xbf16> to vector<12x8xbf16>
    %cst_56 = arith.constant dense<0.000000e+00> : vector<256x8xf32>
    %42 = tpu.matmul %39, %41, %cst_56 {dimension_numbers = #tpu.dot_dimension_numbers<[1], [0], [0], [1], [0, 0, 1, 1], [], []>} : vector<256x12xbf16>, vector<12x8xbf16>, vector<256x8xf32> -> vector<256x8xf32>
    %43 = arith.addf %32, %42 : vector<256x8xf32>
    %cst_57 = arith.constant dense<0.000000e+00> : vector<8xf32>
    %44 = vector.multi_reduction <add>, %43, %cst_57 [0] : vector<256x8xf32> to vector<8xf32>
    %45 = vector.shape_cast %44 : vector<8xf32> to vector<1x8xf32>
    %46 = arith.mulf %43, %43 : vector<256x8xf32>
    %cst_58 = arith.constant dense<0.000000e+00> : vector<8xf32>
    %47 = vector.multi_reduction <add>, %46, %cst_58 [0] : vector<256x8xf32> to vector<8xf32>
    %48 = vector.shape_cast %47 : vector<8xf32> to vector<1x8xf32>
    %cst_59 = arith.constant 3.906250e-03 : f32
    %49 = vector.broadcast %cst_59 : f32 to vector<1x8xf32>
    %50 = arith.mulf %45, %49 : vector<1x8xf32>
    %cst_60 = arith.constant 3.906250e-03 : f32
    %51 = vector.broadcast %cst_60 : f32 to vector<1x8xf32>
    %52 = arith.mulf %48, %51 : vector<1x8xf32>
    %53 = arith.mulf %50, %50 : vector<1x8xf32>
    %54 = arith.subf %52, %53 : vector<1x8xf32>
    %cst_61 = arith.constant 0.000000e+00 : f32
    %55 = vector.broadcast %cst_61 : f32 to vector<1x8xf32>
    %56 = arith.maximumf %54, %55 : vector<1x8xf32>
    %cst_62 = arith.constant 9.99999974E-6 : f32
    %57 = vector.broadcast %cst_62 : f32 to vector<1x8xf32>
    %58 = arith.addf %56, %57 : vector<1x8xf32>
    %59 = math.rsqrt %58 : vector<1x8xf32>
    %60 = tpu.iota {dimensions = array<i32: 1>} : vector<1x8xi32>
    %c4_i32 = arith.constant 4 : i32
    %61 = vector.broadcast %c4_i32 : i32 to vector<1x8xi32>
    %62 = arith.cmpi slt, %60, %61 : vector<1x8xi32>
    %c0_63 = arith.constant 0 : index
    %c0_64 = arith.constant 0 : index
    %63 = vector.load %arg4[%c0_63, %c0_64] : memref<1x8xf32, #tpu.memory_space<vmem>>, vector<1x8xf32>
    %64 = arith.mulf %63, %59 : vector<1x8xf32>
    %cst_65 = arith.constant 1.000000e+00 : f32
    %65 = vector.broadcast %cst_65 : f32 to vector<1x8xf32>
    %66 = arith.select %62, %64, %65 : vector<1x8xi1>, vector<1x8xf32>
    %c0_66 = arith.constant 0 : index
    %c0_67 = arith.constant 0 : index
    %67 = vector.load %arg5[%c0_66, %c0_67] : memref<1x8xf32, #tpu.memory_space<vmem>>, vector<1x8xf32>
    %68 = arith.mulf %50, %64 : vector<1x8xf32>
    %69 = arith.subf %67, %68 : vector<1x8xf32>
    %cst_68 = arith.constant 0.000000e+00 : f32
    %70 = vector.broadcast %cst_68 : f32 to vector<1x8xf32>
    %71 = arith.select %62, %69, %70 : vector<1x8xi1>, vector<1x8xf32>
    %72 = vector.broadcast %66 : vector<1x8xf32> to vector<256x8xf32>
    %73 = arith.mulf %43, %72 : vector<256x8xf32>
    %74 = vector.broadcast %71 : vector<1x8xf32> to vector<256x8xf32>
    %75 = arith.addf %73, %74 : vector<256x8xf32>
    %cst_69 = arith.constant 0.000000e+00 : f32
    %76 = vector.broadcast %cst_69 : f32 to vector<256x8xf32>
    %77 = arith.cmpf oge, %75, %76 : vector<256x8xf32>
    %cst_70 = arith.constant 1.000000e-01 : f32
    %78 = vector.broadcast %cst_70 : f32 to vector<256x8xf32>
    %79 = arith.mulf %78, %75 : vector<256x8xf32>
    %80 = arith.select %77, %75, %79 : vector<256x8xi1>, vector<256x8xf32>
    %81 = arith.truncf %80 : vector<256x8xf32> to vector<256x8xbf16>
    %82 = vector.shape_cast %81 : vector<256x8xbf16> to vector<16x16x8xbf16>
    %c1_71 = arith.constant 1 : index
    %c1_72 = arith.constant 1 : index
    %c0_73 = arith.constant 0 : index
    %83 = vector.load %arg11[%c1_71, %c1_72, %c0_73] : memref<18x18x8xbf16, #tpu.memory_space<vmem>>, vector<16x16x8xbf16>
    tpu.vector_store %arg11[%c1_71, %c1_72, %c0_73], %82 {strides = array<i32>} : memref<18x18x8xbf16, #tpu.memory_space<vmem>>, vector<16x16x8xbf16>,
    %c0_74 = arith.constant 0 : index
    %c0_75 = arith.constant 0 : index
    %c0_76 = arith.constant 0 : index
    %84 = vector.load %arg11[%c0_74, %c0_75, %c0_76] : memref<18x18x8xbf16, #tpu.memory_space<vmem>>, vector<16x16x8xbf16>
    %85 = vector.shape_cast %84 : vector<16x16x8xbf16> to vector<256x8xbf16>
    %c0_77 = arith.constant 0 : index
    %c1_78 = arith.constant 1 : index
    %c0_79 = arith.constant 0 : index
    %86 = vector.load %arg11[%c0_77, %c1_78, %c0_79] : memref<18x18x8xbf16, #tpu.memory_space<vmem>>, vector<16x16x8xbf16>
    %87 = vector.shape_cast %86 : vector<16x16x8xbf16> to vector<256x8xbf16>
    %c0_80 = arith.constant 0 : index
    %c2_81 = arith.constant 2 : index
    %c0_82 = arith.constant 0 : index
    %88 = vector.load %arg11[%c0_80, %c2_81, %c0_82] : memref<18x18x8xbf16, #tpu.memory_space<vmem>>, vector<16x16x8xbf16>
    %89 = vector.shape_cast %88 : vector<16x16x8xbf16> to vector<256x8xbf16>
    %90 = tpu.concatenate %85, %87, %89 in 1 : vector<256x8xbf16>, vector<256x8xbf16>, vector<256x8xbf16> -> vector<256x24xbf16>
    %c0_83 = arith.constant 0 : index
    %c0_84 = arith.constant 0 : index
    %c0_85 = arith.constant 0 : index
    %91 = vector.load %arg6[%c0_83, %c0_84, %c0_85] : memref<3x24x8xbf16, #tpu.memory_space<vmem>>, vector<1x24x8xbf16>
    %92 = vector.shape_cast %91 : vector<1x24x8xbf16> to vector<24x8xbf16>
    %cst_86 = arith.constant dense<0.000000e+00> : vector<256x8xf32>
    %93 = tpu.matmul %90, %92, %cst_86 {dimension_numbers = #tpu.dot_dimension_numbers<[1], [0], [0], [1], [0, 0, 1, 1], [], []>} : vector<256x24xbf16>, vector<24x8xbf16>, vector<256x8xf32> -> vector<256x8xf32>
    %c0_87 = arith.constant 0 : index
    %c0_88 = arith.constant 0 : index
    %94 = vector.load %arg7[%c0_87, %c0_88] : memref<1x8xf32, #tpu.memory_space<vmem>>, vector<1x8xf32>
    %95 = vector.broadcast %94 : vector<1x8xf32> to vector<256x8xf32>
    %96 = arith.addf %93, %95 : vector<256x8xf32>
    %c1_89 = arith.constant 1 : index
    %c0_90 = arith.constant 0 : index
    %c0_91 = arith.constant 0 : index
    %97 = vector.load %arg11[%c1_89, %c0_90, %c0_91] : memref<18x18x8xbf16, #tpu.memory_space<vmem>>, vector<16x16x8xbf16>
    %98 = vector.shape_cast %97 : vector<16x16x8xbf16> to vector<256x8xbf16>
    %c1_92 = arith.constant 1 : index
    %c1_93 = arith.constant 1 : index
    %c0_94 = arith.constant 0 : index
    %99 = vector.load %arg11[%c1_92, %c1_93, %c0_94] : memref<18x18x8xbf16, #tpu.memory_space<vmem>>, vector<16x16x8xbf16>
    %100 = vector.shape_cast %99 : vector<16x16x8xbf16> to vector<256x8xbf16>
    %c1_95 = arith.constant 1 : index
    %c2_96 = arith.constant 2 : index
    %c0_97 = arith.constant 0 : index
    %101 = vector.load %arg11[%c1_95, %c2_96, %c0_97] : memref<18x18x8xbf16, #tpu.memory_space<vmem>>, vector<16x16x8xbf16>
    %102 = vector.shape_cast %101 : vector<16x16x8xbf16> to vector<256x8xbf16>
    %103 = tpu.concatenate %98, %100, %102 in 1 : vector<256x8xbf16>, vector<256x8xbf16>, vector<256x8xbf16> -> vector<256x24xbf16>
    %c1_98 = arith.constant 1 : index
    %c0_99 = arith.constant 0 : index
    %c0_100 = arith.constant 0 : index
    %104 = vector.load %arg6[%c1_98, %c0_99, %c0_100] : memref<3x24x8xbf16, #tpu.memory_space<vmem>>, vector<1x24x8xbf16>
    %105 = vector.shape_cast %104 : vector<1x24x8xbf16> to vector<24x8xbf16>
    %cst_101 = arith.constant dense<0.000000e+00> : vector<256x8xf32>
    %106 = tpu.matmul %103, %105, %cst_101 {dimension_numbers = #tpu.dot_dimension_numbers<[1], [0], [0], [1], [0, 0, 1, 1], [], []>} : vector<256x24xbf16>, vector<24x8xbf16>, vector<256x8xf32> -> vector<256x8xf32>
    %107 = arith.addf %96, %106 : vector<256x8xf32>
    %c2_102 = arith.constant 2 : index
    %c0_103 = arith.constant 0 : index
    %c0_104 = arith.constant 0 : index
    %108 = vector.load %arg11[%c2_102, %c0_103, %c0_104] : memref<18x18x8xbf16, #tpu.memory_space<vmem>>, vector<16x16x8xbf16>
    %109 = vector.shape_cast %108 : vector<16x16x8xbf16> to vector<256x8xbf16>
    %c2_105 = arith.constant 2 : index
    %c1_106 = arith.constant 1 : index
    %c0_107 = arith.constant 0 : index
    %110 = vector.load %arg11[%c2_105, %c1_106, %c0_107] : memref<18x18x8xbf16, #tpu.memory_space<vmem>>, vector<16x16x8xbf16>
    %111 = vector.shape_cast %110 : vector<16x16x8xbf16> to vector<256x8xbf16>
    %c2_108 = arith.constant 2 : index
    %c2_109 = arith.constant 2 : index
    %c0_110 = arith.constant 0 : index
    %112 = vector.load %arg11[%c2_108, %c2_109, %c0_110] : memref<18x18x8xbf16, #tpu.memory_space<vmem>>, vector<16x16x8xbf16>
    %113 = vector.shape_cast %112 : vector<16x16x8xbf16> to vector<256x8xbf16>
    %114 = tpu.concatenate %109, %111, %113 in 1 : vector<256x8xbf16>, vector<256x8xbf16>, vector<256x8xbf16> -> vector<256x24xbf16>
    %c2_111 = arith.constant 2 : index
    %c0_112 = arith.constant 0 : index
    %c0_113 = arith.constant 0 : index
    %115 = vector.load %arg6[%c2_111, %c0_112, %c0_113] : memref<3x24x8xbf16, #tpu.memory_space<vmem>>, vector<1x24x8xbf16>
    %116 = vector.shape_cast %115 : vector<1x24x8xbf16> to vector<24x8xbf16>
    %cst_114 = arith.constant dense<0.000000e+00> : vector<256x8xf32>
    %117 = tpu.matmul %114, %116, %cst_114 {dimension_numbers = #tpu.dot_dimension_numbers<[1], [0], [0], [1], [0, 0, 1, 1], [], []>} : vector<256x24xbf16>, vector<24x8xbf16>, vector<256x8xf32> -> vector<256x8xf32>
    %118 = arith.addf %107, %117 : vector<256x8xf32>
    %cst_115 = arith.constant 0.000000e+00 : f32
    %119 = vector.broadcast %cst_115 : f32 to vector<256x8xf32>
    %120 = arith.cmpf oge, %118, %119 : vector<256x8xf32>
    %cst_116 = arith.constant 1.000000e-01 : f32
    %121 = vector.broadcast %cst_116 : f32 to vector<256x8xf32>
    %122 = arith.mulf %121, %118 : vector<256x8xf32>
    %123 = arith.select %120, %118, %122 : vector<256x8xi1>, vector<256x8xf32>
    %124 = vector.shape_cast %7 : vector<16x16x4xbf16> to vector<256x4xbf16>
    %c0_117 = arith.constant 0 : index
    %c0_118 = arith.constant 0 : index
    %125 = vector.load %arg8[%c0_117, %c0_118] : memref<4x8xbf16, #tpu.memory_space<vmem>>, vector<4x8xbf16>
    %cst_119 = arith.constant dense<0.000000e+00> : vector<256x8xf32>
    %126 = tpu.matmul %124, %125, %cst_119 {dimension_numbers = #tpu.dot_dimension_numbers<[1], [0], [0], [1], [0, 0, 1, 1], [], []>} : vector<256x4xbf16>, vector<4x8xbf16>, vector<256x8xf32> -> vector<256x8xf32>
    %c0_120 = arith.constant 0 : index
    %c0_121 = arith.constant 0 : index
    %127 = vector.load %arg9[%c0_120, %c0_121] : memref<1x8xf32, #tpu.memory_space<vmem>>, vector<1x8xf32>
    %128 = vector.broadcast %127 : vector<1x8xf32> to vector<256x8xf32>
    %129 = arith.addf %126, %128 : vector<256x8xf32>
    %130 = arith.addf %123, %129 : vector<256x8xf32>
    %131 = vector.shape_cast %130 : vector<256x8xf32> to vector<1x16x16x8xf32>
    %c0_122 = arith.constant 0 : index
    %c0_123 = arith.constant 0 : index
    %c0_124 = arith.constant 0 : index
    %c0_125 = arith.constant 0 : index
    %132 = vector.load %arg10[%c0_122, %c0_123, %c0_124, %c0_125] : memref<1x16x16x8xf32, #tpu.memory_space<vmem>>, vector<1x16x16x8xf32>
    tpu.vector_store %arg10[%c0_122, %c0_123, %c0_124, %c0_125], %131 {strides = array<i32>} : memref<1x16x16x8xf32, #tpu.memory_space<vmem>>, vector<1x16x16x8xf32>,
    return
  }
  func.func @transform_0(%arg0: i32) -> (i32, i32, i32, i32) {
    %c0_i32 = arith.constant 0 : i32
    %c0_i32_0 = arith.constant 0 : i32
    %c0_i32_1 = arith.constant 0 : i32
    %c0_i32_2 = arith.constant 0 : i32
    return %arg0, %c0_i32, %c0_i32_0, %c0_i32_1 : i32, i32, i32, i32
  }
  func.func @transform_1(%arg0: i32) -> (i32, i32, i32) {
    %c0_i32 = arith.constant 0 : i32
    %c0_i32_0 = arith.constant 0 : i32
    %c0_i32_1 = arith.constant 0 : i32
    %c0_i32_2 = arith.constant 0 : i32
    return %c0_i32, %c0_i32_0, %c0_i32_1 : i32, i32, i32
  }
  func.func @transform_2(%arg0: i32) -> (i32, i32) {
    %c0_i32 = arith.constant 0 : i32
    %c0_i32_0 = arith.constant 0 : i32
    %c0_i32_1 = arith.constant 0 : i32
    return %c0_i32, %c0_i32_0 : i32, i32
  }
  func.func @transform_3(%arg0: i32) -> (i32, i32) {
    %c0_i32 = arith.constant 0 : i32
    %c0_i32_0 = arith.constant 0 : i32
    %c0_i32_1 = arith.constant 0 : i32
    return %c0_i32, %c0_i32_0 : i32, i32
  }
  func.func @transform_4(%arg0: i32) -> (i32, i32) {
    %c0_i32 = arith.constant 0 : i32
    %c0_i32_0 = arith.constant 0 : i32
    %c0_i32_1 = arith.constant 0 : i32
    return %c0_i32, %c0_i32_0 : i32, i32
  }
  func.func @transform_5(%arg0: i32) -> (i32, i32, i32) {
    %c0_i32 = arith.constant 0 : i32
    %c0_i32_0 = arith.constant 0 : i32
    %c0_i32_1 = arith.constant 0 : i32
    %c0_i32_2 = arith.constant 0 : i32
    return %c0_i32, %c0_i32_0, %c0_i32_1 : i32, i32, i32
  }
  func.func @transform_6(%arg0: i32) -> (i32, i32) {
    %c0_i32 = arith.constant 0 : i32
    %c0_i32_0 = arith.constant 0 : i32
    %c0_i32_1 = arith.constant 0 : i32
    return %c0_i32, %c0_i32_0 : i32, i32
  }
  func.func @transform_7(%arg0: i32) -> (i32, i32) {
    %c0_i32 = arith.constant 0 : i32
    %c0_i32_0 = arith.constant 0 : i32
    %c0_i32_1 = arith.constant 0 : i32
    return %c0_i32, %c0_i32_0 : i32, i32
  }
  func.func @transform_8(%arg0: i32) -> (i32, i32) {
    %c0_i32 = arith.constant 0 : i32
    %c0_i32_0 = arith.constant 0 : i32
    %c0_i32_1 = arith.constant 0 : i32
    return %c0_i32, %c0_i32_0 : i32, i32
  }
  func.func @transform_9(%arg0: i32) -> (i32, i32, i32, i32) {
    %c0_i32 = arith.constant 0 : i32
    %c0_i32_0 = arith.constant 0 : i32
    %c0_i32_1 = arith.constant 0 : i32
    %c0_i32_2 = arith.constant 0 : i32
    return %arg0, %c0_i32, %c0_i32_0, %c0_i32_1 : i32, i32, i32, i32
  }
}

</mosaic_0001>

<bundles_post_ra>
// kernel: unet_conv_block.1
= control target key start
LH: loop header
LB: loop body
LE: loop exit
PB: predicated region body
PF: predicated region fallthrough
CT: control target
= control target key end

     0   :  { %s10700_s30 = smov 0   ;;  %s14807_s0 = inlined_call_operand.vmem [shape: bf16[2,16,16,4], index: 0, kind: input, shape index: {}]   ;;  %s14808_s1 = inlined_call_operand.vmem [shape: bf16[3,12,8], index: 1, kind: input, shape index: {}]   ;;  %s14809_s2 = inlined_call_operand.vmem [shape: f32[1,8], index: 2, kind: input, shape index: {}]   ;;  %s14810_s3 = inlined_call_operand.vmem [shape: f32[1,8], index: 3, kind: input, shape index: {}]   ;;  %s14811_s4 = inlined_call_operand.vmem [shape: f32[1,8], index: 4, kind: input, shape index: {}]   ;;  %s14812_s5 = inlined_call_operand.vmem [shape: bf16[3,24,8], index: 5, kind: input, shape index: {}]   ;;  %s14813_s6 = inlined_call_operand.vmem [shape: f32[1,8], index: 6, kind: input, shape index: {}]   ;;  %s14814_s7 = inlined_call_operand.vmem [shape: bf16[4,8], index: 7, kind: input, shape index: {}]   ;;  %s14815_s8 = inlined_call_operand.vmem [shape: f32[1,8], index: 8, kind: input, shape index: {}]   ;;  %s14816_s9 = inlined_call_operand.vmem [shape: f32[2,16,16,8], index: 9, kind: output, shape index: {}]  }
   0x1 LB: > { %s9181_s10 = sadd.s32 4294967295, %s10644_s30   ;;  %p9185_p0 = scmp.ge.s32.totalorder %s10644_s30, 1  ;;  %s10644_s30 = sphi %s10700_s30, %s19_s30  }
   0x2   : > { %p287_p1 = scmp.lt.s32.totalorder %s10644_s30, 3 }
   0x4   : > { %p288_p2 = pnand %p9185_p0, %p287_p1 }
   0x6   : > { %291 = sbr.rel (%p288_p2) target bundleno = 1544 (0x608), region = 56 }
   0xd   : > { %vm14830_vm0 = vcmask 60416   ;;  %vm337_vm1 = vcmask 57344   ;;  %vm345_vm2 = vsmask.f32 256  ;;  %v10646_v0 = vmov 0   ;;  %p323_p3 = scmp.lt.s32.totalorder %s9181_s10, 1 }
   0xe   : > { %335 = vst.msk [vmem:[#allocation2] sm:$0xf] %vm14830_vm0, %v10646_v0  ;;  %336 = vst.msk [vmem:[#allocation2 + $0x4] sm:$0xf] %vm14830_vm0, %v10646_v0  ;;  %v14858_v1 = vmov 0  ;;  %vm1415_vm6 = vcmask 1042432  }
   0xf   : > { %338 = vst.msk [vmem:[#allocation2 + $0x8] sm:$0x1] %vm337_vm1, %v10646_v0  ;;  %vm10711_vm3 = vmand %vm337_vm1, %vm345_vm2  ;;  %vm395_vm4 = vsmask.f32 7938  ;;  %vm964_vm7 = vsmask.f32 3328 }
  0x10   : > { %v14859_v1 = vsel %vm10711_vm3, 4294967295, %v14858_v1  ;;  %340 = vst.msk [vmem:[#allocation2 + $0xcc] sm:$0xf] %vm14830_vm0, %v10646_v0  ;;  %341 = vst.msk [vmem:[#allocation2 + $0xd0] sm:$0xf] %vm14830_vm0, %v10646_v0  ;;  %vm1416_vm8 = vcmask 1046532  }
  0x11   : > { %14860 = vst [vmem:[#allocation3_spill] sm:$0xff] %v14859_v1  ;;  %342 = vst.msk [vmem:[#allocation2 + $0xd4] sm:$0x1] %vm337_vm1, %v10646_v0  ;;  %v350_v3 = vld [vmem:[#allocation2 + $0x18] sm:$0x1]  ;;  %s15136_s10 = smov (!%p323_p3, %s9181_s10), 1 }
  0x12   : > { %vm10718_vm5 = vmand %vm337_vm1, %vm395_vm4  ;;  %v400_v4 = vld [vmem:[#allocation2 + $0x20] sm:$0x1]  ;;  %v351_v5 = vsel %vm10711_vm3, 0, %v350_v3  ;;  %v347_v7 = vld [vmem:[#allocation2 + $0xc] sm:$0x1]  ;;  %vm799_vm9 = vcmask 27648  }
  0x13   : > { %v401_v6 = vsel %vm10718_vm5, 0, %v400_v4  ;;  %352 = vst [vmem:[#allocation2 + $0x18] sm:$0x1] %v351_v5  ;;  %v348_v8 = vsel %vm10711_vm3, 0, %v347_v7  ;;  %v397_v9 = vld [vmem:[#allocation2 + $0x14] sm:$0x1]  ;;  %vm10737_vm10 = vmor %vm1415_vm6, %vm1416_vm8 }
  0x14   : > { %402 = vst [vmem:[#allocation2 + $0x20] sm:$0x1] %v401_v6  ;;  %v356_v10 = vld [vmem:[#allocation2 + $0x30] sm:$0x1]  ;;  %s9758_s11 = sshll.u32 %s15136_s10, 7  ;;  %v398_v11 = vsel %vm10718_vm5, 0, %v397_v9  ;;  %vm10754_vm14 = vmand %vm799_vm9, %vm395_vm4 }
  0x15   : > { %349 = vst [vmem:[#allocation2 + $0xc] sm:$0x1] %v348_v8  ;;  %v357_v12 = vsel %vm10711_vm3, 0, %v356_v10  ;;  %v406_v13 = vld [vmem:[#allocation2 + $0x38] sm:$0x1]  ;;  %v14863_v14 = vmov 0  ;;  %s10744_s14 = scalar_lea.vmem %s14807_s0, %s9758_s11 }
  0x16   : > { %v14864_v14 = vsel %vm10737_vm10, 4294967295, %v14863_v14  ;;  %vm965_vm11 = vsmask.f32 7440  ;;  %vm477_vm12 = vsmask.f32 4368  ;;  %vm806_vm13 = vcmask 24576  }
  0x17   : > { %14865 = vst [vmem:[#allocation4_spill] sm:$0xff] %v14864_v14  ;;  %399 = vst [vmem:[#allocation2 + $0x14] sm:$0x1] %v398_v11  ;;  %v407_v15 = vsel %vm10718_vm5, 0, %v406_v13  ;;  %v917_v16 = vld [vmem:[#allocation2 + $0x4] sm:$0xf] }
  0x18   : > { %358 = vst [vmem:[#allocation2 + $0x30] sm:$0x1] %v357_v12  ;;  %v948_v17 = vld [vmem:[#allocation2 + $0x8] sm:$0x1]  ;;  %v1351_v18 = vld [vmem:[#allocation2] sm:$0xe]  ;;  %vm10762_vm15 = vmor %vm964_vm7, %vm965_vm11 }
  0x19   : > { %408 = vst [vmem:[#allocation2 + $0x38] sm:$0x1] %v407_v15  ;;  %v9190_v19 = vrot.slane %v1351_v18, 9  ;;  %v1420_v20 = vrot.slane %v917_v16, 5  ;;  %v1423_v21 = vrot.slane %v948_v17, 5  ;;  %v977_v23 = vshll.u32 %v917_v16, 16  ;;  %vm10770_vm1 = vmor %vm345_vm2, %vm477_vm12 }
  0x1a   : > { %v916_v22 = vld [vmem:[#allocation2] sm:$0xf]  ;;  %v981_v26 = vshrl.u32 %v917_v16, 16  ;;  %v987_v27 = vshll.u32 %v948_v17, 16  ;;  %v447_v28 = vld [vmem:[%s10744_s14 + $0x8] sm:$0xf]  ;;  %vm10777_vm6 = vmand %vm806_vm13, %vm345_vm2 }
  0x1b   : > { %v968_v24 = vshrl.u32 %v916_v22, 16  ;;  %v971_v25 = vshll.u32 %v916_v22, 16  ;;  %v1421_v29 = vsel %vm10737_vm10, %v9190_v19, %v1420_v20  ;;  %v1422_v30 = vrot.slane %v1420_v20, 4  ;;  %v448_v32 = vld [vmem:[%s10744_s14 + $0xc] sm:$0xf]  ;;  %s10647_s15 = smov 8   ;;  %vm12719_vm13 = vmand %vm14830_vm0, %vm395_vm4 }
  0x1c   : > { %v979_v31 = vrot.slane %v977_v23, 5  ;;  %v497_v33 = vshrl.u32 %v447_v28, 16  ;;  %v983_v36 = vrot.slane %v981_v26, 4  ;;  %v989_v37 = vrot.slane %v987_v27, 5  ;;  %v811_v43 = vld [vmem:[#allocation2 + $0x18] sm:$0xf] }
  0x1d   : > { %v970_v34 = vrot.slane %v968_v24, 4  ;;  %v973_v35 = vrot.slane %v971_v25, 5  ;;  %v1424_v39 = vsel %vm10737_vm10, %v1422_v30, %v1423_v21  ;;  %v500_v41 = vshll.u32 %v447_v28, 16  ;;  %v445_v49 = vld [vmem:[%s10744_s14] sm:$0xf]  ;;  %s10648_s16 = smov 4  }
  0x1e   : > { %v499_v40 = vrot.slane %v497_v33, 7  ;;  %v505_v42 = vshrl.u32 %v448_v32, 16  ;;  %v9238_v44 = vcombine.low %v1421_v29, %v1424_v39  ;;  %v14868_v45 = vmov 0  ;;  %v446_v50 = vld [vmem:[%s10744_s14 + $0x4] sm:$0xf]  ;;  %s10649_s25 = smov 16  }
  0x1f   : > { %v14869_v45 = vsel %vm10762_vm15, 4294967295, %v14868_v45  ;;  %v974_v46 = vor.u32 %v973_v35, %v970_v34  ;;  %v984_v47 = vor.u32 %v983_v36, %v979_v31  ;;  %v508_v48 = vshll.u32 %v448_v32, 16  ;;  %v815_v59 = vld [vmem:[#allocation2 + $0x20] sm:$0x1]  ;;  %v451_v4 = vld [vmem:[%s10744_s14 + $0x18] sm:$0xf] }
  0x20   : > { %14870 = vst [vmem:[#allocation5_spill] sm:$0xff] %v14869_v45  ;;  %v14871_v51 = vmov 0  ;;  %v502_v52 = vor.u32 %v500_v41, %v499_v40  ;;  %v503_v53 = vrot.slane %v499_v40, 4  ;;  %v507_v54 = vrot.slane %v505_v42, 7  ;;  %1722 = vrot.lane.b32.xlu1 %v9238_v44, %s10647_s15  ;;  %v801_v9 = vld [vmem:[#allocation2 + $0xc] sm:$0xf] }
  0x21   : > { %v14872_v51 = vsel %vm10770_vm1, 4294967295, %v14871_v51  ;;  %v480_v55 = vshrl.u32 %v445_v49, 16  ;;  %v975_v56 = vrot.slane %v974_v46, 4  ;;  %v985_v57 = vrot.slane %v984_v47, 4  ;;  %v452_v10 = vld [vmem:[%s10744_s14 + $0x1c] sm:$0xf] }
  0x22   : > { %14873 = vst [vmem:[#allocation6_spill] sm:$0xff] %v14872_v51  ;;  %v483_v60 = vshll.u32 %v445_v49, 16  ;;  %v488_v61 = vshrl.u32 %v446_v50, 16  ;;  %v510_v62 = vor.u32 %v508_v48, %v507_v54  ;;  %v512_v63 = vrot.slane %v507_v54, 4  ;;  %v808_v16 = vld [vmem:[#allocation2 + $0x14] sm:$0x1] }
  0x23   : > { %v812_v0 = vsel %vm10754_vm14, %v502_v52, %v811_v43  ;;  %v482_v3 = vrot.slane %v480_v55, 7  ;;  %v980_v5 = vsel %vm10762_vm15, %v975_v56, %v979_v31  ;;  %v990_v6 = vsel %vm10762_vm15, %v985_v57, %v989_v37  ;;  %v353_v17 = vld [vmem:[#allocation2 + $0x24] sm:$0x1]  ;;  %v403_v18 = vld [vmem:[#allocation2 + $0x2c] sm:$0x1]  ;;  %s9759_s29 = sshll.u32 %s15136_s10, 8 }
  0x24   : > { %813 = vst [vmem:[#allocation2 + $0x18] sm:$0xf] %v812_v0  ;;  %v490_v7 = vrot.slane %v488_v61, 7  ;;  %v491_v8 = vshll.u32 %v446_v50, 16  ;;  %v9222_v11 = vcombine.low %v980_v5, %v990_v6  ;;  %v511_v12 = vsel %vm10770_vm1, %v503_v53, %v510_v62  ;;  %v449_v23 = vld [vmem:[%s10744_s14 + $0x10] sm:$0xf]  ;;  %s14637_s10 = scalar_lea.vmem %s14816_s9, %s9759_s29 }
  0x25   : > { %v816_v13 = vsel %vm10777_vm6, %v512_v63, %v815_v59  ;;  %v485_v15 = vor.u32 %v483_v60, %v482_v3  ;;  %814 = vst.msk [vmem:[#allocation2 + $0x1c] sm:$0xf] %vm799_vm9, %v511_v12  ;;  %v486_v19 = vrot.slane %v482_v3, 4  ;;  %v531_v22 = vshrl.u32 %v451_v4, 16  ;;  %v825_v28 = vld [vmem:[#allocation2 + $0x30] sm:$0xf] }
  0x26   : > { %817 = vst [vmem:[#allocation2 + $0x20] sm:$0x1] %v816_v13  ;;  %v493_v20 = vor.u32 %v491_v8, %v490_v7  ;;  %v495_v21 = vrot.slane %v490_v7, 4  ;;  %1642 = vrot.lane.b32.xlu0 %v9222_v11, %s10648_s16  ;;  %v534_v25 = vshll.u32 %v451_v4, 16  ;;  %v539_v26 = vshrl.u32 %v452_v10, 16 }
  0x27   : > { %v802_v24 = vsel %vm10754_vm14, %v485_v15, %v801_v9  ;;  %v542_v27 = vshll.u32 %v452_v10, 16  ;;  %v450_v29 = vld [vmem:[%s10744_s14 + $0x14] sm:$0xf]  ;;  %v533_v32 = vrot.slane %v531_v22, 7  ;;  %v829_v33 = vld [vmem:[#allocation2 + $0x38] sm:$0x1] }
  0x28   : > { %v494_v30 = vsel %vm10770_vm1, %v486_v19, %v493_v20  ;;  %803 = vst [vmem:[#allocation2 + $0xc] sm:$0xf] %v802_v24  ;;  %v809_v31 = vsel %vm10777_vm6, %v495_v21, %v808_v16  ;;  %v354_v34 = vsel %vm10711_vm3, 0, %v353_v17  ;;  %v362_v35 = vld [vmem:[#allocation2 + $0x48] sm:$0x1]  ;;  %v541_v36 = vrot.slane %v539_v26, 7 }
  0x29   : > { %805 = vst.msk [vmem:[#allocation2 + $0x10] sm:$0xf] %vm799_vm9, %v494_v30  ;;  %810 = vst [vmem:[#allocation2 + $0x14] sm:$0x1] %v809_v31  ;;  %v404_v37 = vsel %vm10718_vm5, 0, %v403_v18  ;;  %v514_v39 = vshrl.u32 %v449_v23, 16  ;;  %v536_v42 = vor.u32 %v534_v25, %v533_v32 }
  0x2a   : > { %355 = vst [vmem:[#allocation2 + $0x24] sm:$0x1] %v354_v34  ;;  %v517_v40 = vshll.u32 %v449_v23, 16  ;;  %v412_v41 = vld [vmem:[#allocation2 + $0x50] sm:$0x1]  ;;  %v537_v43 = vrot.slane %v533_v32, 4  ;;  %v544_v49 = vor.u32 %v542_v27, %v541_v36 }
  0x2b   : > { %405 = vst [vmem:[#allocation2 + $0x2c] sm:$0x1] %v404_v37  ;;  %v522_v44 = vshrl.u32 %v450_v29, 16  ;;  %v525_v46 = vshll.u32 %v450_v29, 16  ;;  %v455_v47 = vld [vmem:[%s10744_s14 + $0x28] sm:$0xf]  ;;  %v826_v55 = vsel %vm10754_vm14, %v536_v42, %v825_v28 }
  0x2c   : > { %v1353_v48 = vld [vmem:[#allocation2 + $0x18] sm:$0xe]  ;;  %v546_v50 = vrot.slane %v541_v36, 4  ;;  %v516_v52 = vrot.slane %v514_v39, 7  ;;  %v363_v53 = vsel %vm10711_vm3, 0, %v362_v35  ;;  %v413_v57 = vsel %vm10718_vm5, 0, %v412_v41 }
  0x2d   : > { %v9192_v54 = vrot.slane %v1353_v48, 9  ;;  %v524_v56 = vrot.slane %v522_v44, 7  ;;  %364 = vst [vmem:[#allocation2 + $0x48] sm:$0x1] %v363_v53  ;;  %v456_v59 = vld [vmem:[%s10744_s14 + $0x2c] sm:$0xf]  ;;  %v545_v62 = vsel %vm10770_vm1, %v537_v43, %v544_v49 }
  0x2e   : > { %v10816_v60 = vld [vmem:[#allocation2 + $0x1c] sm:$0xf]  ;;  %v10818_v61 = vld [vmem:[#allocation2 + $0x20] sm:$0x1]  ;;  %827 = vst [vmem:[#allocation2 + $0x30] sm:$0xf] %v826_v55  ;;  %v830_v63 = vsel %vm10777_vm6, %v546_v50, %v829_v33  ;;  %v519_v0 = vor.u32 %v517_v40, %v516_v52 }
  0x2f   : > { %v520_v3 = vrot.slane %v516_v52, 4  ;;  %414 = vst [vmem:[#allocation2 + $0x50] sm:$0x1] %v413_v57  ;;  %v1434_v4 = vrot.slane %v10816_v60, 5  ;;  %v1437_v5 = vrot.slane %v10818_v61, 5  ;;  %v527_v6 = vor.u32 %v525_v46, %v524_v56 }
  0x30   : > { %828 = vst.msk [vmem:[#allocation2 + $0x34] sm:$0xf] %vm799_vm9, %v545_v62  ;;  %831 = vst [vmem:[#allocation2 + $0x38] sm:$0x1] %v830_v63  ;;  %v529_v7 = vrot.slane %v524_v56, 4  ;;  %v565_v9 = vshrl.u32 %v455_v47, 16 }
  0x31   : > { %v1352_v8 = vld [vmem:[#allocation2 + $0xc] sm:$0xe]  ;;  %v568_v10 = vshll.u32 %v455_v47, 16  ;;  %v573_v11 = vshrl.u32 %v456_v59, 16  ;;  %v576_v12 = vshll.u32 %v456_v59, 16  ;;  %v1435_v15 = vsel %vm10737_vm10, %v9192_v54, %v1434_v4 }
  0x32   : > { %v359_v13 = vld [vmem:[#allocation2 + $0x3c] sm:$0x1]  ;;  %v1436_v16 = vrot.slane %v1434_v4, 4  ;;  %v10829_v17 = vld [vmem:[#allocation2 + $0x10] sm:$0xf]  ;;  %v9191_v19 = vrot.slane %v1352_v8, 9  ;;  %v528_v20 = vsel %vm10770_vm1, %v520_v3, %v527_v6 }
  0x33   : > { %v10831_v18 = vld [vmem:[#allocation2 + $0x14] sm:$0x1]  ;;  %v1427_v21 = vrot.slane %v10829_v17, 5  ;;  %v818_v23 = vld [vmem:[#allocation2 + $0x24] sm:$0xf]  ;;  %v567_v28 = vrot.slane %v565_v9, 7 }
  0x34   : > { %v1430_v22 = vrot.slane %v10831_v18, 5  ;;  %821 = vst.msk [vmem:[#allocation2 + $0x28] sm:$0xf] %vm799_vm9, %v528_v20  ;;  %v822_v24 = vld [vmem:[#allocation2 + $0x2c] sm:$0x1]  ;;  %v1438_v25 = vsel %vm10737_vm10, %v1436_v16, %v1437_v5  ;;  %v819_v26 = vsel %vm10754_vm14, %v519_v0, %v818_v23  ;;  %v575_v34 = vrot.slane %v573_v11, 7 }
  0x35   : > { %v823_v27 = vsel %vm10777_vm6, %v529_v7, %v822_v24  ;;  %v409_v29 = vld [vmem:[#allocation2 + $0x44] sm:$0x1]  ;;  %v453_v30 = vld [vmem:[%s10744_s14 + $0x20] sm:$0xf]  ;;  %v9240_v31 = vcombine.low %v1435_v15, %v1438_v25  ;;  %v1428_v32 = vsel %vm10737_vm10, %v9191_v19, %v1427_v21  ;;  %v1429_v33 = vrot.slane %v1427_v21, 4 }
  0x36   : > { %820 = vst [vmem:[#allocation2 + $0x24] sm:$0xf] %v819_v26  ;;  %824 = vst [vmem:[#allocation2 + $0x2c] sm:$0x1] %v823_v27  ;;  %v839_v35 = vld [vmem:[#allocation2 + $0x48] sm:$0xf]  ;;  %v570_v39 = vor.u32 %v568_v10, %v567_v28  ;;  %v578_v48 = vor.u32 %v576_v12, %v575_v34 }
  0x37   : > { %v454_v36 = vld [vmem:[%s10744_s14 + $0x24] sm:$0xf]  ;;  %v1355_v37 = vld [vmem:[#allocation2 + $0x30] sm:$0xe]  ;;  %v571_v40 = vrot.slane %v567_v28, 4  ;;  %v360_v42 = vsel %vm10711_vm3, 0, %v359_v13  ;;  %1726 = vrot.lane.b32.xlu0 %v9240_v31, %s10647_s15  ;;  %v1431_v43 = vsel %vm10737_vm10, %v1429_v33, %v1430_v22 }
  0x38   : > { %v843_v41 = vld [vmem:[#allocation2 + $0x50] sm:$0x1]  ;;  %v10853_v44 = vld [vmem:[#allocation2 + $0x34] sm:$0xf]  ;;  %v10855_v46 = vld [vmem:[#allocation2 + $0x38] sm:$0x1]  ;;  %v9239_v50 = vcombine.low %v1428_v32, %v1431_v43  ;;  %v840_v54 = vsel %vm10754_vm14, %v570_v39, %v839_v35 }
  0x39   : > { %v9194_v47 = vrot.slane %v1355_v37, 9  ;;  %v580_v49 = vrot.slane %v575_v34, 4  ;;  %361 = vst [vmem:[#allocation2 + $0x3c] sm:$0x1] %v360_v42  ;;  %v1448_v52 = vrot.slane %v10853_v44, 5  ;;  %v1451_v53 = vrot.slane %v10855_v46, 5 }
  0x3a   : > { %v365_v55 = vld [vmem:[#allocation2 + $0x54] sm:$0x1]  ;;  %v579_v56 = vsel %vm10770_vm1, %v571_v40, %v578_v48  ;;  %841 = vst [vmem:[#allocation2 + $0x48] sm:$0xf] %v840_v54  ;;  %v410_v59 = vsel %vm10718_vm5, 0, %v409_v29  ;;  %v548_v62 = vshrl.u32 %v453_v30, 16  ;;  %1724 = vrot.lane.b32.xlu1 %v9239_v50, %s10647_s15 }
  0x3b   : > { %v844_v57 = vsel %vm10777_vm6, %v580_v49, %v843_v41  ;;  %v415_v63 = vld [vmem:[#allocation2 + $0x5c] sm:$0x1]  ;;  %v1449_v0 = vsel %vm10737_vm10, %v9194_v47, %v1448_v52  ;;  %v1450_v3 = vrot.slane %v1448_v52, 4  ;;  %v10870_v4 = vld [vmem:[#allocation2 + $0x28] sm:$0xf]  ;;  %v551_v5 = vshll.u32 %v453_v30, 16 }
  0x3c   : > { %842 = vst.msk [vmem:[#allocation2 + $0x4c] sm:$0xf] %vm799_vm9, %v579_v56  ;;  %845 = vst [vmem:[#allocation2 + $0x50] sm:$0x1] %v844_v57  ;;  %v556_v6 = vshrl.u32 %v454_v36, 16  ;;  %v1441_v7 = vrot.slane %v10870_v4, 5 }
  0x3d   : > { %411 = vst [vmem:[#allocation2 + $0x44] sm:$0x1] %v410_v59  ;;  %v550_v8 = vrot.slane %v548_v62, 7  ;;  %v559_v9 = vshll.u32 %v454_v36, 16  ;;  %v366_v10 = vsel %vm10711_vm3, 0, %v365_v55  ;;  %v1452_v12 = vsel %vm10737_vm10, %v1450_v3, %v1451_v53 }
  0x3e   : > { %v457_v11 = vld [vmem:[%s10744_s14 + $0x30] sm:$0xf]  ;;  %v10879_v13 = vld [vmem:[#allocation2 + $0x2c] sm:$0x1]  ;;  %v1354_v15 = vld [vmem:[#allocation2 + $0x24] sm:$0xe]  ;;  %v9242_v20 = vcombine.low %v1449_v0, %v1452_v12 }
  0x3f   : > { %v558_v16 = vrot.slane %v556_v6, 7  ;;  %367 = vst [vmem:[#allocation2 + $0x54] sm:$0x1] %v366_v10  ;;  %v416_v19 = vsel %vm10718_vm5, 0, %v415_v63  ;;  %v9193_v21 = vrot.slane %v1354_v15, 9  ;;  %v1443_v22 = vrot.slane %v1441_v7, 4 }
  0x40   : > { %v1444_v23 = vrot.slane %v10879_v13, 5  ;;  %417 = vst [vmem:[#allocation2 + $0x5c] sm:$0x1] %v416_v19  ;;  %v458_v24 = vld [vmem:[%s10744_s14 + $0x34] sm:$0xf]  ;;  %v553_v25 = vor.u32 %v551_v5, %v550_v8  ;;  %v554_v26 = vrot.slane %v550_v8, 4  ;;  %1730 = vrot.lane.b32.xlu0 %v9242_v20, %s10647_s15 }
  0x41   : > { %v561_v27 = vor.u32 %v559_v9, %v558_v16  ;;  %v563_v28 = vrot.slane %v558_v16, 4  ;;  %v832_v29 = vld [vmem:[#allocation2 + $0x3c] sm:$0xf]  ;;  %v1442_v30 = vsel %vm10737_vm10, %v9193_v21, %v1441_v7  ;;  %v582_v32 = vshrl.u32 %v457_v11, 16  ;;  %v1357_v35 = vld [vmem:[#allocation2 + $0x48] sm:$0xe] }
  0x42   : > { %v1445_v31 = vsel %vm10737_vm10, %v1443_v22, %v1444_v23  ;;  %v585_v33 = vshll.u32 %v457_v11, 16  ;;  %v833_v37 = vsel %vm10754_vm14, %v553_v25, %v832_v29  ;;  %v590_v39 = vshrl.u32 %v458_v24, 16  ;;  %v918_v40 = vld [vmem:[#allocation2 + $0xc] sm:$0xf]  ;;  %v922_v10 = vld [vmem:[#allocation2 + $0x24] sm:$0xf] }
  0x43   : > { %v9241_v34 = vcombine.low %v1442_v30, %v1445_v31  ;;  %v562_v36 = vsel %vm10770_vm1, %v554_v26, %v561_v27  ;;  %v10894_v41 = vld [vmem:[#allocation2 + $0x4c] sm:$0xf]  ;;  %v10896_v42 = vld [vmem:[#allocation2 + $0x50] sm:$0x1]  ;;  %v9196_v43 = vrot.slane %v1357_v35, 9  ;;  %v584_v47 = vrot.slane %v582_v32, 7 }
  0x44   : > { %834 = vst [vmem:[#allocation2 + $0x3c] sm:$0xf] %v833_v37  ;;  %835 = vst.msk [vmem:[#allocation2 + $0x40] sm:$0xf] %vm799_vm9, %v562_v36  ;;  %v1462_v48 = vrot.slane %v10894_v41, 5  ;;  %v1465_v49 = vrot.slane %v10896_v42, 5 }
  0x45   : > { %1728 = vrot.lane.b32.xlu1 %v9241_v34, %s10647_s15  ;;  %v836_v50 = vld [vmem:[#allocation2 + $0x44] sm:$0x1]  ;;  %v592_v52 = vrot.slane %v590_v39, 7  ;;  %v593_v53 = vshll.u32 %v458_v24, 16  ;;  %v587_v55 = vor.u32 %v585_v33, %v584_v47  ;;  %v588_v56 = vrot.slane %v584_v47, 4 }
  0x46   : > { %v837_v54 = vsel %vm10777_vm6, %v563_v28, %v836_v50  ;;  %v846_v57 = vld [vmem:[#allocation2 + $0x54] sm:$0xf]  ;;  %v992_v59 = vshrl.u32 %v918_v40, 16  ;;  %v1463_v62 = vsel %vm10737_vm10, %v9196_v43, %v1462_v48  ;;  %v1464_v63 = vrot.slane %v1462_v48, 4  ;;  %v920_v34 = vld [vmem:[#allocation2 + $0x18] sm:$0xf] }
  0x47   : > { %838 = vst [vmem:[#allocation2 + $0x44] sm:$0x1] %v837_v54  ;;  %v595_v0 = vor.u32 %v593_v53, %v592_v52  ;;  %v597_v3 = vrot.slane %v592_v52, 4  ;;  %v850_v5 = vld [vmem:[#allocation2 + $0x5c] sm:$0x1]  ;;  %v847_v6 = vsel %vm10754_vm14, %v587_v55, %v846_v57  ;;  %v995_v8 = vshll.u32 %v918_v40, 16 }
  0x48   : > { %v994_v7 = vrot.slane %v992_v59, 4  ;;  %v1001_v9 = vshll.u32 %v10829_v17, 16  ;;  %v1466_v11 = vsel %vm10737_vm10, %v1464_v63, %v1465_v49  ;;  %848 = vst [vmem:[#allocation2 + $0x54] sm:$0xf] %v847_v6  ;;  %v1005_v16 = vshrl.u32 %v10829_v17, 16 }
  0x49   : > { %v596_v12 = vsel %vm10770_vm1, %v588_v56, %v595_v0  ;;  %v851_v15 = vsel %vm10777_vm6, %v597_v3, %v850_v5  ;;  %v9244_v19 = vcombine.low %v1463_v62, %v1466_v11  ;;  %v997_v20 = vrot.slane %v995_v8, 5 }
  0x4a   : > { %849 = vst.msk [vmem:[#allocation2 + $0x58] sm:$0xf] %vm799_vm9, %v596_v12  ;;  %852 = vst [vmem:[#allocation2 + $0x5c] sm:$0x1] %v851_v15  ;;  %v1003_v21 = vrot.slane %v1001_v9, 5  ;;  %v1011_v22 = vshll.u32 %v10831_v18, 16 }
  0x4b   : > { %v10918_v23 = vld [vmem:[#allocation2 + $0x40] sm:$0xf]  ;;  %v1356_v24 = vld [vmem:[#allocation2 + $0x3c] sm:$0xe]  ;;  %v1007_v25 = vrot.slane %v1005_v16, 4  ;;  %v1040_v26 = vshrl.u32 %v922_v10, 16  ;;  %1734 = vrot.lane.b32.xlu0 %v9244_v19, %s10647_s15  ;;  %v998_v29 = vor.u32 %v997_v20, %v994_v7 }
  0x4c   : > { %v9195_v27 = vrot.slane %v1356_v24, 9  ;;  %v1455_v28 = vrot.slane %v10918_v23, 5  ;;  %v1013_v17 = vrot.slane %v1011_v22, 5  ;;  %v1043_v32 = vshll.u32 %v922_v10, 16  ;;  %v926_v9 = vld [vmem:[#allocation2 + $0x3c] sm:$0xf] }
  0x4d   : > { %v1008_v30 = vor.u32 %v1007_v25, %v1003_v21  ;;  %v1042_v31 = vrot.slane %v1040_v26, 4  ;;  %v1049_v33 = vshll.u32 %v10870_v4, 16  ;;  %v999_v37 = vrot.slane %v998_v29, 4 }
  0x4e   : > { %v10923_v35 = vld [vmem:[#allocation2 + $0x44] sm:$0x1]  ;;  %v1456_v18 = vsel %vm10737_vm10, %v9195_v27, %v1455_v28  ;;  %v1457_v36 = vrot.slane %v1455_v28, 4  ;;  %v1053_v39 = vshrl.u32 %v10870_v4, 16  ;;  %v1045_v47 = vrot.slane %v1043_v32, 5 }
  0x4f   : > { %v1458_v40 = vrot.slane %v10923_v35, 5  ;;  %v1009_v43 = vrot.slane %v1008_v30, 4  ;;  %v1051_v48 = vrot.slane %v1049_v33, 5  ;;  %v1358_v49 = vld [vmem:[#allocation2 + $0x54] sm:$0xe]  ;;  %v1004_v50 = vsel %vm10762_vm15, %v999_v37, %v1003_v21 }
  0x50   : > { %v1055_v52 = vrot.slane %v1053_v39, 4  ;;  %v1059_v53 = vshll.u32 %v10879_v13, 16  ;;  %v1016_v54 = vshrl.u32 %v920_v34, 16  ;;  %v9197_v4 = vrot.slane %v1358_v49, 9  ;;  %v924_v30 = vld [vmem:[#allocation2 + $0x30] sm:$0xf] }
  0x51   : > { %v1459_v55 = vsel %vm10737_vm10, %v1457_v36, %v1458_v40  ;;  %v10934_v56 = vld [vmem:[#allocation2 + $0x58] sm:$0xf]  ;;  %v10936_v57 = vld [vmem:[#allocation2 + $0x5c] sm:$0x1]  ;;  %v1014_v59 = vsel %vm10762_vm15, %v1009_v43, %v1013_v17  ;;  %v1046_v62 = vor.u32 %v1045_v47, %v1042_v31  ;;  %v1019_v12 = vshll.u32 %v920_v34, 16 }
  0x52   : > { %v9243_v63 = vcombine.low %v1456_v18, %v1459_v55  ;;  %v1469_v0 = vrot.slane %v10934_v56, 5  ;;  %v1472_v3 = vrot.slane %v10936_v57, 5  ;;  %v9223_v5 = vcombine.low %v1004_v50, %v1014_v59  ;;  %v11332_v2 = vld [vmem:[#allocation2 + $0x54] sm:$0xf] }
  0x53   : > { %v1047_v13 = vrot.slane %v1046_v62, 4  ;;  %v1056_v6 = vor.u32 %v1055_v52, %v1051_v48  ;;  %v1061_v7 = vrot.slane %v1059_v53, 5  ;;  %v1018_v8 = vrot.slane %v1016_v54, 4 }
  0x54   : > { %1732 = vrot.lane.b32.xlu1 %v9243_v63, %s10647_s15  ;;  %v1470_v10 = vsel %vm10737_vm10, %v9197_v4, %v1469_v0  ;;  %v1471_v11 = vrot.slane %v1469_v0, 4  ;;  %1644 = vrot.lane.b32.xlu0 %v9223_v5, %s10648_s16  ;;  %v1025_v15 = vshll.u32 %v10816_v60, 16  ;;  %v1029_v20 = vshrl.u32 %v10816_v60, 16  ;;  %v930_v4 = vld [vmem:[#allocation2 + $0x54] sm:$0xf] }
  0x55   : > { %v1052_v16 = vsel %vm10762_vm15, %v1047_v13, %v1051_v48  ;;  %v1057_v19 = vrot.slane %v1056_v6, 4  ;;  %v1035_v21 = vshll.u32 %v10818_v61, 16  ;;  %v1021_v24 = vrot.slane %v1019_v12, 5 }
  0x56   : > { %v1473_v22 = vsel %vm10737_vm10, %v1471_v11, %v1472_v3  ;;  %v1027_v25 = vrot.slane %v1025_v15, 5  ;;  %v1088_v26 = vshrl.u32 %v926_v9, 16  ;;  %v1031_v29 = vrot.slane %v1029_v20, 4  ;;  %v928_v15 = vld [vmem:[#allocation2 + $0x48] sm:$0xf] }
  0x57   : > { %v9245_v27 = vcombine.low %v1470_v10, %v1473_v22  ;;  %v1062_v28 = vsel %vm10762_vm15, %v1057_v19, %v1061_v7  ;;  %v1037_v17 = vrot.slane %v1035_v21, 5  ;;  %v1022_v32 = vor.u32 %v1021_v24, %v1018_v8 }
  0x58   : > { %v9225_v31 = vcombine.low %v1052_v16, %v1062_v28  ;;  %v1090_v33 = vrot.slane %v1088_v26, 4  ;;  %v1091_v34 = vshll.u32 %v926_v9, 16  ;;  %v1032_v60 = vor.u32 %v1031_v29, %v1027_v25 }
  0x59   : > { %1736 = vrot.lane.b32.xlu1 %v9245_v27, %s10647_s15  ;;  %v1097_v61 = vshll.u32 %v10918_v23, 16  ;;  %v1101_v18 = vshrl.u32 %v10918_v23, 16  ;;  %v1107_v36 = vshll.u32 %v10923_v35, 16  ;;  %v1023_v37 = vrot.slane %v1022_v32, 4  ;;  %v2050_v32 = vld [vmem:[#allocation2 + $0x18] sm:$0xf] }
  0x5a   : > { %v1093_v39 = vrot.slane %v1091_v34, 5  ;;  %v1064_v40 = vshrl.u32 %v924_v30, 16  ;;  %v1067_v43 = vshll.u32 %v924_v30, 16  ;;  %v1033_v47 = vrot.slane %v1032_v60, 4 }
  0x5b   : > { %v1099_v48 = vrot.slane %v1097_v61, 5  ;;  %v1103_v49 = vrot.slane %v1101_v18, 4  ;;  %v1109_v50 = vrot.slane %v1107_v36, 5  ;;  %v1028_v52 = vsel %vm10762_vm15, %v1023_v37, %v1027_v25  ;;  %v2051_v37 = vld [vmem:[#allocation2 + $0x1c] sm:$0xf] }
  0x5c   : > { %v1094_v53 = vor.u32 %v1093_v39, %v1090_v33  ;;  %v1066_v54 = vrot.slane %v1064_v40, 4  ;;  %v1069_v55 = vrot.slane %v1067_v43, 5  ;;  %v1038_v23 = vsel %vm10762_vm15, %v1033_v47, %v1037_v17 }
  0x5d   : > { %1648 = vrot.lane.b32.xlu1 %v9225_v31, %s10648_s16  ;;  %v1104_v35 = vor.u32 %v1103_v49, %v1099_v48  ;;  %v1073_v59 = vshll.u32 %v10853_v44, 16  ;;  %v1077_v62 = vshrl.u32 %v10853_v44, 16  ;;  %v9224_v63 = vcombine.low %v1028_v52, %v1038_v23  ;;  %v2081_v52 = vld [vmem:[#allocation2 + $0x20] sm:$0x1]  ;;  %v2048_v23 = vld [vmem:[#allocation2 + $0xc] sm:$0xf] }
  0x5e   : > { %v1095_v0 = vrot.slane %v1094_v53, 4  ;;  %v1070_v3 = vor.u32 %v1069_v55, %v1066_v54  ;;  %v1083_v5 = vshll.u32 %v10855_v46, 16  ;;  %v1136_v8 = vshrl.u32 %v930_v4, 16 }
  0x5f   : > { %v1105_v13 = vrot.slane %v1104_v35, 4  ;;  %v1075_v6 = vrot.slane %v1073_v59, 5  ;;  %v1079_v7 = vrot.slane %v1077_v62, 4  ;;  %1646 = vrot.lane.b32.xlu0 %v9224_v63, %s10648_s16  ;;  %v1139_v12 = vshll.u32 %v930_v4, 16  ;;  %v2049_v63 = vld [vmem:[#allocation2 + $0x10] sm:$0xf] }
  0x60   : > { %v1100_v9 = vsel %vm10762_vm15, %v1095_v0, %v1099_v48  ;;  %v1071_v10 = vrot.slane %v1070_v3, 4  ;;  %v1085_v11 = vrot.slane %v1083_v5, 5  ;;  %v1138_v19 = vrot.slane %v1136_v8, 4 }
  0x61   : > { %v1110_v44 = vsel %vm10762_vm15, %v1105_v13, %v1109_v50  ;;  %v1080_v16 = vor.u32 %v1079_v7, %v1075_v6  ;;  %v1145_v46 = vshll.u32 %v10934_v56, 16  ;;  %v1141_v22 = vrot.slane %v1139_v12, 5 }
  0x62   : > { %v9227_v20 = vcombine.low %v1100_v9, %v1110_v44  ;;  %v1076_v21 = vsel %vm10762_vm15, %v1071_v10, %v1075_v6  ;;  %v1149_v24 = vshrl.u32 %v10934_v56, 16  ;;  %v1155_v27 = vshll.u32 %v10936_v57, 16  ;;  %v2080_v9 = vld [vmem:[#allocation2 + $0x14] sm:$0x1] }
  0x63   : > { %v1081_v25 = vrot.slane %v1080_v16, 4  ;;  %v1147_v26 = vrot.slane %v1145_v46, 5  ;;  %v1112_v28 = vshrl.u32 %v928_v15, 16  ;;  %v1142_v29 = vor.u32 %v1141_v22, %v1138_v19  ;;  %v2481_v16 = vld [vmem:[#allocation2 + $0x18] sm:$0xe] }
  0x64   : > { %1652 = vrot.lane.b32.xlu1 %v9227_v20, %s10648_s16  ;;  %v1151_v17 = vrot.slane %v1149_v24, 4  ;;  %v1115_v30 = vshll.u32 %v928_v15, 16  ;;  %v1121_v31 = vshll.u32 %v10894_v41, 16  ;;  %v1157_v34 = vrot.slane %v1155_v27, 5  ;;  %v2480_v27 = vld [vmem:[#allocation2 + $0xc] sm:$0xe] }
  0x65   : > { %v1086_v33 = vsel %vm10762_vm15, %v1081_v25, %v1085_v11  ;;  %v1114_v60 = vrot.slane %v1112_v28, 4  ;;  %v1125_v56 = vshrl.u32 %v10894_v41, 16  ;;  %v1143_v18 = vrot.slane %v1142_v29, 4 }
  0x66   : > { %v9226_v61 = vcombine.low %v1076_v21, %v1086_v33  ;;  %v1152_v36 = vor.u32 %v1151_v17, %v1147_v26  ;;  %v1117_v57 = vrot.slane %v1115_v30, 5  ;;  %v1123_v39 = vrot.slane %v1121_v31, 5 }
  0x67   : > { %v1127_v40 = vrot.slane %v1125_v56, 4  ;;  %v1131_v43 = vshll.u32 %v10896_v42, 16  ;;  %v2121_v47 = vshrl.u32 %v2050_v32, 16  ;;  %v1148_v48 = vsel %vm10762_vm15, %v1143_v18, %v1147_v26 }
  0x68   : > { %1650 = vrot.lane.b32.xlu0 %v9226_v61, %s10648_s16  ;;  %v1153_v49 = vrot.slane %v1152_v36, 4  ;;  %v1118_v50 = vor.u32 %v1117_v57, %v1114_v60  ;;  %v2124_v53 = vshll.u32 %v2050_v32, 16  ;;  %v2130_v4 = vshll.u32 %v2051_v37, 16  ;;  %v2054_v60 = vld [vmem:[#allocation2 + $0x30] sm:$0xf] }
  0x69   : > { %v1128_v41 = vor.u32 %v1127_v40, %v1123_v39  ;;  %v1133_v54 = vrot.slane %v1131_v43, 5  ;;  %v2123_v55 = vrot.slane %v2121_v47, 4  ;;  %v2134_v62 = vshrl.u32 %v2051_v37, 16  ;;  %v2055_v47 = vld [vmem:[#allocation2 + $0x34] sm:$0xf] }
  0x6a   : > { %v1158_v35 = vsel %vm10762_vm15, %v1153_v49, %v1157_v34  ;;  %v1119_v59 = vrot.slane %v1118_v50, 4  ;;  %v2126_v42 = vrot.slane %v2124_v53, 5  ;;  %v2132_v5 = vrot.slane %v2130_v4, 5  ;;  %v2052_v53 = vld [vmem:[#allocation2 + $0x24] sm:$0xf] }
  0x6b   : > { %v9229_v0 = vcombine.low %v1148_v48, %v1158_v35  ;;  %v1129_v3 = vrot.slane %v1128_v41, 4  ;;  %v2140_v13 = vshll.u32 %v2081_v52, 16  ;;  %v2136_v8 = vrot.slane %v2134_v62, 4  ;;  %v11000_v48 = vld [vmem:[#allocation2 + $0x38] sm:$0x1] }
  0x6c   : > { %v1124_v6 = vsel %vm10762_vm15, %v1119_v59, %v1123_v39  ;;  %v2127_v7 = vor.u32 %v2126_v42, %v2123_v55  ;;  %v2097_v10 = vshrl.u32 %v2048_v23, 16  ;;  %v2100_v15 = vshll.u32 %v2048_v23, 16 }
  0x6d   : > { %1656 = vrot.lane.b32.xlu1 %v9229_v0, %s10648_s16  ;;  %v1134_v11 = vsel %vm10762_vm15, %v1129_v3, %v1133_v54  ;;  %v2142_v12 = vrot.slane %v2140_v13, 5  ;;  %v2106_v44 = vshll.u32 %v2049_v63, 16  ;;  %v2137_v20 = vor.u32 %v2136_v8, %v2132_v5  ;;  %v2053_v3 = vld [vmem:[#allocation2 + $0x28] sm:$0xf] }
  0x6e   : > { %v9228_v19 = vcombine.low %v1124_v6, %v1134_v11  ;;  %v2128_v46 = vrot.slane %v2127_v7, 4  ;;  %v2099_v21 = vrot.slane %v2097_v10, 4  ;;  %v2102_v22 = vrot.slane %v2100_v15, 5  ;;  %v2483_v10 = vld [vmem:[#allocation2 + $0x30] sm:$0xe] }
  0x6f   : > { %v2108_v24 = vrot.slane %v2106_v44, 5  ;;  %v2110_v25 = vshrl.u32 %v2049_v63, 16  ;;  %v2116_v26 = vshll.u32 %v2080_v9, 16  ;;  %v2138_v29 = vrot.slane %v2137_v20, 4 }
  0x70   : > { %1654 = vrot.lane.b32.xlu0 %v9228_v19, %s10648_s16  ;;  %v2133_v28 = vsel %vm10762_vm15, %v2128_v46, %v2132_v5  ;;  %v9273_v17 = vrot.slane %v2481_v16, 9  ;;  %v2553_v30 = vrot.slane %v2051_v37, 5  ;;  %v2103_v31 = vor.u32 %v2102_v22, %v2099_v21 }
  0x71   : > { %v2112_v32 = vrot.slane %v2110_v25, 4  ;;  %v2118_v33 = vrot.slane %v2116_v26, 5  ;;  %v2556_v34 = vrot.slane %v2081_v52, 5  ;;  %v2143_v56 = vsel %vm10762_vm15, %v2138_v29, %v2142_v12  ;;  %v2482_v26 = vld [vmem:[#allocation2 + $0x24] sm:$0xe] }
  0x72   : > { %v2554_v61 = vsel %vm10737_vm10, %v9273_v17, %v2553_v30  ;;  %v2555_v18 = vrot.slane %v2553_v30, 4  ;;  %v9272_v36 = vrot.slane %v2480_v27, 9  ;;  %v9305_v57 = vcombine.low %v2133_v28, %v2143_v56  ;;  %v2058_v30 = vld [vmem:[#allocation2 + $0x48] sm:$0xf] }
  0x73   : > { %v2104_v39 = vrot.slane %v2103_v31, 4  ;;  %v2113_v40 = vor.u32 %v2112_v32, %v2108_v24  ;;  %v2546_v43 = vrot.slane %v2049_v63, 5  ;;  %v2549_v49 = vrot.slane %v2080_v9, 5  ;;  %v2082_v9 = vld [vmem:[#allocation2 + $0x2c] sm:$0x1] }
  0x74   : > { %v2557_v37 = vsel %vm10737_vm10, %v2555_v18, %v2556_v34  ;;  %v2169_v50 = vshrl.u32 %v2054_v60, 16  ;;  %v2172_v52 = vshll.u32 %v2054_v60, 16  ;;  %2770 = vrot.lane.b32.xlu1 %v9305_v57, %s10648_s16  ;;  %v2178_v42 = vshll.u32 %v2055_v47, 16 }
  0x75   : > { %v2109_v41 = vsel %vm10762_vm15, %v2104_v39, %v2108_v24  ;;  %v2114_v54 = vrot.slane %v2113_v40, 4  ;;  %v9321_v55 = vcombine.low %v2554_v61, %v2557_v37  ;;  %v2547_v4 = vsel %vm10737_vm10, %v9272_v36, %v2546_v43  ;;  %v2059_v36 = vld [vmem:[#allocation2 + $0x4c] sm:$0xf] }
  0x76   : > { %v2548_v23 = vrot.slane %v2546_v43, 4  ;;  %v2171_v35 = vrot.slane %v2169_v50, 4  ;;  %v2174_v59 = vrot.slane %v2172_v52, 5  ;;  %v2182_v63 = vshrl.u32 %v2055_v47, 16  ;;  %v11024_v43 = vld [vmem:[#allocation2 + $0x50] sm:$0x1] }
  0x77   : > { %v2119_v62 = vsel %vm10762_vm15, %v2114_v54, %v2118_v33  ;;  %v2188_v0 = vshll.u32 %v11000_v48, 16  ;;  %v2145_v5 = vshrl.u32 %v2052_v53, 16  ;;  %v2180_v8 = vrot.slane %v2178_v42, 5 }
  0x78   : > { %v9304_v13 = vcombine.low %v2109_v41, %v2119_v62  ;;  %v2550_v6 = vsel %vm10737_vm10, %v2548_v23, %v2549_v49  ;;  %v2175_v7 = vor.u32 %v2174_v59, %v2171_v35  ;;  %2850 = vrot.lane.b32.xlu1 %v9321_v55, %s10647_s15  ;;  %v2184_v12 = vrot.slane %v2182_v63, 4  ;;  %v11028_v41 = vld [vmem:[#allocation2 + $0x40] sm:$0xf]  ;;  %v11032_v23 = vld [vmem:[#allocation2 + $0x44] sm:$0x1] }
  0x79   : > { %v9320_v11 = vcombine.low %v2547_v4, %v2550_v6  ;;  %v2190_v15 = vrot.slane %v2188_v0, 5  ;;  %v2147_v44 = vrot.slane %v2145_v5, 4  ;;  %v2148_v19 = vshll.u32 %v2052_v53, 16  ;;  %v2056_v53 = vld [vmem:[#allocation2 + $0x3c] sm:$0xf] }
  0x7a   : > { %2768 = vrot.lane.b32.xlu0 %v9304_v13, %s10648_s16  ;;  %v2176_v16 = vrot.slane %v2175_v7, 4  ;;  %v2154_v46 = vshll.u32 %v2053_v3, 16  ;;  %v2158_v20 = vshrl.u32 %v2053_v3, 16  ;;  %v2185_v21 = vor.u32 %v2184_v12, %v2180_v8  ;;  %v2485_v63 = vld [vmem:[#allocation2 + $0x48] sm:$0xe] }
  0x7b   : > { %v2164_v22 = vshll.u32 %v2082_v9, 16  ;;  %v9275_v24 = vrot.slane %v2483_v10, 9  ;;  %v2567_v25 = vrot.slane %v2055_v47, 5  ;;  %v2150_v28 = vrot.slane %v2148_v19, 5 }
  0x7c   : > { %v2181_v27 = vsel %vm10762_vm15, %v2176_v16, %v2180_v8  ;;  %v2156_v29 = vrot.slane %v2154_v46, 5  ;;  %v2160_v17 = vrot.slane %v2158_v20, 4  ;;  %v2186_v31 = vrot.slane %v2185_v21, 4  ;;  %v2484_v20 = vld [vmem:[#allocation2 + $0x3c] sm:$0xe] }
  0x7d   : > { %v2166_v32 = vrot.slane %v2164_v22, 5  ;;  %v2568_v33 = vsel %vm10737_vm10, %v9275_v24, %v2567_v25  ;;  %v2569_v34 = vrot.slane %v2567_v25, 4  ;;  %v2151_v60 = vor.u32 %v2150_v28, %v2147_v44 }
  0x7e   : > { %2848 = vrot.lane.b32.xlu0 %v9320_v11, %s10647_s15  ;;  %v2161_v56 = vor.u32 %v2160_v17, %v2156_v29  ;;  %v2570_v61 = vrot.slane %v11000_v48, 5  ;;  %v9274_v18 = vrot.slane %v2482_v26, 9  ;;  %v2191_v57 = vsel %vm10762_vm15, %v2186_v31, %v2190_v15  ;;  %v368_v17 = vld [vmem:[#allocation2 + $0x60] sm:$0x1] }
  0x7f   : > { %v2560_v39 = vrot.slane %v2053_v3, 5  ;;  %v2563_v40 = vrot.slane %v2082_v9, 5  ;;  %v2217_v47 = vshrl.u32 %v2058_v30, 16  ;;  %v9307_v37 = vcombine.low %v2181_v27, %v2191_v57  ;;  %v459_v57 = vld [vmem:[%s10744_s14 + $0x38] sm:$0xf] }
  0x80   : > { %v2152_v49 = vrot.slane %v2151_v60, 4  ;;  %v2162_v50 = vrot.slane %v2161_v56, 4  ;;  %v2571_v52 = vsel %vm10737_vm10, %v2569_v34, %v2570_v61  ;;  %v2220_v42 = vshll.u32 %v2058_v30, 16  ;;  %v418_v34 = vld [vmem:[#allocation2 + $0x68] sm:$0x1] }
  0x81   : > { %v9323_v48 = vcombine.low %v2568_v33, %v2571_v52  ;;  %v2561_v54 = vsel %vm10737_vm10, %v9274_v18, %v2560_v39  ;;  %v2562_v55 = vrot.slane %v2560_v39, 4  ;;  %v2219_v4 = vrot.slane %v2217_v47, 4  ;;  %2774 = vrot.lane.b32.xlu1 %v9307_v37, %s10648_s16  ;;  %v460_v39 = vld [vmem:[%s10744_s14 + $0x3c] sm:$0xf]  ;;  %v2060_v37 = vld [vmem:[#allocation2 + $0x54] sm:$0xf] }
  0x82   : > { %v2157_v35 = vsel %vm10762_vm15, %v2152_v49, %v2156_v29  ;;  %v2167_v59 = vsel %vm10762_vm15, %v2162_v50, %v2166_v32  ;;  %v2226_v62 = vshll.u32 %v2059_v36, 16  ;;  %v2230_v5 = vshrl.u32 %v2059_v36, 16 }
  0x83   : > { %v9306_v0 = vcombine.low %v2157_v35, %v2167_v59  ;;  %v2564_v3 = vsel %vm10737_vm10, %v2562_v55, %v2563_v40  ;;  %v2236_v13 = vshll.u32 %v11024_v43, 16  ;;  %v2222_v7 = vrot.slane %v2220_v42, 5 }
  0x84   : > { %v9322_v6 = vcombine.low %v2561_v54, %v2564_v3  ;;  %v2228_v8 = vrot.slane %v2226_v62, 5  ;;  %v2193_v9 = vshrl.u32 %v2056_v53, 16  ;;  %v2232_v10 = vrot.slane %v2230_v5, 4  ;;  %v11063_v54 = vld [vmem:[#allocation2 + $0x5c] sm:$0x1] }
  0x85   : > { %2772 = vrot.lane.b32.xlu0 %v9306_v0, %s10648_s16  ;;  %v2238_v11 = vrot.slane %v2236_v13, 5  ;;  %v2196_v12 = vshll.u32 %v2056_v53, 16  ;;  %v2202_v15 = vshll.u32 %v11028_v41, 16  ;;  %2854 = vrot.lane.b32.xlu1 %v9323_v48, %s10647_s15  ;;  %v2223_v44 = vor.u32 %v2222_v7, %v2219_v4  ;;  %v2061_v48 = vld [vmem:[#allocation2 + $0x58] sm:$0xf] }
  0x86   : > { %v2195_v16 = vrot.slane %v2193_v9, 4  ;;  %v2206_v19 = vshrl.u32 %v11028_v41, 16  ;;  %v2212_v46 = vshll.u32 %v11032_v23, 16  ;;  %v2233_v21 = vor.u32 %v2232_v10, %v2228_v8  ;;  %v2486_v13 = vld [vmem:[#allocation2 + $0x54] sm:$0xe] }
  0x87   : > { %v2198_v22 = vrot.slane %v2196_v12, 5  ;;  %v2204_v24 = vrot.slane %v2202_v15, 5  ;;  %v9277_v25 = vrot.slane %v2485_v63, 9  ;;  %v2224_v26 = vrot.slane %v2223_v44, 4  ;;  %v374_v44 = vld [vmem:[#allocation2 + $0x78] sm:$0x1] }
  0x88   : > { %v2208_v27 = vrot.slane %v2206_v19, 4  ;;  %v2214_v28 = vrot.slane %v2212_v46, 5  ;;  %v2581_v29 = vrot.slane %v2059_v36, 5  ;;  %v2234_v30 = vrot.slane %v2233_v21, 4  ;;  %v424_v21 = vld [vmem:[#allocation2 + $0x80] sm:$0x1] }
  0x89   : > { %2852 = vrot.lane.b32.xlu0 %v9322_v6, %s10647_s15  ;;  %v2199_v31 = vor.u32 %v2198_v22, %v2195_v16  ;;  %v2584_v32 = vrot.slane %v11024_v43, 5  ;;  %v9276_v33 = vrot.slane %v2484_v20, 9  ;;  %v2229_v60 = vsel %vm10762_vm15, %v2224_v26, %v2228_v8 }
  0x8a   : > { %v2209_v56 = vor.u32 %v2208_v27, %v2204_v24  ;;  %v2582_v61 = vsel %vm10737_vm10, %v9277_v25, %v2581_v29  ;;  %v2583_v18 = vrot.slane %v2581_v29, 4  ;;  %v2239_v36 = vsel %vm10762_vm15, %v2234_v30, %v2238_v11  ;;  %v463_v27 = vld [vmem:[%s10744_s14 + $0x48] sm:$0xf] }
  0x8b   : > { %v2200_v40 = vrot.slane %v2199_v31, 4  ;;  %v2574_v47 = vrot.slane %v11028_v41, 5  ;;  %v2577_v43 = vrot.slane %v11032_v23, 5  ;;  %v9309_v49 = vcombine.low %v2229_v60, %v2239_v36 }
  0x8c   : > { %v2210_v50 = vrot.slane %v2209_v56, 4  ;;  %v2585_v52 = vsel %vm10737_vm10, %v2583_v18, %v2584_v32  ;;  %v369_v53 = vsel %vm10711_vm3, 0, %v368_v17  ;;  %v419_v59 = vsel %vm10718_vm5, 0, %v418_v34  ;;  %v464_v56 = vld [vmem:[%s10744_s14 + $0x4c] sm:$0xf] }
  0x8d   : > { %v2205_v55 = vsel %vm10762_vm15, %v2200_v40, %v2204_v24  ;;  %v9325_v4 = vcombine.low %v2582_v61, %v2585_v52  ;;  %v2575_v41 = vsel %vm10737_vm10, %v9276_v33, %v2574_v47  ;;  %v2576_v23 = vrot.slane %v2574_v47, 4  ;;  %370 = vst [vmem:[#allocation2 + $0x60] sm:$0x1] %v369_v53  ;;  %2778 = vrot.lane.b32.xlu1 %v9309_v49, %s10648_s16  ;;  %v371_v61 = vld [vmem:[#allocation2 + $0x6c] sm:$0x1] }
  0x8e   : > { %v2215_v35 = vsel %vm10762_vm15, %v2210_v50, %v2214_v28  ;;  %v599_v42 = vshrl.u32 %v459_v57, 16  ;;  %v602_v62 = vshll.u32 %v459_v57, 16  ;;  %420 = vst [vmem:[#allocation2 + $0x68] sm:$0x1] %v419_v59  ;;  %v607_v3 = vshrl.u32 %v460_v39, 16 }
  0x8f   : > { %v9308_v63 = vcombine.low %v2205_v55, %v2215_v35  ;;  %v2578_v0 = vsel %vm10737_vm10, %v2576_v23, %v2577_v43  ;;  %v610_v5 = vshll.u32 %v460_v39, 16  ;;  %v2241_v8 = vshrl.u32 %v2060_v37, 16  ;;  %v421_v50 = vld [vmem:[#allocation2 + $0x74] sm:$0x1]  ;;  %v461_v55 = vld [vmem:[%s10744_s14 + $0x40] sm:$0xf] }
  0x90   : > { %v9324_v6 = vcombine.low %v2575_v41, %v2578_v0  ;;  %v601_v7 = vrot.slane %v599_v42, 7  ;;  %v2244_v9 = vshll.u32 %v2060_v37, 16  ;;  %v609_v10 = vrot.slane %v607_v3, 7  ;;  %v462_v35 = vld [vmem:[%s10744_s14 + $0x44] sm:$0xf] }
  0x91   : > { %2776 = vrot.lane.b32.xlu0 %v9308_v63, %s10648_s16  ;;  %v2250_v11 = vshll.u32 %v2061_v48, 16  ;;  %v2254_v12 = vshrl.u32 %v2061_v48, 16  ;;  %v2260_v15 = vshll.u32 %v11063_v54, 16  ;;  %2858 = vrot.lane.b32.xlu1 %v9325_v4, %s10647_s15  ;;  %v2243_v46 = vrot.slane %v2241_v8, 4 }
  0x92   : > { %v604_v16 = vor.u32 %v602_v62, %v601_v7  ;;  %v605_v19 = vrot.slane %v601_v7, 4  ;;  %v2246_v20 = vrot.slane %v2244_v9, 5  ;;  %v612_v22 = vor.u32 %v610_v5, %v609_v10 }
  0x93   : > { %v614_v24 = vrot.slane %v609_v10, 4  ;;  %v2252_v25 = vrot.slane %v2250_v11, 5  ;;  %v2256_v26 = vrot.slane %v2254_v12, 4  ;;  %v2262_v17 = vrot.slane %v2260_v15, 5 }
  0x94   : > { %v853_v28 = vld [vmem:[#allocation2 + $0x60] sm:$0xf]  ;;  %v2247_v29 = vor.u32 %v2246_v20, %v2243_v46  ;;  %v9278_v30 = vrot.slane %v2486_v13, 9  ;;  %v2588_v31 = vrot.slane %v2061_v48, 5  ;;  %v613_v32 = vsel %vm10770_vm1, %v605_v19, %v612_v22 }
  0x95   : > { %2856 = vrot.lane.b32.xlu0 %v9324_v6, %s10647_s15  ;;  %v854_v33 = vsel %vm10754_vm14, %v604_v16, %v853_v28  ;;  %v2257_v34 = vor.u32 %v2256_v26, %v2252_v25  ;;  %v2591_v60 = vrot.slane %v11063_v54, 5  ;;  %856 = vst.msk [vmem:[#allocation2 + $0x64] sm:$0xf] %vm799_vm9, %v613_v32  ;;  %v857_v18 = vld [vmem:[#allocation2 + $0x68] sm:$0x1]  ;;  %v375_v40 = vsel %vm10711_vm3, 0, %v374_v44 }
  0x96   : > { %855 = vst [vmem:[#allocation2 + $0x60] sm:$0xf] %v854_v33  ;;  %v2248_v57 = vrot.slane %v2247_v29, 4  ;;  %v2589_v39 = vsel %vm10737_vm10, %v9278_v30, %v2588_v31  ;;  %v2590_v36 = vrot.slane %v2588_v31, 4  ;;  %v858_v47 = vsel %vm10777_vm6, %v614_v24, %v857_v18  ;;  %376 = vst [vmem:[#allocation2 + $0x78] sm:$0x1] %v375_v40 }
  0x97   : > { %v2258_v43 = vrot.slane %v2257_v34, 4  ;;  %v425_v37 = vsel %vm10718_vm5, 0, %v424_v21  ;;  %v633_v49 = vshrl.u32 %v463_v27, 16  ;;  %859 = vst [vmem:[#allocation2 + $0x68] sm:$0x1] %v858_v47  ;;  %v636_v48 = vshll.u32 %v463_v27, 16 }
  0x98   : > { %v2253_v52 = vsel %vm10762_vm15, %v2248_v57, %v2252_v25  ;;  %v2592_v53 = vsel %vm10737_vm10, %v2590_v36, %v2591_v60  ;;  %426 = vst [vmem:[#allocation2 + $0x80] sm:$0x1] %v425_v37  ;;  %v641_v54 = vshrl.u32 %v464_v56, 16  ;;  %v644_v23 = vshll.u32 %v464_v56, 16  ;;  %v380_v30 = vld [vmem:[#allocation2 + $0x90] sm:$0x1] }
  0x99   : > { %v2263_v4 = vsel %vm10762_vm15, %v2258_v43, %v2262_v17  ;;  %v635_v41 = vrot.slane %v633_v49, 7  ;;  %v372_v62 = vsel %vm10711_vm3, 0, %v371_v61  ;;  %v422_v63 = vsel %vm10718_vm5, 0, %v421_v50  ;;  %v430_v57 = vld [vmem:[#allocation2 + $0x98] sm:$0x1] }
  0x9a   : > { %v9310_v59 = vcombine.low %v2253_v52, %v2263_v4  ;;  %v643_v42 = vrot.slane %v641_v54, 7  ;;  %v9326_v0 = vcombine.low %v2589_v39, %v2592_v53  ;;  %373 = vst [vmem:[#allocation2 + $0x6c] sm:$0x1] %v372_v62  ;;  %423 = vst [vmem:[#allocation2 + $0x74] sm:$0x1] %v422_v63  ;;  %v616_v13 = vshrl.u32 %v461_v55, 16 }
  0x9b   : > { %v638_v3 = vor.u32 %v636_v48, %v635_v41  ;;  %v639_v5 = vrot.slane %v635_v41, 4  ;;  %v619_v8 = vshll.u32 %v461_v55, 16  ;;  %v624_v9 = vshrl.u32 %v462_v35, 16  ;;  %v467_v39 = vld [vmem:[%s10744_s14 + $0x58] sm:$0xf] }
  0x9c   : > { %2780 = vrot.lane.b32.xlu0 %v9310_v59, %s10648_s16  ;;  %v646_v6 = vor.u32 %v644_v23, %v643_v42  ;;  %v648_v7 = vrot.slane %v643_v42, 4  ;;  %v2063_v11 = vld [vmem:[#allocation2 + $0x64] sm:$0xf]  ;;  %v627_v34 = vshll.u32 %v462_v35, 16  ;;  %v618_v18 = vrot.slane %v616_v13, 7 }
  0x9d   : > { %v2062_v10 = vld [vmem:[#allocation2 + $0x60] sm:$0xf]  ;;  %v2274_v16 = vshll.u32 %v2063_v11, 16  ;;  %v2278_v19 = vshrl.u32 %v2063_v11, 16  ;;  %v867_v46 = vld [vmem:[#allocation2 + $0x78] sm:$0xf] }
  0x9e   : > { %v2487_v12 = vld [vmem:[#allocation2 + $0x60] sm:$0xe]  ;;  %v2265_v15 = vshrl.u32 %v2062_v10, 16  ;;  %v2268_v44 = vshll.u32 %v2062_v10, 16  ;;  %v2087_v20 = vld [vmem:[#allocation2 + $0x68] sm:$0x1]  ;;  %v647_v24 = vsel %vm10770_vm1, %v639_v5, %v646_v6  ;;  %v868_v25 = vsel %vm10754_vm14, %v638_v3, %v867_v46 }
  0x9f   : > { %v9279_v21 = vrot.slane %v2487_v12, 9  ;;  %v2595_v22 = vrot.slane %v2063_v11, 5  ;;  %v871_v26 = vld [vmem:[#allocation2 + $0x80] sm:$0x1]  ;;  %v2276_v29 = vrot.slane %v2274_v16, 5  ;;  %v2280_v17 = vrot.slane %v2278_v19, 4 }
  0xa0   : > { %v2267_v27 = vrot.slane %v2265_v15, 4  ;;  %v2270_v28 = vrot.slane %v2268_v44, 5  ;;  %2860 = vrot.lane.b32.xlu0 %v9326_v0, %s10647_s15  ;;  %869 = vst [vmem:[#allocation2 + $0x78] sm:$0xf] %v868_v25  ;;  %870 = vst.msk [vmem:[#allocation2 + $0x7c] sm:$0xf] %vm799_vm9, %v647_v24  ;;  %v872_v61 = vsel %vm10777_vm6, %v648_v7, %v871_v26  ;;  %v621_v53 = vor.u32 %v619_v8, %v618_v18 }
  0xa1   : > { %v2284_v31 = vshll.u32 %v2087_v20, 16  ;;  %v2597_v32 = vrot.slane %v2595_v22, 4  ;;  %v2598_v33 = vrot.slane %v2087_v20, 5  ;;  %v2281_v56 = vor.u32 %v2280_v17, %v2276_v29  ;;  %873 = vst [vmem:[#allocation2 + $0x80] sm:$0x1] %v872_v61 }
  0xa2   : > { %v2271_v60 = vor.u32 %v2270_v28, %v2267_v27  ;;  %v2596_v40 = vsel %vm10737_vm10, %v9279_v21, %v2595_v22  ;;  %v626_v47 = vrot.slane %v624_v9, 7  ;;  %v860_v43 = vld [vmem:[#allocation2 + $0x6c] sm:$0xf]  ;;  %v381_v37 = vsel %vm10711_vm3, 0, %v380_v30  ;;  %v864_v48 = vld [vmem:[#allocation2 + $0x74] sm:$0x1] }
  0xa3   : > { %v2286_v36 = vrot.slane %v2284_v31, 5  ;;  %v2282_v50 = vrot.slane %v2281_v56, 4  ;;  %v2599_v52 = vsel %vm10737_vm10, %v2597_v32, %v2598_v33  ;;  %382 = vst [vmem:[#allocation2 + $0x90] sm:$0x1] %v381_v37  ;;  %v622_v54 = vrot.slane %v618_v18, 4 }
  0xa4   : > { %v2272_v49 = vrot.slane %v2271_v60, 4  ;;  %v629_v55 = vor.u32 %v627_v34, %v626_v47  ;;  %v631_v4 = vrot.slane %v626_v47, 4  ;;  %v431_v41 = vsel %vm10718_vm5, 0, %v430_v57  ;;  %v11139_v15 = vld [vmem:[%s10744_s14 + $0x5c] sm:$0xf] }
  0xa5   : > { %v2287_v35 = vsel %vm10762_vm15, %v2282_v50, %v2286_v36  ;;  %v861_v59 = vsel %vm10754_vm14, %v621_v53, %v860_v43  ;;  %432 = vst [vmem:[#allocation2 + $0x98] sm:$0x1] %v431_v41  ;;  %v667_v42 = vshrl.u32 %v467_v39, 16  ;;  %v9327_v63 = vcombine.low %v2596_v40, %v2599_v52  ;;  %v11159_v50 = vld [vmem:[#allocation2] sm:$0xf] }
  0xa6   : > { %v2277_v23 = vsel %vm10762_vm15, %v2272_v49, %v2276_v29  ;;  %v630_v5 = vsel %vm10770_vm1, %v622_v54, %v629_v55  ;;  %862 = vst [vmem:[#allocation2 + $0x6c] sm:$0xf] %v861_v59  ;;  %v865_v13 = vsel %vm10777_vm6, %v631_v4, %v864_v48  ;;  %v670_v16 = vshll.u32 %v467_v39, 16  ;;  %v11157_v49 = vld [vmem:[#allocation2 + $0x4] sm:$0xf] }
  0xa7   : > { %v9311_v62 = vcombine.low %v2277_v23, %v2287_v35  ;;  %v2066_v0 = vld [vmem:[#allocation2 + $0x78] sm:$0xf]  ;;  %v2067_v3 = vld [vmem:[#allocation2 + $0x7c] sm:$0xf]  ;;  %863 = vst.msk [vmem:[#allocation2 + $0x70] sm:$0xf] %vm799_vm9, %v630_v5 }
  0xa8   : > { %v2489_v6 = vld [vmem:[#allocation2 + $0x78] sm:$0xe]  ;;  %v2313_v7 = vshrl.u32 %v2066_v0, 16  ;;  %v2316_v8 = vshll.u32 %v2066_v0, 16  ;;  %v2322_v9 = vshll.u32 %v2067_v3, 16  ;;  %v2326_v10 = vshrl.u32 %v2067_v3, 16 }
  0xa9   : > { %866 = vst [vmem:[#allocation2 + $0x74] sm:$0x1] %v865_v13  ;;  %2782 = vrot.lane.b32.xlu1 %v9311_v62, %s10648_s16  ;;  %v9281_v11 = vrot.slane %v2489_v6, 9  ;;  %v2609_v12 = vrot.slane %v2067_v3, 5  ;;  %v11141_v44 = vrot.slane %v667_v42, 7  ;;  %v675_v34 = vshrl.u32 %v11139_v15, 16 }
  0xaa   : > { %v2089_v19 = vld [vmem:[#allocation2 + $0x80] sm:$0x1]  ;;  %v2315_v46 = vrot.slane %v2313_v7, 4  ;;  %v2318_v20 = vrot.slane %v2316_v8, 5  ;;  %v2324_v21 = vrot.slane %v2322_v9, 5  ;;  %v2328_v22 = vrot.slane %v2326_v10, 4 }
  0xab   : > { %v2332_v24 = vshll.u32 %v2089_v19, 16  ;;  %v11145_v25 = vsel %vm10737_vm10, %v9281_v11, %v2609_v12  ;;  %v2611_v26 = vrot.slane %v2609_v12, 4  ;;  %v2612_v27 = vrot.slane %v2089_v19, 5  ;;  %v881_v28 = vld [vmem:[#allocation2 + $0x90] sm:$0xf] }
  0xac   : > { %v2319_v29 = vor.u32 %v2318_v20, %v2315_v46  ;;  %v2329_v17 = vor.u32 %v2328_v22, %v2324_v21  ;;  %v672_v30 = vor.u32 %v670_v16, %v11141_v44  ;;  %v673_v31 = vrot.slane %v11141_v44, 4  ;;  %v377_v59 = vld [vmem:[#allocation2 + $0x84] sm:$0x1]  ;;  %v427_v3 = vld [vmem:[#allocation2 + $0x8c] sm:$0x1] }
  0xad   : > { %2862 = vrot.lane.b32.xlu1 %v9327_v63, %s10647_s15  ;;  %v2334_v32 = vrot.slane %v2332_v24, 5  ;;  %v2613_v33 = vsel %vm10737_vm10, %v2611_v26, %v2612_v27  ;;  %v678_v60 = vshll.u32 %v11139_v15, 16  ;;  %v2064_v18 = vld [vmem:[#allocation2 + $0x6c] sm:$0xf]  ;;  %v677_v7 = vrot.slane %v675_v34, 7 }
  0xae   : > { %v2320_v56 = vrot.slane %v2319_v29, 4  ;;  %v2330_v61 = vrot.slane %v2329_v17, 4  ;;  %v2488_v57 = vld [vmem:[#allocation2 + $0x6c] sm:$0xe]  ;;  %v882_v39 = vsel %vm10754_vm14, %v672_v30, %v881_v28  ;;  %v2065_v36 = vld [vmem:[#allocation2 + $0x70] sm:$0xf]  ;;  %v9329_v37 = vcombine.low %v11145_v25, %v2613_v33 }
  0xaf   : > { %v2289_v47 = vshrl.u32 %v2064_v18, 16  ;;  %v2292_v43 = vshll.u32 %v2064_v18, 16  ;;  %883 = vst [vmem:[#allocation2 + $0x90] sm:$0xf] %v882_v39  ;;  %v2298_v54 = vshll.u32 %v2065_v36, 16  ;;  %v2302_v55 = vshrl.u32 %v2065_v36, 16 }
  0xb0   : > { %v2088_v40 = vld [vmem:[#allocation2 + $0x74] sm:$0x1]  ;;  %v2325_v53 = vsel %vm10762_vm15, %v2320_v56, %v2324_v21  ;;  %v2335_v48 = vsel %vm10762_vm15, %v2330_v61, %v2334_v32  ;;  %v9280_v63 = vrot.slane %v2488_v57, 9  ;;  %v2602_v0 = vrot.slane %v2065_v36, 5  ;;  %v465_v8 = vld [vmem:[%s10744_s14 + $0x50] sm:$0xf] }
  0xb1   : > { %v9313_v4 = vcombine.low %v2325_v53, %v2335_v48  ;;  %v2291_v41 = vrot.slane %v2289_v47, 4  ;;  %v2294_v23 = vrot.slane %v2292_v43, 5  ;;  %v2308_v35 = vshll.u32 %v2088_v40, 16  ;;  %v885_v12 = vld [vmem:[#allocation2 + $0x98] sm:$0x1] }
  0xb2   : > { %v2300_v42 = vrot.slane %v2298_v54, 5  ;;  %v2304_v62 = vrot.slane %v2302_v55, 4  ;;  %v2605_v6 = vrot.slane %v2088_v40, 5  ;;  %v11171_v10 = vsel %vm10737_vm10, %v9280_v63, %v2602_v0  ;;  %v466_v20 = vld [vmem:[%s10744_s14 + $0x54] sm:$0xf] }
  0xb3   : > { %2786 = vrot.lane.b32.xlu1 %v9313_v4, %s10648_s16  ;;  %v2295_v5 = vor.u32 %v2294_v23, %v2291_v41  ;;  %v2310_v13 = vrot.slane %v2308_v35, 5  ;;  %v2604_v11 = vrot.slane %v2602_v0, 4  ;;  %v378_v15 = vsel %vm10711_vm3, 0, %v377_v59  ;;  %v386_v32 = vld [vmem:[#allocation2 + $0xa8] sm:$0x1] }
  0xb4   : > { %v2305_v9 = vor.u32 %v2304_v62, %v2300_v42  ;;  %v680_v16 = vor.u32 %v678_v60, %v677_v7  ;;  %v682_v19 = vrot.slane %v677_v7, 4  ;;  %379 = vst [vmem:[#allocation2 + $0x84] sm:$0x1] %v378_v15  ;;  %v428_v46 = vsel %vm10718_vm5, 0, %v427_v3  ;;  %v436_v33 = vld [vmem:[#allocation2 + $0xb0] sm:$0x1] }
  0xb5   : > { %v2296_v44 = vrot.slane %v2295_v5, 4  ;;  %v2606_v22 = vsel %vm10737_vm10, %v2604_v11, %v2605_v6  ;;  %429 = vst [vmem:[#allocation2 + $0x8c] sm:$0x1] %v428_v46  ;;  %v650_v25 = vshrl.u32 %v465_v8, 16  ;;  %v653_v26 = vshll.u32 %v465_v8, 16 }
  0xb6   : > { %v2306_v21 = vrot.slane %v2305_v9, 4  ;;  %v2070_v24 = vld [vmem:[#allocation2 + $0x90] sm:$0xf]  ;;  %v9328_v28 = vcombine.low %v11171_v10, %v2606_v22  ;;  %v681_v29 = vsel %vm10770_vm1, %v673_v31, %v680_v16  ;;  %v886_v17 = vsel %vm10777_vm6, %v682_v19, %v885_v12  ;;  %v471_v18 = vld [vmem:[%s10744_s14 + $0x68] sm:$0xf] }
  0xb7   : > { %v2301_v27 = vsel %vm10762_vm15, %v2296_v44, %v2300_v42  ;;  %2866 = vrot.lane.b32.xlu1 %v9329_v37, %s10647_s15  ;;  %v11188_v30 = vld [vmem:[#allocation2 + $0x90] sm:$0xe]  ;;  %884 = vst.msk [vmem:[#allocation2 + $0x94] sm:$0xf] %vm799_vm9, %v681_v29  ;;  %887 = vst [vmem:[#allocation2 + $0x98] sm:$0x1] %v886_v17 }
  0xb8   : > { %v2311_v34 = vsel %vm10762_vm15, %v2306_v21, %v2310_v13  ;;  %v2361_v60 = vshrl.u32 %v2070_v24, 16  ;;  %v2364_v56 = vshll.u32 %v2070_v24, 16  ;;  %v652_v61 = vrot.slane %v650_v25, 7  ;;  %v472_v40 = vld [vmem:[%s10744_s14 + $0x6c] sm:$0xf] }
  0xb9   : > { %v9312_v57 = vcombine.low %v2301_v27, %v2311_v34  ;;  %v658_v31 = vshrl.u32 %v466_v20, 16  ;;  %v661_v39 = vshll.u32 %v466_v20, 16  ;;  %v9283_v36 = vrot.slane %v11188_v30, 9  ;;  %v383_v48 = vld [vmem:[#allocation2 + $0x9c] sm:$0x1] }
  0xba   : > { %v2363_v47 = vrot.slane %v2361_v60, 4  ;;  %v2366_v43 = vrot.slane %v2364_v56, 5  ;;  %v655_v37 = vor.u32 %v653_v26, %v652_v61  ;;  %v656_v53 = vrot.slane %v652_v61, 4  ;;  %v433_v23 = vld [vmem:[#allocation2 + $0xa4] sm:$0x1] }
  0xbb   : > { %2784 = vrot.lane.b32.xlu0 %v9312_v57, %s10648_s16  ;;  %v660_v54 = vrot.slane %v658_v31, 7  ;;  %v387_v55 = vsel %vm10711_vm3, 0, %v386_v32  ;;  %v437_v4 = vsel %vm10718_vm5, 0, %v436_v33  ;;  %v701_v41 = vshrl.u32 %v471_v18, 16  ;;  %v874_v59 = vld [vmem:[#allocation2 + $0x84] sm:$0xf] }
  0xbc   : > { %v2367_v35 = vor.u32 %v2366_v43, %v2363_v47  ;;  %388 = vst [vmem:[#allocation2 + $0xa8] sm:$0x1] %v387_v55  ;;  %438 = vst [vmem:[#allocation2 + $0xb0] sm:$0x1] %v437_v4  ;;  %v704_v42 = vshll.u32 %v471_v18, 16  ;;  %v709_v62 = vshrl.u32 %v472_v40, 16  ;;  %v875_v5 = vsel %vm10754_vm14, %v655_v37, %v874_v59 }
  0xbd   : > { %v712_v63 = vshll.u32 %v472_v40, 16  ;;  %v663_v0 = vor.u32 %v661_v39, %v660_v54  ;;  %v665_v3 = vrot.slane %v660_v54, 4  ;;  %v878_v13 = vld [vmem:[#allocation2 + $0x8c] sm:$0x1]  ;;  %v703_v6 = vrot.slane %v701_v41, 7 }
  0xbe   : > { %v11203_v7 = vrot.slane %v2367_v35, 4  ;;  %876 = vst [vmem:[#allocation2 + $0x84] sm:$0xf] %v875_v5  ;;  %v711_v8 = vrot.slane %v709_v62, 7  ;;  %v384_v9 = vsel %vm10711_vm3, 0, %v383_v48  ;;  %v434_v10 = vsel %vm10718_vm5, 0, %v433_v23 }
  0xbf   : > { %v469_v11 = vld [vmem:[%s10744_s14 + $0x60] sm:$0xf]  ;;  %2864 = vrot.lane.b32.xlu0 %v9328_v28, %s10647_s15  ;;  %v2071_v12 = vld [vmem:[#allocation2 + $0x94] sm:$0xf]  ;;  %v2091_v15 = vld [vmem:[#allocation2 + $0x98] sm:$0x1]  ;;  %v664_v44 = vsel %vm10770_vm1, %v656_v53, %v663_v0  ;;  %v879_v16 = vsel %vm10777_vm6, %v665_v3, %v878_v13  ;;  %v706_v19 = vor.u32 %v704_v42, %v703_v6 }
  0xc0   : > { %v707_v46 = vrot.slane %v703_v6, 4  ;;  %385 = vst [vmem:[#allocation2 + $0x9c] sm:$0x1] %v384_v9  ;;  %435 = vst [vmem:[#allocation2 + $0xa4] sm:$0x1] %v434_v10  ;;  %v2370_v20 = vshll.u32 %v2071_v12, 16  ;;  %v714_v26 = vor.u32 %v712_v63, %v711_v8 }
  0xc1   : > { %v2374_v21 = vshrl.u32 %v2071_v12, 16  ;;  %v2380_v22 = vshll.u32 %v2091_v15, 16  ;;  %877 = vst.msk [vmem:[#allocation2 + $0x88] sm:$0xf] %vm799_vm9, %v664_v44  ;;  %880 = vst [vmem:[#allocation2 + $0x8c] sm:$0x1] %v879_v16 }
  0xc2   : > { %v2623_v24 = vrot.slane %v2071_v12, 5  ;;  %v2626_v25 = vrot.slane %v2091_v15, 5  ;;  %v716_v27 = vrot.slane %v711_v8, 4  ;;  %v684_v28 = vshrl.u32 %v469_v11, 16  ;;  %v11224_v18 = vld [vmem:[#allocation2 + $0x10] sm:$0xf] }
  0xc3   : > { %v2372_v29 = vrot.slane %v2370_v20, 5  ;;  %v2376_v17 = vrot.slane %v2374_v21, 4  ;;  %v2382_v30 = vrot.slane %v2380_v22, 5  ;;  %v715_v34 = vsel %vm10770_vm1, %v707_v46, %v714_v26  ;;  %v895_v60 = vld [vmem:[#allocation2 + $0xa8] sm:$0xf] }
  0xc4   : > { %v11218_v32 = vsel %vm10737_vm10, %v9283_v36, %v2623_v24  ;;  %v2625_v33 = vrot.slane %v2623_v24, 4  ;;  %v899_v56 = vld [vmem:[#allocation2 + $0xb0] sm:$0x1]  ;;  %v11222_v61 = vrot.slane %v684_v28, 7  ;;  %v11226_v57 = vld [vmem:[#allocation2 + $0xc] sm:$0xf]  ;;  %v896_v40 = vsel %vm10754_vm14, %v706_v19, %v895_v60 }
  0xc5   : > { %v2373_v39 = vsel %vm10762_vm15, %v11203_v7, %v2372_v29  ;;  %v2377_v36 = vor.u32 %v2376_v17, %v2372_v29  ;;  %898 = vst.msk [vmem:[#allocation2 + $0xac] sm:$0xf] %vm799_vm9, %v715_v34  ;;  %v900_v47 = vsel %vm10777_vm6, %v716_v27, %v899_v56  ;;  %v11239_v43 = vld [vmem:[%s10744_s14 + $0x64] sm:$0xf]  ;;  %897 = vst [vmem:[#allocation2 + $0xa8] sm:$0xf] %v896_v40 }
  0xc6   : > { %v2068_v37 = vld [vmem:[#allocation2 + $0x84] sm:$0xf]  ;;  %v2627_v53 = vsel %vm10737_vm10, %v2625_v33, %v2626_v25  ;;  %901 = vst [vmem:[#allocation2 + $0xb0] sm:$0x1] %v900_v47  ;;  %v687_v54 = vshll.u32 %v469_v11, 16  ;;  %v690_v55 = vrot.slane %v11222_v61, 4 }
  0xc7   : > { %v2490_v48 = vld [vmem:[#allocation2 + $0x84] sm:$0xe]  ;;  %v11244_v4 = vld [vmem:[#allocation2 + $0x28] sm:$0xf]  ;;  %v2378_v35 = vrot.slane %v2377_v36, 4  ;;  %v2337_v59 = vshrl.u32 %v2068_v37, 16  ;;  %v9331_v62 = vcombine.low %v11218_v32, %v2627_v53 }
  0xc8   : > { %v11246_v41 = vld [vmem:[#allocation2 + $0x24] sm:$0xf]  ;;  %v2340_v42 = vshll.u32 %v2068_v37, 16  ;;  %v2069_v63 = vld [vmem:[#allocation2 + $0x88] sm:$0xf]  ;;  %v9282_v3 = vrot.slane %v2490_v48, 9  ;;  %v689_v5 = vor.u32 %v687_v54, %v11222_v61 }
  0xc9   : > { %v2090_v0 = vld [vmem:[#allocation2 + $0x8c] sm:$0x1]  ;;  %v692_v13 = vshrl.u32 %v11239_v43, 16  ;;  %v11253_v6 = vld [vmem:[#allocation2 + $0x1c] sm:$0xf]  ;;  %v2383_v9 = vsel %vm10762_vm15, %v2378_v35, %v2382_v30  ;;  %v2339_v10 = vrot.slane %v2337_v59, 4 }
  0xca   : > { %v11255_v7 = vld [vmem:[#allocation2 + $0x18] sm:$0xf]  ;;  %v2342_v11 = vrot.slane %v2340_v42, 5  ;;  %v2346_v12 = vshll.u32 %v2069_v63, 16  ;;  %v9315_v15 = vcombine.low %v2373_v39, %v2383_v9  ;;  %v2350_v44 = vshrl.u32 %v2069_v63, 16 }
  0xcb   : > { %v2356_v16 = vshll.u32 %v2090_v0, 16  ;;  %v2616_v19 = vrot.slane %v2069_v63, 5  ;;  %v888_v46 = vld [vmem:[#allocation2 + $0x9c] sm:$0xf]  ;;  %v2619_v22 = vrot.slane %v2090_v0, 5  ;;  %v694_v24 = vrot.slane %v692_v13, 7 }
  0xcc   : > { %v2343_v20 = vor.u32 %v2342_v11, %v2339_v10  ;;  %v2348_v21 = vrot.slane %v2346_v12, 5  ;;  %2790 = vrot.lane.b32.xlu1 %v9315_v15, %s10648_s16  ;;  %v2352_v25 = vrot.slane %v2350_v44, 4  ;;  %v2075_v29 = vld [vmem:[#allocation2 + $0xac] sm:$0xf]  ;;  %v2074_v30 = vld [vmem:[#allocation2 + $0xa8] sm:$0xf]  ;;  %v889_v34 = vsel %vm10754_vm14, %v689_v5, %v888_v46 }
  0xcd   : > { %v2358_v26 = vrot.slane %v2356_v16, 5  ;;  %v11264_v27 = vsel %vm10737_vm10, %v9282_v3, %v2616_v19  ;;  %v2618_v28 = vrot.slane %v2616_v19, 4  ;;  %v2093_v32 = vld [vmem:[#allocation2 + $0xb0] sm:$0x1]  ;;  %v2418_v33 = vshll.u32 %v2075_v29, 16 }
  0xce   : > { %v2344_v17 = vrot.slane %v2343_v20, 4  ;;  %v11268_v60 = vld [vmem:[#allocation2 + $0x40] sm:$0xf]  ;;  %v11270_v56 = vld [vmem:[#allocation2 + $0x3c] sm:$0xf]  ;;  %v2353_v36 = vor.u32 %v2352_v25, %v2348_v21  ;;  %v2409_v47 = vshrl.u32 %v2074_v30, 16 }
  0xcf   : > { %v11276_v40 = vsel %vm10737_vm10, %v2618_v28, %v2619_v22  ;;  %v2412_v37 = vshll.u32 %v2074_v30, 16  ;;  %890 = vst [vmem:[#allocation2 + $0x9c] sm:$0xf] %v889_v34  ;;  %v2493_v53 = vld [vmem:[#allocation2 + $0xa8] sm:$0xe]  ;;  %v2420_v35 = vrot.slane %v2418_v33, 5 }
  0xd0   : > { %v2349_v48 = vsel %vm10762_vm15, %v2344_v17, %v2348_v21  ;;  %v9330_v54 = vcombine.low %v11264_v27, %v11276_v40  ;;  %v2422_v59 = vshrl.u32 %v2075_v29, 16  ;;  %v2354_v42 = vrot.slane %v2353_v36, 4  ;;  %2870 = vrot.lane.b32.xlu1 %v9331_v62, %s10647_s15  ;;  %v892_v5 = vld [vmem:[#allocation2 + $0xa4] sm:$0x1]  ;;  %v392_v19 = vld [vmem:[#allocation2 + $0xc0] sm:$0x1] }
  0xd1   : > { %v2411_v63 = vrot.slane %v2409_v47, 4  ;;  %v2414_v0 = vrot.slane %v2412_v37, 5  ;;  %v2428_v3 = vshll.u32 %v2093_v32, 16  ;;  %v695_v9 = vshll.u32 %v11239_v43, 16  ;;  %v442_v22 = vld [vmem:[#allocation2 + $0xc8] sm:$0x1] }
  0xd2   : > { %v2424_v13 = vrot.slane %v2422_v59, 4  ;;  %v699_v10 = vrot.slane %v694_v24, 4  ;;  %v9285_v11 = vrot.slane %v2493_v53, 9  ;;  %v2359_v12 = vsel %vm10762_vm15, %v2354_v42, %v2358_v26  ;;  %v475_v26 = vld [vmem:[%s10744_s14 + $0x78] sm:$0xf] }
  0xd3   : > { %v2415_v15 = vor.u32 %v2414_v0, %v2411_v63  ;;  %v2430_v44 = vrot.slane %v2428_v3, 5  ;;  %v2637_v16 = vrot.slane %v2075_v29, 5  ;;  %v9314_v46 = vcombine.low %v2349_v48, %v2359_v12  ;;  %v11302_v34 = vld [vmem:[#allocation2 + $0x34] sm:$0xf]  ;;  %v476_v37 = vld [vmem:[%s10744_s14 + $0x7c] sm:$0xf] }
  0xd4   : > { %v2425_v20 = vor.u32 %v2424_v13, %v2420_v35  ;;  %v697_v62 = vor.u32 %v695_v9, %v694_v24  ;;  %v893_v21 = vsel %vm10777_vm6, %v699_v10, %v892_v5  ;;  %v2640_v28 = vrot.slane %v2093_v32, 5  ;;  %v11304_v32 = vld [vmem:[#allocation2 + $0x30] sm:$0xf]  ;;  %v389_v53 = vld [vmem:[#allocation2 + $0xb4] sm:$0x1] }
  0xd5   : > { %v2416_v25 = vrot.slane %v2415_v15, 4  ;;  %894 = vst [vmem:[#allocation2 + $0xa4] sm:$0x1] %v893_v21  ;;  %v11290_v43 = vsel %vm10737_vm10, %v9285_v11, %v2637_v16  ;;  %v2639_v27 = vrot.slane %v2637_v16, 4  ;;  %2788 = vrot.lane.b32.xlu0 %v9314_v46, %s10648_s16  ;;  %v393_v33 = vsel %vm10711_vm3, 0, %v392_v19 }
  0xd6   : > { %v2426_v29 = vrot.slane %v2425_v20, 4  ;;  %v698_v24 = vsel %vm10770_vm1, %v690_v55, %v697_v62  ;;  %v2072_v17 = vld [vmem:[#allocation2 + $0x9c] sm:$0xf]  ;;  %394 = vst [vmem:[#allocation2 + $0xc0] sm:$0x1] %v393_v33  ;;  %v735_v9 = vshrl.u32 %v475_v26, 16 }
  0xd7   : > { %v11298_v30 = vld [vmem:[#allocation2 + $0x9c] sm:$0xe]  ;;  %v2421_v61 = vsel %vm10762_vm15, %v2416_v25, %v2420_v35  ;;  %891 = vst.msk [vmem:[#allocation2 + $0xa0] sm:$0xf] %vm799_vm9, %v698_v24  ;;  %v2385_v55 = vshrl.u32 %v2072_v17, 16  ;;  %v2388_v40 = vshll.u32 %v2072_v17, 16  ;;  %v2641_v47 = vsel %vm10737_vm10, %v2639_v27, %v2640_v28 }
  0xd8   : > { %v2431_v48 = vsel %vm10762_vm15, %v2426_v29, %v2430_v44  ;;  %v9333_v59 = vcombine.low %v11290_v43, %v2641_v47  ;;  %v9284_v42 = vrot.slane %v11298_v30, 9  ;;  %v443_v35 = vsel %vm10718_vm5, 0, %v442_v22  ;;  %v439_v63 = vld [vmem:[#allocation2 + $0xbc] sm:$0x1]  ;;  %v473_v0 = vld [vmem:[%s10744_s14 + $0x70] sm:$0xf] }
  0xd9   : > { %v9317_v3 = vcombine.low %v2421_v61, %v2431_v48  ;;  %v2387_v5 = vrot.slane %v2385_v55, 4  ;;  %v2390_v13 = vrot.slane %v2388_v40, 5  ;;  %444 = vst [vmem:[#allocation2 + $0xc8] sm:$0x1] %v443_v35  ;;  %v474_v10 = vld [vmem:[%s10744_s14 + $0x74] sm:$0xf]  ;;  %2868 = vrot.lane.b32.xlu0 %v9330_v54, %s10647_s15 }
  0xda   : > { %v738_v11 = vshll.u32 %v475_v26, 16  ;;  %v743_v12 = vshrl.u32 %v476_v37, 16  ;;  %v746_v15 = vshll.u32 %v476_v37, 16  ;;  %v390_v44 = vsel %vm10711_vm3, 0, %v389_v53  ;;  %v11330_v61 = vld [vmem:[#allocation2 + $0x58] sm:$0xf] }
  0xdb   : > { %2794 = vrot.lane.b32.xlu1 %v9317_v3, %s10648_s16  ;;  %v2391_v16 = vor.u32 %v2390_v13, %v2387_v5  ;;  %v737_v19 = vrot.slane %v735_v9, 7  ;;  %391 = vst [vmem:[#allocation2 + $0xb4] sm:$0x1] %v390_v44  ;;  %v440_v46 = vsel %vm10718_vm5, 0, %v439_v63  ;;  %v718_v20 = vshrl.u32 %v473_v0, 16 }
  0xdc   : > { %v2092_v62 = vld [vmem:[#allocation2 + $0xa4] sm:$0x1]  ;;  %v745_v21 = vrot.slane %v743_v12, 7  ;;  %441 = vst [vmem:[#allocation2 + $0xbc] sm:$0x1] %v440_v46  ;;  %v721_v22 = vshll.u32 %v473_v0, 16 }
  0xdd   : > { %v726_v54 = vshrl.u32 %v474_v10, 16  ;;  %v729_v25 = vshll.u32 %v474_v10, 16  ;;  %v11328_v43 = vrot.slane %v2391_v16, 4  ;;  %v2404_v27 = vshll.u32 %v2092_v62, 16  ;;  %v909_v33 = vld [vmem:[#allocation2 + $0xc0] sm:$0xf] }
  0xde   : > { %v2633_v28 = vrot.slane %v2092_v62, 5  ;;  %v740_v26 = vor.u32 %v738_v11, %v737_v19  ;;  %v2073_v29 = vld [vmem:[#allocation2 + $0xa0] sm:$0xf]  ;;  %v741_v24 = vrot.slane %v737_v19, 4  ;;  %v748_v17 = vor.u32 %v746_v15, %v745_v21  ;;  %v3199_v5 = vld [vmem:[#allocation2 + $0x24] sm:$0xf] }
  0xdf   : > { %v750_v30 = vrot.slane %v745_v21, 4  ;;  %v2394_v40 = vshll.u32 %v2073_v29, 16  ;;  %v2398_v47 = vshrl.u32 %v2073_v29, 16  ;;  %v2406_v37 = vrot.slane %v2404_v27, 5  ;;  %2874 = vrot.lane.b32.xlu1 %v9333_v59, %s10647_s15  ;;  %v11346_v59 = vld [vmem:[#allocation2 + $0x28] sm:$0xf] }
  0xe0   : > { %v2630_v53 = vrot.slane %v2073_v29, 5  ;;  %v749_v48 = vsel %vm10770_vm1, %v741_v24, %v748_v17  ;;  %v910_v35 = vsel %vm10754_vm14, %v740_v26, %v909_v33  ;;  %v913_v63 = vld [vmem:[#allocation2 + $0xc8] sm:$0x1]  ;;  %v720_v0 = vrot.slane %v718_v20, 7  ;;  %v11350_v46 = vld [vmem:[#allocation2 + $0x2c] sm:$0x1]  ;;  %v11352_v20 = vpop.permute.xlu1 %1722 }
  0xe1   : > { %v728_v3 = vrot.slane %v726_v54, 7  ;;  %v2396_v13 = vrot.slane %v2394_v40, 5  ;;  %v2400_v9 = vrot.slane %v2398_v47, 4  ;;  %911 = vst [vmem:[#allocation2 + $0xc0] sm:$0xf] %v910_v35  ;;  %v914_v12 = vsel %vm10777_vm6, %v750_v30, %v913_v63  ;;  %v11385_v63 = vpop.permute.xlu0 %1642 }
  0xe2   : > { %v11343_v10 = vsel %vm10737_vm10, %v9284_v42, %v2630_v53  ;;  %v2632_v11 = vrot.slane %v2630_v53, 4  ;;  %912 = vst.msk [vmem:[#allocation2 + $0xc4] sm:$0xf] %vm799_vm9, %v749_v48  ;;  %v723_v15 = vor.u32 %v721_v22, %v720_v0  ;;  %v724_v44 = vrot.slane %v720_v0, 4  ;;  %v902_v19 = vld [vmem:[#allocation2 + $0xb4] sm:$0xf] }
  0xe3   : > { %v731_v16 = vor.u32 %v729_v25, %v728_v3  ;;  %v2397_v42 = vsel %vm10762_vm15, %v11328_v43, %v2396_v13  ;;  %v2401_v62 = vor.u32 %v2400_v9, %v2396_v13  ;;  %915 = vst [vmem:[#allocation2 + $0xc8] sm:$0x1] %v914_v12  ;;  %v733_v54 = vrot.slane %v728_v3, 4  ;;  %v906_v27 = vld [vmem:[#allocation2 + $0xbc] sm:$0x1] }
  0xe4   : > { %v11359_v21 = vsel %vm10737_vm10, %v2632_v11, %v2633_v28  ;;  %v11361_v22 = vld [vmem:[#allocation2 + $0x18] sm:$0xf]  ;;  %v903_v29 = vsel %vm10754_vm14, %v723_v15, %v902_v19  ;;  %v3270_v43 = vshrl.u32 %v3199_v5, 16  ;;  %v3273_v17 = vshll.u32 %v3199_v5, 16  ;;  %v11387_v9 = vpop.permute.xlu1 %1724  ;;  %v11391_v11 = vld [vmem:[#allocation2 + $0x48] sm:$0xf] }
  0xe5   : > { %v9332_v25 = vcombine.low %v11343_v10, %v11359_v21  ;;  %v732_v26 = vsel %vm10770_vm1, %v724_v44, %v731_v16  ;;  %v2402_v24 = vrot.slane %v2401_v62, 4  ;;  %904 = vst [vmem:[#allocation2 + $0xb4] sm:$0xf] %v903_v29  ;;  %v907_v28 = vsel %vm10777_vm6, %v733_v54, %v906_v27  ;;  %v11389_v10 = vld [vmem:[#allocation2 + $0x4c] sm:$0xf] }
  0xe6   : > { %905 = vst.msk [vmem:[#allocation2 + $0xb8] sm:$0xf] %vm799_vm9, %v732_v26  ;;  %v3279_v30 = vshll.u32 %v11346_v59, 16  ;;  %908 = vst [vmem:[#allocation2 + $0xbc] sm:$0x1] %v907_v28  ;;  %v11373_v33 = vrot.slane %v3270_v43, 4 }
  0xe7   : > { %v3283_v40 = vshrl.u32 %v11346_v59, 16  ;;  %v2407_v53 = vsel %vm10762_vm15, %v2402_v24, %v2406_v37  ;;  %v11380_v48 = vrot.slane %v3273_v17, 5  ;;  %v11395_v12 = vld [vmem:[#allocation2 + $0x18] sm:$0xf]  ;;  %v11397_v15 = vld [vmem:[#allocation2 + $0x1c] sm:$0xf] }
  0xe8   : > { %v11382_v35 = vrot.slane %v3279_v30, 5  ;;  %v9316_v0 = vcombine.low %v2397_v42, %v2407_v53  ;;  %v2078_v3 = vld [vmem:[#allocation2 + $0xc0] sm:$0xf]  ;;  %v11401_v16 = vld [vmem:[#allocation2 + $0xc] sm:$0xf]  ;;  %vm14828_vm2 = vcmask 31744  }
  0xe9   : > { %v2079_v5 = vld [vmem:[#allocation2 + $0xc4] sm:$0xf]  ;;  %v2495_v13 = vld [vmem:[#allocation2 + $0xc0] sm:$0xe]  ;;  %v11403_v19 = vld [vmem:[#allocation2 + $0x10] sm:$0xf]  ;;  %v3276_v24 = vor.u32 %v11380_v48, %v11373_v33  ;;  %v11413_v33 = vpop.permute.xlu0 %1726 }
  0xea   : > { %v2457_v62 = vshrl.u32 %v2078_v3, 16  ;;  %v2460_v21 = vshll.u32 %v2078_v3, 16  ;;  %v2466_v54 = vshll.u32 %v2079_v5, 16  ;;  %v2470_v27 = vshrl.u32 %v2079_v5, 16  ;;  %2792 = vrot.lane.b32.xlu0 %v9316_v0, %s10648_s16  ;;  %v2095_v26 = vld [vmem:[#allocation2 + $0xc8] sm:$0x1] }
  0xeb   : > { %v9287_v29 = vrot.slane %v2495_v13, 9  ;;  %v2651_v43 = vrot.slane %v2079_v5, 5  ;;  %v3285_v28 = vrot.slane %v3283_v40, 4  ;;  %v2476_v37 = vshll.u32 %v2095_v26, 16 }
  0xec   : > { %v2459_v17 = vrot.slane %v2457_v62, 4  ;;  %v2462_v30 = vrot.slane %v2460_v21, 5  ;;  %v2468_v53 = vrot.slane %v2466_v54, 5  ;;  %v2472_v44 = vrot.slane %v2470_v27, 4  ;;  %v2076_v55 = vld [vmem:[#allocation2 + $0xb4] sm:$0xf]  ;;  %v11416_v27 = vpop.permute.xlu1 %1728 }
  0xed   : > { %v2077_v42 = vld [vmem:[#allocation2 + $0xb8] sm:$0xf]  ;;  %v2652_v3 = vsel %vm10737_vm10, %v9287_v29, %v2651_v43  ;;  %v2653_v36 = vrot.slane %v2651_v43, 4  ;;  %v3286_v0 = vor.u32 %v3285_v28, %v11382_v35  ;;  %v2094_v5 = vld [vmem:[#allocation2 + $0xbc] sm:$0x1]  ;;  %v2433_v8 = vshrl.u32 %v2076_v55, 16 }
  0xee   : > { %v2463_v39 = vor.u32 %v2462_v30, %v2459_v17  ;;  %v2473_v13 = vor.u32 %v2472_v44, %v2468_v53  ;;  %v2436_v23 = vshll.u32 %v2076_v55, 16  ;;  %2872 = vrot.lane.b32.xlu0 %v9332_v25, %s10647_s15  ;;  %v2478_v40 = vrot.slane %v2476_v37, 5  ;;  %v2494_v54 = vld [vmem:[#allocation2 + $0xb4] sm:$0xe] }
  0xef   : > { %v2442_v48 = vshll.u32 %v2077_v42, 16  ;;  %v2446_v62 = vshrl.u32 %v2077_v42, 16  ;;  %v2452_v21 = vshll.u32 %v2094_v5, 16  ;;  %v2435_v31 = vrot.slane %v2433_v8, 4 }
  0xf0   : > { %v2464_v29 = vrot.slane %v2463_v39, 4  ;;  %v2474_v43 = vrot.slane %v2473_v13, 4  ;;  %v2438_v28 = vrot.slane %v2436_v23, 5  ;;  %v2654_v52 = vrot.slane %v2095_v26, 5  ;;  %v11424_v26 = vpop.permute.xlu0 %1730 }
  0xf1   : > { %v2444_v17 = vrot.slane %v2442_v48, 5  ;;  %v2448_v44 = vrot.slane %v2446_v62, 4  ;;  %v2454_v30 = vrot.slane %v2452_v21, 5  ;;  %v9286_v58 = vrot.slane %v2494_v54, 9  ;;  %v3198_v21 = vld [vmem:[#allocation2 + $0x1c] sm:$0xf] }
  0xf2   : > { %v2469_v55 = vsel %vm10762_vm15, %v2464_v29, %v2468_v53  ;;  %v2479_v25 = vsel %vm10762_vm15, %v2474_v43, %v2478_v40  ;;  %v2439_v37 = vor.u32 %v2438_v28, %v2435_v31  ;;  %v2655_v39 = vsel %vm10737_vm10, %v2653_v36, %v2654_v52  ;;  %v11429_v29 = vpop.permute.xlu1 %1732 }
  0xf3   : > { %v9319_v38 = vcombine.low %v2469_v55, %v2479_v25  ;;  %v2449_v47 = vor.u32 %v2448_v44, %v2444_v17  ;;  %v2644_v13 = vrot.slane %v2077_v42, 5  ;;  %v9335_v23 = vcombine.low %v2652_v3, %v2655_v39  ;;  %14876 = vst [vmem:[#allocation7_spill] sm:$0xff] %v11429_v29  ;;  %v3229_v3 = vld [vmem:[#allocation2 + $0x20] sm:$0x1] }
  0xf4   : > { %v2440_v8 = vrot.slane %v2439_v37, 4  ;;  %v2647_v48 = vrot.slane %v2094_v5, 5  ;;  %v3277_v62 = vrot.slane %v3276_v24, 4  ;;  %v3287_v54 = vrot.slane %v3286_v0, 4  ;;  %v3629_v37 = vld [vmem:[#allocation2 + $0x18] sm:$0xe] }
  0xf5   : > { %2798 = vrot.lane.b32.xlu1 %v9319_v38, %s10648_s16  ;;  %v2450_v53 = vrot.slane %v2449_v47, 4  ;;  %v2645_v31 = vsel %vm10737_vm10, %v9286_v58, %v2644_v13  ;;  %v2646_v40 = vrot.slane %v2644_v13, 4  ;;  %v14877_v42 = vshll.u32 %v11350_v46, 16 }
  0xf6   : > { %v2445_v52 = vsel %vm10762_vm15, %v2440_v8, %v2444_v17  ;;  %v3282_v36 = vsel %vm10762_vm15, %v3277_v62, %v11382_v35  ;;  %v14878_v47 = vshrl.u32 %v11361_v22, 16  ;;  %v14879_v5 = vshll.u32 %v11361_v22, 16  ;;  %v3630_v17 = vld [vmem:[#allocation2 + $0x24] sm:$0xe] }
  0xf7   : > { %v3291_v24 = vrot.slane %v14877_v42, 5  ;;  %v2455_v58 = vsel %vm10762_vm15, %v2450_v53, %v2454_v30  ;;  %v2648_v0 = vsel %vm10737_vm10, %v2646_v40, %v2647_v48  ;;  %v3255_v28 = vshll.u32 %v3198_v21, 16  ;;  %v11452_v40 = vpop.permute.xlu0 %1734 }
  0xf8   : > { %v3248_v38 = vrot.slane %v14878_v47, 4  ;;  %v3251_v43 = vrot.slane %v14879_v5, 5  ;;  %v9318_v44 = vcombine.low %v2445_v52, %v2455_v58  ;;  %v9334_v35 = vcombine.low %v2645_v31, %v2648_v0  ;;  %v3203_v31 = vld [vmem:[#allocation2 + $0x3c] sm:$0xf]  ;;  %14880 = vst [vmem:[#allocation8_spill] sm:$0xff] %v11452_v40 }
  0xf9   : > { %v3292_v55 = vsel %vm10762_vm15, %v3287_v54, %v3291_v24  ;;  %v3259_v25 = vshrl.u32 %v3198_v21, 16  ;;  %2878 = vrot.lane.b32.xlu1 %v9335_v23, %s10647_s15  ;;  %v3257_v30 = vrot.slane %v3255_v28, 5  ;;  %v3265_v8 = vshll.u32 %v3229_v3, 16  ;;  %v11454_v23 = vld [vmem:[#allocation2 + $0x40] sm:$0xf] }
  0xfa   : > { %v9388_v39 = vcombine.low %v3282_v36, %v3292_v55  ;;  %v3252_v13 = vor.u32 %v3251_v43, %v3248_v38  ;;  %2796 = vrot.lane.b32.xlu0 %v9318_v44, %s10648_s16  ;;  %v9356_v22 = vrot.slane %v3630_v17, 9  ;;  %v3702_v62 = vrot.slane %v11346_v59, 5  ;;  %v11456_v36 = vpop.permute.xlu1 %1736  ;;  %v3201_v43 = vld [vmem:[#allocation2 + $0x30] sm:$0xf]  ;;  %v3232_v44 = vld [vmem:[#allocation2 + $0x44] sm:$0x1] }
  0xfb   : > { %v3261_v48 = vrot.slane %v3259_v25, 4  ;;  %v3705_v53 = vrot.slane %v11350_v46, 5  ;;  %v3267_v52 = vrot.slane %v3265_v8, 5  ;;  %v9355_v42 = vrot.slane %v3629_v37, 9  ;;  %14881 = vst [vmem:[#allocation9_spill] sm:$0xff] %v11456_v36 }
  0xfc   : > { %v3253_v54 = vrot.slane %v3252_v13, 4  ;;  %v3695_v24 = vrot.slane %v3198_v21, 5  ;;  %v3703_v38 = vsel %vm10737_vm10, %v9356_v22, %v3702_v62  ;;  %v3704_v58 = vrot.slane %v3702_v62, 4  ;;  %v11474_v62 = vld [vmem:[#allocation2 + $0x38] sm:$0x1] }
  0xfd   : > { %v3262_v47 = vor.u32 %v3261_v48, %v3257_v30  ;;  %v3698_v0 = vrot.slane %v3229_v3, 5  ;;  %3919 = vrot.lane.b32.xlu1 %v9388_v39, %s10648_s16  ;;  %v3318_v21 = vshrl.u32 %v3203_v31, 16  ;;  %v3321_v55 = vshll.u32 %v3203_v31, 16 }
  0xfe   : > { %v3258_v59 = vsel %vm10762_vm15, %v3253_v54, %v3257_v30  ;;  %v3696_v46 = vsel %vm10737_vm10, %v9355_v42, %v3695_v24  ;;  %v3697_v5 = vrot.slane %v3695_v24, 4  ;;  %2876 = vrot.lane.b32.xlu0 %v9334_v35, %s10647_s15  ;;  %v3706_v17 = vsel %vm10737_vm10, %v3704_v58, %v3705_v53  ;;  %v3202_v30 = vld [vmem:[#allocation2 + $0x34] sm:$0xf]  ;;  %v11476_v53 = vpop.permute.xlu0 %1644 }
  0xff   : > { %v3263_v28 = vrot.slane %v3262_v47, 4  ;;  %v3327_v3 = vshll.u32 %v11454_v23, 16  ;;  %v9404_v25 = vcombine.low %v3703_v38, %v3706_v17  ;;  %v3320_v39 = vrot.slane %v3318_v21, 4  ;;  %v11479_v47 = vpop.permute.xlu1 %1648 }
 0x100   : > { %v3699_v37 = vsel %vm10737_vm10, %v3697_v5, %v3698_v0  ;;  %v3331_v13 = vshrl.u32 %v11454_v23, 16  ;;  %v3323_v48 = vrot.slane %v3321_v55, 5  ;;  %v3337_v42 = vshll.u32 %v3232_v44, 16 }
 0x101   : > { %v3268_v8 = vsel %vm10762_vm15, %v3263_v28, %v3267_v52  ;;  %v9403_v35 = vcombine.low %v3696_v46, %v3699_v37  ;;  %v3329_v22 = vrot.slane %v3327_v3, 5  ;;  %3999 = vrot.lane.b32.xlu1 %v9404_v25, %s10647_s15  ;;  %v3294_v24 = vshrl.u32 %v3201_v43, 16  ;;  %v3632_v52 = vld [vmem:[#allocation2 + $0x3c] sm:$0xe]  ;;  %v3631_v37 = vld [vmem:[#allocation2 + $0x30] sm:$0xe] }
 0x102   : > { %v9387_v31 = vcombine.low %v3258_v59, %v3268_v8  ;;  %v3333_v54 = vrot.slane %v3331_v13, 4  ;;  %v3324_v38 = vor.u32 %v3323_v48, %v3320_v39  ;;  %v3297_v58 = vshll.u32 %v3201_v43, 16 }
 0x103   : > { %v3303_v0 = vshll.u32 %v3202_v30, 16  ;;  %v3307_v5 = vshrl.u32 %v3202_v30, 16  ;;  %v3339_v21 = vrot.slane %v3337_v42, 5  ;;  %v3296_v28 = vrot.slane %v3294_v24, 4  ;;  %v3207_v42 = vld [vmem:[#allocation2 + $0x54] sm:$0xf]  ;;  %v11486_v24 = vpop.permute.xlu0 %1646 }
 0x104   : > { %3917 = vrot.lane.b32.xlu0 %v9387_v31, %s10648_s16  ;;  %v3334_v46 = vor.u32 %v3333_v54, %v3329_v22  ;;  %v3313_v17 = vshll.u32 %v11474_v62, 16  ;;  %v3325_v59 = vrot.slane %v3324_v38, 4  ;;  %v3299_v55 = vrot.slane %v3297_v58, 5 }
 0x105   : > { %v3305_v3 = vrot.slane %v3303_v0, 5  ;;  %v3309_v25 = vrot.slane %v3307_v5, 4  ;;  %v9358_v1 = vrot.slane %v3632_v52, 9  ;;  %v3716_v43 = vrot.slane %v11454_v23, 5  ;;  %v11493_v23 = vld [vmem:[#allocation2 + $0x58] sm:$0xf]  ;;  %v11495_v52 = vpop.permute.xlu1 %1652 }
 0x106   : > { %v3335_v13 = vrot.slane %v3334_v46, 4  ;;  %v3315_v8 = vrot.slane %v3313_v17, 5  ;;  %v3330_v39 = vsel %vm10762_vm15, %v3325_v59, %v3329_v22  ;;  %v3300_v48 = vor.u32 %v3299_v55, %v3296_v28  ;;  %v11497_v17 = vld [vmem:[#allocation2 + $0x5c] sm:$0x1] }
 0x107   : > { %v3310_v31 = vor.u32 %v3309_v25, %v3305_v3  ;;  %v3719_v54 = vrot.slane %v3232_v44, 5  ;;  %v3717_v58 = vsel %vm10737_vm10, %v9358_v1, %v3716_v43  ;;  %v3718_v0 = vrot.slane %v3716_v43, 4  ;;  %v3205_v1 = vld [vmem:[#allocation2 + $0x48] sm:$0xf]  ;;  %v3206_v43 = vld [vmem:[#allocation2 + $0x4c] sm:$0xf] }
 0x108   : > { %3997 = vrot.lane.b32.xlu0 %v9403_v35, %s10647_s15  ;;  %v3340_v38 = vsel %vm10762_vm15, %v3335_v13, %v3339_v21  ;;  %v9357_v5 = vrot.slane %v3631_v37, 9  ;;  %v3301_v46 = vrot.slane %v3300_v48, 4  ;;  %v3709_v28 = vrot.slane %v3202_v30, 5 }
 0x109   : > { %v9390_v22 = vcombine.low %v3330_v39, %v3340_v38  ;;  %v3311_v44 = vrot.slane %v3310_v31, 4  ;;  %v3720_v35 = vsel %vm10737_vm10, %v3718_v0, %v3719_v54  ;;  %v3712_v21 = vrot.slane %v11474_v62, 5 }
 0x10a   : > { %v3366_v59 = vshrl.u32 %v3207_v42, 16  ;;  %v3369_v55 = vshll.u32 %v3207_v42, 16  ;;  %v3306_v25 = vsel %vm10762_vm15, %v3301_v46, %v3305_v3  ;;  %v9406_v13 = vcombine.low %v3717_v58, %v3720_v35  ;;  %v11512_v3 = vpop.permute.xlu0 %1650 }
 0x10b   : > { %3923 = vrot.lane.b32.xlu1 %v9390_v22, %s10648_s16  ;;  %v3316_v37 = vsel %vm10762_vm15, %v3311_v44, %v3315_v8  ;;  %v3710_v30 = vsel %vm10737_vm10, %v9357_v5, %v3709_v28  ;;  %v3711_v48 = vrot.slane %v3709_v28, 4  ;;  %v3375_v54 = vshll.u32 %v11493_v23, 16  ;;  %v3233_v5 = vld [vmem:[#allocation2 + $0x50] sm:$0x1]  ;;  %v11517_v44 = vpop.permute.xlu1 %1656 }
 0x10c   : > { %v9389_v39 = vcombine.low %v3306_v25, %v3316_v37  ;;  %v3368_v31 = vrot.slane %v3366_v59, 4  ;;  %v3371_v62 = vrot.slane %v3369_v55, 5  ;;  %v3379_v42 = vshrl.u32 %v11493_v23, 16  ;;  %v3634_v25 = vld [vmem:[#allocation2 + $0x54] sm:$0xe] }
 0x10d   : > { %v3385_v38 = vshll.u32 %v11497_v17, 16  ;;  %v3342_v0 = vshrl.u32 %v3205_v1, 16  ;;  %v3713_v8 = vsel %vm10737_vm10, %v3711_v48, %v3712_v21  ;;  %v3345_v22 = vshll.u32 %v3205_v1, 16  ;;  %v3633_v48 = vld [vmem:[#allocation2 + $0x48] sm:$0xe] }
 0x10e   : > { %3921 = vrot.lane.b32.xlu0 %v9389_v39, %s10648_s16  ;;  %v3372_v58 = vor.u32 %v3371_v62, %v3368_v31  ;;  %v3351_v46 = vshll.u32 %v3206_v43, 16  ;;  %v9405_v28 = vcombine.low %v3710_v30, %v3713_v8  ;;  %v3377_v35 = vrot.slane %v3375_v54, 5  ;;  %v11529_v8 = vpop.permute.xlu0 %1654 }
 0x10f   : > { %4003 = vrot.lane.b32.xlu1 %v9406_v13, %s10647_s15  ;;  %v3381_v59 = vrot.slane %v3379_v42, 4  ;;  %v3387_v55 = vrot.slane %v3385_v38, 5  ;;  %v3344_v51 = vrot.slane %v3342_v0, 4  ;;  %v3347_v36 = vrot.slane %v3345_v22, 5 }
 0x110   : > { %v3373_v37 = vrot.slane %v3372_v58, 4  ;;  %v3353_v39 = vrot.slane %v3351_v46, 5  ;;  %v3355_v29 = vshrl.u32 %v3206_v43, 16  ;;  %v3361_v21 = vshll.u32 %v3233_v5, 16 }
 0x111   : > { %v3382_v40 = vor.u32 %v3381_v59, %v3377_v35  ;;  %v3348_v13 = vor.u32 %v3347_v36, %v3344_v51  ;;  %v14882_v30 = vcombine.low %v11159_v50, %v11157_v49  ;;  %v9360_v62 = vrot.slane %v3634_v25, 9  ;;  %v11532_v51 = vpop.permute.xlu1 %2770 }
 0x112   : > { %4001 = vrot.lane.b32.xlu0 %v9405_v28, %s10647_s15  ;;  %v3378_v1 = vsel %vm10762_vm15, %v3373_v37, %v3377_v35  ;;  %v3357_v42 = vrot.slane %v3355_v29, 4  ;;  %v3363_v38 = vrot.slane %v3361_v21, 5  ;;  %v3730_v0 = vrot.slane %v11493_v23, 5 }
 0x113   : > { %v1757_v31 = vsel %vm14828_vm2, %v14882_v30, %v11385_v63  ;;  %v3383_v54 = vrot.slane %v3382_v40, 4  ;;  %v3349_v58 = vrot.slane %v3348_v13, 4  ;;  %v3733_v22 = vrot.slane %v11497_v17, 5  ;;  %v3211_v40 = vld [vmem:[#allocation2 + $0x6c] sm:$0xf] }
 0x114   : > { %v9359_v46 = vrot.slane %v3633_v48, 9  ;;  %v3723_v28 = vrot.slane %v3206_v43, 5  ;;  %v3358_v50 = vor.u32 %v3357_v42, %v3353_v39  ;;  %v3731_v63 = vsel %vm10737_vm10, %v9360_v62, %v3730_v0  ;;  %v3212_v43 = vld [vmem:[#allocation2 + $0x70] sm:$0xf]  ;;  %v3236_v48 = vld [vmem:[#allocation2 + $0x74] sm:$0x1]  ;;  %v11552_v42 = vpop.permute.xlu0 %2768 }
 0x115   : > { %v3388_v49 = vsel %vm10762_vm15, %v3383_v54, %v3387_v55  ;;  %v3732_v29 = vrot.slane %v3730_v0, 4  ;;  %v3354_v23 = vsel %vm10762_vm15, %v3349_v58, %v3353_v39  ;;  %v3726_v55 = vrot.slane %v3233_v5, 5  ;;  %v3210_v54 = vld [vmem:[#allocation2 + $0x64] sm:$0xf] }
 0x116   : > { %v9392_v36 = vcombine.low %v3378_v1, %v3388_v49  ;;  %v3724_v17 = vsel %vm10737_vm10, %v9359_v46, %v3723_v28  ;;  %v3725_v35 = vrot.slane %v3723_v28, 4  ;;  %v3359_v59 = vrot.slane %v3358_v50, 4  ;;  %v3209_v1 = vld [vmem:[#allocation2 + $0x60] sm:$0xf]  ;;  %v11556_v46 = vpop.permute.xlu1 %2850 }
 0x117   : > { %v3734_v25 = vsel %vm10737_vm10, %v3732_v29, %v3733_v22  ;;  %vm14829_vm5 = vcmask 64512   ;;  %vm1850_vm7 = vcmask 97280   ;;  %v3414_v39 = vshrl.u32 %v3211_v40, 16  ;;  %v11554_v22 = vld [vmem:[#allocation2 + $0x68] sm:$0x1]  ;;  %14883 = vst [vmem:[#allocation10_spill] sm:$0xff] %v11556_v46 }
 0x118   : > { %3927 = vrot.lane.b32.xlu1 %v9392_v36, %s10648_s16  ;;  %v9408_v37 = vcombine.low %v3731_v63, %v3734_v25  ;;  %v1805_v21 = vsel %vm14829_vm5, %v1757_v31, %v11352_v20  ;;  %v3364_v13 = vsel %vm10762_vm15, %v3359_v59, %v3363_v38  ;;  %v3727_v30 = vsel %vm10737_vm10, %v3725_v35, %v3726_v55 }
 0x119   : > { %9916 = vmatprep.mubr.msk.bf16.mxu0 %vm1850_vm7, %v1805_v21  ;;  %v3417_v5 = vshll.u32 %v3211_v40, 16  ;;  %v3423_v62 = vshll.u32 %v3212_v43, 16  ;;  %v9391_v0 = vcombine.low %v3354_v23, %v3364_v13  ;;  %v9407_v58 = vcombine.low %v3724_v17, %v3727_v30  ;;  %v3636_v23 = vld [vmem:[#allocation2 + $0x6c] sm:$0xe]  ;;  %v3635_v30 = vld [vmem:[#allocation2 + $0x60] sm:$0xe] }
 0x11a   : > { %v3416_v20 = vrot.slane %v3414_v39, 4  ;;  %v3427_v31 = vshrl.u32 %v3212_v43, 16  ;;  %v3433_v49 = vshll.u32 %v3236_v48, 16  ;;  %v3390_v50 = vshrl.u32 %v3209_v1, 16 }
 0x11b   : > { %v3419_v28 = vrot.slane %v3417_v5, 5  ;;  %v3425_v38 = vrot.slane %v3423_v62, 5  ;;  %3925 = vrot.lane.b32.xlu0 %v9391_v0, %s10648_s16  ;;  %v3393_v29 = vshll.u32 %v3209_v1, 16  ;;  %v3399_v40 = vshll.u32 %v3210_v54, 16 }
 0x11c   : > { %4007 = vrot.lane.b32.xlu1 %v9408_v37, %s10647_s15  ;;  %v3429_v63 = vrot.slane %v3427_v31, 4  ;;  %v3403_v36 = vshrl.u32 %v3210_v54, 16  ;;  %v3435_v35 = vrot.slane %v3433_v49, 5  ;;  %v3392_v59 = vrot.slane %v3390_v50, 4  ;;  %v11561_v37 = vpop.permute.xlu0 %2848  ;;  %v934_v49 = vld [vmem:[#allocation2 + $0x6c] sm:$0xf]  ;;  %v11564_v50 = vpop.permute.xlu1 %2774 }
 0x11d   : > { %v3420_v17 = vor.u32 %v3419_v28, %v3416_v20  ;;  %v3409_v25 = vshll.u32 %v11554_v22, 16  ;;  %v3395_v21 = vrot.slane %v3393_v29, 5  ;;  %v3401_v39 = vrot.slane %v3399_v40, 5 }
 0x11e   : > { %v3430_v55 = vor.u32 %v3429_v63, %v3425_v38  ;;  %v3405_v13 = vrot.slane %v3403_v36, 4  ;;  %v9362_v0 = vrot.slane %v3636_v23, 9  ;;  %v3744_v46 = vrot.slane %v3212_v43, 5 }
 0x11f   : > { %v3421_v5 = vrot.slane %v3420_v17, 4  ;;  %v3411_v62 = vrot.slane %v3409_v25, 5  ;;  %4005 = vrot.lane.b32.xlu0 %v9407_v58, %s10647_s15  ;;  %v3396_v31 = vor.u32 %v3395_v21, %v3392_v59  ;;  %v3747_v28 = vrot.slane %v3236_v48, 5  ;;  %v932_v59 = vld [vmem:[#allocation2 + $0x60] sm:$0xf] }
 0x120   : > { %v3431_v1 = vrot.slane %v3430_v55, 4  ;;  %v3406_v20 = vor.u32 %v3405_v13, %v3401_v39  ;;  %v3745_v29 = vsel %vm10737_vm10, %v9362_v0, %v3744_v46  ;;  %v3746_v40 = vrot.slane %v3744_v46, 4  ;;  %v11575_v21 = vld [vmem:[#allocation2 + $0x70] sm:$0xf] }
 0x121   : > { %v3426_v63 = vsel %vm10762_vm15, %v3421_v5, %v3425_v38  ;;  %v9361_v36 = vrot.slane %v3635_v30, 9  ;;  %v3397_v23 = vrot.slane %v3396_v31, 4  ;;  %v3737_v17 = vrot.slane %v3210_v54, 5  ;;  %v11577_v38 = vld [vmem:[#allocation2 + $0x74] sm:$0x1] }
 0x122   : > { %v3436_v43 = vsel %vm10762_vm15, %v3431_v1, %v3435_v35  ;;  %v3407_v58 = vrot.slane %v3406_v20, 4  ;;  %v3748_v48 = vsel %vm10737_vm10, %v3746_v40, %v3747_v28  ;;  %v3740_v55 = vrot.slane %v11554_v22, 5  ;;  %v11585_v5 = vld [vmem:[#allocation2 + $0x64] sm:$0xf]  ;;  %v11588_v20 = vpop.permute.xlu0 %2772  ;;  %v11595_v40 = vpop.permute.xlu1 %2854 }
 0x123   : > { %v9394_v25 = vcombine.low %v3426_v63, %v3436_v43  ;;  %v1184_v13 = vshrl.u32 %v934_v49, 16  ;;  %v3402_v46 = vsel %vm10762_vm15, %v3397_v23, %v3401_v39  ;;  %v9410_v30 = vcombine.low %v3745_v29, %v3748_v48  ;;  %14884 = vst [vmem:[#allocation11_spill] sm:$0xff] %v11588_v20  ;;  %v11593_v63 = vld [vmem:[#allocation2 + $0x68] sm:$0x1]  ;;  %14885 = vst [vmem:[#allocation12_spill] sm:$0xff] %v11595_v40 }
 0x124   : > { %v3412_v35 = vsel %vm10762_vm15, %v3407_v58, %v3411_v62  ;;  %v3738_v54 = vsel %vm10737_vm10, %v9361_v36, %v3737_v17  ;;  %v3739_v0 = vrot.slane %v3737_v17, 4  ;;  %v1187_v31 = vshll.u32 %v934_v49, 16  ;;  %v10372_v58 = vld [vmem:[%s14808_s1] sm:$0x3f]  }
 0x125   : > { %3931 = vrot.lane.b32.xlu1 %v9394_v25, %s10648_s16  ;;  %v9393_v22 = vcombine.low %v3402_v46, %v3412_v35  ;;  %v1186_v1 = vrot.slane %v1184_v13, 4  ;;  %v1193_v28 = vshll.u32 %v11575_v21, 16  ;;  %v1197_v39 = vshrl.u32 %v11575_v21, 16  ;;  %v1360_v46 = vld [vmem:[#allocation2 + $0x6c] sm:$0xe] }
 0x126   : > { %v1203_v62 = vshll.u32 %v11577_v38, 16  ;;  %v1160_v29 = vshrl.u32 %v932_v59, 16  ;;  %v3741_v36 = vsel %vm10737_vm10, %v3739_v0, %v3740_v55  ;;  %v1189_v43 = vrot.slane %v1187_v31, 5 }
 0x127   : > { %3929 = vrot.lane.b32.xlu0 %v9393_v22, %s10648_s16  ;;  %v1163_v49 = vshll.u32 %v932_v59, 16  ;;  %v1169_v23 = vshll.u32 %v11585_v5, 16  ;;  %v9409_v17 = vcombine.low %v3738_v54, %v3741_v36  ;;  %v1195_v25 = vrot.slane %v1193_v28, 5  ;;  %v11608_v59 = vld [vmem:[%s14808_s1 + $0x8] sm:$0x3f]  }
 0x128   : > { %v1199_v48 = vrot.slane %v1197_v39, 4  ;;  %v1205_v13 = vrot.slane %v1203_v62, 5  ;;  %v1190_v35 = vor.u32 %v1189_v43, %v1186_v1  ;;  %v1162_v22 = vrot.slane %v1160_v29, 4  ;;  %v1359_v62 = vld [vmem:[#allocation2 + $0x60] sm:$0xe]  ;;  %v11620_v29 = vpop.permute.xlu0 %2852 }
 0x129   : > { %4011 = vrot.lane.b32.xlu1 %v9410_v30, %s10647_s15  ;;  %v1165_v40 = vrot.slane %v1163_v49, 5  ;;  %v1171_v20 = vrot.slane %v1169_v23, 5  ;;  %v1173_v0 = vshrl.u32 %v11585_v5, 16  ;;  %v1179_v54 = vshll.u32 %v11593_v63, 16 }
 0x12a   : > { %v1200_v55 = vor.u32 %v1199_v48, %v1195_v25  ;;  %vm1883_vm8 = vcmask 1045504   ;;  %v1191_v31 = vrot.slane %v1190_v35, 4  ;;  %v14886_v1 = vcombine.low %v11226_v57, %v11224_v18 }
 0x12b   : > { %4009 = vrot.lane.b32.xlu0 %v9409_v17, %s10647_s15  ;;  %v1166_v28 = vor.u32 %v1165_v40, %v1162_v22  ;;  %10352 = vmatprep.subr.msk.bf16.mxu0 %vm1883_vm8, %v10372_v58  ;;  %v1885_v30 = vsel %vm1883_vm8, %v10372_v58, 0  ;;  %v1175_v43 = vrot.slane %v1173_v0, 4  ;;  %v1181_v49 = vrot.slane %v1179_v54, 5  ;;  %v11622_v17 = vpop.permute.xlu1 %2778 }
 0x12c   : > { %v1760_v39 = vsel %vm14828_vm2, %v14886_v1, %v11476_v53  ;;  %v1201_v36 = vrot.slane %v1200_v55, 4  ;;  %9915 = vmatpush3.bf16.msra.mxu0 %v1885_v30  ;;  %v9199_v23 = vrot.slane %v1360_v46, 9  ;;  %10353 = vmatprep.subr.msk.bf16.mxu1 %vm1883_vm8, %v10372_v58  ;;  %v1196_v40 = vsel %vm10762_vm15, %v1191_v31, %v1195_v25 }
 0x12d   : > { %v1167_v48 = vrot.slane %v1166_v28, 4  ;;  %v1483_v18 = vrot.slane %v11575_v21, 5  ;;  %v1486_v57 = vrot.slane %v11577_v38, 5  ;;  %10354 = vmatprep.subr.msk.bf16.mxu0 %vm1883_vm8, %v11608_v59  ;;  %10159 = vmatpush3.bf16.msra.mxu1 %v1885_v30  ;;  %v1176_v46 = vor.u32 %v1175_v43, %v1171_v20  ;;  %v3215_v38 = vld [vmem:[#allocation2 + $0x84] sm:$0xf] }
 0x12e   : > { %v1206_v53 = vsel %vm10762_vm15, %v1201_v36, %v1205_v13  ;;  %v9198_v35 = vrot.slane %v1359_v62, 9  ;;  %v1476_v22 = vrot.slane %v11585_v5, 5  ;;  %v1479_v13 = vrot.slane %v11593_v63, 5  ;;  %v11641_v28 = vld [vmem:[#allocation2 + $0x88] sm:$0xf] }
 0x12f   : > { %v9231_v58 = vcombine.low %v1196_v40, %v1206_v53  ;;  %v1172_v25 = vsel %vm10762_vm15, %v1167_v48, %v1171_v20  ;;  %v1484_v21 = vsel %vm10737_vm10, %v9199_v23, %v1483_v18  ;;  %v1485_v55 = vrot.slane %v1483_v18, 4  ;;  %v11660_v36 = vld [vmem:[#allocation2 + $0x8c] sm:$0x1]  ;;  %v3213_v43 = vld [vmem:[#allocation2 + $0x78] sm:$0xf]  ;;  %v11662_v23 = vpop.permute.xlu0 %2776 }
 0x130   : > { %v1177_v0 = vrot.slane %v1176_v46, 4  ;;  %v1477_v54 = vsel %vm10737_vm10, %v9198_v35, %v1476_v22  ;;  %v1478_v31 = vrot.slane %v1476_v22, 4  ;;  %v1807_v20 = vsel %vm14829_vm5, %v1760_v39, %v11387_v9  ;;  %v11676_v53 = vld [vmem:[#allocation2 + $0x80] sm:$0x1] }
 0x131   : > { %1660 = vrot.lane.b32.xlu1 %v9231_v58, %s10648_s16  ;;  %v1487_v5 = vsel %vm10737_vm10, %v1485_v55, %v1486_v57  ;;  %v14887_v30 = vcombine.low %v11246_v41, %v11244_v4  ;;  %v14888_v63 = vcombine.low %v11255_v7, %v11253_v6  ;;  %9917 = vmatmul.mubr.msk.bf16.vlgmr.msra.gmra.mrb[0].mxu0 %vm1850_vm7, %v1807_v20  ;;  %v3462_v41 = vshrl.u32 %v3215_v38, 16  ;;  %v11671_v6 = vpop.permute.xlu1 %2858  ;;  %v3638_v20 = vld [vmem:[#allocation2 + $0x84] sm:$0xe] }
 0x132   : > { %v1182_v9 = vsel %vm10762_vm15, %v1177_v0, %v1181_v49  ;;  %v9247_v39 = vcombine.low %v1484_v21, %v1487_v5  ;;  %v1480_v4 = vsel %vm10737_vm10, %v1478_v31, %v1479_v13  ;;  %v3465_v40 = vshll.u32 %v3215_v38, 16 }
 0x133   : > { %v11653_v1 = vsel %vm14828_vm2, %v14887_v30, %v11479_v47  ;;  %v1763_v62 = vsel %vm14828_vm2, %v14888_v63, %v11486_v24  ;;  %v11669_v47 = vld [vmem:[#allocation2 + $0x7c] sm:$0xf]  ;;  %v9230_v7 = vcombine.low %v1172_v25, %v1182_v9  ;;  %v9246_v24 = vcombine.low %v1477_v54, %v1480_v4  ;;  %v11683_v30 = vpop.permute.xlu0 %2856 }
 0x134   : > { %v3471_v48 = vshll.u32 %v11641_v28, 16  ;;  %v3464_v18 = vrot.slane %v3462_v41, 4  ;;  %v3475_v57 = vshrl.u32 %v11641_v28, 16  ;;  %v3481_v49 = vshll.u32 %v11660_v36, 16  ;;  %v3637_v41 = vld [vmem:[#allocation2 + $0x78] sm:$0xe] }
 0x135   : > { %v3438_v46 = vshrl.u32 %v3213_v43, 16  ;;  %1658 = vrot.lane.b32.xlu0 %v9230_v7, %s10648_s16  ;;  %1740 = vrot.lane.b32.xlu1 %v9247_v39, %s10647_s15  ;;  %v3467_v35 = vrot.slane %v3465_v40, 5  ;;  %v3441_v58 = vshll.u32 %v3213_v43, 16  ;;  %v3447_v25 = vshll.u32 %v11669_v47, 16  ;;  %v11694_v7 = vpop.permute.xlu1 %2782 }
 0x136   : > { %v3473_v22 = vrot.slane %v3471_v48, 5  ;;  %v3477_v21 = vrot.slane %v3475_v57, 4  ;;  %v3483_v55 = vrot.slane %v3481_v49, 5  ;;  %v3451_v0 = vshrl.u32 %v11669_v47, 16 }
 0x137   : > { %v3440_v38 = vrot.slane %v3438_v46, 4  ;;  %v3468_v54 = vor.u32 %v3467_v35, %v3464_v18  ;;  %v3443_v31 = vrot.slane %v3441_v58, 5  ;;  %v3449_v13 = vrot.slane %v3447_v25, 5 }
 0x138   : > { %v3457_v5 = vshll.u32 %v11676_v53, 16  ;;  %v3478_v63 = vor.u32 %v3477_v21, %v3473_v22  ;;  %v3453_v9 = vrot.slane %v3451_v0, 4  ;;  %v1809_v43 = vsel %vm14829_vm5, %v1763_v62, %v11413_v33  ;;  %v11715_v0 = vpop.permute.xlu0 %2780 }
 0x139   : > { %v14889_v39 = vcombine.low %v11270_v56, %v11268_v60  ;;  %1738 = vrot.lane.b32.xlu0 %v9246_v24, %s10647_s15  ;;  %v3469_v40 = vrot.slane %v3468_v54, 4  ;;  %v3444_v48 = vor.u32 %v3443_v31, %v3440_v38  ;;  %9920 = vmatprep.mubr.msk.bf16.mxu0 %vm1850_vm7, %v1809_v43  ;;  %v14890_v33 = vcombine.low %v11304_v32, %v11302_v34  ;;  %v938_v38 = vld [vmem:[#allocation2 + $0x84] sm:$0xf] }
 0x13a   : > { %v3459_v18 = vrot.slane %v3457_v5, 5  ;;  %v3479_v60 = vrot.slane %v3478_v63, 4  ;;  %v3454_v56 = vor.u32 %v3453_v9, %v3449_v13  ;;  %v3758_v57 = vrot.slane %v11641_v28, 5  ;;  %v11735_v5 = vpop.permute.xlu1 %2862 }
 0x13b   : > { %v11692_v4 = vsel %vm14828_vm2, %v14889_v39, %v11495_v52  ;;  %v1769_v62 = vsel %vm14828_vm2, %v14890_v33, %v11512_v3  ;;  %v9364_v52 = vrot.slane %v3638_v20, 9  ;;  %v3474_v49 = vsel %vm10762_vm15, %v3469_v40, %v3473_v22  ;;  %v958_v33 = vld [vmem:[#allocation2 + $0x80] sm:$0x1] }
 0x13c   : > { %v3445_v24 = vrot.slane %v3444_v48, 4  ;;  %v3761_v46 = vrot.slane %v11660_v36, 5  ;;  %v9363_v35 = vrot.slane %v3637_v41, 9  ;;  %v3484_v58 = vsel %vm10762_vm15, %v3479_v60, %v3483_v55 }
 0x13d   : > { %v3455_v25 = vrot.slane %v3454_v56, 4  ;;  %v3759_v34 = vsel %vm10737_vm10, %v9364_v52, %v3758_v57  ;;  %v3760_v32 = vrot.slane %v3758_v57, 4  ;;  %v9396_v3 = vcombine.low %v3474_v49, %v3484_v58  ;;  %v11758_v49 = vpop.permute.xlu0 %2860 }
 0x13e   : > { %v3450_v21 = vsel %vm10762_vm15, %v3445_v24, %v3449_v13  ;;  %v3751_v28 = vrot.slane %v11669_v47, 5  ;;  %v3754_v22 = vrot.slane %v11676_v53, 5  ;;  %v1811_v54 = vsel %vm14829_vm5, %v11653_v1, %v11416_v27  ;;  %v11731_v53 = vld [vmem:[#allocation2 + $0x88] sm:$0xf]  ;;  %v11733_v13 = vld [vmem:[#allocation2 + $0x8c] sm:$0x1] }
 0x13f   : > { %v3460_v36 = vsel %vm10762_vm15, %v3455_v25, %v3459_v18  ;;  %v3762_v55 = vsel %vm10737_vm10, %v3760_v32, %v3761_v46  ;;  %v14891_v31 = vcombine.low %v11332_v2, %v11330_v61  ;;  %3935 = vrot.lane.b32.xlu1 %v9396_v3, %s10648_s16  ;;  %9921 = vmatmul.mubr.msk.bf16.gmra.mrb[4].mxu0 %vm1850_vm7, %v1811_v54  ;;  %v936_v61 = vld [vmem:[#allocation2 + $0x78] sm:$0xf]  ;;  %v1232_v43 = vshrl.u32 %v938_v38, 16  ;;  %v937_v18 = vld [vmem:[#allocation2 + $0x7c] sm:$0xf] }
 0x140   : > { %v9395_v20 = vcombine.low %v3450_v21, %v3460_v36  ;;  %v9412_v63 = vcombine.low %v3759_v34, %v3762_v55  ;;  %v3752_v27 = vsel %vm10737_vm10, %v9363_v35, %v3751_v28  ;;  %v3753_v1 = vrot.slane %v3751_v28, 4  ;;  %v1362_v25 = vld [vmem:[#allocation2 + $0x84] sm:$0xe]  ;;  %v11760_v34 = vpop.permute.xlu1 %2786 }
 0x141   : > { %v11729_v47 = vsel %vm14828_vm2, %v14891_v31, %v11517_v44  ;;  %v1813_v2 = vsel %vm14829_vm5, %v1769_v62, %v11424_v26  ;;  %v14892_v44 = vcombine.low %v11391_v11, %v11389_v10  ;;  %v1235_v39 = vshll.u32 %v938_v38, 16 }
 0x142   : > { %3933 = vrot.lane.b32.xlu0 %v9395_v20, %s10648_s16  ;;  %v3755_v41 = vsel %vm10737_vm10, %v3753_v1, %v3754_v22  ;;  %9924 = vmatprep.mubr.msk.bf16.mxu0 %vm1850_vm7, %v1813_v2  ;;  %v1241_v40 = vshll.u32 %v11731_v53, 16  ;;  %v1245_v26 = vshrl.u32 %v11731_v53, 16  ;;  %v1251_v48 = vshll.u32 %v11733_v13, 16  ;;  %v1361_v20 = vld [vmem:[#allocation2 + $0x78] sm:$0xe] }
 0x143   : > { %v11748_v9 = vsel %vm14828_vm2, %v14892_v44, %v11529_v8  ;;  %v9411_v10 = vcombine.low %v3752_v27, %v3755_v41  ;;  %v1234_v11 = vrot.slane %v1232_v43, 4  ;;  %v1237_v8 = vrot.slane %v1235_v39, 5  ;;  %4015 = vrot.lane.b32.xlu1 %v9412_v63, %s10647_s15 }
 0x144   : > { %v1208_v62 = vshrl.u32 %v936_v61, 16  ;;  %v1243_v60 = vrot.slane %v1241_v40, 5  ;;  %v1247_v56 = vrot.slane %v1245_v26, 4  ;;  %v1253_v52 = vrot.slane %v1251_v48, 5  ;;  %v11783_v48 = vpop.permute.xlu1 %2866 }
 0x145   : > { %v1211_v57 = vshll.u32 %v936_v61, 16  ;;  %v1238_v24 = vor.u32 %v1237_v8, %v1234_v11  ;;  %v1217_v35 = vshll.u32 %v937_v18, 16  ;;  %v1221_v58 = vshrl.u32 %v937_v18, 16  ;;  %v11789_v8 = vld [vmem:[#allocation2 + $0x9c] sm:$0xf] }
 0x146   : > { %v1210_v46 = vrot.slane %v1208_v62, 4  ;;  %4013 = vrot.lane.b32.xlu0 %v9411_v10, %s10647_s15  ;;  %v1248_v32 = vor.u32 %v1247_v56, %v1243_v60  ;;  %v1227_v21 = vshll.u32 %v958_v33, 16  ;;  %v14893_v28 = vcombine.low %v11395_v12, %v11397_v15 }
 0x147   : > { %v1213_v3 = vrot.slane %v1211_v57, 5  ;;  %v1239_v38 = vrot.slane %v1238_v24, 4  ;;  %v1219_v36 = vrot.slane %v1217_v35, 5  ;;  %v1223_v55 = vrot.slane %v1221_v58, 4  ;;  %v11803_v24 = vld [vmem:[#allocation2 + $0xa0] sm:$0xf] }
 0x148   : > { %v2885_v22 = vsel %vm14828_vm2, %v14893_v28, %v11532_v51  ;;  %v14894_v54 = vcombine.low %v11401_v16, %v11403_v19  ;;  %v1249_v63 = vrot.slane %v1248_v32, 4  ;;  %v1229_v1 = vrot.slane %v1227_v21, 5  ;;  %v14897_v32 = vld [vmem:[#allocation8_spill] sm:$0xff] }
 0x149   : > { %v1214_v27 = vor.u32 %v1213_v3, %v1210_v46  ;;  %v9201_v61 = vrot.slane %v1362_v25, 9  ;;  %v1244_v2 = vsel %vm10762_vm15, %v1239_v38, %v1243_v60  ;;  %v1224_v12 = vor.u32 %v1223_v55, %v1219_v36  ;;  %v14895_v60 = vld [vmem:[#allocation7_spill] sm:$0xff]  ;;  %v11807_v46 = vld [vmem:[#allocation2 + $0x90] sm:$0xf]  ;;  %v11815_v3 = vld [vmem:[#allocation2 + $0x94] sm:$0xf] }
 0x14a   : > { %v2882_v31 = vsel %vm14828_vm2, %v14894_v54, %v11552_v42  ;;  %v1497_v15 = vrot.slane %v11731_v53, 5  ;;  %v1500_v51 = vrot.slane %v11733_v13, 5  ;;  %v1254_v44 = vsel %vm10762_vm15, %v1249_v63, %v1253_v52  ;;  %v11779_v42 = vpop.permute.xlu0 %2784  ;;  %v14896_v52 = vld [vmem:[#allocation10_spill] sm:$0xff]  ;;  %v11832_v63 = vld [vmem:[#allocation2 + $0x98] sm:$0x1] }
 0x14b   : > { %v1215_v43 = vrot.slane %v1214_v27, 4  ;;  %v9200_v16 = vrot.slane %v1361_v20, 9  ;;  %v1490_v19 = vrot.slane %v937_v18, 5  ;;  %v9233_v39 = vcombine.low %v1244_v2, %v1254_v44  ;;  %v11841_v44 = vld [vmem:[%s14808_s1 + $0x10] sm:$0x3f]  }
 0x14c   : > { %v1225_v41 = vrot.slane %v1224_v12, 4  ;;  %v1498_v40 = vsel %vm10737_vm10, %v9201_v61, %v1497_v15  ;;  %v1499_v26 = vrot.slane %v1497_v15, 4  ;;  %v1493_v11 = vrot.slane %v958_v33, 5  ;;  %v11805_v33 = vld [vmem:[#allocation2 + $0xa4] sm:$0x1]  ;;  %v11836_v61 = vpop.permute.xlu1 %2790 }
 0x14d   : > { %v1220_v53 = vsel %vm10762_vm15, %v1215_v43, %v1219_v36  ;;  %v1491_v13 = vsel %vm10737_vm10, %v9200_v16, %v1490_v19  ;;  %v1492_v10 = vrot.slane %v1490_v19, 4  ;;  %1664 = vrot.lane.b32.xlu1 %v9233_v39, %s10648_s16  ;;  %v1815_v56 = vsel %vm14829_vm5, %v11692_v4, %v14895_v60 }
 0x14e   : > { %v1230_v18 = vsel %vm10762_vm15, %v1225_v41, %v1229_v1  ;;  %v1501_v62 = vsel %vm10737_vm10, %v1499_v26, %v1500_v51  ;;  %v11801_v57 = vsel %vm14829_vm5, %v2885_v22, %v14896_v52  ;;  %9925 = vmatmul.mubr.msk.bf16.gmra.mrb[8].mxu0 %vm1850_vm7, %v1815_v56  ;;  %v1817_v4 = vsel %vm14829_vm5, %v11748_v9, %v14897_v32  ;;  %v11829_v20 = vpop.permute.xlu0 %2864  ;;  %v3640_v41 = vld [vmem:[#allocation2 + $0x9c] sm:$0xe]  ;;  %v10473_v56 = vld [vmem:[#allocation2 + $0x24] sm:$0xf]  ;;  %v10474_v52 = vld [vmem:[#allocation2 + $0x28] sm:$0xf] }
 0x14f   : > { %v9232_v35 = vcombine.low %v1220_v53, %v1230_v18  ;;  %v9249_v58 = vcombine.low %v1498_v40, %v1501_v62  ;;  %v1494_v25 = vsel %vm10737_vm10, %v1492_v10, %v1493_v11  ;;  %9928 = vmatprep.mubr.msk.bf16.mxu0 %vm1850_vm7, %v1817_v4  ;;  %v11820_v28 = vsel %vm14829_vm5, %v2882_v31, %v11561_v37  ;;  %v10472_v10 = vld [vmem:[#allocation2 + $0x34] sm:$0xf] }
 0x150   : > { %v9248_v21 = vcombine.low %v1491_v13, %v1494_v25  ;;  %v3510_v22 = vshrl.u32 %v11789_v8, 16  ;;  %v3513_v38 = vshll.u32 %v11789_v8, 16  ;;  %v3519_v36 = vshll.u32 %v11803_v24, 16  ;;  %v10471_v13 = vld [vmem:[#allocation2 + $0x30] sm:$0xf] }
 0x151   : > { %1662 = vrot.lane.b32.xlu0 %v9232_v35, %s10648_s16  ;;  %v3523_v55 = vshrl.u32 %v11803_v24, 16  ;;  %v3529_v9 = vshll.u32 %v11805_v33, 16  ;;  %v3486_v54 = vshrl.u32 %v11807_v46, 16  ;;  %1744 = vrot.lane.b32.xlu1 %v9249_v58, %s10647_s15  ;;  %v3489_v27 = vshll.u32 %v11807_v46, 16  ;;  %v3639_v58 = vld [vmem:[#allocation2 + $0x90] sm:$0xe] }
 0x152   : > { %v3512_v37 = vrot.slane %v3510_v22, 4  ;;  %v3515_v31 = vrot.slane %v3513_v38, 5  ;;  %v3495_v1 = vshll.u32 %v11815_v3, 16  ;;  %v3521_v2 = vrot.slane %v3519_v36, 5 }
 0x153   : > { %v3525_v12 = vrot.slane %v3523_v55, 4  ;;  %v3531_v15 = vrot.slane %v3529_v9, 5  ;;  %v3488_v51 = vrot.slane %v3486_v54, 4  ;;  %v3491_v16 = vrot.slane %v3489_v27, 5  ;;  %v14898_v55 = vld [vmem:[#allocation11_spill] sm:$0xff]  ;;  %v11858_v54 = vpop.permute.xlu1 %2870 }
 0x154   : > { %v3516_v43 = vor.u32 %v3515_v31, %v3512_v37  ;;  %v3497_v19 = vrot.slane %v3495_v1, 5  ;;  %v3499_v39 = vshrl.u32 %v11815_v3, 16  ;;  %v3505_v26 = vshll.u32 %v11832_v63, 16 }
 0x155   : > { %1742 = vrot.lane.b32.xlu0 %v9248_v21, %s10647_s15  ;;  %v3526_v40 = vor.u32 %v3525_v12, %v3521_v2  ;;  %v3001_v53 = vsel %vm1883_vm8, %v11608_v59, 0  ;;  %v9291_v11 = vcombine.low %v10471_v13, %v10472_v10  ;;  %v3492_v62 = vor.u32 %v3491_v16, %v3488_v51  ;;  %v11852_v59 = vpop.permute.xlu0 %2788  ;;  %v14900_v13 = vld [vmem:[#allocation12_spill] sm:$0xff] }
 0x156   : > { %v3517_v18 = vrot.slane %v3516_v43, 4  ;;  %v3501_v60 = vrot.slane %v3499_v39, 4  ;;  %9949 = vmatpush3.bf16.msra.mxu0 %v3001_v53  ;;  %v9290_v35 = vcombine.low %v10473_v56, %v10474_v52  ;;  %v3507_v32 = vrot.slane %v3505_v26, 5  ;;  %v11867_v43 = vld [vmem:[#allocation2 + $0x9c] sm:$0xf] }
 0x157   : > { %v3527_v25 = vrot.slane %v3526_v40, 4  ;;  %v2891_v4 = vsel %vm14828_vm2, %v9291_v11, %v11564_v50  ;;  %v9366_v21 = vrot.slane %v3640_v41, 9  ;;  %10355 = vmatprep.subr.msk.bf16.mxu0 %vm1883_vm8, %v11841_v44  ;;  %v3493_v38 = vrot.slane %v3492_v62, 4  ;;  %v14899_v41 = vld [vmem:[#allocation9_spill] sm:$0xff]  ;;  %v11875_v40 = vld [vmem:[#allocation2 + $0xa0] sm:$0xf] }
 0x158   : > { %v3522_v22 = vsel %vm10762_vm15, %v3517_v18, %v3521_v2  ;;  %v3502_v36 = vor.u32 %v3501_v60, %v3497_v19  ;;  %v2888_v9 = vsel %vm14828_vm2, %v9290_v35, %v14898_v55  ;;  %v3772_v50 = vrot.slane %v11803_v24, 5  ;;  %v11887_v10 = vld [vmem:[#allocation2 + $0xa4] sm:$0x1]  ;;  %v11896_v60 = vld [vmem:[#allocation2 + $0x90] sm:$0xf] }
 0x159   : > { %v3532_v37 = vsel %vm10762_vm15, %v3527_v25, %v3531_v15  ;;  %v3775_v31 = vrot.slane %v11805_v33, 5  ;;  %v9365_v27 = vrot.slane %v3639_v58, 9  ;;  %v3498_v12 = vsel %vm10762_vm15, %v3493_v38, %v3497_v19  ;;  %v11898_v56 = vpop.permute.xlu0 %2868  ;;  %v11911_v38 = vld [vmem:[#allocation2 + $0x98] sm:$0x1] }
 0x15a   : > { %v9398_v1 = vcombine.low %v3522_v22, %v3532_v37  ;;  %v3503_v2 = vrot.slane %v3502_v36, 4  ;;  %v3765_v51 = vrot.slane %v11815_v3, 5  ;;  %v3773_v16 = vsel %vm10737_vm10, %v9366_v21, %v3772_v50 }
 0x15b   : > { %v3774_v39 = vrot.slane %v3772_v50, 4  ;;  %v3768_v15 = vrot.slane %v11832_v63, 5  ;;  %v1819_v33 = vsel %vm14829_vm5, %v11729_v47, %v14899_v41  ;;  %v11885_v63 = vsel %vm14829_vm5, %v2891_v4, %v14900_v13 }
 0x15c   : > { %3939 = vrot.lane.b32.xlu1 %v9398_v1, %s10648_s16  ;;  %v3508_v19 = vsel %vm10762_vm15, %v3503_v2, %v3507_v32  ;;  %v3766_v26 = vsel %vm10737_vm10, %v9365_v27, %v3765_v51  ;;  %v3767_v53 = vrot.slane %v3765_v51, 4  ;;  %9929 = vmatmul.mubr.msk.bf16.gmra.mrb[12].mxu0 %vm1850_vm7, %v1819_v33  ;;  %v2933_v18 = vsel %vm14829_vm5, %v2888_v9, %v11620_v29  ;;  %v11904_v32 = vld [vmem:[#allocation2 + $0x94] sm:$0xf] }
 0x15d   : > { %v9397_v47 = vcombine.low %v3498_v12, %v3508_v19  ;;  %v3776_v11 = vsel %vm10737_vm10, %v3774_v39, %v3775_v31  ;;  %9950 = vmatprep.mubr.msk.bf16.mxu0 %vm1850_vm7, %v11820_v28  ;;  %v1280_v62 = vshrl.u32 %v11867_v43, 16  ;;  %v1283_v58 = vshll.u32 %v11867_v43, 16  ;;  %v11906_v28 = vpop.permute.xlu1 %2794  ;;  %v1364_v39 = vld [vmem:[#allocation2 + $0x9c] sm:$0xe]  ;;  %v10475_v19 = vld [vmem:[#allocation2 + $0x48] sm:$0xf]  ;;  %v11920_v13 = vpop.permute.xlu0 %2792 }
 0x15e   : > { %v9414_v52 = vcombine.low %v3773_v16, %v3776_v11  ;;  %v3769_v35 = vsel %vm10737_vm10, %v3767_v53, %v3768_v15  ;;  %v1289_v25 = vshll.u32 %v11875_v40, 16  ;;  %v1293_v21 = vshrl.u32 %v11875_v40, 16 }
 0x15f   : > { %3937 = vrot.lane.b32.xlu0 %v9397_v47, %s10648_s16  ;;  %v9413_v29 = vcombine.low %v3766_v26, %v3769_v35  ;;  %v1282_v4 = vrot.slane %v1280_v62, 4  ;;  %v1299_v22 = vshll.u32 %v11887_v10, 16  ;;  %v1285_v36 = vrot.slane %v1283_v58, 5  ;;  %v10476_v26 = vld [vmem:[#allocation2 + $0x4c] sm:$0xf] }
 0x160   : > { %4019 = vrot.lane.b32.xlu1 %v9414_v52, %s10647_s15  ;;  %v1291_v55 = vrot.slane %v1289_v25, 5  ;;  %v1256_v9 = vshrl.u32 %v11896_v60, 16  ;;  %v1259_v37 = vshll.u32 %v11896_v60, 16  ;;  %v1295_v50 = vrot.slane %v1293_v21, 4  ;;  %v10477_v52 = vld [vmem:[#allocation2 + $0x3c] sm:$0xf] }
 0x161   : > { %v1301_v31 = vrot.slane %v1299_v22, 5  ;;  %v1265_v27 = vshll.u32 %v11904_v32, 16  ;;  %v1269_v1 = vshrl.u32 %v11904_v32, 16  ;;  %v1286_v12 = vor.u32 %v1285_v36, %v1282_v4  ;;  %v10478_v35 = vld [vmem:[#allocation2 + $0x40] sm:$0xf]  ;;  %v11924_v4 = vpop.permute.xlu1 %2874 }
 0x162   : > { %v1258_v2 = vrot.slane %v1256_v9, 4  ;;  %v1261_v51 = vrot.slane %v1259_v37, 5  ;;  %v1275_v16 = vshll.u32 %v11911_v38, 16  ;;  %v1296_v15 = vor.u32 %v1295_v50, %v1291_v55  ;;  %v1363_v25 = vld [vmem:[#allocation2 + $0x90] sm:$0xe] }
 0x163   : > { %4017 = vrot.lane.b32.xlu0 %v9413_v29, %s10647_s15  ;;  %v1267_v41 = vrot.slane %v1265_v27, 5  ;;  %v1271_v33 = vrot.slane %v1269_v1, 4  ;;  %v9293_v53 = vcombine.low %v10475_v19, %v10476_v26  ;;  %v1287_v47 = vrot.slane %v1286_v12, 4 }
 0x164   : > { %v1262_v11 = vor.u32 %v1261_v51, %v1258_v2  ;;  %v1277_v62 = vrot.slane %v1275_v16, 5  ;;  %v9292_v58 = vcombine.low %v10477_v52, %v10478_v35  ;;  %9951 = vmatmul.mubr.msk.bf16.vlgmr.msra.gmra.mrb[0].mxu0 %vm1850_vm7, %v11801_v57  ;;  %v1297_v29 = vrot.slane %v1296_v15, 4  ;;  %v11951_v15 = vld [vmem:[#allocation2 + $0xb8] sm:$0xf] }
 0x165   : > { %v1272_v21 = vor.u32 %v1271_v33, %v1267_v41  ;;  %v2897_v22 = vsel %vm14828_vm2, %v9293_v53, %v11622_v17  ;;  %v9203_v36 = vrot.slane %v1364_v39, 9  ;;  %9954 = vmatprep.mubr.msk.bf16.mxu0 %vm1850_vm7, %v2933_v18  ;;  %v1292_v9 = vsel %vm10762_vm15, %v1287_v47, %v1291_v55  ;;  %v11937_v17 = vld [vmem:[#allocation2 + $0xb4] sm:$0xf]  ;;  %v11953_v33 = vld [vmem:[#allocation2 + $0xbc] sm:$0x1] }
 0x166   : > { %v1263_v37 = vrot.slane %v1262_v11, 4  ;;  %v2894_v50 = vsel %vm14828_vm2, %v9292_v58, %v11662_v23  ;;  %v1511_v27 = vrot.slane %v11875_v40, 5  ;;  %v1302_v57 = vsel %vm10762_vm15, %v1297_v29, %v1301_v31  ;;  %v11963_v47 = vld [vmem:[#allocation2 + $0xa8] sm:$0xf] }
 0x167   : > { %v1273_v1 = vrot.slane %v1272_v21, 4  ;;  %v1514_v12 = vrot.slane %v11887_v10, 5  ;;  %v9202_v2 = vrot.slane %v1363_v25, 9  ;;  %v9235_v51 = vcombine.low %v1292_v9, %v1302_v57  ;;  %14901 = vst [vmem:[#allocation7_spill] sm:$0xff] %v11963_v47  ;;  %v11974_v21 = vld [vmem:[#allocation2 + $0xac] sm:$0xf] }
 0x168   : > { %v1268_v18 = vsel %vm10762_vm15, %v1263_v37, %v1267_v41  ;;  %v1512_v55 = vsel %vm10737_vm10, %v9203_v36, %v1511_v27  ;;  %v1513_v16 = vrot.slane %v1511_v27, 4  ;;  %v1504_v39 = vrot.slane %v11904_v32, 5  ;;  %v11955_v41 = vpop.permute.xlu0 %2872  ;;  %14902 = vst [vmem:[#allocation10_spill] sm:$0xff] %v11974_v21  ;;  %v11980_v9 = vld [vmem:[#allocation2 + $0xb0] sm:$0x1] }
 0x169   : > { %v1278_v23 = vsel %vm10762_vm15, %v1273_v1, %v1277_v62  ;;  %v1507_v31 = vrot.slane %v11911_v38, 5  ;;  %v11949_v10 = vsel %vm14829_vm5, %v2897_v22, %v11671_v6  ;;  %1668 = vrot.lane.b32.xlu1 %v9235_v51, %s10648_s16  ;;  %v2937_v53 = vsel %vm14829_vm5, %v2894_v50, %v11683_v30  ;;  %v11965_v6 = vpop.permute.xlu1 %2798 }
 0x16a   : > { %v9234_v19 = vcombine.low %v1268_v18, %v1278_v23  ;;  %v1515_v26 = vsel %vm10737_vm10, %v1513_v16, %v1514_v12  ;;  %v3558_v38 = vshrl.u32 %v11937_v17, 16  ;;  %v1505_v62 = vsel %vm10737_vm10, %v9202_v2, %v1504_v39 }
 0x16b   : > { %v9251_v11 = vcombine.low %v1512_v55, %v1515_v26  ;;  %v1506_v52 = vrot.slane %v1504_v39, 4  ;;  %v3561_v35 = vshll.u32 %v11937_v17, 16  ;;  %v3567_v25 = vshll.u32 %v11951_v15, 16  ;;  %v10480_v26 = vld [vmem:[#allocation2 + $0x64] sm:$0xf] }
 0x16c   : > { %1666 = vrot.lane.b32.xlu0 %v9234_v19, %s10648_s16  ;;  %v3560_v58 = vrot.slane %v3558_v38, 4  ;;  %v3571_v30 = vshrl.u32 %v11951_v15, 16  ;;  %v3577_v29 = vshll.u32 %v11953_v33, 16  ;;  %9955 = vmatmul.mubr.msk.bf16.gmra.mrb[4].mxu0 %vm1850_vm7, %v11885_v63  ;;  %v3534_v37 = vshrl.u32 %v11963_v47, 16  ;;  %v11987_v55 = vpop.permute.xlu0 %2796  ;;  %v10479_v19 = vld [vmem:[#allocation2 + $0x60] sm:$0xf] }
 0x16d   : > { %v1508_v22 = vsel %vm10737_vm10, %v1506_v52, %v1507_v31  ;;  %v3563_v36 = vrot.slane %v3561_v35, 5  ;;  %v3537_v50 = vshll.u32 %v11963_v47, 16  ;;  %9958 = vmatprep.mubr.msk.bf16.mxu0 %vm1850_vm7, %v2937_v53  ;;  %1748 = vrot.lane.b32.xlu1 %v9251_v11, %s10647_s15  ;;  %v3569_v57 = vrot.slane %v3567_v25, 5  ;;  %v11989_v16 = vpop.permute.xlu1 %2878  ;;  %v3642_v38 = vld [vmem:[#allocation2 + $0xb4] sm:$0xe] }
 0x16e   : > { %v9250_v27 = vcombine.low %v1505_v62, %v1508_v22  ;;  %v3573_v1 = vrot.slane %v3571_v30, 4  ;;  %v3579_v12 = vrot.slane %v3577_v29, 5  ;;  %v3536_v63 = vrot.slane %v3534_v37, 4  ;;  %v10481_v35 = vld [vmem:[#allocation2 + $0x54] sm:$0xf] }
 0x16f   : > { %v3564_v2 = vor.u32 %v3563_v36, %v3560_v58  ;;  %v3539_v51 = vrot.slane %v3537_v50, 5  ;;  %v3543_v18 = vshll.u32 %v11974_v21, 16  ;;  %v3547_v39 = vshrl.u32 %v11974_v21, 16  ;;  %v10482_v58 = vld [vmem:[#allocation2 + $0x58] sm:$0xf] }
 0x170   : > { %1746 = vrot.lane.b32.xlu0 %v9250_v27, %s10647_s15  ;;  %v3574_v23 = vor.u32 %v3573_v1, %v3569_v57  ;;  %v3553_v31 = vshll.u32 %v11980_v9, 16  ;;  %v9295_v53 = vcombine.low %v10479_v19, %v10480_v26  ;;  %v9294_v25 = vcombine.low %v10481_v35, %v10482_v58  ;;  %v3641_v37 = vld [vmem:[#allocation2 + $0xa8] sm:$0xe]  ;;  %v12011_v19 = vld [vmem:[#allocation2 + $0xb4] sm:$0xf] }
 0x171   : > { %v3565_v11 = vrot.slane %v3564_v2, 4  ;;  %v3540_v62 = vor.u32 %v3539_v51, %v3536_v63  ;;  %v3545_v52 = vrot.slane %v3543_v18, 5  ;;  %v3549_v29 = vrot.slane %v3547_v39, 4  ;;  %v12000_v63 = vpop.permute.xlu0 %2876  ;;  %14903 = vst [vmem:[#allocation8_spill] sm:$0xff] %v12011_v19  ;;  %v12013_v26 = vpop.permute.xlu1 %3919 }
 0x172   : > { %v3575_v30 = vrot.slane %v3574_v23, 4  ;;  %v3555_v22 = vrot.slane %v3553_v31, 5  ;;  %v2903_v36 = vsel %vm14828_vm2, %v9295_v53, %v11694_v7  ;;  %v2900_v1 = vsel %vm14828_vm2, %v9294_v25, %v11715_v0  ;;  %v12031_v25 = vld [vmem:[#allocation2 + $0xbc] sm:$0x1] }
 0x173   : > { %v3570_v50 = vsel %vm10762_vm15, %v3565_v11, %v3569_v57  ;;  %v3541_v27 = vrot.slane %v3540_v62, 4  ;;  %v9368_v2 = vrot.slane %v3642_v38, 9  ;;  %v3550_v18 = vor.u32 %v3549_v29, %v3545_v52  ;;  %v12018_v11 = vld [vmem:[#allocation2 + $0xb8] sm:$0xf] }
 0x174   : > { %v3580_v51 = vsel %vm10762_vm15, %v3575_v30, %v3579_v12  ;;  %v3786_v23 = vrot.slane %v11951_v15, 5  ;;  %v3789_v39 = vrot.slane %v11953_v33, 5  ;;  %9959 = vmatmul.mubr.msk.bf16.gmra.mrb[8].mxu0 %vm1850_vm7, %v11949_v10  ;;  %v9367_v31 = vrot.slane %v3641_v37, 9  ;;  %14904 = vst [vmem:[#allocation11_spill] sm:$0xff] %v12018_v11  ;;  %v12035_v37 = vld [vmem:[#allocation2 + $0xa8] sm:$0xf] }
 0x175   : > { %v9400_v7 = vcombine.low %v3570_v50, %v3580_v51  ;;  %v3546_v57 = vsel %vm10762_vm15, %v3541_v27, %v3545_v52  ;;  %v3779_v0 = vrot.slane %v11974_v21, 5  ;;  %v3551_v12 = vrot.slane %v3550_v18, 4  ;;  %14905 = vst [vmem:[#allocation9_spill] sm:$0xff] %v12035_v37  ;;  %v12041_v50 = vld [vmem:[#allocation2 + $0xac] sm:$0xf] }
 0x176   : > { %v3787_v53 = vsel %vm10737_vm10, %v9368_v2, %v3786_v23  ;;  %v3788_v38 = vrot.slane %v3786_v23, 4  ;;  %v3782_v33 = vrot.slane %v11980_v9, 5  ;;  %v2943_v52 = vsel %vm14829_vm5, %v2903_v36, %v11735_v5  ;;  %14906 = vst [vmem:[#allocation12_spill] sm:$0xff] %v12041_v50  ;;  %v12043_v27 = vpop.permute.xlu0 %3917  ;;  %v12046_v23 = vld [vmem:[#allocation2 + $0xb0] sm:$0x1] }
 0x177   : > { %3943 = vrot.lane.b32.xlu1 %v9400_v7, %s10648_s16  ;;  %v3780_v10 = vsel %vm10737_vm10, %v9367_v31, %v3779_v0  ;;  %v3781_v62 = vrot.slane %v3779_v0, 4  ;;  %v2941_v35 = vsel %vm14829_vm5, %v2900_v1, %v11758_v49  ;;  %v3556_v58 = vsel %vm10762_vm15, %v3551_v12, %v3555_v22  ;;  %v12053_v0 = vpop.permute.xlu1 %3999 }
 0x178   : > { %v3790_v9 = vsel %vm10737_vm10, %v3788_v38, %v3789_v39  ;;  %v1328_v30 = vshrl.u32 %v12011_v19, 16  ;;  %v1331_v29 = vshll.u32 %v12011_v19, 16  ;;  %9962 = vmatprep.mubr.msk.bf16.mxu0 %vm1850_vm7, %v2941_v35  ;;  %v9399_v5 = vcombine.low %v3546_v57, %v3556_v58  ;;  %v10486_v19 = vld [vmem:[#allocation2 + $0x70] sm:$0xf] }
 0x179   : > { %v9416_v36 = vcombine.low %v3787_v53, %v3790_v9  ;;  %v3783_v49 = vsel %vm10737_vm10, %v3781_v62, %v3782_v33  ;;  %v1337_v22 = vshll.u32 %v12018_v11, 16  ;;  %v1341_v18 = vshrl.u32 %v12018_v11, 16  ;;  %v1366_v9 = vld [vmem:[#allocation2 + $0xb4] sm:$0xe] }
 0x17a   : > { %v9415_v1 = vcombine.low %v3780_v10, %v3783_v49  ;;  %v1330_v2 = vrot.slane %v1328_v30, 4  ;;  %v1333_v51 = vrot.slane %v1331_v29, 5  ;;  %3941 = vrot.lane.b32.xlu0 %v9399_v5, %s10648_s16  ;;  %v1347_v7 = vshll.u32 %v12031_v25, 16 }
 0x17b   : > { %4023 = vrot.lane.b32.xlu1 %v9416_v36, %s10647_s15  ;;  %v1339_v39 = vrot.slane %v1337_v22, 5  ;;  %v1304_v57 = vshrl.u32 %v12035_v37, 16  ;;  %v1307_v31 = vshll.u32 %v12035_v37, 16  ;;  %v1343_v53 = vrot.slane %v1341_v18, 4  ;;  %v10485_v37 = vld [vmem:[#allocation2 + $0x6c] sm:$0xf] }
 0x17c   : > { %v1334_v12 = vor.u32 %v1333_v51, %v1330_v2  ;;  %v1313_v38 = vshll.u32 %v12041_v50, 16  ;;  %v1317_v33 = vshrl.u32 %v12041_v50, 16  ;;  %9963 = vmatmul.mubr.msk.bf16.gmra.mrb[12].mxu0 %vm1850_vm7, %v2943_v52  ;;  %v1349_v10 = vrot.slane %v1347_v7, 5  ;;  %v10483_v2 = vld [vmem:[#allocation2 + $0x78] sm:$0xf] }
 0x17d   : > { %v1306_v62 = vrot.slane %v1304_v57, 4  ;;  %v1309_v35 = vrot.slane %v1307_v31, 5  ;;  %v1323_v58 = vshll.u32 %v12046_v23, 16  ;;  %v1344_v29 = vor.u32 %v1343_v53, %v1339_v39  ;;  %v10484_v51 = vld [vmem:[#allocation2 + $0x7c] sm:$0xf]  ;;  %v12060_v57 = vpop.permute.xlu0 %3997 }
 0x17e   : > { %v1335_v30 = vrot.slane %v1334_v12, 4  ;;  %v1315_v5 = vrot.slane %v1313_v38, 5  ;;  %v1319_v36 = vrot.slane %v1317_v33, 4  ;;  %4021 = vrot.lane.b32.xlu0 %v9415_v1, %s10647_s15  ;;  %v9297_v18 = vcombine.low %v10483_v2, %v10484_v51  ;;  %v1365_v7 = vld [vmem:[#allocation2 + $0xa8] sm:$0xe] }
 0x17f   : > { %v1310_v49 = vor.u32 %v1309_v35, %v1306_v62  ;;  %v1325_v22 = vrot.slane %v1323_v58, 5  ;;  %v9296_v52 = vcombine.low %v10485_v37, %v10486_v19  ;;  %v1345_v12 = vrot.slane %v1344_v29, 4  ;;  %v12069_v58 = vpop.permute.xlu1 %3923  ;;  %v12074_v29 = vld [vmem:[#allocation2 + $0xcc] sm:$0xf]  ;;  %v12086_v51 = vld [vmem:[#allocation2 + $0xd0] sm:$0xf] }
 0x180   : > { %v1340_v31 = vsel %vm10762_vm15, %v1335_v30, %v1339_v39  ;;  %v1320_v53 = vor.u32 %v1319_v36, %v1315_v5  ;;  %v9205_v38 = vrot.slane %v1366_v9, 9  ;;  %v2909_v1 = vsel %vm14828_vm2, %v9297_v18, %v11760_v34  ;;  %v12088_v18 = vld [vmem:[#allocation2 + $0xd4] sm:$0x1] }
 0x181   : > { %v1311_v33 = vrot.slane %v1310_v49, 4  ;;  %v2906_v62 = vsel %vm14828_vm2, %v9296_v52, %v11779_v42  ;;  %v1525_v35 = vrot.slane %v12018_v11, 5  ;;  %v1350_v19 = vsel %vm10762_vm15, %v1345_v12, %v1349_v10  ;;  %v3643_v11 = vld [vmem:[#allocation2 + $0xc0] sm:$0xe] }
 0x182   : > { %v1321_v37 = vrot.slane %v1320_v53, 4  ;;  %v1528_v39 = vrot.slane %v12031_v25, 5  ;;  %v9204_v30 = vrot.slane %v1365_v7, 9  ;;  %v9237_v9 = vcombine.low %v1340_v31, %v1350_v19  ;;  %v12096_v31 = vld [vmem:[#allocation2 + $0xc0] sm:$0xf] }
 0x183   : > { %v1316_v34 = vsel %vm10762_vm15, %v1311_v33, %v1315_v5  ;;  %v1526_v42 = vsel %vm10737_vm10, %v9205_v38, %v1525_v35  ;;  %v1527_v36 = vrot.slane %v1525_v35, 4  ;;  %v1518_v2 = vrot.slane %v12041_v50, 5  ;;  %14907 = vst [vmem:[#allocation13_spill] sm:$0xff] %v12096_v31  ;;  %v12108_v35 = vld [vmem:[#allocation2 + $0xc4] sm:$0xf]  ;;  %v12111_v19 = vpop.permute.xlu1 %4003 }
 0x184   : > { %v1326_v49 = vsel %vm10762_vm15, %v1321_v37, %v1325_v22  ;;  %v1521_v10 = vrot.slane %v12046_v23, 5  ;;  %v2947_v25 = vsel %vm14829_vm5, %v2909_v1, %v11783_v48  ;;  %1672 = vrot.lane.b32.xlu1 %v9237_v9, %s10648_s16  ;;  %v2945_v22 = vsel %vm14829_vm5, %v2906_v62, %v11829_v20  ;;  %v12098_v23 = vpop.permute.xlu0 %3921 }
 0x185   : > { %v9236_v5 = vcombine.low %v1316_v34, %v1326_v49  ;;  %v1529_v52 = vsel %vm10737_vm10, %v1527_v36, %v1528_v39  ;;  %v3606_v7 = vshrl.u32 %v12074_v29, 16  ;;  %v1519_v12 = vsel %vm10737_vm10, %v9204_v30, %v1518_v2  ;;  %9966 = vmatprep.mubr.msk.bf16.mxu0 %vm1850_vm7, %v2945_v22  ;;  %v12115_v30 = vld [vmem:[#allocation2 + $0xc8] sm:$0x1] }
 0x186   : > { %v9253_v48 = vcombine.low %v1526_v42, %v1529_v52  ;;  %v1520_v53 = vrot.slane %v1518_v2, 4  ;;  %v3609_v38 = vshll.u32 %v12074_v29, 16  ;;  %v3615_v20 = vshll.u32 %v12086_v51, 16  ;;  %9967 = vmatmul.mubr.msk.bf16.gmra.mrb[16].mxu0 %vm1850_vm7, %v2947_v25 }
 0x187   : > { %1670 = vrot.lane.b32.xlu0 %v9236_v5, %s10648_s16  ;;  %v3608_v33 = vrot.slane %v3606_v7, 4  ;;  %v3619_v1 = vshrl.u32 %v12086_v51, 16  ;;  %v3625_v62 = vshll.u32 %v12088_v18, 16  ;;  %v3582_v9 = vshrl.u32 %v12096_v31, 16 }
 0x188   : > { %v1522_v37 = vsel %vm10737_vm10, %v1520_v53, %v1521_v10  ;;  %v3611_v39 = vrot.slane %v3609_v38, 5  ;;  %v3585_v34 = vshll.u32 %v12096_v31, 16  ;;  %1752 = vrot.lane.b32.xlu1 %v9253_v48, %s10647_s15  ;;  %v3617_v36 = vrot.slane %v3615_v20, 5  ;;  %v3644_v48 = vld [vmem:[#allocation2 + $0xcc] sm:$0xe] }
 0x189   : > { %v9252_v42 = vcombine.low %v1519_v12, %v1522_v37  ;;  %v3621_v49 = vrot.slane %v3619_v1, 4  ;;  %v3627_v2 = vrot.slane %v3625_v62, 5  ;;  %v3584_v25 = vrot.slane %v3582_v9, 4  ;;  %v12126_v12 = vpop.permute.xlu0 %4001  ;;  %v10487_v62 = vld [vmem:[#allocation2 + $0x90] sm:$0xf] }
 0x18a   : > { %v3612_v5 = vor.u32 %v3611_v39, %v3608_v33  ;;  %v3587_v52 = vrot.slane %v3585_v34, 5  ;;  %v3591_v22 = vshll.u32 %v12108_v35, 16  ;;  %v3595_v7 = vshrl.u32 %v12108_v35, 16  ;;  %v10488_v37 = vld [vmem:[#allocation2 + $0x94] sm:$0xf]  ;;  %v12128_v47 = vpop.permute.xlu1 %3927 }
 0x18b   : > { %1750 = vrot.lane.b32.xlu0 %v9252_v42, %s10647_s15  ;;  %v3622_v10 = vor.u32 %v3621_v49, %v3617_v36  ;;  %v3601_v53 = vshll.u32 %v12115_v30, 16  ;;  %v4150_v38 = vsel %vm1883_vm8, %v11841_v44, 0  ;;  %v9299_v39 = vcombine.low %v10487_v62, %v10488_v37  ;;  %v10489_v49 = vld [vmem:[#allocation2 + $0x84] sm:$0xf]  ;;  %v10490_v31 = vld [vmem:[#allocation2 + $0x88] sm:$0xf] }
 0x18c   : > { %v3613_v20 = vrot.slane %v3612_v5, 4  ;;  %v3588_v1 = vor.u32 %v3587_v52, %v3584_v25  ;;  %v3593_v33 = vrot.slane %v3591_v22, 5  ;;  %9983 = vmatpush3.bf16.msra.mxu0 %v4150_v38  ;;  %v3597_v34 = vrot.slane %v3595_v7, 4 }
 0x18d   : > { %v3623_v9 = vrot.slane %v3622_v10, 4  ;;  %v3603_v42 = vrot.slane %v3601_v53, 5  ;;  %v9298_v50 = vcombine.low %v10489_v49, %v10490_v31  ;;  %v2915_v5 = vsel %vm14828_vm2, %v9299_v39, %v11836_v61  ;;  %v10493_v49 = vld [vmem:[#allocation2 + $0xac] sm:$0xf] }
 0x18e   : > { %v3618_v44 = vsel %vm10762_vm15, %v3613_v20, %v3617_v36  ;;  %v3589_v21 = vrot.slane %v3588_v1, 4  ;;  %v9370_v25 = vrot.slane %v3644_v48, 9  ;;  %v3598_v22 = vor.u32 %v3597_v34, %v3593_v33  ;;  %v12145_v1 = vpop.permute.xlu0 %3925  ;;  %v12160_v37 = vpop.permute.xlu1 %4007 }
 0x18f   : > { %v3628_v52 = vsel %vm10762_vm15, %v3623_v9, %v3627_v2  ;;  %v2912_v10 = vsel %vm14828_vm2, %v9298_v50, %v11852_v59  ;;  %v3800_v31 = vrot.slane %v12086_v51, 5  ;;  %v3803_v36 = vrot.slane %v12088_v18, 5  ;;  %v10492_v9 = vld [vmem:[#allocation2 + $0xa0] sm:$0xf] }
 0x190   : > { %v9402_v7 = vcombine.low %v3618_v44, %v3628_v52  ;;  %v3594_v53 = vsel %vm10762_vm15, %v3589_v21, %v3593_v33  ;;  %v9369_v38 = vrot.slane %v3643_v11, 9  ;;  %v3599_v20 = vrot.slane %v3598_v22, 4  ;;  %v10494_v44 = vld [vmem:[#allocation2 + $0xa8] sm:$0xf]  ;;  %v10495_v22 = vld [vmem:[#allocation2 + $0xb4] sm:$0xf] }
 0x191   : > { %v3801_v61 = vsel %vm10737_vm10, %v9370_v25, %v3800_v31  ;;  %v3802_v48 = vrot.slane %v3800_v31, 4  ;;  %v3793_v2 = vrot.slane %v12108_v35, 5  ;;  %v3796_v59 = vrot.slane %v12115_v30, 5 }
 0x192   : > { %3947 = vrot.lane.b32.xlu1 %v9402_v7, %s10648_s16  ;;  %v2951_v50 = vsel %vm14829_vm5, %v2915_v5, %v11858_v54  ;;  %v2949_v21 = vsel %vm14829_vm5, %v2912_v10, %v11898_v56  ;;  %v3604_v11 = vsel %vm10762_vm15, %v3599_v20, %v3603_v42  ;;  %v10491_v54 = vld [vmem:[#allocation2 + $0x9c] sm:$0xf]  ;;  %v9301_v5 = vcombine.low %v10494_v44, %v10493_v49  ;;  %v10496_v10 = vld [vmem:[#allocation2 + $0xb8] sm:$0xf]  ;;  %v12171_v7 = vpop.permute.xlu0 %4005  ;;  %v10507_v49 = vld [vmem:[#allocation2 + $0x60] sm:$0xf] }
 0x193   : > { %v3804_v18 = vsel %vm10737_vm10, %v3802_v48, %v3803_v36  ;;  %v3794_v33 = vsel %vm10737_vm10, %v9369_v38, %v3793_v2  ;;  %v3795_v62 = vrot.slane %v3793_v2, 4  ;;  %9970 = vmatprep.mubr.msk.bf16.mxu0 %vm1850_vm7, %v2949_v21  ;;  %v9401_v30 = vcombine.low %v3594_v53, %v3604_v11  ;;  %v10498_v48 = vld [vmem:[#allocation2 + $0xc4] sm:$0xf] }
 0x194   : > { %v9418_v39 = vcombine.low %v3801_v61, %v3804_v18  ;;  %v9300_v34 = vcombine.low %v10491_v54, %v10492_v9  ;;  %9971 = vmatmul.mubr.msk.bf16.gmra.mrb[20].mxu0 %vm1850_vm7, %v2951_v50  ;;  %v9302_v31 = vcombine.low %v10495_v22, %v10496_v10  ;;  %v2921_v36 = vsel %vm14828_vm2, %v9301_v5, %v11906_v28  ;;  %v10497_v61 = vld [vmem:[#allocation2 + $0xc0] sm:$0xf]  ;;  %v10500_v28 = vld [vmem:[#allocation2 + $0x1c] sm:$0xf]  ;;  %v10503_v9 = vld [vmem:[#allocation2 + $0x30] sm:$0xf] }
 0x195   : > { %v3797_v56 = vsel %vm10737_vm10, %v3795_v62, %v3796_v59  ;;  %3945 = vrot.lane.b32.xlu0 %v9401_v30, %s10648_s16  ;;  %v9303_v2 = vcombine.low %v10497_v61, %v10498_v48  ;;  %v10499_v59 = vld [vmem:[#allocation2 + $0x18] sm:$0xf]  ;;  %v10501_v30 = vld [vmem:[#allocation2 + $0x24] sm:$0xf]  ;;  %v10512_v48 = vld [vmem:[#allocation2 + $0x4c] sm:$0xf] }
 0x196   : > { %4027 = vrot.lane.b32.xlu1 %v9418_v39, %s10647_s15  ;;  %v9417_v42 = vcombine.low %v3794_v33, %v3797_v56  ;;  %v2918_v25 = vsel %vm14828_vm2, %v9300_v34, %v11920_v13  ;;  %v2955_v13 = vsel %vm14829_vm5, %v2921_v36, %v11924_v4  ;;  %v9371_v50 = vcombine.low %v10499_v59, %v10500_v28  ;;  %v10502_v39 = vld [vmem:[#allocation2 + $0x28] sm:$0xf]  ;;  %v10505_v56 = vld [vmem:[#allocation2 + $0x6c] sm:$0xf] }
 0x197   : > { %v2953_v52 = vsel %vm14829_vm5, %v2918_v25, %v11955_v41  ;;  %v12174_v53 = vpop.permute.xlu1 %3931  ;;  %v2924_v41 = vsel %vm14828_vm2, %v9302_v31, %v11987_v55  ;;  %v9386_v4 = vcombine.low %v12074_v29, %v12086_v51  ;;  %v2927_v55 = vsel %vm14828_vm2, %v9303_v2, %v11965_v6  ;;  %v10504_v6 = vld [vmem:[#allocation2 + $0x34] sm:$0xf] }
 0x198   : > { %9974 = vmatprep.mubr.msk.bf16.mxu0 %vm1850_vm7, %v2953_v52  ;;  %v2957_v38 = vsel %vm14829_vm5, %v2924_v41, %v12000_v63  ;;  %v2959_v63 = vsel %vm14829_vm5, %v2927_v55, %v11989_v16  ;;  %v4031_v11 = vsel %vm14828_vm2, %v9371_v50, %v12043_v27  ;;  %v9372_v54 = vcombine.low %v10501_v30, %v10502_v39  ;;  %v10506_v16 = vld [vmem:[#allocation2 + $0x70] sm:$0xf]  ;;  %v10508_v27 = vld [vmem:[#allocation2 + $0x64] sm:$0xf]  ;;  %v10509_v41 = vld [vmem:[#allocation2 + $0x3c] sm:$0xf] }
 0x199   : > { %4025 = vrot.lane.b32.xlu0 %v9417_v42, %s10647_s15  ;;  %v12187_v20 = vpop.permute.xlu0 %3929  ;;  %v4078_v33 = vsel %vm14829_vm5, %v4031_v11, %v12060_v57  ;;  %v9373_v34 = vcombine.low %v10503_v9, %v10504_v6  ;;  %v9215_v42 = vcombine.low %v10505_v56, %v10506_v16  ;;  %v9214_v44 = vcombine.low %v10507_v49, %v10508_v27  ;;  %v10514_v11 = vld [vmem:[#allocation2 + $0x58] sm:$0xf]  ;;  %v10516_v30 = vld [vmem:[#allocation2 + $0x64] sm:$0xf]  ;;  %v10520_v49 = vld [vmem:[#allocation2 + $0x70] sm:$0xf] }
 0x19a   : > { %v4034_v57 = vsel %vm14828_vm2, %v9372_v54, %v12013_v26  ;;  %v10517_v6 = vld [vmem:[#allocation2 + $0x78] sm:$0xf] }
 0x19b   : > { %v12189_v21 = vpop.permute.xlu1 %4011  ;;  %v4080_v52 = vsel %vm14829_vm5, %v4034_v57, %v12053_v0  ;;  %v4037_v22 = vsel %vm14828_vm2, %v9373_v34, %v12098_v23  ;;  %v10511_v23 = vld [vmem:[#allocation2 + $0x48] sm:$0xf]  ;;  %v10518_v34 = vld [vmem:[#allocation2 + $0x7c] sm:$0xf] }
 0x19c   : > { %9975 = vmatmul.mubr.msk.bf16.gmra.mrb[24].mxu0 %vm1850_vm7, %v2955_v13  ;;  %v4082_v10 = vsel %vm14829_vm5, %v4037_v22, %v12126_v12  ;;  %v9375_v2 = vcombine.low %v10511_v23, %v10512_v48  ;;  %v9379_v56 = vcombine.low %v10517_v6, %v10518_v34  ;;  %v10524_v22 = vld [vmem:[#allocation2 + $0x7c] sm:$0xf] }
 0x19d   : > { %9978 = vmatprep.mubr.msk.bf16.mxu0 %vm1850_vm7, %v2957_v38  ;;  %v4010_v18 = vpop.permute.xlu0 %4009  ;;  %v10510_v38 = vld [vmem:[#allocation2 + $0x40] sm:$0xf] }
 0x19e   : > { %v9374_v0 = vcombine.low %v10509_v41, %v10510_v38  ;;  %v4043_v28 = vsel %vm14828_vm2, %v9375_v2, %v12145_v1 }
 0x19f   : > { %v4086_v50 = vsel %vm14829_vm5, %v4043_v28, %v12171_v7 }
 0x1a0   : > { %v4040_v12 = vsel %vm14828_vm2, %v9374_v0, %v12069_v58 }
 0x1a1   : > { %v4084_v59 = vsel %vm14829_vm5, %v4040_v12, %v12111_v19  ;;  %v9382_v12 = vcombine.low %v11789_v8, %v11803_v24  ;;  %v9219_v8 = vcombine.low %v11867_v43, %v11875_v40  ;;  %v9218_v24 = vcombine.low %v11896_v60, %v11904_v32  ;;  %v14908_v40 = vld [vmem:[#allocation10_spill] sm:$0xff]  ;;  %v14909_v60 = vld [vmem:[#allocation7_spill] sm:$0xff] }
 0x1a2   : > { %v9384_v43 = vcombine.low %v11937_v17, %v11951_v15  ;;  %v9383_v32 = vcombine.low %v14909_v60, %v14908_v40  ;;  %v14910_v17 = vld [vmem:[#allocation11_spill] sm:$0xff]  ;;  %v14911_v15 = vld [vmem:[#allocation8_spill] sm:$0xff] }
 0x1a3   : > { %v1661_v62 = vpop.permute.xlu1 %1660 }
 0x1a4   : > { %9979 = vmatmul.mubr.msk.bf16.gmra.mrb[28].mxu0 %vm1850_vm7, %v2959_v63  ;;  %v1784_v31 = vsel %vm14828_vm2, %v9215_v42, %v1661_v62  ;;  %v10513_v63 = vld [vmem:[#allocation2 + $0x54] sm:$0xf]  ;;  %v10515_v62 = vld [vmem:[#allocation2 + $0x60] sm:$0xf]  ;;  %v10519_v42 = vld [vmem:[#allocation2 + $0x6c] sm:$0xf] }
 0x1a5   : > { %9984 = vmatprep.mubr.msk.bf16.mxu0 %vm1850_vm7, %v4078_v33  ;;  %v9376_v33 = vcombine.low %v10513_v63, %v10514_v11  ;;  %v9377_v58 = vcombine.low %v10515_v62, %v10516_v30 }
 0x1a7   : > { %v1659_v5 = vpop.permute.xlu0 %1658  ;;  %v1741_v25 = vpop.permute.xlu1 %1740  ;;  %v4046_v19 = vsel %vm14828_vm2, %v9376_v33, %v12128_v47  ;;  %v4049_v7 = vsel %vm14828_vm2, %v9377_v58, %v12187_v20  ;;  %v9378_v47 = vcombine.low %v10519_v42, %v10520_v49 }
 0x1a8   : > { %v1781_v36 = vsel %vm14828_vm2, %v9214_v44, %v1659_v5  ;;  %v1823_v26 = vsel %vm14829_vm5, %v1784_v31, %v1741_v25  ;;  %v4088_v1 = vsel %vm14829_vm5, %v4046_v19, %v12160_v37  ;;  %v4090_v9 = vsel %vm14829_vm5, %v4049_v7, %v4010_v18  ;;  %v10521_v18 = vld [vmem:[#allocation2 + $0x84] sm:$0xf]  ;;  %v10522_v5 = vld [vmem:[#allocation2 + $0x88] sm:$0xf] }
 0x1a9   : > { %v4052_v37 = vsel %vm14828_vm2, %v9378_v47, %v12174_v53  ;;  %v9217_v57 = vcombine.low %v10521_v18, %v10522_v5 }
 0x1aa   : > { %v4092_v25 = vsel %vm14829_vm5, %v4052_v37, %v12189_v21  ;;  %v14913_v37 = vld [vmem:[#allocation9_spill] sm:$0xff] }
 0x1ab   : > { %v1739_v13 = vpop.permute.xlu0 %1738 }
 0x1ac   : > { %9985 = vmatmul.mubr.msk.bf16.vlgmr.msra.gmra.mrb[0].mxu0 %vm1850_vm7, %v4080_v52  ;;  %v1821_v61 = vsel %vm14829_vm5, %v1781_v36, %v1739_v13  ;;  %v10523_v52 = vld [vmem:[#allocation2 + $0x78] sm:$0xf]  ;;  %v10526_v13 = vld [vmem:[#allocation2 + $0x88] sm:$0xf] }
 0x1ad   : > { %9988 = vmatprep.mubr.msk.bf16.mxu0 %vm1850_vm7, %v4082_v10  ;;  %9932 = vmatprep.mubr.msk.bf16.mxu1 %vm1850_vm7, %v1821_v61  ;;  %v9216_v10 = vcombine.low %v10523_v52, %v10524_v22 }
 0x1ae   : > { %9933 = vmatmul.mubr.msk.bf16.vlgmr.msra.gmra.mrb[0].mxu1 %vm1850_vm7, %v1823_v26  ;;  %v10525_v26 = vld [vmem:[#allocation2 + $0x84] sm:$0xf] }
 0x1af   : > { %v9380_v53 = vcombine.low %v10525_v26, %v10526_v13 }
 0x1b1   : > { %v3936_v55 = vpop.permute.xlu1 %3935 }
 0x1b2   : > { %v4058_v23 = vsel %vm14828_vm2, %v9380_v53, %v3936_v55 }
 0x1b4   : > { %9989 = vmatmul.mubr.msk.bf16.gmra.mrb[4].mxu0 %vm1850_vm7, %v4084_v59  ;;  %v3934_v39 = vpop.permute.xlu0 %3933  ;;  %v9381_v59 = vcombine.low %v11807_v46, %v11815_v3 }
 0x1b5   : > { %9992 = vmatprep.mubr.msk.bf16.mxu0 %vm1850_vm7, %v4086_v50  ;;  %v4016_v54 = vpop.permute.xlu1 %4015  ;;  %v4055_v44 = vsel %vm14828_vm2, %v9379_v56, %v3934_v39 }
 0x1b6   : > { %v4096_v48 = vsel %vm14829_vm5, %v4058_v23, %v4016_v54 }
 0x1b8   : > { %v4014_v16 = vpop.permute.xlu0 %4013 }
 0x1b9   : > { %v4094_v20 = vsel %vm14829_vm5, %v4055_v44, %v4014_v16  ;;  %v14912_v44 = vld [vmem:[#allocation12_spill] sm:$0xff] }
 0x1bc   : > { %9993 = vmatmul.mubr.msk.bf16.gmra.mrb[8].mxu0 %vm1850_vm7, %v4088_v1 }
 0x1bd   : > { %9996 = vmatprep.mubr.msk.bf16.mxu0 %vm1850_vm7, %v4090_v9 }
 0x1bf   : > { %v1665_v27 = vpop.permute.xlu1 %1664 }
 0x1c0   : > { %v1790_v41 = vsel %vm14828_vm2, %v9217_v57, %v1665_v27  ;;  %v9221_v27 = vcombine.low %v14911_v15, %v14910_v17 }
 0x1c3   : > { %v1663_v31 = vpop.permute.xlu0 %1662  ;;  %v1745_v36 = vpop.permute.xlu1 %1744 }
 0x1c4   : > { %9997 = vmatmul.mubr.msk.bf16.gmra.mrb[12].mxu0 %vm1850_vm7, %v4092_v25  ;;  %v1787_v38 = vsel %vm14828_vm2, %v9216_v10, %v1663_v31  ;;  %v1827_v0 = vsel %vm14829_vm5, %v1790_v41, %v1745_v36  ;;  %v14914_v36 = vld [vmem:[#allocation13_spill] sm:$0xff] }
 0x1c5   : > { %10000 = vmatprep.mubr.msk.bf16.mxu0 %vm1850_vm7, %v4094_v20  ;;  %v9220_v20 = vcombine.low %v14913_v37, %v14912_v44  ;;  %v9385_v26 = vcombine.low %v14914_v36, %v12108_v35  ;;  %v12309_v35 = vld [vmem:[%s14809_s2] ss:$0 sm:$0xff] }
 0x1c7   : > { %v1743_v61 = vpop.permute.xlu0 %1742 }
 0x1c8   : > { %v1825_v21 = vsel %vm14829_vm5, %v1787_v38, %v1743_v61 }
 0x1c9   : > { %9936 = vmatprep.mubr.msk.bf16.mxu1 %vm1850_vm7, %v1825_v21 }
 0x1ca   : > { %9937 = vmatmul.mubr.msk.bf16.gmra.mrb[4].mxu1 %vm1850_vm7, %v1827_v0 }
 0x1cc   : > { %10001 = vmatmul.mubr.msk.bf16.gmra.mrb[16].mxu0 %vm1850_vm7, %v4096_v48 }
 0x1ce   : > { %v3940_v2 = vpop.permute.xlu1 %3939 }
 0x1cf   : > { %v4064_v63 = vsel %vm14828_vm2, %v9382_v12, %v3940_v2 }
 0x1d1   : > { %v3938_v28 = vpop.permute.xlu0 %3937 }
 0x1d2   : > { %v4020_v50 = vpop.permute.xlu1 %4019  ;;  %v4061_v11 = vsel %vm14828_vm2, %v9381_v59, %v3938_v28 }
 0x1d3   : > { %v4100_v55 = vsel %vm14829_vm5, %v4064_v63, %v4020_v50 }
 0x1d5   : > { %v4018_v33 = vpop.permute.xlu0 %4017 }
 0x1d6   : > { %v4098_v62 = vsel %vm14829_vm5, %v4061_v11, %v4018_v33 }
 0x1d7   : > { %10004 = vmatprep.mubr.msk.bf16.mxu0 %vm1850_vm7, %v4098_v62 }
 0x1d8   : > { %10005 = vmatmul.mubr.msk.bf16.gmra.mrb[20].mxu0 %vm1850_vm7, %v4100_v55 }
 0x1db   : > { %v1669_v30 = vpop.permute.xlu1 %1668 }
 0x1dc   : > { %v1796_v58 = vsel %vm14828_vm2, %v9219_v8, %v1669_v30 }
 0x1de   : > { %v1667_v46 = vpop.permute.xlu0 %1666 }
 0x1df   : > { %v1749_v3 = vpop.permute.xlu1 %1748  ;;  %v1793_v39 = vsel %vm14828_vm2, %v9218_v24, %v1667_v46 }
 0x1e0   : > { %v1831_v19 = vsel %vm14829_vm5, %v1796_v58, %v1749_v3 }
 0x1e2   : > { %v1747_v54 = vpop.permute.xlu0 %1746 }
 0x1e3   : > { %v1829_v1 = vsel %vm14829_vm5, %v1793_v39, %v1747_v54 }
 0x1e4   : > { %9940 = vmatprep.mubr.msk.bf16.mxu1 %vm1850_vm7, %v1829_v1 }
 0x1e5   : > { %9941 = vmatmul.mubr.msk.bf16.gmra.mrb[8].mxu1 %vm1850_vm7, %v1831_v19 }
 0x1e9   : > { %v3944_v7 = vpop.permute.xlu1 %3943 }
 0x1ea   : > { %v4070_v34 = vsel %vm14828_vm2, %v9384_v43, %v3944_v7 }
 0x1ec   : > { %v3942_v9 = vpop.permute.xlu0 %3941 }
 0x1ed   : > { %v4024_v6 = vpop.permute.xlu1 %4023  ;;  %v4067_v56 = vsel %vm14828_vm2, %v9383_v32, %v3942_v9 }
 0x1ee   : > { %v4104_v16 = vsel %vm14829_vm5, %v4070_v34, %v4024_v6 }
 0x1f0   : > { %v4022_v42 = vpop.permute.xlu0 %4021 }
 0x1f1   : > { %v4102_v49 = vsel %vm14829_vm5, %v4067_v56, %v4022_v42 }
 0x1f2   : > { %10008 = vmatprep.mubr.msk.bf16.mxu0 %vm1850_vm7, %v4102_v49 }
 0x1f3   : > { %10009 = vmatmul.mubr.msk.bf16.gmra.mrb[24].mxu0 %vm1850_vm7, %v4104_v16 }
 0x1f6   : > { %v1673_v47 = vpop.permute.xlu1 %1672 }
 0x1f7   : > { %v1802_v57 = vsel %vm14828_vm2, %v9221_v27, %v1673_v47 }
 0x1f9   : > { %v1671_v18 = vpop.permute.xlu0 %1670 }
 0x1fa   : > { %v1753_v5 = vpop.permute.xlu1 %1752  ;;  %v1799_v25 = vsel %vm14828_vm2, %v9220_v20, %v1671_v18 }
 0x1fb   : > { %v1835_v52 = vsel %vm14829_vm5, %v1802_v57, %v1753_v5 }
 0x1fd   : > { %v1751_v22 = vpop.permute.xlu0 %1750 }
 0x1fe   : > { %v1833_v10 = vsel %vm14829_vm5, %v1799_v25, %v1751_v22 }
 0x1ff   : > { %9944 = vmatprep.mubr.msk.bf16.mxu1 %vm1850_vm7, %v1833_v10 }
 0x200   : > { %9945 = vmatmul.mubr.msk.bf16.gmra.mrb[12].mxu1 %vm1850_vm7, %v1835_v52 }
 0x204   : > { %v3948_v31 = vpop.permute.xlu1 %3947 }
 0x205   : > { %v4076_v41 = vsel %vm14828_vm2, %v9386_v4, %v3948_v31 }
 0x207   : > { %v3946_v13 = vpop.permute.xlu0 %3945 }
 0x208   : > { %v4028_v53 = vpop.permute.xlu1 %4027  ;;  %v4073_v38 = vsel %vm14828_vm2, %v9385_v26, %v3946_v13 }
 0x209   : > { %v4108_v0 = vsel %vm14829_vm5, %v4076_v41, %v4028_v53 }
 0x20b   : > { %v4026_v61 = vpop.permute.xlu0 %4025 }
 0x20c   : > { %v4106_v21 = vsel %vm14829_vm5, %v4073_v38, %v4026_v61 }
 0x20d   : > { %10012 = vmatprep.mubr.msk.bf16.mxu0 %vm1850_vm7, %v4106_v21 }
 0x20e   : > { %10013 = vmatmul.mubr.msk.bf16.gmra.mrb[28].mxu0 %vm1850_vm7, %v4108_v0 }
 0x27f   : > { %v9986_v23 = vpop.f32.mrb[0].mxu0 }
 0x280   : > { %v4186_v29 = vpop.f32.mrb[1].mxu0  ;;  %v12312_v51 = vadd.f32 %v9986_v23, %v12309_v35 }
 0x281   : > { %v12315_v4 = vadd.f32 %v12309_v35, %v4186_v29  ;;  %v9987_v48 = vpop.f32.mrb[2].mxu0  ;;  %v12325_v50 = vpop.f32.mrb[0].mxu1 }
 0x282   : > { %v4189_v2 = vpop.f32.mrb[3].mxu0  ;;  %v12320_v59 = vadd.f32 %v9987_v48, %v12309_v35  ;;  %v12327_v63 = vpop.f32.mrb[1].mxu1  ;;  %v4416_v11 = vmul.f32 %v12312_v51, %v12312_v51  ;;  %v4348_v46 = vsel %vm14829_vm5, %v12312_v51, 0.0 }
 0x283   : > { %v4414_v12 = vmul.f32 %v12315_v4, %v12315_v4  ;;  %v12323_v28 = vadd.f32 %v12309_v35, %v4189_v2  ;;  %v4345_v55 = vsel %vm14829_vm5, %v12315_v4, 0.0  ;;  %v12337_v30 = vpop.f32.mrb[2].mxu1 }
 0x284   : > { %v12339_v24 = vpop.f32.mrb[3].mxu1  ;;  %v4417_v58 = vmul.f32 %v12320_v59, %v12320_v59  ;;  %v4449_v43 = vsel %vm14829_vm5, %v4416_v11, 0.0  ;;  %v4350_v40 = vsel %vm14829_vm5, %v12320_v59, 0.0 }
 0x285   : > { %v4346_v33 = vsel %vm14829_vm5, %v12323_v28, 0.0  ;;  %v4415_v62 = vmul.f32 %v12323_v28, %v12323_v28  ;;  %v4446_v3 = vsel %vm14829_vm5, %v4414_v12, 0.0 }
 0x286   : > { %v4347_v8 = vadd.f32 %v4346_v33, %v4345_v55  ;;  %v4451_v56 = vsel %vm14829_vm5, %v4417_v58, 0.0 }
 0x287   : > { %v4447_v39 = vsel %vm14829_vm5, %v4415_v62, 0.0  ;;  %v9990_v19 = vpop.f32.mrb[4].mxu0 }
 0x288   : > { %v4349_v54 = vadd.f32 %v4348_v46, %v4347_v8  ;;  %v4448_v1 = vadd.f32 %v4447_v39, %v4446_v3  ;;  %v4202_v7 = vpop.f32.mrb[5].mxu0  ;;  %v12362_v47 = vadd.f32 %v9990_v19, %v12309_v35 }
 0x289   : > { %v12351_v60 = vadd.f32 %v12309_v35, %v4202_v7  ;;  %v9991_v32 = vpop.f32.mrb[6].mxu0  ;;  %v1994_v7 = vadd.f32 %v12325_v50, %v12309_v35 }
 0x28a   : > { %v4450_v9 = vadd.f32 %v4449_v43, %v4448_v1  ;;  %v4351_v6 = vadd.f32 %v4350_v40, %v4349_v54  ;;  %v4205_v34 = vpop.f32.mrb[7].mxu0  ;;  %v4420_v57 = vmul.f32 %v12362_v47, %v12362_v47  ;;  %v12372_v25 = vadd.f32 %v9991_v32, %v12309_v35 }
 0x28b   : > { %v4352_v16 = vsel %vm14829_vm5, %v12351_v60, 0.0  ;;  %v4418_v42 = vmul.f32 %v12351_v60, %v12351_v60  ;;  %v12359_v49 = vadd.f32 %v12309_v35, %v4205_v34  ;;  %v4356_v36 = vsel %vm14829_vm5, %v12362_v47, 0.0 }
 0x28c   : > { %v4353_v17 = vadd.f32 %v4352_v16, %v4351_v6  ;;  %v4452_v15 = vadd.f32 %v4451_v56, %v4450_v9  ;;  %v4457_v41 = vsel %vm14829_vm5, %v4420_v57, 0.0  ;;  %v4421_v38 = vmul.f32 %v12372_v25, %v12372_v25 }
 0x28d   : > { %v4453_v27 = vsel %vm14829_vm5, %v4418_v42, 0.0  ;;  %v4354_v44 = vsel %vm14829_vm5, %v12359_v49, 0.0  ;;  %v4419_v20 = vmul.f32 %v12359_v49, %v12359_v49  ;;  %v4358_v61 = vsel %vm14829_vm5, %v12372_v25, 0.0 }
 0x28e   : > { %v4454_v37 = vadd.f32 %v4453_v27, %v4452_v15  ;;  %v4355_v18 = vadd.f32 %v4354_v44, %v4353_v17  ;;  %v4459_v2 = vsel %vm14829_vm5, %v4421_v38, 0.0  ;;  %v1986_v9 = vadd.f32 %v12309_v35, %v12327_v63  ;;  %v5230_v38 = vld [vmem:[#allocation2 + $0x4] sm:$0xf] }
 0x28f   : > { %v9994_v5 = vpop.f32.mrb[8].mxu0  ;;  %v4455_v52 = vsel %vm14829_vm5, %v4419_v20, 0.0  ;;  %v1997_v16 = vadd.f32 %v12337_v30, %v12309_v35  ;;  %v1989_v27 = vadd.f32 %v12309_v35, %v12339_v24 }
 0x290   : > { %v4218_v22 = vpop.f32.mrb[9].mxu0  ;;  %v4456_v10 = vadd.f32 %v4455_v52, %v4454_v37  ;;  %v4357_v53 = vadd.f32 %v4356_v36, %v4355_v18  ;;  %v12399_v58 = vadd.f32 %v9994_v5, %v12309_v35 }
 0x291   : > { %v9995_v31 = vpop.f32.mrb[10].mxu0  ;;  %v12378_v26 = vadd.f32 %v12309_v35, %v4218_v22 }
 0x292   : > { %v4221_v13 = vpop.f32.mrb[11].mxu0  ;;  %v4458_v0 = vadd.f32 %v4457_v41, %v4456_v10  ;;  %v4359_v29 = vadd.f32 %v4358_v61, %v4357_v53  ;;  %v12407_v40 = vadd.f32 %v9995_v31, %v12309_v35  ;;  %v4424_v56 = vmul.f32 %v12399_v58, %v12399_v58  ;;  %v5229_v41 = vld [vmem:[#allocation2] sm:$0xf]  ;;  %v5261_v61 = vld [vmem:[#allocation2 + $0x8] sm:$0x1] }
 0x293   : > { %v4422_v21 = vmul.f32 %v12378_v26, %v12378_v26  ;;  %v12388_v23 = vadd.f32 %v12309_v35, %v4221_v13  ;;  %v4360_v12 = vsel %vm14829_vm5, %v12378_v26, 0.0  ;;  %v4364_v63 = vsel %vm14829_vm5, %v12399_v58, 0.0 }
 0x294   : > { %v4460_v55 = vadd.f32 %v4459_v2, %v4458_v0  ;;  %v4361_v3 = vadd.f32 %v4360_v12, %v4359_v29  ;;  %v4425_v30 = vmul.f32 %v12407_v40, %v12407_v40  ;;  %v4465_v24 = vsel %vm14829_vm5, %v4424_v56, 0.0 }
 0x295   : > { %v4461_v62 = vsel %vm14829_vm5, %v4422_v21, 0.0  ;;  %v4423_v8 = vmul.f32 %v12388_v23, %v12388_v23  ;;  %v4362_v39 = vsel %vm14829_vm5, %v12388_v23, 0.0  ;;  %v4366_v10 = vsel %vm14829_vm5, %v12407_v40, 0.0 }
 0x296   : > { %v4462_v19 = vadd.f32 %v4461_v62, %v4460_v55  ;;  %v4363_v32 = vadd.f32 %v4362_v39, %v4361_v3  ;;  %v4467_v31 = vsel %vm14829_vm5, %v4425_v30, 0.0  ;;  %v5278_v21 = vshrl.u32 %v5229_v41, 16 }
 0x297   : > { %v9998_v48 = vpop.f32.mrb[12].mxu0  ;;  %v4463_v1 = vsel %vm14829_vm5, %v4423_v8, 0.0  ;;  %v5281_v29 = vshll.u32 %v5229_v41, 16  ;;  %v5287_v2 = vshll.u32 %v5230_v38, 16  ;;  %v5291_v62 = vshrl.u32 %v5230_v38, 16 }
 0x298   : > { %v4234_v11 = vpop.f32.mrb[13].mxu0  ;;  %v4464_v15 = vadd.f32 %v4463_v1, %v4462_v19  ;;  %v4365_v5 = vadd.f32 %v4364_v63, %v4363_v32  ;;  %v12444_v12 = vadd.f32 %v9998_v48, %v12309_v35  ;;  %v5280_v8 = vrot.slane %v5278_v21, 4 }
 0x299   : > { %v12393_v33 = vpop.f32.mrb[14].mxu0  ;;  %v12428_v57 = vadd.f32 %v12309_v35, %v4234_v11  ;;  %v5283_v3 = vrot.slane %v5281_v29, 5  ;;  %v5289_v39 = vrot.slane %v5287_v2, 5  ;;  %v5297_v19 = vshll.u32 %v5261_v61, 16 }
 0x29a   : > { %v4237_v46 = vpop.f32.mrb[15].mxu0  ;;  %v4466_v22 = vadd.f32 %v4465_v24, %v4464_v15  ;;  %v4367_v36 = vadd.f32 %v4366_v10, %v4365_v5  ;;  %v5730_v41 = vrot.slane %v5261_v61, 5  ;;  %v4428_v21 = vmul.f32 %v12444_v12, %v12444_v12 }
 0x29b   : > { %v4368_v13 = vsel %vm14829_vm5, %v12428_v57, 0.0  ;;  %v4426_v53 = vmul.f32 %v12428_v57, %v12428_v57  ;;  %v12441_v0 = vadd.f32 %v12309_v35, %v4237_v46  ;;  %v12470_v29 = vadd.f32 %v12393_v33, %v12309_v35 }
 0x29c   : > { %v4468_v11 = vadd.f32 %v4467_v31, %v4466_v22  ;;  %v4369_v1 = vadd.f32 %v4368_v13, %v4367_v36  ;;  %v5727_v36 = vrot.slane %v5230_v38, 5  ;;  %v4473_v33 = vsel %vm14829_vm5, %v4428_v21, 0.0 }
 0x29d   : > { %v9938_v54 = vpop.f32.mrb[4].mxu1  ;;  %v4370_v15 = vsel %vm14829_vm5, %v12441_v0, 0.0 }
 0x29e   : > { %v2001_v43 = vpop.f32.mrb[5].mxu1  ;;  %v2010_v55 = vadd.f32 %v9938_v54, %v12309_v35 }
 0x29f   : > { %v10002_v6 = vpop.f32.mrb[16].mxu0  ;;  %v9939_v34 = vpop.f32.mrb[6].mxu1  ;;  %v2002_v46 = vadd.f32 %v12309_v35, %v2001_v43 }
 0x2a0   : > { %v12415_v42 = vadd.f32 %v10002_v6, %v1994_v7  ;;  %v4250_v17 = vpop.f32.mrb[17].mxu0  ;;  %v2004_v50 = vpop.f32.mrb[7].mxu1  ;;  %v4469_v7 = vsel %vm14829_vm5, %v4426_v53, 0.0  ;;  %v4427_v6 = vmul.f32 %v12441_v0, %v12441_v0  ;;  %v2013_v48 = vadd.f32 %v9939_v34, %v12309_v35 }
 0x2a1   : > { %v12419_v44 = vadd.f32 %v4250_v17, %v1986_v9  ;;  %v10003_v37 = vpop.f32.mrb[18].mxu0  ;;  %v5293_v9 = vrot.slane %v5291_v62, 4  ;;  %v5661_v17 = vld [vmem:[#allocation2] sm:$0xe]  ;;  %v5299_v34 = vrot.slane %v5297_v19, 5  ;;  %v4371_v53 = vadd.f32 %v4370_v15, %v4369_v1 }
 0x2a2   : > { %v12423_v20 = vadd.f32 %v10003_v37, %v1997_v16  ;;  %v4253_v18 = vpop.f32.mrb[19].mxu0  ;;  %v5284_v16 = vor.u32 %v5283_v3, %v5280_v8  ;;  %v9470_v31 = vrot.slane %v5661_v17, 9  ;;  %v4471_v13 = vsel %vm14829_vm5, %v4427_v6, 0.0 }
 0x2a3   : > { %v12430_v52 = vadd.f32 %v4253_v18, %v1989_v27  ;;  %v2005_v27 = vadd.f32 %v12309_v35, %v2004_v50  ;;  %v5294_v63 = vor.u32 %v5293_v9, %v5289_v39  ;;  %v4470_v18 = vadd.f32 %v4469_v7, %v4468_v11 }
 0x2a4   : > { %v5285_v24 = vrot.slane %v5284_v16, 4  ;;  %v5728_v38 = vsel %vm10737_vm10, %v9470_v31, %v5727_v36  ;;  %v5729_v62 = vrot.slane %v5727_v36, 4  ;;  %v4372_v8 = vsel %vm14829_vm5, %v12444_v12, 0.0 }
 0x2a5   : > { %v5295_v10 = vrot.slane %v5294_v63, 4  ;;  %v4472_v11 = vadd.f32 %v4471_v13, %v4470_v18  ;;  %v4373_v61 = vadd.f32 %v4372_v8, %v4371_v53  ;;  %v4374_v7 = vsel %vm14829_vm5, %v12470_v29, 0.0 }
 0x2a6   : > { %v5290_v50 = vsel %vm10762_vm15, %v5285_v24, %v5289_v39  ;;  %v5731_v3 = vsel %vm10737_vm10, %v5729_v62, %v5730_v41  ;;  %v4429_v39 = vmul.f32 %v12470_v29, %v12470_v29  ;;  %v4378_v18 = vsel %vm14829_vm5, %v12430_v52, 0.0 }
 0x2a7   : > { %v5300_v2 = vsel %vm10762_vm15, %v5295_v10, %v5299_v34  ;;  %v9518_v19 = vcombine.low %v5728_v38, %v5731_v3  ;;  %v4474_v1 = vadd.f32 %v4473_v33, %v4472_v11  ;;  %v4375_v9 = vadd.f32 %v4374_v7, %v4373_v61 }
 0x2a8   : > { %v4432_v10 = vmul.f32 %v12415_v42, %v12415_v42  ;;  %v4380_v36 = vsel %vm14829_vm5, %v12415_v42, 0.0  ;;  %v4382_v38 = vsel %vm14829_vm5, %v12423_v20, 0.0 }
 0x2aa   : > { %v4481_v53 = vsel %vm14829_vm5, %v4432_v10, 0.0 }
 0x2ab   : > { %v10006_v32 = vpop.f32.mrb[20].mxu0 }
 0x2ac   : > { %v12452_v56 = vadd.f32 %v10006_v32, %v2010_v55  ;;  %v4266_v54 = vpop.f32.mrb[21].mxu0  ;;  %v9502_v55 = vcombine.low %v5290_v50, %v5300_v2  ;;  %v4433_v50 = vmul.f32 %v12423_v20, %v12423_v20 }
 0x2ad   : > { %v12457_v37 = vadd.f32 %v4266_v54, %v2002_v46  ;;  %v10007_v43 = vpop.f32.mrb[22].mxu0  ;;  %v4430_v46 = vmul.f32 %v12419_v44, %v12419_v44  ;;  %v4376_v54 = vsel %vm14829_vm5, %v12419_v44, 0.0 }
 0x2ae   : > { %v12459_v30 = vadd.f32 %v10007_v43, %v2013_v48  ;;  %v4269_v5 = vpop.f32.mrb[23].mxu0  ;;  %5949 = vrot.lane.b32.xlu0 %v9502_v55, %s10647_s15  ;;  %v4475_v48 = vsel %vm14829_vm5, %v4429_v39, 0.0  ;;  %v4431_v43 = vmul.f32 %v12430_v52, %v12430_v52  ;;  %v4377_v63 = vadd.f32 %v4376_v54, %v4375_v9 }
 0x2af   : > { %v12461_v22 = vadd.f32 %v4269_v5, %v2005_v27  ;;  %v4476_v17 = vadd.f32 %v4475_v48, %v4474_v1  ;;  %v4477_v27 = vsel %vm14829_vm5, %v4430_v46, 0.0  ;;  %v4434_v41 = vmul.f32 %v12457_v37, %v12457_v37 }
 0x2b0   : > { %v4479_v24 = vsel %vm14829_vm5, %v4431_v43, 0.0  ;;  %v4379_v34 = vadd.f32 %v4378_v18, %v4377_v63  ;;  %v4384_v62 = vsel %vm14829_vm5, %v12457_v37, 0.0  ;;  %v4483_v7 = vsel %vm14829_vm5, %v4433_v50, 0.0 }
 0x2b1   : > { %v4478_v5 = vadd.f32 %v4477_v27, %v4476_v17  ;;  %v4485_v46 = vsel %vm14829_vm5, %v4434_v41, 0.0  ;;  %v4386_v17 = vsel %vm14829_vm5, %v12461_v22, 0.0  ;;  %v4436_v63 = vmul.f32 %v12452_v56, %v12452_v56 }
 0x2b2   : > { %6029 = vrot.lane.b32.xlu0 %v9518_v19, %s10649_s25  ;;  %v4381_v13 = vadd.f32 %v4380_v36, %v4379_v34  ;;  %v4390_v41 = vsel %vm14829_vm5, %v12459_v30, 0.0 }
 0x2b3   : > { %v4480_v31 = vadd.f32 %v4479_v24, %v4478_v5  ;;  %v4388_v5 = vsel %vm14829_vm5, %v12452_v56, 0.0  ;;  %v4489_v10 = vsel %vm14829_vm5, %v4436_v63, 0.0 }
 0x2b4   : > { %v4383_v33 = vadd.f32 %v4382_v38, %v4381_v13 }
 0x2b5   : > { %v4482_v2 = vadd.f32 %v4481_v53, %v4480_v31  ;;  %v4437_v31 = vmul.f32 %v12459_v30, %v12459_v30 }
 0x2b6   : > { %v4385_v48 = vadd.f32 %v4384_v62, %v4383_v33 }
 0x2b7   : > { %v4484_v54 = vadd.f32 %v4483_v7, %v4482_v2 }
 0x2b8   : > { %v9942_v32 = vpop.f32.mrb[8].mxu1  ;;  %v4387_v43 = vadd.f32 %v4386_v17, %v4385_v48 }
 0x2b9   : > { %v2017_v6 = vpop.f32.mrb[9].mxu1  ;;  %v2026_v21 = vadd.f32 %v9942_v32, %v12309_v35  ;;  %v4435_v32 = vmul.f32 %v12461_v22, %v12461_v22 }
 0x2ba   : > { %v9943_v16 = vpop.f32.mrb[10].mxu1  ;;  %v2018_v11 = vadd.f32 %v12309_v35, %v2017_v6  ;;  %v4389_v24 = vadd.f32 %v4388_v5, %v4387_v43 }
 0x2bb   : > { %v2020_v15 = vpop.f32.mrb[11].mxu1  ;;  %v2029_v8 = vadd.f32 %v9943_v16, %v12309_v35  ;;  %v4487_v27 = vsel %vm14829_vm5, %v4435_v32, 0.0 }
 0x2bc   : > { %v2021_v39 = vadd.f32 %v12309_v35, %v2020_v15  ;;  %v4486_v15 = vadd.f32 %v4485_v46, %v4484_v54 }
 0x2be   : > { %v4488_v18 = vadd.f32 %v4487_v27, %v4486_v15 }
 0x2c0   : > { %v4490_v53 = vadd.f32 %v4489_v10, %v4488_v18 }
 0x2c6   : > { %v10010_v55 = vpop.f32.mrb[24].mxu0 }
 0x2c7   : > { %v12514_v61 = vadd.f32 %v10010_v55, %v2026_v21  ;;  %v4282_v3 = vpop.f32.mrb[25].mxu0  ;;  %v4491_v55 = vsel %vm14829_vm5, %v4437_v31, 0.0 }
 0x2c8   : > { %v12517_v19 = vadd.f32 %v4282_v3, %v2018_v11  ;;  %v10011_v1 = vpop.f32.mrb[26].mxu0  ;;  %v4391_v11 = vadd.f32 %v4390_v41, %v4389_v24  ;;  %v4492_v3 = vadd.f32 %v4491_v55, %v4490_v53 }
 0x2c9   : > { %v12523_v9 = vadd.f32 %v10011_v1, %v2029_v8  ;;  %v4285_v6 = vpop.f32.mrb[27].mxu0  ;;  %v4440_v46 = vmul.f32 %v12514_v61, %v12514_v61 }
 0x2ca   : > { %v12525_v16 = vadd.f32 %v4285_v6, %v2021_v39  ;;  %v4438_v36 = vmul.f32 %v12517_v19, %v12517_v19  ;;  %v4392_v21 = vsel %vm14829_vm5, %v12517_v19, 0.0  ;;  %v4396_v6 = vsel %vm14829_vm5, %v12514_v61, 0.0 }
 0x2cb   : > { %v4393_v8 = vadd.f32 %v4392_v21, %v4391_v11  ;;  %v4497_v17 = vsel %vm14829_vm5, %v4440_v46, 0.0  ;;  %v4441_v15 = vmul.f32 %v12523_v9, %v12523_v9  ;;  %v4398_v10 = vsel %vm14829_vm5, %v12523_v9, 0.0 }
 0x2cc   : > { %v4493_v38 = vsel %vm14829_vm5, %v4438_v36, 0.0  ;;  %v4439_v62 = vmul.f32 %v12525_v16, %v12525_v16  ;;  %v4394_v33 = vsel %vm14829_vm5, %v12525_v16, 0.0 }
 0x2cd   : > { %v4494_v39 = vadd.f32 %v4493_v38, %v4492_v3  ;;  %v4395_v7 = vadd.f32 %v4394_v33, %v4393_v8 }
 0x2ce   : > { %v4495_v1 = vsel %vm14829_vm5, %v4439_v62, 0.0 }
 0x2cf   : > { %v4496_v32 = vadd.f32 %v4495_v1, %v4494_v39  ;;  %v4397_v48 = vadd.f32 %v4396_v6, %v4395_v7 }
 0x2d1   : > { %v4498_v63 = vadd.f32 %v4497_v17, %v4496_v32  ;;  %v4399_v53 = vadd.f32 %v4398_v10, %v4397_v48 }
 0x2d3   : > { %v9946_v34 = vpop.f32.mrb[12].mxu1 }
 0x2d4   : > { %v2033_v13 = vpop.f32.mrb[13].mxu1  ;;  %v2042_v54 = vadd.f32 %v9946_v34, %v12309_v35 }
 0x2d5   : > { %v9947_v50 = vpop.f32.mrb[14].mxu1  ;;  %v2034_v27 = vadd.f32 %v12309_v35, %v2033_v13  ;;  %v4499_v13 = vsel %vm14829_vm5, %v4441_v15, 0.0 }
 0x2d6   : > { %v2036_v2 = vpop.f32.mrb[15].mxu1  ;;  %v2045_v18 = vadd.f32 %v9947_v50, %v12309_v35  ;;  %v4500_v62 = vadd.f32 %v4499_v13, %v4498_v63 }
 0x2d7   : > { %v2037_v31 = vadd.f32 %v12309_v35, %v2036_v2 }
 0x2e1   : > { %v10014_v43 = vpop.f32.mrb[28].mxu0 }
 0x2e2   : > { %v12560_v5 = vadd.f32 %v10014_v43, %v2042_v54  ;;  %v4298_v24 = vpop.f32.mrb[29].mxu0 }
 0x2e3   : > { %v10203_v34 = vadd.f32 %v4298_v24, %v2034_v27  ;;  %v10015_v36 = vpop.f32.mrb[30].mxu0 }
 0x2e4   : > { %v12565_v41 = vadd.f32 %v10015_v36, %v2045_v18  ;;  %v4301_v21 = vpop.f32.mrb[31].mxu0  ;;  %v4444_v8 = vmul.f32 %v12560_v5, %v12560_v5  ;;  %v4404_v1 = vsel %vm14829_vm5, %v12560_v5, 0.0 }
 0x2e5   : > { %v4400_v11 = vsel %vm14829_vm5, %v10203_v34, 0.0  ;;  %v4442_v55 = vmul.f32 %v10203_v34, %v10203_v34  ;;  %v10207_v50 = vadd.f32 %v4301_v21, %v2037_v31 }
 0x2e6   : > { %v4401_v38 = vadd.f32 %v4400_v11, %v4399_v53  ;;  %v4445_v7 = vmul.f32 %v12565_v41, %v12565_v41  ;;  %v4505_v48 = vsel %vm14829_vm5, %v4444_v8, 0.0  ;;  %v4406_v54 = vsel %vm14829_vm5, %v12565_v41, 0.0 }
 0x2e7   : > { %v4501_v3 = vsel %vm14829_vm5, %v4442_v55, 0.0  ;;  %v4402_v35 = vsel %vm14829_vm5, %v10207_v50, 0.0  ;;  %v4443_v2 = vmul.f32 %v10207_v50, %v10207_v50 }
 0x2e8   : > { %v4502_v33 = vadd.f32 %v4501_v3, %v4500_v62  ;;  %v4403_v39 = vadd.f32 %v4402_v35, %v4401_v38  ;;  %v4507_v27 = vsel %vm14829_vm5, %v4445_v7, 0.0 }
 0x2e9   : > { %v4503_v46 = vsel %vm14829_vm5, %v4443_v2, 0.0 }
 0x2ea   : > { %v4405_v32 = vadd.f32 %v4404_v1, %v4403_v39  ;;  %v4504_v6 = vadd.f32 %v4503_v46, %v4502_v33  ;;  %v4522_v39 = vlaneseq  ;;  %v4525_v46 = vld [vmem:[%s14810_s3] sm:$0x1] }
 0x2ec   : > { %v4407_v17 = vadd.f32 %v4406_v54, %v4405_v32  ;;  %v4506_v15 = vadd.f32 %v4505_v48, %v4504_v6  ;;  %v4523_v1 = vand.u32 127, %v4522_v39  ;;  %v4533_v7 = vshrl.u32 %v4522_v39, 7  ;;  %v4528_v54 = vld [vmem:[%s14811_s4] sm:$0x1] }
 0x2ee   : > { %v4408_v43 = vrot.slane %v4407_v17, 4  ;;  %v4508_v63 = vadd.f32 %v4507_v27, %v4506_v15  ;;  %vm4524_vm9 = vcmp.lt.s32.totalorder %v4523_v1, 4  ;;  %v4534_v6 = vsub.s32 0, %v4533_v7 }
 0x2f0   : > { %v4409_v18 = vadd.f32 %v4408_v43, %v4407_v17  ;;  %v4509_v24 = vrot.slane %v4508_v63, 4 }
 0x2f2   : > { %v4410_v10 = vrot.slane %v4409_v18, 2  ;;  %v4510_v31 = vadd.f32 %v4509_v24, %v4508_v63 }
 0x2f4   : > { %v4411_v36 = vadd.f32 %v4410_v10, %v4409_v18  ;;  %v4511_v53 = vrot.slane %v4510_v31, 2 }
 0x2f6   : > { %v4412_v21 = vrot.slane %v4411_v36, 1  ;;  %v4512_v13 = vadd.f32 %v4511_v53, %v4510_v31 }
 0x2f8   : > { %v4413_v11 = vadd.f32 %v4412_v21, %v4411_v36  ;;  %v4513_v55 = vrot.slane %v4512_v13, 1 }
 0x2fa   : > { %v4514_v38 = vadd.f32 %v4513_v55, %v4512_v13  ;;  %v4515_v62 = vmul.f32 0.00390625, %v4413_v11 }
 0x2fc   : > { %v4516_v8 = vmul.f32 0.00390625, %v4514_v38  ;;  %v4517_v3 = vmul.f32 %v4515_v62, %v4515_v62 }
 0x2fe   : > { %v4518_v35 = vsub.f32 %v4516_v8, %v4517_v3 }
 0x300   : > { %v4519_v2 = vmax.f32 %v4518_v35, 0.0 }
 0x302   : > { %v4520_v33 = vadd.f32 1e-05, %v4519_v2 }
 0x304   : > { %10449 = vrsqrt.f32 %v4520_v33 }
 0x30e   : > { %v10450_v32 = vpop.eup %10449 }
 0x30f   : > { %v4526_v48 = vmul.f32 %v10450_v32, %v4525_v46 }
 0x311   : > { %v4527_v17 = vsel %vm4524_vm9, %v4526_v48, 1.0  ;;  %v4529_v15 = vmul.f32 %v4526_v48, %v4515_v62 }
 0x312   : > { %v4535_v27 = vrot.slane %v4527_v17, %v4534_v6 }
 0x313   : > { %v4530_v43 = vsub.f32 %v4528_v54, %v4529_v15 }
 0x314   : > { %v4564_v63 = vmul.f32 %v10203_v34, %v4535_v27  ;;  %v4565_v18 = vmul.f32 %v10207_v50, %v4535_v27  ;;  %v4536_v24 = vmul.f32 %v12315_v4, %v4535_v27  ;;  %v4537_v31 = vmul.f32 %v12323_v28, %v4535_v27 }
 0x315   : > { %v4531_v10 = vsel %vm4524_vm9, %v4530_v43, 0.0  ;;  %v4538_v36 = vmul.f32 %v12312_v51, %v4535_v27  ;;  %v4539_v53 = vmul.f32 %v12320_v59, %v4535_v27  ;;  %v4540_v13 = vmul.f32 %v12351_v60, %v4535_v27 }
 0x316   : > { %v12592_v21 = vrot.slane %v4531_v10, %v4534_v6  ;;  %v4541_v11 = vmul.f32 %v12359_v49, %v4535_v27  ;;  %v4542_v55 = vmul.f32 %v12362_v47, %v4535_v27  ;;  %v4543_v34 = vmul.f32 %v12372_v25, %v4535_v27 }
 0x317   : > { %v4544_v50 = vmul.f32 %v12378_v26, %v4535_v27  ;;  %v4545_v4 = vmul.f32 %v12388_v23, %v4535_v27  ;;  %v4546_v28 = vmul.f32 %v12399_v58, %v4535_v27  ;;  %v4547_v38 = vmul.f32 %v12407_v40, %v4535_v27 }
 0x318   : > { %v4600_v51 = vadd.f32 %v12592_v21, %v4564_v63  ;;  %v4601_v59 = vadd.f32 %v12592_v21, %v4565_v18  ;;  %v4548_v60 = vmul.f32 %v12428_v57, %v4535_v27  ;;  %v4549_v49 = vmul.f32 %v12441_v0, %v4535_v27 }
 0x319   : > { %v4550_v47 = vmul.f32 %v12444_v12, %v4535_v27  ;;  %v4551_v25 = vmul.f32 %v12470_v29, %v4535_v27  ;;  %v4552_v26 = vmul.f32 %v12419_v44, %v4535_v27  ;;  %v4553_v62 = vmul.f32 %v12430_v52, %v4535_v27 }
 0x31a   : > { %vm4632_vm11 = vcmp.ge.f32.partialorder %v4600_v51, 0.0  ;;  %vm4633_vm12 = vcmp.ge.f32.partialorder %v4601_v59, 0.0  ;;  %v4664_v23 = vmul.f32 0.1, %v4600_v51  ;;  %v4665_v58 = vmul.f32 0.1, %v4601_v59 }
 0x31b   : > { %v4554_v8 = vmul.f32 %v12415_v42, %v4535_v27  ;;  %v4555_v40 = vmul.f32 %v12423_v20, %v4535_v27  ;;  %v4556_v57 = vmul.f32 %v12457_v37, %v4535_v27  ;;  %v4557_v12 = vmul.f32 %v12461_v22, %v4535_v27 }
 0x31c   : > { %v4696_v3 = vsel %vm4632_vm11, %v4600_v51, %v4664_v23  ;;  %v4697_v0 = vsel %vm4633_vm12, %v4601_v59, %v4665_v58  ;;  %v4558_v29 = vmul.f32 %v12452_v56, %v4535_v27  ;;  %v4559_v2 = vmul.f32 %v12459_v30, %v4535_v27 }
 0x31d   : > { %v9788_v35 = vpack.c.bf16 %v4696_v3, %v4696_v3  ;;  %v9789_v44 = vpack.c.bf16 %v4697_v0, %v4697_v0  ;;  %v4560_v33 = vmul.f32 %v12517_v19, %v4535_v27  ;;  %v4561_v52 = vmul.f32 %v12525_v16, %v4535_v27 }
 0x31e   : > { %v4562_v42 = vmul.f32 %v12514_v61, %v4535_v27  ;;  %v4566_v20 = vmul.f32 %v12560_v5, %v4535_v27  ;;  %v4567_v37 = vmul.f32 %v12565_v41, %v4535_v27  ;;  %v4563_v22 = vmul.f32 %v12523_v9, %v4535_v27  ;;  %v5219_v9 = vld [vmem:[#allocation2 + $0xbc] sm:$0x1] }
 0x31f   : > { %v5035_v39 = vshrl.u32 %v9788_v35, 16  ;;  %v5043_v1 = vshrl.u32 %v9789_v44, 16  ;;  %v5046_v7 = vshll.u32 %v9789_v44, 16  ;;  %v12623_v56 = vadd.f32 %v12592_v21, %v4536_v24 }
 0x320   : > { %v12626_v30 = vadd.f32 %v12592_v21, %v4537_v31  ;;  %v12629_v19 = vadd.f32 %v12592_v21, %v4538_v36  ;;  %v12632_v61 = vadd.f32 %v12592_v21, %v4539_v53  ;;  %v12635_v41 = vadd.f32 %v12592_v21, %v4540_v13 }
 0x321   : > { %v5037_v16 = vrot.slane %v5035_v39, 7  ;;  %v5045_v5 = vrot.slane %v5043_v1, 7  ;;  %v12638_v46 = vadd.f32 %v12592_v21, %v4541_v11  ;;  %v12641_v32 = vadd.f32 %v12592_v21, %v4542_v55 }
 0x322   : > { %v12644_v6 = vadd.f32 %v12592_v21, %v4543_v34  ;;  %v12647_v48 = vadd.f32 %v12592_v21, %v4544_v50  ;;  %v12650_v54 = vadd.f32 %v12592_v21, %v4545_v4  ;;  %v12653_v43 = vadd.f32 %v12592_v21, %v4546_v28 }
 0x323   : > { %v5041_v17 = vrot.slane %v5037_v16, 4  ;;  %v5048_v15 = vor.u32 %v5046_v7, %v5045_v5  ;;  %v5050_v27 = vrot.slane %v5045_v5, 4  ;;  %v12656_v63 = vadd.f32 %v12592_v21, %v4547_v38 }
 0x324   : > { %v12659_v18 = vadd.f32 %v12592_v21, %v4548_v60  ;;  %v12662_v24 = vadd.f32 %v12592_v21, %v4549_v49  ;;  %v12665_v10 = vadd.f32 %v12592_v21, %v4550_v47  ;;  %v12672_v11 = vadd.f32 %v12592_v21, %v4551_v25 }
 0x325   : > { %v5049_v36 = vsel %vm10770_vm1, %v5041_v17, %v5048_v15  ;;  %v5220_v13 = vsel %vm10711_vm3, %v5050_v27, %v5219_v9  ;;  %v12675_v55 = vadd.f32 %v12592_v21, %v4552_v26  ;;  %v12679_v34 = vadd.f32 %v12592_v21, %v4553_v62 }
 0x326   : > { %5218 = vst.msk [vmem:[#allocation2 + $0xb8] sm:$0xf] %vm14830_vm0, %v5049_v36  ;;  %5221 = vst [vmem:[#allocation2 + $0xbc] sm:$0x1] %v5220_v13  ;;  %v12682_v50 = vadd.f32 %v12592_v21, %v4554_v8  ;;  %v12685_v4 = vadd.f32 %v12592_v21, %v4555_v40  ;;  %v12688_v28 = vadd.f32 %v12592_v21, %v4556_v57  ;;  %v5038_v58 = vshll.u32 %v9788_v35, 16 }
 0x327   : > { %v12691_v51 = vadd.f32 %v12592_v21, %v4557_v12  ;;  %v12694_v59 = vadd.f32 %v12592_v21, %v4558_v29  ;;  %v12697_v38 = vadd.f32 %v12592_v21, %v4559_v2  ;;  %v12700_v60 = vadd.f32 %v12592_v21, %v4560_v33  ;;  %v5215_v40 = vld [vmem:[#allocation2 + $0xb4] sm:$0xf] }
 0x328   : > { %v12703_v49 = vadd.f32 %v12592_v21, %v4561_v52  ;;  %v12706_v47 = vadd.f32 %v12592_v21, %v4562_v42  ;;  %v12709_v25 = vadd.f32 %v12592_v21, %v4563_v22  ;;  %v12712_v26 = vadd.f32 %v12592_v21, %v4566_v20 }
 0x329   : > { %v12715_v23 = vadd.f32 %v12592_v21, %v4567_v37  ;;  %v5040_v62 = vor.u32 %v5038_v58, %v5037_v16  ;;  %vm4604_vm14 = vcmp.ge.f32.partialorder %v12623_v56, 0.0  ;;  %vm4605_vm6 = vcmp.ge.f32.partialorder %v12626_v30, 0.0 }
 0x32a   : > { %14917 = vst [vmem:[#allocation10_spill] sm:$0xff] %v12703_v49  ;;  %14918 = vst [vmem:[#allocation7_spill] sm:$0xff] %v12706_v47  ;;  %vm4606_vm7 = vcmp.ge.f32.partialorder %v12629_v19, 0.0  ;;  %vm4607_vm8 = vcmp.ge.f32.partialorder %v12632_v61, 0.0  ;;  %vm4608_vm9 = vcmp.ge.f32.partialorder %v12635_v41, 0.0  ;;  %vm4612_vm2 = vcmp.ge.f32.partialorder %v12647_v48, 0.0 }
 0x32b   : > { %14919 = vst [vmem:[#allocation11_spill] sm:$0xff] %v12709_v25  ;;  %14920 = vst [vmem:[#allocation8_spill] sm:$0xff] %v12712_v26  ;;  %v4636_v21 = vmul.f32 0.1, %v12623_v56  ;;  %v4638_v57 = vmul.f32 0.1, %v12629_v19  ;;  %v5216_v3 = vsel %vm12719_vm13, %v5040_v62, %v5215_v40 }
 0x32c   : > { %v4637_v0 = vmul.f32 0.1, %v12626_v30  ;;  %v4639_v12 = vmul.f32 0.1, %v12632_v61  ;;  %v4640_v29 = vmul.f32 0.1, %v12635_v41 }
 0x32d   : > { %5217 = vst [vmem:[#allocation2 + $0xb4] sm:$0xf] %v5216_v3  ;;  %v4641_v35 = vmul.f32 0.1, %v12638_v46  ;;  %v4642_v44 = vmul.f32 0.1, %v12641_v32  ;;  %v4670_v33 = vsel %vm4606_vm7, %v12629_v19, %v4638_v57  ;;  %v4668_v58 = vsel %vm4604_vm14, %v12623_v56, %v4636_v21 }
 0x32e   : > { %v4643_v2 = vmul.f32 0.1, %v12644_v6  ;;  %v4644_v52 = vmul.f32 0.1, %v12647_v48  ;;  %v4645_v42 = vmul.f32 0.1, %v12650_v54  ;;  %v4671_v37 = vsel %vm4607_vm8, %v12632_v61, %v4639_v12 }
 0x32f   : > { %v4646_v20 = vmul.f32 0.1, %v12653_v43  ;;  %v4647_v39 = vmul.f32 0.1, %v12656_v63  ;;  %v4648_v1 = vmul.f32 0.1, %v12659_v18  ;;  %v9762_v16 = vpack.c.bf16 %v4670_v33, %v4670_v33 }
 0x330   : > { %v4649_v7 = vmul.f32 0.1, %v12662_v24  ;;  %v4650_v22 = vmul.f32 0.1, %v12665_v10  ;;  %v4651_v19 = vmul.f32 0.1, %v12672_v11  ;;  %v9763_v15 = vpack.c.bf16 %v4671_v37, %v4671_v37 }
 0x331   : > { %v4652_v61 = vmul.f32 0.1, %v12675_v55  ;;  %vm4624_vm4 = vcmp.ge.f32.partialorder %v12688_v28, 0.0  ;;  %vm4625_vm0 = vcmp.ge.f32.partialorder %v12691_v51, 0.0  ;;  %v4653_v5 = vmul.f32 0.1, %v12679_v34 }
 0x332   : > { %v4654_v9 = vmul.f32 0.1, %v12682_v50  ;;  %v4655_v17 = vmul.f32 0.1, %v12685_v4  ;;  %vm4628_vm11 = vcmp.ge.f32.partialorder %v12700_v60, 0.0  ;;  %vm4629_vm5 = vcmp.ge.f32.partialorder %v12703_v49, 0.0 }
 0x333   : > { %v4656_v27 = vmul.f32 0.1, %v12688_v28  ;;  %v4657_v36 = vmul.f32 0.1, %v12691_v51  ;;  %v4658_v13 = vmul.f32 0.1, %v12694_v59  ;;  %v4669_v3 = vsel %vm4605_vm6, %v12626_v30, %v4637_v0 }
 0x334   : > { %vm4631_vm12 = vcmp.ge.f32.partialorder %v12709_v25, 0.0  ;;  %vm4634_vm7 = vcmp.ge.f32.partialorder %v12712_v26, 0.0  ;;  %v4659_v62 = vmul.f32 0.1, %v12697_v38  ;;  %v4660_v40 = vmul.f32 0.1, %v12700_v60 }
 0x335   : > { %v4661_v57 = vmul.f32 0.1, %v12703_v49  ;;  %v4662_v12 = vmul.f32 0.1, %v12706_v47  ;;  %v4663_v56 = vmul.f32 0.1, %v12709_v25  ;;  %v4672_v33 = vsel %vm4608_vm9, %v12635_v41, %v4640_v29 }
 0x336   : > { %v4666_v21 = vmul.f32 0.1, %v12712_v26  ;;  %v4667_v37 = vmul.f32 0.1, %v12715_v23  ;;  %v4814_v14 = vshrl.u32 %v9762_v16, 16  ;;  %v4822_v45 = vshrl.u32 %v9763_v15, 16 }
 0x337   : > { %vm14923_vm14 = vcmp.ge.f32.partialorder %v12638_v46, 0.0  ;;  %v4817_v0 = vshll.u32 %v9762_v16, 16  ;;  %v4825_v49 = vshll.u32 %v9763_v15, 16  ;;  %vm14924_vm6 = vcmp.ge.f32.partialorder %v12641_v32, 0.0  ;;  %v5128_v16 = vld [vmem:[#allocation2 + $0x20] sm:$0x1] }
 0x338   : > { %v4673_v30 = vsel %vm14923_vm14, %v12638_v46, %v4641_v35  ;;  %v4674_v25 = vsel %vm14924_vm6, %v12641_v32, %v4642_v44  ;;  %vm14925_vm8 = vcmp.ge.f32.partialorder %v12644_v6, 0.0  ;;  %v4816_v47 = vrot.slane %v4814_v14, 7  ;;  %v5124_v35 = vld [vmem:[#allocation2 + $0x18] sm:$0xf] }
 0x339   : > { %v4675_v26 = vsel %vm14925_vm8, %v12644_v6, %v4643_v2  ;;  %v4824_v41 = vrot.slane %v4822_v45, 7  ;;  %v4676_v29 = vsel %vm4612_vm2, %v12647_v48, %v4644_v52  ;;  %vm14926_vm9 = vcmp.ge.f32.partialorder %v12650_v54, 0.0 }
 0x33a   : > { %v4677_v46 = vsel %vm14926_vm9, %v12650_v54, %v4645_v42  ;;  %vm14927_vm14 = vcmp.ge.f32.partialorder %v12653_v43, 0.0  ;;  %vm14928_vm6 = vcmp.ge.f32.partialorder %v12656_v63, 0.0  ;;  %vm14929_vm8 = vcmp.ge.f32.partialorder %v12659_v18, 0.0 }
 0x33b   : > { %v4678_v32 = vsel %vm14927_vm14, %v12653_v43, %v4646_v20  ;;  %v4679_v6 = vsel %vm14928_vm6, %v12656_v63, %v4647_v39  ;;  %v4680_v14 = vsel %vm14929_vm8, %v12659_v18, %v4648_v1  ;;  %vm14930_vm2 = vcmp.ge.f32.partialorder %v12662_v24, 0.0  ;;  %v14943_v39 = vld [vmem:[#allocation11_spill] sm:$0xff]  ;;  %v14944_v1 = vld [vmem:[#allocation8_spill] sm:$0xff] }
 0x33c   : > { %v4681_v45 = vsel %vm14930_vm2, %v12662_v24, %v4649_v7  ;;  %v4819_v48 = vor.u32 %v4817_v0, %v4816_v47  ;;  %v4820_v54 = vrot.slane %v4816_v47, 4  ;;  %v4827_v44 = vor.u32 %v4825_v49, %v4824_v41 }
 0x33d   : > { %v4829_v2 = vrot.slane %v4824_v41, 4  ;;  %vm14931_vm9 = vcmp.ge.f32.partialorder %v12665_v10, 0.0  ;;  %vm14932_vm14 = vcmp.ge.f32.partialorder %v12672_v11, 0.0  ;;  %vm14933_vm6 = vcmp.ge.f32.partialorder %v12675_v55, 0.0 }
 0x33e   : > { %v4682_v43 = vsel %vm14931_vm9, %v12665_v10, %v4650_v22  ;;  %v4683_v63 = vsel %vm14932_vm14, %v12672_v11, %v4651_v19  ;;  %v4684_v18 = vsel %vm14933_vm6, %v12675_v55, %v4652_v61  ;;  %vm14934_vm8 = vcmp.ge.f32.partialorder %v12679_v34, 0.0 }
 0x33f   : > { %v4685_v24 = vsel %vm14934_vm8, %v12679_v34, %v4653_v5  ;;  %v4828_v49 = vsel %vm10770_vm1, %v4820_v54, %v4827_v44  ;;  %v5125_v47 = vsel %vm12719_vm13, %v4819_v48, %v5124_v35  ;;  %v5129_v10 = vsel %vm10711_vm3, %v4829_v2, %v5128_v16 }
 0x340   : > { %vm14935_vm2 = vcmp.ge.f32.partialorder %v12682_v50, 0.0  ;;  %5126 = vst [vmem:[#allocation2 + $0x18] sm:$0xf] %v5125_v47  ;;  %vm14936_vm9 = vcmask 60416   ;;  %5130 = vst [vmem:[#allocation2 + $0x20] sm:$0x1] %v5129_v10  ;;  %v4688_v34 = vsel %vm4624_vm4, %v12688_v28, %v4656_v27  ;;  %v4689_v52 = vsel %vm4625_vm0, %v12691_v51, %v4657_v36 }
 0x341   : > { %v4686_v11 = vsel %vm14935_vm2, %v12682_v50, %v4654_v9  ;;  %5127 = vst.msk [vmem:[#allocation2 + $0x1c] sm:$0xf] %vm14936_vm9, %v4828_v49  ;;  %vm14937_vm14 = vcmp.ge.f32.partialorder %v12685_v4, 0.0  ;;  %vm14938_vm6 = vcmp.ge.f32.partialorder %v12694_v59, 0.0  ;;  %vm14939_vm8 = vcmp.ge.f32.partialorder %v12697_v38, 0.0  ;;  %v14940_v28 = vld [vmem:[#allocation10_spill] sm:$0xff]  ;;  %vm15000_vm4 = vmmov %vm14936_vm9 }
 0x342   : > { %v4687_v55 = vsel %vm14937_vm14, %v12685_v4, %v4655_v17  ;;  %v12861_v50 = vsel %vm14938_vm6, %v12694_v59, %v4658_v13  ;;  %v12866_v42 = vsel %vm14939_vm8, %v12697_v38, %v4659_v62  ;;  %v12871_v4 = vsel %vm4628_vm11, %v12700_v60, %v4660_v40  ;;  %v14941_v51 = vld [vmem:[#allocation7_spill] sm:$0xff]  ;;  %vm14946_vm11 = vmmov %vm14936_vm9 }
 0x343   : > { %v12876_v20 = vsel %vm4629_vm5, %v14940_v28, %v4661_v57  ;;  %vm14942_vm0 = vcmp.ge.f32.partialorder %v14941_v51, 0.0  ;;  %v12886_v38 = vsel %vm4631_vm12, %v14943_v39, %v4663_v56  ;;  %v12891_v60 = vsel %vm4634_vm7, %v14944_v1, %v4666_v21  ;;  %vm14967_vm12 = vmmov %vm14936_vm9 }
 0x344   : > { %v12881_v59 = vsel %vm14942_vm0, %v14941_v51, %v4662_v12  ;;  %v9760_v7 = vpack.c.bf16 %v4668_v58, %v4668_v58  ;;  %v9761_v22 = vpack.c.bf16 %v4669_v3, %v4669_v3  ;;  %vm14945_vm5 = vcmp.ge.f32.partialorder %v12715_v23, 0.0  ;;  %vm15008_vm7 = vmmov %vm15000_vm4 }
 0x345   : > { %v12896_v19 = vsel %vm14945_vm5, %v12715_v23, %v4667_v37  ;;  %v12898_v61 = vpack.c.bf16 %v4672_v33, %v4672_v33  ;;  %v12900_v5 = vpack.c.bf16 %v4673_v30, %v4673_v30  ;;  %v12902_v9 = vpack.c.bf16 %v4674_v25, %v4674_v25  ;;  %vm15009_vm2 = vmmov %vm15000_vm4 }
 0x346   : > { %v4797_v17 = vshrl.u32 %v9760_v7, 16  ;;  %v4805_v15 = vshrl.u32 %v9761_v22, 16  ;;  %v12904_v27 = vpack.c.bf16 %v4675_v26, %v4675_v26  ;;  %v12906_v36 = vpack.c.bf16 %v4676_v29, %v4676_v29  ;;  %vm15012_vm9 = vmmov %vm15009_vm2 }
 0x347   : > { %v4800_v13 = vshll.u32 %v9760_v7, 16  ;;  %v4808_v58 = vshll.u32 %v9761_v22, 16  ;;  %v12908_v62 = vpack.c.bf16 %v4677_v46, %v4677_v46  ;;  %v12910_v40 = vpack.c.bf16 %v4678_v32, %v4678_v32  ;;  %v5233_v25 = vld [vmem:[#allocation2 + $0x18] sm:$0xf]  ;;  %v12916_v21 = vld [vmem:[#allocation2 + $0x20] sm:$0x1]  ;;  %vm15013_vm14 = vmmov %vm15009_vm2 }
 0x348   : > { %v4799_v23 = vrot.slane %v4797_v17, 7  ;;  %v4807_v57 = vrot.slane %v4805_v15, 7  ;;  %v12912_v3 = vpack.c.bf16 %v4679_v6, %v4679_v6  ;;  %v12914_v12 = vpack.c.bf16 %v4680_v14, %v4680_v14  ;;  %v5234_v56 = vld [vmem:[#allocation2 + $0x1c] sm:$0xf]  ;;  %v5121_v14 = vld [vmem:[#allocation2 + $0x14] sm:$0x1]  ;;  %vm15014_vm6 = vmmov %vm15009_vm2 }
 0x349   : > { %v12918_v26 = vpack.c.bf16 %v4681_v45, %v4681_v45  ;;  %v12920_v33 = vpack.c.bf16 %v4682_v43, %v4682_v43  ;;  %v12922_v37 = vpack.c.bf16 %v4683_v63, %v4683_v63  ;;  %v12924_v30 = vpack.c.bf16 %v4684_v18, %v4684_v18  ;;  %v10527_v63 = vld [vmem:[#allocation2 + $0xc] sm:$0xf]  ;;  %v5663_v17 = vld [vmem:[#allocation2 + $0x18] sm:$0xe]  ;;  %vm15015_vm8 = vmmov %vm15009_vm2 }
 0x34a   : > { %v5326_v0 = vshrl.u32 %v5233_v25, 16  ;;  %v5329_v41 = vshll.u32 %v5233_v25, 16  ;;  %v5335_v29 = vshll.u32 %v5234_v56, 16  ;;  %v5339_v46 = vshrl.u32 %v5234_v56, 16  ;;  %vm15016_vm0 = vmmov %vm15009_vm2 }
 0x34b   : > { %v5345_v35 = vshll.u32 %v12916_v21, 16  ;;  %v4802_v16 = vor.u32 %v4800_v13, %v4799_v23  ;;  %v4803_v32 = vrot.slane %v4799_v23, 4  ;;  %v4810_v6 = vor.u32 %v4808_v58, %v4807_v57  ;;  %vm15017_vm5 = vmmov %vm15016_vm0 }
 0x34c   : > { %v5328_v48 = vrot.slane %v5326_v0, 4  ;;  %v5331_v54 = vrot.slane %v5329_v41, 5  ;;  %v5337_v45 = vrot.slane %v5335_v29, 5  ;;  %v5341_v44 = vrot.slane %v5339_v46, 4 }
 0x34d   : > { %v4811_v2 = vsel %vm10770_vm1, %v4803_v32, %v4810_v6  ;;  %v4812_v43 = vrot.slane %v4807_v57, 4  ;;  %v5118_v18 = vsel %vm12719_vm13, %v4802_v16, %v10527_v63  ;;  %v12931_v49 = vpack.c.bf16 %v4685_v24, %v4685_v24 }
 0x34e   : > { %v5332_v47 = vor.u32 %v5331_v54, %v5328_v48  ;;  %v5342_v10 = vor.u32 %v5341_v44, %v5337_v45  ;;  %v5347_v28 = vrot.slane %v5345_v35, 5  ;;  %5119 = vst [vmem:[#allocation2 + $0xc] sm:$0xf] %v5118_v18  ;;  %5120 = vst.msk [vmem:[#allocation2 + $0x10] sm:$0xf] %vm14946_vm11, %v4811_v2  ;;  %v12934_v51 = vpack.c.bf16 %v4686_v11, %v4686_v11 }
 0x34f   : > { %v5122_v39 = vsel %vm10711_vm3, %v4812_v43, %v5121_v14  ;;  %v12938_v1 = vpack.c.bf16 %v4687_v55, %v4687_v55  ;;  %v12940_v7 = vpack.c.bf16 %v4688_v34, %v4688_v34  ;;  %v12942_v22 = vpack.c.bf16 %v4689_v52, %v4689_v52  ;;  %vm15021_vm11 = vmmov %vm15016_vm0 }
 0x350   : > { %v5333_v24 = vrot.slane %v5332_v47, 4  ;;  %v5343_v15 = vrot.slane %v5342_v10, 4  ;;  %5123 = vst [vmem:[#allocation2 + $0x14] sm:$0x1] %v5122_v39  ;;  %v12946_v13 = vpack.c.bf16 %v12861_v50, %v12861_v50  ;;  %v12950_v11 = vpack.c.bf16 %v12866_v42, %v12866_v42 }
 0x351   : > { %v12954_v55 = vpack.c.bf16 %v12871_v4, %v12871_v4  ;;  %v12958_v34 = vpack.c.bf16 %v12876_v20, %v12876_v20  ;;  %v12962_v52 = vpack.c.bf16 %v12881_v59, %v12881_v59  ;;  %v12966_v50 = vpack.c.bf16 %v12886_v38, %v12886_v38 }
 0x352   : > { %v5338_v42 = vsel %vm10762_vm15, %v5333_v24, %v5337_v45  ;;  %v5348_v23 = vsel %vm10762_vm15, %v5343_v15, %v5347_v28  ;;  %v9472_v4 = vrot.slane %v5663_v17, 9  ;;  %v5741_v57 = vrot.slane %v5234_v56, 5 }
 0x353   : > { %14947 = vst [vmem:[#allocation12_spill] sm:$0xff] %v12954_v55  ;;  %14948 = vst [vmem:[#allocation9_spill] sm:$0xff] %v12958_v34  ;;  %v9504_v25 = vcombine.low %v5338_v42, %v5348_v23  ;;  %v12974_v20 = vpack.c.bf16 %v12891_v60, %v12891_v60  ;;  %v5744_v59 = vrot.slane %v12916_v21, 5  ;;  %v4831_v0 = vshrl.u32 %v12898_v61, 16 }
 0x354   : > { %14949 = vst [vmem:[#allocation13_spill] sm:$0xff] %v12962_v52  ;;  %14950 = vst [vmem:[#allocation6_spill] sm:$0xff] %v12966_v50  ;;  %v5743_v41 = vrot.slane %v5741_v57, 4  ;;  %v4839_v29 = vshrl.u32 %v12900_v5, 16  ;;  %v12986_v60 = vpack.c.bf16 %v12896_v19, %v12896_v19  ;;  %v5742_v21 = vsel %vm10737_vm10, %v9472_v4, %v5741_v57 }
 0x355   : > { %14952 = vst [vmem:[#allocation3_spill] sm:$0xff] %v12974_v20  ;;  %5953 = vrot.lane.b32.xlu0 %v9504_v25, %s10647_s15  ;;  %v5231_v35 = vld [vmem:[#allocation2 + $0xc] sm:$0xf]  ;;  %v12982_v56 = vld [vmem:[#allocation2 + $0x10] sm:$0xf]  ;;  %v4873_v4 = vshrl.u32 %v12908_v62, 16 }
 0x356   : > { %14953 = vst [vmem:[#allocation10_spill] sm:$0xff] %v12986_v60  ;;  %v5302_v14 = vshrl.u32 %v5231_v35, 16  ;;  %v5305_v48 = vshll.u32 %v5231_v35, 16  ;;  %v5311_v54 = vshll.u32 %v12982_v56, 16  ;;  %v5315_v45 = vshrl.u32 %v12982_v56, 16 }
 0x357   : > { %v12994_v44 = vld [vmem:[#allocation2 + $0x14] sm:$0x1]  ;;  %v5745_v2 = vsel %vm10737_vm10, %v5743_v41, %v5744_v59  ;;  %v4882_v59 = vshrl.u32 %v12910_v40, 16  ;;  %v4890_v35 = vshrl.u32 %v12912_v3, 16  ;;  %v4975_v41 = vshrl.u32 %v12942_v22, 16 }
 0x358   : > { %v5304_v18 = vrot.slane %v5302_v14, 4  ;;  %v5307_v47 = vrot.slane %v5305_v48, 5  ;;  %v5313_v10 = vrot.slane %v5311_v54, 5  ;;  %v5317_v28 = vrot.slane %v5315_v45, 4  ;;  %v5662_v46 = vld [vmem:[#allocation2 + $0xc] sm:$0xe] }
 0x359   : > { %v5321_v39 = vshll.u32 %v12994_v44, 16  ;;  %v9520_v24 = vcombine.low %v5742_v21, %v5745_v2  ;;  %v4899_v54 = vshrl.u32 %v12914_v12, 16  ;;  %v4907_v2 = vshrl.u32 %v12918_v26, 16 }
 0x35a   : > { %v5308_v42 = vor.u32 %v5307_v47, %v5304_v18  ;;  %v5318_v23 = vor.u32 %v5317_v28, %v5313_v10  ;;  %v4916_v47 = vshrl.u32 %v12920_v33, 16  ;;  %v4933_v45 = vshrl.u32 %v12924_v30, 16 }
 0x35b   : > { %v5323_v25 = vrot.slane %v5321_v39, 5  ;;  %6033 = vrot.lane.b32.xlu0 %v9520_v24, %s10649_s25  ;;  %v4941_v18 = vshrl.u32 %v12931_v49, 16  ;;  %v4984_v57 = vshrl.u32 %v12946_v13, 16  ;;  %v5001_v15 = vshrl.u32 %v12954_v55, 16 }
 0x35c   : > { %v5309_v14 = vrot.slane %v5308_v42, 4  ;;  %v5319_v48 = vrot.slane %v5318_v23, 4  ;;  %v4924_v42 = vshrl.u32 %v12922_v37, 16  ;;  %v5009_v38 = vshrl.u32 %v12958_v34, 16 }
 0x35d   : > { %v5018_v43 = vshrl.u32 %v12962_v52, 16  ;;  %v5026_v6 = vshrl.u32 %v12966_v50, 16  ;;  %v5052_v17 = vshrl.u32 %v12974_v20, 16  ;;  %v5060_v63 = vshrl.u32 %v12986_v60, 16 }
 0x35e   : > { %v5314_v28 = vsel %vm10762_vm15, %v5309_v14, %v5313_v10  ;;  %v5324_v39 = vsel %vm10762_vm15, %v5319_v48, %v5323_v25  ;;  %v4950_v10 = vshrl.u32 %v12934_v51, 16  ;;  %v4958_v25 = vshrl.u32 %v12938_v1, 16 }
 0x35f   : > { %v9503_v23 = vcombine.low %v5314_v28, %v5324_v39  ;;  %v4967_v28 = vshrl.u32 %v12940_v7, 16  ;;  %v4992_v14 = vshrl.u32 %v12950_v11, 16  ;;  %v9471_v19 = vrot.slane %v5662_v46, 9 }
 0x360   : > { %v5734_v32 = vrot.slane %v12982_v56, 5  ;;  %v13055_v39 = vrot.slane %v4831_v0, 7  ;;  %v13059_v21 = vrot.slane %v4839_v29, 7  ;;  %v14955_v24 = vshrl.u32 %v12902_v9, 16 }
 0x361   : > { %5951 = vrot.lane.b32.xlu1 %v9503_v23, %s10647_s15  ;;  %v14956_v23 = vshrl.u32 %v12904_v27, 16  ;;  %v14957_v56 = vshrl.u32 %v12906_v36, 16  ;;  %v13071_v0 = vrot.slane %v4873_v4, 7  ;;  %v13073_v50 = vrot.slane %v4882_v59, 7 }
 0x362   : > { %v4850_v58 = vrot.slane %v14955_v24, 7  ;;  %v5735_v48 = vsel %vm10737_vm10, %v9471_v19, %v5734_v32  ;;  %v5736_v46 = vrot.slane %v5734_v32, 4  ;;  %v13075_v29 = vrot.slane %v4890_v35, 7 }
 0x363   : > { %v4858_v20 = vrot.slane %v14956_v23, 7  ;;  %v13069_v60 = vrot.slane %v14957_v56, 7  ;;  %v13077_v52 = vrot.slane %v4899_v54, 7  ;;  %v13079_v24 = vrot.slane %v4907_v2, 7 }
 0x364   : > { %v14958_v23 = vrot.slane %v12994_v44, 5  ;;  %v13085_v32 = vrot.slane %v4916_v47, 7  ;;  %v13087_v34 = vrot.slane %v4924_v42, 7  ;;  %v13089_v56 = vrot.slane %v4933_v45, 7  ;;  %v5138_v47 = vld [vmem:[#allocation2 + $0x30] sm:$0xf] }
 0x365   : > { %v13091_v59 = vrot.slane %v4941_v18, 7  ;;  %v13093_v35 = vrot.slane %v4950_v10, 7  ;;  %v13095_v54 = vrot.slane %v4958_v25, 7  ;;  %v13097_v2 = vrot.slane %v4967_v28, 7  ;;  %v5142_v25 = vld [vmem:[#allocation2 + $0x38] sm:$0x1] }
 0x366   : > { %v5738_v19 = vsel %vm10737_vm10, %v5736_v46, %v14958_v23  ;;  %v13099_v55 = vrot.slane %v4975_v41, 7  ;;  %v13101_v44 = vrot.slane %v4984_v57, 7  ;;  %v13103_v46 = vrot.slane %v4992_v14, 7 }
 0x367   : > { %v9519_v4 = vcombine.low %v5735_v48, %v5738_v19  ;;  %v13106_v45 = vrot.slane %v5001_v15, 7  ;;  %v13108_v42 = vrot.slane %v5009_v38, 7  ;;  %v13110_v18 = vrot.slane %v5018_v43, 7 }
 0x368   : > { %14959 = vst [vmem:[#allocation7_spill] sm:$0xff] %v13099_v55  ;;  %v13112_v10 = vrot.slane %v5026_v6, 7  ;;  %v13114_v48 = vrot.slane %v5052_v17, 7  ;;  %v13116_v41 = vrot.slane %v5060_v63, 7  ;;  %v14961_v57 = vshll.u32 %v12902_v9, 16 }
 0x369   : > { %6031 = vrot.lane.b32.xlu1 %v9519_v4, %s10649_s25  ;;  %14960 = vst [vmem:[#allocation11_spill] sm:$0xff] %v13108_v42  ;;  %v4854_v28 = vrot.slane %v4850_v58, 4  ;;  %v14962_v23 = vshll.u32 %v12904_v27, 16  ;;  %v4863_v15 = vrot.slane %v4858_v20, 4  ;;  %v14963_v38 = vshll.u32 %v12898_v61, 16 }
 0x36a   : > { %v4853_v14 = vor.u32 %v14961_v57, %v4850_v58  ;;  %v14964_v63 = vshll.u32 %v12900_v5, 16  ;;  %v14965_v27 = vshll.u32 %v12906_v36, 16  ;;  %v14966_v5 = vshll.u32 %v12908_v62, 16 }
 0x36b   : > { %v4861_v19 = vor.u32 %v14962_v23, %v4858_v20  ;;  %v13125_v43 = vor.u32 %v14963_v38, %v13055_v39  ;;  %v5143_v4 = vsel %vm10711_vm3, %v4863_v15, %v5142_v25  ;;  %v14969_v25 = vshll.u32 %v12912_v3, 16 }
 0x36c   : > { %v5139_v17 = vsel %vm12719_vm13, %v4853_v14, %v5138_v47  ;;  %v13133_v9 = vor.u32 %v14964_v63, %v13059_v21  ;;  %v13139_v20 = vor.u32 %v14965_v27, %v13069_v60  ;;  %v13149_v57 = vor.u32 %v14966_v5, %v13071_v0  ;;  %5144 = vst [vmem:[#allocation2 + $0x38] sm:$0x1] %v5143_v4 }
 0x36d   : > { %v4862_v61 = vsel %vm10770_vm1, %v4854_v28, %v4861_v19  ;;  %5140 = vst [vmem:[#allocation2 + $0x30] sm:$0xf] %v5139_v17  ;;  %v14968_v14 = vshll.u32 %v12910_v40, 16  ;;  %v13162_v19 = vor.u32 %v14969_v25, %v13075_v29  ;;  %v14970_v15 = vshll.u32 %v12914_v12, 16 }
 0x36e   : > { %5141 = vst.msk [vmem:[#allocation2 + $0x34] sm:$0xf] %vm14967_vm12, %v4862_v61  ;;  %v14971_v40 = vshll.u32 %v12918_v26, 16  ;;  %v14972_v3 = vshll.u32 %v12920_v33, 16  ;;  %v14973_v12 = vshll.u32 %v12922_v37, 16  ;;  %v14974_v26 = vshll.u32 %v12924_v30, 16  ;;  %vm15022_vm12 = vmmov %vm15016_vm0 }
 0x36f   : > { %v13156_v28 = vor.u32 %v14968_v14, %v13073_v50  ;;  %v13168_v38 = vor.u32 %v14970_v15, %v13077_v52  ;;  %v14975_v33 = vshll.u32 %v12931_v49, 16  ;;  %v14976_v37 = vshll.u32 %v12934_v51, 16  ;;  %v14985_v15 = vld [vmem:[#allocation12_spill] sm:$0xff] }
 0x370   : > { %v13174_v63 = vor.u32 %v14971_v40, %v13079_v24  ;;  %v13180_v61 = vor.u32 %v14972_v3, %v13085_v32  ;;  %v13186_v5 = vor.u32 %v14973_v12, %v13087_v34  ;;  %v13192_v25 = vor.u32 %v14974_v26, %v13089_v56 }
 0x371   : > { %v13198_v40 = vor.u32 %v14975_v33, %v13091_v59  ;;  %v13204_v12 = vor.u32 %v14976_v37, %v13093_v35  ;;  %v14977_v30 = vshll.u32 %v12938_v1, 16  ;;  %v14978_v49 = vshll.u32 %v12940_v7, 16 }
 0x372   : > { %v14979_v51 = vshll.u32 %v12942_v22, 16  ;;  %v14980_v1 = vshll.u32 %v12946_v13, 16  ;;  %v4990_v27 = vrot.slane %v13101_v44, 4  ;;  %v14982_v7 = vshll.u32 %v12950_v11, 16  ;;  %v14988_v13 = vld [vmem:[#allocation9_spill] sm:$0xff] }
 0x373   : > { %v13210_v26 = vor.u32 %v14977_v30, %v13095_v54  ;;  %v13216_v33 = vor.u32 %v14978_v49, %v13097_v2  ;;  %v13236_v14 = vld [vmem:[#allocation2 + $0x38] sm:$0x1]  ;;  %v14986_v36 = vshll.u32 %v14985_v15, 16  ;;  %v15018_v31 = vrot.slane %v13071_v0, 4  ;;  %v5208_v0 = vld [vmem:[#allocation2 + $0xa8] sm:$0xf] }
 0x374   : > { %v13222_v37 = vor.u32 %v14979_v51, %v13099_v55  ;;  %v5237_v62 = vld [vmem:[#allocation2 + $0x30] sm:$0xf]  ;;  %v13228_v30 = vor.u32 %v14980_v1, %v13101_v44  ;;  %v4997_v49 = vor.u32 %v14982_v7, %v13103_v46  ;;  %14984 = vst [vmem:[#allocation15_spill] sm:$0xff] %v13236_v14  ;;  %v14989_v1 = vshll.u32 %v14988_v13, 16  ;;  %v14990_v13 = vld [vmem:[#allocation13_spill] sm:$0xff] }
 0x375   : > { %v13234_v3 = vld [vmem:[#allocation2 + $0x34] sm:$0xf]  ;;  %v5374_v22 = vshrl.u32 %v5237_v62, 16  ;;  %v5377_v51 = vshll.u32 %v5237_v62, 16  ;;  %v13241_v4 = vor.u32 %v14986_v36, %v13106_v45  ;;  %v5393_v7 = vshll.u32 %v13236_v14, 16 }
 0x376   : > { %14981 = vst [vmem:[#allocation8_spill] sm:$0xff] %v13228_v30  ;;  %14983 = vst [vmem:[#allocation14_spill] sm:$0xff] %v13234_v3  ;;  %v5014_v17 = vor.u32 %v14989_v1, %v13108_v42  ;;  %v5383_v44 = vshll.u32 %v13234_v3, 16  ;;  %v5387_v11 = vshrl.u32 %v13234_v3, 16  ;;  %v5007_v62 = vrot.slane %v13106_v45, 4 }
 0x377   : > { %14987 = vst [vmem:[#allocation12_spill] sm:$0xff] %v13241_v4  ;;  %v5376_v47 = vrot.slane %v5374_v22, 4  ;;  %v5379_v58 = vrot.slane %v5377_v51, 5  ;;  %v5131_v36 = vld [vmem:[#allocation2 + $0x24] sm:$0xf]  ;;  %v5395_v4 = vrot.slane %v5393_v7, 5 }
 0x378   : > { %v5385_v6 = vrot.slane %v5383_v44, 5  ;;  %v5389_v16 = vrot.slane %v5387_v11, 4  ;;  %v14991_v1 = vshll.u32 %v14990_v13, 16  ;;  %v5135_v3 = vld [vmem:[#allocation2 + $0x2c] sm:$0x1]  ;;  %v5024_v14 = vrot.slane %v13110_v18, 4 }
 0x379   : > { %v5380_v55 = vor.u32 %v5379_v58, %v5376_v47  ;;  %v14993_v22 = vld [vmem:[#allocation6_spill] sm:$0xff]  ;;  %v5033_v45 = vrot.slane %v13112_v10, 4  ;;  %v14995_v44 = vld [vmem:[#allocation3_spill] sm:$0xff]  ;;  %v5058_v13 = vrot.slane %v13114_v48, 4  ;;  %v13271_v47 = vld [vmem:[#allocation2 + $0x48] sm:$0xf] }
 0x37a   : > { %v13255_v30 = vor.u32 %v14991_v1, %v13110_v18  ;;  %v14994_v51 = vshll.u32 %v14993_v22, 16  ;;  %v5390_v15 = vor.u32 %v5389_v16, %v5385_v6  ;;  %v14996_v11 = vshll.u32 %v14995_v44, 16  ;;  %v14997_v1 = vld [vmem:[#allocation10_spill] sm:$0xff]  ;;  %v5145_v18 = vld [vmem:[#allocation2 + $0x3c] sm:$0xf] }
 0x37b   : > { %v5156_v42 = vld [vmem:[#allocation2 + $0x50] sm:$0x1]  ;;  %v5381_v22 = vrot.slane %v5380_v55, 4  ;;  %v14999_v16 = vrot.slane %v13055_v39, 4  ;;  %v15001_v55 = vrot.slane %v13059_v21, 4  ;;  %v15002_v39 = vrot.slane %v13069_v60, 4 }
 0x37c   : > { %14992 = vst [vmem:[#allocation9_spill] sm:$0xff] %v13255_v30  ;;  %v5031_v23 = vor.u32 %v14994_v51, %v13112_v10  ;;  %v13265_v7 = vor.u32 %v14996_v11, %v13114_v48  ;;  %v14998_v30 = vshll.u32 %v14997_v1, 16  ;;  %v5132_v48 = vsel %vm12719_vm13, %v13125_v43, %v5131_v36  ;;  %v5149_v11 = vld [vmem:[#allocation2 + $0x44] sm:$0x1]  ;;  %v13282_v1 = vld [vmem:[#allocation2 + $0x60] sm:$0xf] }
 0x37d   : > { %v4845_v44 = vsel %vm10770_vm1, %v14999_v16, %v13133_v9  ;;  %5133 = vst [vmem:[#allocation2 + $0x24] sm:$0xf] %v5132_v48  ;;  %v5136_v51 = vsel %vm10711_vm3, %v15001_v55, %v5135_v3  ;;  %v4879_v9 = vsel %vm10770_vm1, %v15002_v39, %v13149_v57  ;;  %v15003_v43 = vrot.slane %v13073_v50, 4  ;;  %v5159_v36 = vld [vmem:[#allocation2 + $0x54] sm:$0xf] }
 0x37e   : > { %v5065_v58 = vor.u32 %v14998_v30, %v13116_v41  ;;  %v5391_v30 = vrot.slane %v5390_v15, 4  ;;  %5134 = vst.msk [vmem:[#allocation2 + $0x28] sm:$0xf] %vm15000_vm4, %v4845_v44  ;;  %v5170_v16 = vld [vmem:[#allocation2 + $0x68] sm:$0x1]  ;;  %v5386_v21 = vsel %vm10762_vm15, %v5381_v22, %v5385_v6  ;;  %v15005_v3 = vrot.slane %v13077_v52, 4 }
 0x37f   : > { %v4896_v15 = vsel %vm10770_vm1, %v15003_v43, %v13162_v19  ;;  %v5163_v44 = vld [vmem:[#allocation2 + $0x5c] sm:$0x1]  ;;  %5137 = vst [vmem:[#allocation2 + $0x2c] sm:$0x1] %v5136_v51  ;;  %v15006_v57 = vrot.slane %v13085_v32, 4  ;;  %v15007_v19 = vrot.slane %v13089_v56, 4  ;;  %v4998_v51 = vsel %vm10770_vm1, %v4990_v27, %v4997_v49 }
 0x380   : > { %v4913_v60 = vsel %vm10770_vm1, %v15005_v3, %v13174_v63  ;;  %5148 = vst.msk [vmem:[#allocation2 + $0x40] sm:$0xf] %vm15008_vm7, %v4879_v9  ;;  %v5180_v52 = vld [vmem:[#allocation2 + $0x78] sm:$0xf]  ;;  %v5173_v6 = vld [vmem:[#allocation2 + $0x6c] sm:$0xf]  ;;  %v5396_v63 = vsel %vm10762_vm15, %v5391_v30, %v5395_v4 }
 0x381   : > { %v4930_v50 = vsel %vm10770_vm1, %v15006_v57, %v13186_v5  ;;  %v4947_v55 = vsel %vm10770_vm1, %v15007_v19, %v13198_v40  ;;  %5155 = vst.msk [vmem:[#allocation2 + $0x4c] sm:$0xf] %vm15009_vm2, %v4896_v15  ;;  %v5184_v22 = vld [vmem:[#allocation2 + $0x80] sm:$0x1]  ;;  %v15010_v32 = vrot.slane %v13093_v35, 4  ;;  %v15011_v56 = vrot.slane %v13097_v2, 4 }
 0x382   : > { %5162 = vst.msk [vmem:[#allocation2 + $0x58] sm:$0xf] %vm15012_vm9, %v4913_v60  ;;  %v5177_v4 = vld [vmem:[#allocation2 + $0x74] sm:$0x1]  ;;  %v5194_v35 = vld [vmem:[#allocation2 + $0x90] sm:$0xf]  ;;  %v9506_v30 = vcombine.low %v5386_v21, %v5396_v63  ;;  %v5032_v2 = vsel %vm10770_vm1, %v5024_v14, %v5031_v23  ;;  %v5146_v23 = vsel %vm12719_vm13, %v13139_v20, %v5145_v18  ;;  %v5153_v14 = vsel %vm12719_vm13, %v13156_v28, %v13271_v47 }
 0x383   : > { %v4964_v5 = vsel %vm10770_vm1, %v15010_v32, %v13210_v26  ;;  %v4981_v40 = vsel %vm10770_vm1, %v15011_v56, %v13222_v37  ;;  %5169 = vst.msk [vmem:[#allocation2 + $0x64] sm:$0xf] %vm15013_vm14, %v4930_v50  ;;  %v5015_v26 = vsel %vm10770_vm1, %v5007_v62, %v5014_v17  ;;  %v5066_v37 = vsel %vm10770_vm1, %v5058_v13, %v5065_v58  ;;  %v10400_v27 = vld [vmem:[%s14812_s5] sm:$0xff]   ;;  %v5198_v39 = vld [vmem:[#allocation2 + $0x98] sm:$0x1]  ;;  %vm15020_vm1 = vmmov %vm15016_vm0 }
 0x384   : > { %5176 = vst.msk [vmem:[#allocation2 + $0x70] sm:$0xf] %vm15014_vm6, %v4947_v55  ;;  %v5187_v49 = vld [vmem:[#allocation2 + $0x84] sm:$0xf]  ;;  %v5191_v9 = vld [vmem:[#allocation2 + $0x8c] sm:$0x1]  ;;  %v5150_v17 = vsel %vm10711_vm3, %v15018_v31, %v5149_v11  ;;  %5957 = vrot.lane.b32.xlu0 %v9506_v30, %s10647_s15  ;;  %v5160_v58 = vsel %vm12719_vm13, %v13168_v38, %v5159_v36  ;;  %v5174_v43 = vsel %vm12719_vm13, %v13192_v25, %v5173_v6 }
 0x385   : > { %5183 = vst.msk [vmem:[#allocation2 + $0x7c] sm:$0xf] %vm15015_vm8, %v4964_v5  ;;  %v15019_v62 = vrot.slane %v13075_v29, 4  ;;  %v5201_v20 = vld [vmem:[#allocation2 + $0x9c] sm:$0xf]  ;;  %v15023_v28 = vrot.slane %v13079_v24, 4  ;;  %10016 = vmatprep.subr.bf16.mxu1 %v10400_v27 }
 0x386   : > { %5190 = vst.msk [vmem:[#allocation2 + $0x88] sm:$0xf] %vm15016_vm0, %v4981_v40  ;;  %v15024_v47 = vrot.slane %v13087_v34, 4  ;;  %5147 = vst [vmem:[#allocation2 + $0x3c] sm:$0xf] %v5146_v23  ;;  %v15025_v15 = vrot.slane %v13091_v59, 4  ;;  %v5181_v34 = vsel %vm12719_vm13, %v13204_v12, %v5180_v52  ;;  %10017 = vmatpush3.bf16.msra.mxu1 %v10400_v27 }
 0x387   : > { %5197 = vst.msk [vmem:[#allocation2 + $0x94] sm:$0xf] %vm15017_vm5, %v4998_v51  ;;  %v5157_v13 = vsel %vm10711_vm3, %v15019_v62, %v5156_v42  ;;  %v5164_v29 = vsel %vm10711_vm3, %v15023_v28, %v5163_v44  ;;  %v5167_v42 = vsel %vm12719_vm13, %v13180_v61, %v13282_v1  ;;  %5151 = vst [vmem:[#allocation2 + $0x44] sm:$0x1] %v5150_v17  ;;  %v5212_v38 = vld [vmem:[#allocation2 + $0xb0] sm:$0x1] }
 0x388   : > { %5204 = vst.msk [vmem:[#allocation2 + $0xa0] sm:$0xf] %vm15020_vm1, %v5015_v26  ;;  %v5171_v18 = vsel %vm10711_vm3, %v15024_v47, %v5170_v16  ;;  %5154 = vst [vmem:[#allocation2 + $0x48] sm:$0xf] %v5153_v14  ;;  %v5205_v11 = vld [vmem:[#allocation2 + $0xa4] sm:$0x1]  ;;  %v5178_v61 = vsel %vm10711_vm3, %v15025_v15, %v5177_v4  ;;  %v5188_v44 = vsel %vm12719_vm13, %v13216_v33, %v5187_v49 }
 0x389   : > { %5211 = vst.msk [vmem:[#allocation2 + $0xac] sm:$0xf] %vm15021_vm11, %v5032_v2  ;;  %5158 = vst [vmem:[#allocation2 + $0x50] sm:$0x1] %v5157_v13  ;;  %v5222_v24 = vld [vmem:[#allocation2 + $0xc0] sm:$0xf]  ;;  %v5213_v49 = vsel %vm10711_vm3, %v5033_v45, %v5212_v38 }
 0x38a   : > { %5225 = vst.msk [vmem:[#allocation2 + $0xc4] sm:$0xf] %vm15022_vm12, %v5066_v37  ;;  %v15026_v1 = vrot.slane %v13095_v54, 4  ;;  %5161 = vst [vmem:[#allocation2 + $0x54] sm:$0xf] %v5160_v58  ;;  %v15027_v21 = vld [vmem:[#allocation7_spill] sm:$0xff] }
 0x38b   : > { %5165 = vst [vmem:[#allocation2 + $0x5c] sm:$0x1] %v5164_v29  ;;  %5168 = vst [vmem:[#allocation2 + $0x60] sm:$0xf] %v5167_v42  ;;  %v5226_v25 = vld [vmem:[#allocation2 + $0xc8] sm:$0x1] }
 0x38c   : > { %v5185_v36 = vsel %vm10711_vm3, %v15026_v1, %v5184_v22  ;;  %5172 = vst [vmem:[#allocation2 + $0x68] sm:$0x1] %v5171_v18  ;;  %v5235_v16 = vld [vmem:[#allocation2 + $0x24] sm:$0xf]  ;;  %v5236_v59 = vld [vmem:[#allocation2 + $0x28] sm:$0xf] }
 0x38d   : > { %v15028_v3 = vrot.slane %v15027_v21, 4  ;;  %v15029_v12 = vld [vmem:[#allocation8_spill] sm:$0xff]  ;;  %v15030_v57 = vrot.slane %v13103_v46, 4  ;;  %5175 = vst [vmem:[#allocation2 + $0x6c] sm:$0xf] %v5174_v43  ;;  %v5350_v19 = vshrl.u32 %v5235_v16, 16 }
 0x38e   : > { %v5195_v60 = vsel %vm12719_vm13, %v15029_v12, %v5194_v35  ;;  %5179 = vst [vmem:[#allocation2 + $0x74] sm:$0x1] %v5178_v61  ;;  %5182 = vst [vmem:[#allocation2 + $0x78] sm:$0xf] %v5181_v34  ;;  %v5264_v33 = vld [vmem:[#allocation2 + $0x2c] sm:$0x1] }
 0x38f   : > { %v5192_v54 = vsel %vm10711_vm3, %v15028_v3, %v5191_v9  ;;  %v5199_v50 = vsel %vm10711_vm3, %v15030_v57, %v5198_v39  ;;  %5186 = vst [vmem:[#allocation2 + $0x80] sm:$0x1] %v5185_v36  ;;  %v5353_v55 = vshll.u32 %v5235_v16, 16  ;;  %v5359_v52 = vshll.u32 %v5236_v59, 16  ;;  %5189 = vst [vmem:[#allocation2 + $0x84] sm:$0xf] %v5188_v44 }
 0x390   : > { %v5363_v6 = vshrl.u32 %v5236_v59, 16  ;;  %5193 = vst [vmem:[#allocation2 + $0x8c] sm:$0x1] %v5192_v54  ;;  %5196 = vst [vmem:[#allocation2 + $0x90] sm:$0xf] %v5195_v60  ;;  %v5369_v22 = vshll.u32 %v5264_v33, 16  ;;  %v5223_v39 = vsel %vm12719_vm13, %v13265_v7, %v5222_v24 }
 0x391   : > { %5200 = vst [vmem:[#allocation2 + $0x98] sm:$0x1] %v5199_v50  ;;  %v15031_v63 = vld [vmem:[#allocation12_spill] sm:$0xff]  ;;  %v15032_v32 = vld [vmem:[#allocation11_spill] sm:$0xff]  ;;  %v15034_v40 = vld [vmem:[#allocation9_spill] sm:$0xff]  ;;  %v5352_v35 = vrot.slane %v5350_v19, 4 }
 0x392   : > { %v5202_v46 = vsel %vm12719_vm13, %v15031_v63, %v5201_v20  ;;  %v15033_v5 = vrot.slane %v15032_v32, 4  ;;  %v5209_v51 = vsel %vm12719_vm13, %v15034_v40, %v5208_v0  ;;  %v5665_v4 = vld [vmem:[#allocation2 + $0x30] sm:$0xe]  ;;  %v5355_v30 = vrot.slane %v5353_v55, 5  ;;  %v5664_v37 = vld [vmem:[#allocation2 + $0x24] sm:$0xe] }
 0x393   : > { %v5361_v26 = vrot.slane %v5359_v52, 5  ;;  %v5365_v2 = vrot.slane %v5363_v6, 4  ;;  %5203 = vst [vmem:[#allocation2 + $0x9c] sm:$0xf] %v5202_v46  ;;  %5210 = vst [vmem:[#allocation2 + $0xa8] sm:$0xf] %v5209_v51 }
 0x394   : > { %v5206_v56 = vsel %vm10711_vm3, %v15033_v5, %v5205_v11  ;;  %v5371_v27 = vrot.slane %v5369_v22, 5  ;;  %v15035_v9 = vrot.slane %v13116_v41, 4  ;;  %v5356_v31 = vor.u32 %v5355_v30, %v5352_v35  ;;  %v15036_v62 = vld [vmem:[#allocation14_spill] sm:$0xff]  ;;  %5214 = vst [vmem:[#allocation2 + $0xb0] sm:$0x1] %v5213_v49  ;;  %v15037_v0 = vld [vmem:[#allocation15_spill] sm:$0xff] }
 0x395   : > { %5207 = vst [vmem:[#allocation2 + $0xa4] sm:$0x1] %v5206_v56  ;;  %v5366_v17 = vor.u32 %v5365_v2, %v5361_v26  ;;  %v9474_v14 = vrot.slane %v5665_v4, 9  ;;  %v5755_v13 = vrot.slane %v15036_v62, 5  ;;  %5224 = vst [vmem:[#allocation2 + $0xc0] sm:$0xf] %v5223_v39 }
 0x396   : > { %v5227_v23 = vsel %vm10711_vm3, %v15035_v9, %v5226_v25  ;;  %v5241_v10 = vld [vmem:[#allocation2 + $0x48] sm:$0xf]  ;;  %v5758_v45 = vrot.slane %v15037_v0, 5  ;;  %v9473_v20 = vrot.slane %v5664_v37, 9  ;;  %v5748_v58 = vrot.slane %v5236_v59, 5 }
 0x397   : > { %5228 = vst [vmem:[#allocation2 + $0xc8] sm:$0x1] %v5227_v23  ;;  %v5751_v8 = vrot.slane %v5264_v33, 5  ;;  %v5242_v7 = vld [vmem:[#allocation2 + $0x4c] sm:$0xf]  ;;  %v5357_v28 = vrot.slane %v5356_v31, 4  ;;  %v5756_v53 = vsel %vm10737_vm10, %v9474_v14, %v5755_v13 }
 0x398   : > { %v5367_v41 = vrot.slane %v5366_v17, 4  ;;  %v5757_v42 = vrot.slane %v5755_v13, 4  ;;  %v5749_v47 = vsel %vm10737_vm10, %v9473_v20, %v5748_v58  ;;  %v5750_v18 = vrot.slane %v5748_v58, 4  ;;  %v13436_v24 = vld [vmem:[#allocation2 + $0x40] sm:$0xf] }
 0x399   : > { %v5422_v38 = vshrl.u32 %v5241_v10, 16  ;;  %v5425_v11 = vshll.u32 %v5241_v10, 16  ;;  %v5362_v43 = vsel %vm10762_vm15, %v5357_v28, %v5361_v26  ;;  %v5267_v34 = vld [vmem:[#allocation2 + $0x50] sm:$0x1]  ;;  %v5431_v1 = vshll.u32 %v5242_v7, 16 }
 0x39a   : > { %v5372_v15 = vsel %vm10762_vm15, %v5367_v41, %v5371_v27  ;;  %v5759_v61 = vsel %vm10737_vm10, %v5757_v42, %v5758_v45  ;;  %v5239_v36 = vld [vmem:[#allocation2 + $0x3c] sm:$0xf]  ;;  %v5752_v59 = vsel %vm10737_vm10, %v5750_v18, %v5751_v8  ;;  %v5266_v21 = vld [vmem:[#allocation2 + $0x44] sm:$0x1]  ;;  %v5435_v60 = vshrl.u32 %v5242_v7, 16 }
 0x39b   : > { %v9505_v25 = vcombine.low %v5362_v43, %v5372_v15  ;;  %v9522_v16 = vcombine.low %v5756_v53, %v5759_v61  ;;  %v5424_v44 = vrot.slane %v5422_v38, 4  ;;  %v9521_v3 = vcombine.low %v5749_v47, %v5752_v59  ;;  %v5667_v63 = vld [vmem:[#allocation2 + $0x48] sm:$0xe]  ;;  %v5666_v40 = vld [vmem:[#allocation2 + $0x3c] sm:$0xe] }
 0x39c   : > { %v5427_v54 = vrot.slane %v5425_v11, 5  ;;  %v5433_v12 = vrot.slane %v5431_v1, 5  ;;  %v5441_v57 = vshll.u32 %v5267_v34, 16  ;;  %v5398_v50 = vshrl.u32 %v5239_v36, 16  ;;  %v5245_v49 = vld [vmem:[#allocation2 + $0x60] sm:$0xf] }
 0x39d   : > { %5955 = vrot.lane.b32.xlu1 %v9505_v25, %s10647_s15  ;;  %6037 = vrot.lane.b32.xlu0 %v9522_v16, %s10649_s25  ;;  %v5401_v33 = vshll.u32 %v5239_v36, 16  ;;  %v5407_v19 = vshll.u32 %v13436_v24, 16  ;;  %v5437_v52 = vrot.slane %v5435_v60, 4  ;;  %v5411_v6 = vshrl.u32 %v13436_v24, 16  ;;  %v5246_v20 = vld [vmem:[#allocation2 + $0x64] sm:$0xf] }
 0x39e   : > { %v5428_v55 = vor.u32 %v5427_v54, %v5424_v44  ;;  %v5417_v22 = vshll.u32 %v5266_v21, 16  ;;  %v5443_v46 = vrot.slane %v5441_v57, 5  ;;  %v5400_v32 = vrot.slane %v5398_v50, 4  ;;  %v5269_v53 = vld [vmem:[#allocation2 + $0x68] sm:$0x1] }
 0x39f   : > { %v5403_v5 = vrot.slane %v5401_v33, 5  ;;  %v5409_v56 = vrot.slane %v5407_v19, 5  ;;  %v5438_v4 = vor.u32 %v5437_v52, %v5433_v12  ;;  %v5413_v35 = vrot.slane %v5411_v6, 4  ;;  %v5243_v42 = vld [vmem:[#allocation2 + $0x54] sm:$0xf] }
 0x3a0   : > { %v5429_v51 = vrot.slane %v5428_v55, 4  ;;  %v5419_v30 = vrot.slane %v5417_v22, 5  ;;  %v9476_v2 = vrot.slane %v5667_v63, 9  ;;  %v5769_v37 = vrot.slane %v5242_v7, 5  ;;  %v5268_v25 = vld [vmem:[#allocation2 + $0x5c] sm:$0x1] }
 0x3a1   : > { %6035 = vrot.lane.b32.xlu1 %v9521_v3, %s10649_s25  ;;  %v5404_v26 = vor.u32 %v5403_v5, %v5400_v32  ;;  %v5772_v27 = vrot.slane %v5267_v34, 5  ;;  %v5439_v9 = vrot.slane %v5438_v4, 4  ;;  %v5414_v23 = vor.u32 %v5413_v35, %v5409_v56  ;;  %v5244_v34 = vld [vmem:[#allocation2 + $0x58] sm:$0xf]  ;;  %v5668_v5 = vld [vmem:[#allocation2 + $0x54] sm:$0xe] }
 0x3a2   : > { %v5434_v39 = vsel %vm10762_vm15, %v5429_v51, %v5433_v12  ;;  %v9475_v31 = vrot.slane %v5666_v40, 9  ;;  %v5770_v14 = vsel %vm10737_vm10, %v9476_v2, %v5769_v37  ;;  %v5771_v62 = vrot.slane %v5769_v37, 4  ;;  %v5669_v12 = vld [vmem:[#allocation2 + $0x60] sm:$0xe]  ;;  %v5249_v37 = vld [vmem:[#allocation2 + $0x78] sm:$0xf] }
 0x3a3   : > { %v5405_v17 = vrot.slane %v5404_v26, 4  ;;  %v5762_v13 = vrot.slane %v13436_v24, 5  ;;  %v5444_v10 = vsel %vm10762_vm15, %v5439_v9, %v5443_v46  ;;  %v5415_v0 = vrot.slane %v5414_v23, 4  ;;  %v5250_v23 = vld [vmem:[#allocation2 + $0x7c] sm:$0xf] }
 0x3a4   : > { %v5765_v45 = vrot.slane %v5266_v21, 5  ;;  %v5470_v58 = vshrl.u32 %v5245_v49, 16  ;;  %v9508_v8 = vcombine.low %v5434_v39, %v5444_v10  ;;  %v5773_v28 = vsel %vm10737_vm10, %v5771_v62, %v5772_v27 }
 0x3a5   : > { %v5410_v7 = vsel %vm10762_vm15, %v5405_v17, %v5409_v56  ;;  %v5763_v41 = vsel %vm10737_vm10, %v9475_v31, %v5762_v13  ;;  %v5420_v47 = vsel %vm10762_vm15, %v5415_v0, %v5419_v30  ;;  %v9524_v18 = vcombine.low %v5770_v14, %v5773_v28 }
 0x3a6   : > { %v5764_v38 = vrot.slane %v5762_v13, 4  ;;  %v5472_v11 = vrot.slane %v5470_v58, 4  ;;  %5961 = vrot.lane.b32.xlu0 %v9508_v8, %s10647_s15  ;;  %v9507_v24 = vcombine.low %v5410_v7, %v5420_v47  ;;  %v5473_v43 = vshll.u32 %v5245_v49, 16  ;;  %v5271_v13 = vld [vmem:[#allocation2 + $0x80] sm:$0x1] }
 0x3a7   : > { %v5479_v15 = vshll.u32 %v5246_v20, 16  ;;  %v5483_v61 = vshrl.u32 %v5246_v20, 16  ;;  %v5489_v36 = vshll.u32 %v5269_v53, 16  ;;  %v5446_v16 = vshrl.u32 %v5243_v42, 16 }
 0x3a8   : > { %v5766_v1 = vsel %vm10737_vm10, %v5764_v38, %v5765_v45  ;;  %v5449_v59 = vshll.u32 %v5243_v42, 16  ;;  %5959 = vrot.lane.b32.xlu1 %v9507_v24, %s10647_s15  ;;  %v5475_v21 = vrot.slane %v5473_v43, 5  ;;  %v5455_v33 = vshll.u32 %v5244_v34, 16  ;;  %v5248_v38 = vld [vmem:[#allocation2 + $0x70] sm:$0xf] }
 0x3a9   : > { %v9523_v44 = vcombine.low %v5763_v41, %v5766_v1  ;;  %v5481_v3 = vrot.slane %v5479_v15, 5  ;;  %v5485_v54 = vrot.slane %v5483_v61, 4  ;;  %v5491_v60 = vrot.slane %v5489_v36, 5  ;;  %v5247_v41 = vld [vmem:[#allocation2 + $0x6c] sm:$0xf] }
 0x3aa   : > { %v5448_v57 = vrot.slane %v5446_v16, 4  ;;  %v5451_v50 = vrot.slane %v5449_v59, 5  ;;  %6041 = vrot.lane.b32.xlu0 %v9524_v18, %s10649_s25  ;;  %v5476_v19 = vor.u32 %v5475_v21, %v5472_v11  ;;  %v5459_v52 = vshrl.u32 %v5244_v34, 16  ;;  %v5270_v61 = vld [vmem:[#allocation2 + $0x74] sm:$0x1] }
 0x3ab   : > { %v5486_v55 = vor.u32 %v5485_v54, %v5481_v3  ;;  %v5465_v6 = vshll.u32 %v5268_v25, 16  ;;  %v5457_v63 = vrot.slane %v5455_v33, 5  ;;  %v9478_v46 = vrot.slane %v5669_v12, 9 }
 0x3ac   : > { %v5452_v22 = vor.u32 %v5451_v50, %v5448_v57  ;;  %v5783_v32 = vrot.slane %v5246_v20, 5  ;;  %6039 = vrot.lane.b32.xlu1 %v9523_v44, %s10649_s25  ;;  %v5477_v56 = vrot.slane %v5476_v19, 4  ;;  %v5461_v51 = vrot.slane %v5459_v52, 4  ;;  %v5670_v50 = vld [vmem:[#allocation2 + $0x6c] sm:$0xe] }
 0x3ad   : > { %v5487_v40 = vrot.slane %v5486_v55, 4  ;;  %v5467_v4 = vrot.slane %v5465_v6, 5  ;;  %v5786_v2 = vrot.slane %v5269_v53, 5  ;;  %v9477_v9 = vrot.slane %v5668_v5, 9 }
 0x3ae   : > { %v5453_v35 = vrot.slane %v5452_v22, 4  ;;  %v5784_v30 = vsel %vm10737_vm10, %v9478_v46, %v5783_v32  ;;  %v5785_v26 = vrot.slane %v5783_v32, 4  ;;  %v5482_v27 = vsel %vm10762_vm15, %v5477_v56, %v5481_v3 }
 0x3af   : > { %v5492_v49 = vsel %vm10762_vm15, %v5487_v40, %v5491_v60  ;;  %v5462_v39 = vor.u32 %v5461_v51, %v5457_v63  ;;  %v5776_v62 = vrot.slane %v5244_v34, 5  ;;  %v5779_v45 = vrot.slane %v5268_v25, 5  ;;  %v5671_v34 = vld [vmem:[#allocation2 + $0x78] sm:$0xe]  ;;  %v5253_v51 = vld [vmem:[#allocation2 + $0x90] sm:$0xf] }
 0x3b0   : > { %v9510_v31 = vcombine.low %v5482_v27, %v5492_v49  ;;  %v5458_v17 = vsel %vm10762_vm15, %v5453_v35, %v5457_v63  ;;  %v5787_v14 = vsel %vm10737_vm10, %v5785_v26, %v5786_v2  ;;  %v5518_v20 = vshrl.u32 %v5249_v37, 16 }
 0x3b1   : > { %v5463_v10 = vrot.slane %v5462_v39, 4  ;;  %v9526_v0 = vcombine.low %v5784_v30, %v5787_v14  ;;  %v5777_v58 = vsel %vm10737_vm10, %v9477_v9, %v5776_v62  ;;  %v5778_v8 = vrot.slane %v5776_v62, 4  ;;  %v5254_v39 = vld [vmem:[#allocation2 + $0x94] sm:$0xf] }
 0x3b2   : > { %5965 = vrot.lane.b32.xlu0 %v9510_v31, %s10647_s15  ;;  %v5521_v7 = vshll.u32 %v5249_v37, 16  ;;  %v5527_v28 = vshll.u32 %v5250_v23, 16  ;;  %v5520_v42 = vrot.slane %v5518_v20, 4  ;;  %v5531_v47 = vshrl.u32 %v5250_v23, 16  ;;  %v5252_v20 = vld [vmem:[#allocation2 + $0x88] sm:$0xf] }
 0x3b3   : > { %v5468_v53 = vsel %vm10762_vm15, %v5463_v10, %v5467_v4  ;;  %v5537_v18 = vshll.u32 %v5271_v13, 16  ;;  %v5780_v24 = vsel %vm10737_vm10, %v5778_v8, %v5779_v45  ;;  %v5494_v16 = vshrl.u32 %v5247_v41, 16  ;;  %v5251_v45 = vld [vmem:[#allocation2 + $0x84] sm:$0xf] }
 0x3b4   : > { %v9509_v11 = vcombine.low %v5458_v17, %v5468_v53  ;;  %v5523_v43 = vrot.slane %v5521_v7, 5  ;;  %v5529_v15 = vrot.slane %v5527_v28, 5  ;;  %v9525_v1 = vcombine.low %v5777_v58, %v5780_v24  ;;  %v5273_v17 = vld [vmem:[#allocation2 + $0x98] sm:$0x1] }
 0x3b5   : > { %v5533_v36 = vrot.slane %v5531_v47, 4  ;;  %v5539_v25 = vrot.slane %v5537_v18, 5  ;;  %v5497_v44 = vshll.u32 %v5247_v41, 16  ;;  %v5503_v21 = vshll.u32 %v5248_v38, 16  ;;  %v5272_v18 = vld [vmem:[#allocation2 + $0x8c] sm:$0x1] }
 0x3b6   : > { %5963 = vrot.lane.b32.xlu1 %v9509_v11, %s10647_s15  ;;  %6045 = vrot.lane.b32.xlu0 %v9526_v0, %s10649_s25  ;;  %v5524_v59 = vor.u32 %v5523_v43, %v5520_v42  ;;  %v5507_v3 = vshrl.u32 %v5248_v38, 16  ;;  %v5496_v12 = vrot.slane %v5494_v16, 4  ;;  %v5513_v60 = vshll.u32 %v5270_v61, 16 }
 0x3b7   : > { %v5534_v54 = vor.u32 %v5533_v36, %v5529_v15  ;;  %v9480_v57 = vrot.slane %v5671_v34, 9  ;;  %v5499_v19 = vrot.slane %v5497_v44, 5  ;;  %v5505_v55 = vrot.slane %v5503_v21, 5  ;;  %v5672_v21 = vld [vmem:[#allocation2 + $0x84] sm:$0xe] }
 0x3b8   : > { %v5525_v33 = vrot.slane %v5524_v59, 4  ;;  %v5509_v52 = vrot.slane %v5507_v3, 4  ;;  %v5515_v22 = vrot.slane %v5513_v60, 5  ;;  %v5797_v63 = vrot.slane %v5250_v23, 5 }
 0x3b9   : > { %v5535_v6 = vrot.slane %v5534_v54, 4  ;;  %v5800_v46 = vrot.slane %v5271_v13, 5  ;;  %v5500_v5 = vor.u32 %v5499_v19, %v5496_v12  ;;  %v9479_v40 = vrot.slane %v5670_v50, 9 }
 0x3ba   : > { %6043 = vrot.lane.b32.xlu1 %v9525_v1, %s10649_s25  ;;  %v5530_v32 = vsel %vm10762_vm15, %v5525_v33, %v5529_v15  ;;  %v5510_v56 = vor.u32 %v5509_v52, %v5505_v55  ;;  %v5798_v35 = vsel %vm10737_vm10, %v9480_v57, %v5797_v63  ;;  %v5799_v30 = vrot.slane %v5797_v63, 4  ;;  %v5673_v15 = vld [vmem:[#allocation2 + $0x90] sm:$0xe] }
 0x3bb   : > { %v5540_v4 = vsel %vm10762_vm15, %v5535_v6, %v5539_v25  ;;  %v5790_v26 = vrot.slane %v5248_v38, 5  ;;  %v5501_v37 = vrot.slane %v5500_v5, 4  ;;  %v5793_v49 = vrot.slane %v5270_v61, 5 }
 0x3bc   : > { %v9512_v2 = vcombine.low %v5530_v32, %v5540_v4  ;;  %v5511_v27 = vrot.slane %v5510_v56, 4  ;;  %v5801_v9 = vsel %vm10737_vm10, %v5799_v30, %v5800_v46  ;;  %v5566_v14 = vshrl.u32 %v5253_v51, 16 }
 0x3bd   : > { %v5791_v23 = vsel %vm10737_vm10, %v9479_v40, %v5790_v26  ;;  %v5792_v31 = vrot.slane %v5790_v26, 4  ;;  %v5506_v62 = vsel %vm10762_vm15, %v5501_v37, %v5505_v55  ;;  %v9528_v10 = vcombine.low %v5798_v35, %v5801_v9  ;;  %v5257_v55 = vld [vmem:[#allocation2 + $0xa8] sm:$0xf]  ;;  %v5258_v35 = vld [vmem:[#allocation2 + $0xac] sm:$0xf] }
 0x3be   : > { %5969 = vrot.lane.b32.xlu0 %v9512_v2, %s10647_s15  ;;  %v5516_v13 = vsel %vm10762_vm15, %v5511_v27, %v5515_v22  ;;  %v5569_v0 = vshll.u32 %v5253_v51, 16  ;;  %v5568_v7 = vrot.slane %v5566_v14, 4  ;;  %v5575_v28 = vshll.u32 %v5254_v39, 16 }
 0x3bf   : > { %v9511_v58 = vcombine.low %v5506_v62, %v5516_v13  ;;  %v5794_v8 = vsel %vm10737_vm10, %v5792_v31, %v5793_v49  ;;  %v5579_v42 = vshrl.u32 %v5254_v39, 16  ;;  %v5585_v47 = vshll.u32 %v5273_v17, 16  ;;  %v5275_v49 = vld [vmem:[#allocation2 + $0xb0] sm:$0x1] }
 0x3c0   : > { %v9527_v41 = vcombine.low %v5791_v23, %v5794_v8  ;;  %v5571_v53 = vrot.slane %v5569_v0, 5  ;;  %v5577_v38 = vrot.slane %v5575_v28, 5  ;;  %v5542_v11 = vshrl.u32 %v5251_v45, 16  ;;  %v5256_v0 = vld [vmem:[#allocation2 + $0xa0] sm:$0xf] }
 0x3c1   : > { %5967 = vrot.lane.b32.xlu1 %v9511_v58, %s10647_s15  ;;  %v5545_v24 = vshll.u32 %v5251_v45, 16  ;;  %v5551_v43 = vshll.u32 %v5252_v20, 16  ;;  %v5581_v34 = vrot.slane %v5579_v42, 4  ;;  %v5587_v1 = vrot.slane %v5585_v47, 5  ;;  %v5274_v58 = vld [vmem:[#allocation2 + $0xa4] sm:$0x1] }
 0x3c2   : > { %6049 = vrot.lane.b32.xlu0 %v9528_v10, %s10649_s25  ;;  %v5572_v61 = vor.u32 %v5571_v53, %v5568_v7  ;;  %v5555_v36 = vshrl.u32 %v5252_v20, 16  ;;  %v5544_v25 = vrot.slane %v5542_v11, 4  ;;  %v5561_v44 = vshll.u32 %v5272_v18, 16  ;;  %v5675_v47 = vld [vmem:[#allocation2 + $0xa8] sm:$0xe] }
 0x3c3   : > { %v5547_v16 = vrot.slane %v5545_v24, 5  ;;  %v5553_v59 = vrot.slane %v5551_v43, 5  ;;  %v5582_v54 = vor.u32 %v5581_v34, %v5577_v38  ;;  %v9482_v60 = vrot.slane %v5673_v15, 9 }
 0x3c4   : > { %v5573_v3 = vrot.slane %v5572_v61, 4  ;;  %v5557_v12 = vrot.slane %v5555_v36, 4  ;;  %v5563_v50 = vrot.slane %v5561_v44, 5  ;;  %v5811_v33 = vrot.slane %v5254_v39, 5  ;;  %v5255_v39 = vld [vmem:[#allocation2 + $0x9c] sm:$0xf] }
 0x3c5   : > { %6047 = vrot.lane.b32.xlu1 %v9527_v41, %s10649_s25  ;;  %v5548_v57 = vor.u32 %v5547_v16, %v5544_v25  ;;  %v5814_v19 = vrot.slane %v5273_v17, 5  ;;  %v5583_v6 = vrot.slane %v5582_v54, 4  ;;  %v9481_v63 = vrot.slane %v5672_v21, 9 }
 0x3c6   : > { %v5578_v52 = vsel %vm10762_vm15, %v5573_v3, %v5577_v38  ;;  %v5558_v22 = vor.u32 %v5557_v12, %v5553_v59  ;;  %v5812_v32 = vsel %vm10737_vm10, %v9482_v60, %v5811_v33  ;;  %v5813_v5 = vrot.slane %v5811_v33, 4  ;;  %v6359_v33 = vld [vmem:[#allocation2 + $0xc] sm:$0xf] }
 0x3c7   : > { %v5549_v46 = vrot.slane %v5548_v57, 4  ;;  %v5804_v56 = vrot.slane %v5252_v20, 5  ;;  %v5588_v40 = vsel %vm10762_vm15, %v5583_v6, %v5587_v1  ;;  %v5807_v4 = vrot.slane %v5272_v18, 5 }
 0x3c8   : > { %v5559_v51 = vrot.slane %v5558_v22, 4  ;;  %v5614_v30 = vshrl.u32 %v5257_v55, 16  ;;  %v9514_v26 = vcombine.low %v5578_v52, %v5588_v40  ;;  %v5815_v37 = vsel %vm10737_vm10, %v5813_v5, %v5814_v19  ;;  %v6360_v22 = vld [vmem:[#allocation2 + $0x10] sm:$0xf] }
 0x3c9   : > { %v5554_v2 = vsel %vm10762_vm15, %v5549_v46, %v5553_v59  ;;  %v5805_v27 = vsel %vm10737_vm10, %v9481_v63, %v5804_v56  ;;  %v9530_v23 = vcombine.low %v5812_v32, %v5815_v37  ;;  %v5806_v31 = vrot.slane %v5804_v56, 4  ;;  %v5674_v59 = vld [vmem:[#allocation2 + $0x9c] sm:$0xe]  ;;  %v6391_v56 = vld [vmem:[#allocation2 + $0x14] sm:$0x1] }
 0x3ca   : > { %v5564_v9 = vsel %vm10762_vm15, %v5559_v51, %v5563_v50  ;;  %v5616_v17 = vrot.slane %v5614_v30, 4  ;;  %5973 = vrot.lane.b32.xlu0 %v9514_v26, %s10647_s15  ;;  %v5617_v62 = vshll.u32 %v5257_v55, 16  ;;  %v5623_v13 = vshll.u32 %v5258_v35, 16 }
 0x3cb   : > { %v9513_v14 = vcombine.low %v5554_v2, %v5564_v9  ;;  %v5627_v10 = vshrl.u32 %v5258_v35, 16  ;;  %v5808_v45 = vsel %vm10737_vm10, %v5806_v31, %v5807_v4  ;;  %v5633_v20 = vshll.u32 %v5275_v49, 16  ;;  %v5260_v31 = vld [vmem:[#allocation2 + $0xb8] sm:$0xf] }
 0x3cc   : > { %v5590_v8 = vshrl.u32 %v5255_v39, 16  ;;  %v5593_v7 = vshll.u32 %v5255_v39, 16  ;;  %v9529_v28 = vcombine.low %v5805_v27, %v5808_v45  ;;  %v5619_v41 = vrot.slane %v5617_v62, 5  ;;  %v5259_v27 = vld [vmem:[#allocation2 + $0xb4] sm:$0xf] }
 0x3cd   : > { %5971 = vrot.lane.b32.xlu1 %v9513_v14, %s10647_s15  ;;  %v5625_v53 = vrot.slane %v5623_v13, 5  ;;  %v5629_v42 = vrot.slane %v5627_v10, 4  ;;  %v5635_v18 = vrot.slane %v5633_v20, 5  ;;  %v5599_v24 = vshll.u32 %v5256_v0, 16  ;;  %v5276_v10 = vld [vmem:[#allocation2 + $0xbc] sm:$0x1] }
 0x3ce   : > { %v5592_v38 = vrot.slane %v5590_v8, 4  ;;  %v5595_v11 = vrot.slane %v5593_v7, 5  ;;  %6053 = vrot.lane.b32.xlu0 %v9530_v23, %s10649_s25  ;;  %v5620_v43 = vor.u32 %v5619_v41, %v5616_v17  ;;  %v5603_v61 = vshrl.u32 %v5256_v0, 16 }
 0x3cf   : > { %v5630_v15 = vor.u32 %v5629_v42, %v5625_v53  ;;  %v5609_v34 = vshll.u32 %v5274_v58, 16  ;;  %v5601_v36 = vrot.slane %v5599_v24, 5  ;;  %v9484_v25 = vrot.slane %v5675_v47, 9 }
 0x3d0   : > { %v5596_v1 = vor.u32 %v5595_v11, %v5592_v38  ;;  %v5825_v16 = vrot.slane %v5258_v35, 5  ;;  %v5621_v44 = vrot.slane %v5620_v43, 4  ;;  %v5605_v3 = vrot.slane %v5603_v61, 4  ;;  %v5676_v11 = vld [vmem:[#allocation2 + $0xb4] sm:$0xe] }
 0x3d1   : > { %6051 = vrot.lane.b32.xlu1 %v9529_v28, %s10649_s25  ;;  %v5631_v21 = vrot.slane %v5630_v15, 4  ;;  %v5611_v54 = vrot.slane %v5609_v34, 5  ;;  %v5828_v50 = vrot.slane %v5275_v49, 5  ;;  %v9483_v6 = vrot.slane %v5674_v59, 9 }
 0x3d2   : > { %v5597_v12 = vrot.slane %v5596_v1, 4  ;;  %v5826_v60 = vsel %vm10737_vm10, %v9484_v25, %v5825_v16  ;;  %v5827_v57 = vrot.slane %v5825_v16, 4  ;;  %v5626_v19 = vsel %vm10762_vm15, %v5621_v44, %v5625_v53 }
 0x3d3   : > { %v5636_v55 = vsel %vm10762_vm15, %v5631_v21, %v5635_v18  ;;  %v5606_v52 = vor.u32 %v5605_v3, %v5601_v36  ;;  %v5818_v5 = vrot.slane %v5256_v0, 5  ;;  %v5821_v4 = vrot.slane %v5274_v58, 5  ;;  %v6791_v0 = vld [vmem:[#allocation2 + $0xc] sm:$0xe]  ;;  %v6363_v3 = vld [vmem:[#allocation2 + $0x24] sm:$0xf] }
 0x3d4   : > { %v9516_v63 = vcombine.low %v5626_v19, %v5636_v55  ;;  %v5602_v46 = vsel %vm10762_vm15, %v5597_v12, %v5601_v36  ;;  %v5829_v32 = vsel %vm10737_vm10, %v5827_v57, %v5828_v50  ;;  %v6408_v35 = vshrl.u32 %v6359_v33, 16 }
 0x3d5   : > { %v5607_v40 = vrot.slane %v5606_v52, 4  ;;  %v9532_v51 = vcombine.low %v5826_v60, %v5829_v32  ;;  %v5819_v30 = vsel %vm10737_vm10, %v9483_v6, %v5818_v5  ;;  %v5820_v26 = vrot.slane %v5818_v5, 4  ;;  %v6364_v52 = vld [vmem:[#allocation2 + $0x28] sm:$0xf] }
 0x3d6   : > { %5977 = vrot.lane.b32.xlu0 %v9516_v63, %s10647_s15  ;;  %v6411_v2 = vshll.u32 %v6359_v33, 16  ;;  %v6417_v37 = vshll.u32 %v6360_v22, 16  ;;  %v6410_v39 = vrot.slane %v6408_v35, 4  ;;  %v6421_v9 = vshrl.u32 %v6360_v22, 16  ;;  %v6362_v35 = vld [vmem:[#allocation2 + $0x1c] sm:$0xf] }
 0x3d7   : > { %v5612_v49 = vsel %vm10762_vm15, %v5607_v40, %v5611_v54  ;;  %v6427_v23 = vshll.u32 %v6391_v56, 16  ;;  %v5822_v14 = vsel %vm10737_vm10, %v5820_v26, %v5821_v4  ;;  %v5638_v8 = vshrl.u32 %v5259_v27, 16  ;;  %v6361_v4 = vld [vmem:[#allocation2 + $0x18] sm:$0xf] }
 0x3d8   : > { %v9515_v17 = vcombine.low %v5602_v46, %v5612_v49  ;;  %v6413_v62 = vrot.slane %v6411_v2, 5  ;;  %v6419_v13 = vrot.slane %v6417_v37, 5  ;;  %v9531_v45 = vcombine.low %v5819_v30, %v5822_v14  ;;  %v6393_v46 = vld [vmem:[#allocation2 + $0x2c] sm:$0x1] }
 0x3d9   : > { %v6423_v20 = vrot.slane %v6421_v9, 4  ;;  %v6429_v58 = vrot.slane %v6427_v23, 5  ;;  %v5641_v28 = vshll.u32 %v5259_v27, 16  ;;  %v5647_v41 = vshll.u32 %v5260_v31, 16  ;;  %v6392_v23 = vld [vmem:[#allocation2 + $0x20] sm:$0x1] }
 0x3da   : > { %5975 = vrot.lane.b32.xlu1 %v9515_v17, %s10647_s15  ;;  %6057 = vrot.lane.b32.xlu0 %v9532_v51, %s10649_s25  ;;  %v6414_v7 = vor.u32 %v6413_v62, %v6410_v39  ;;  %v5651_v53 = vshrl.u32 %v5260_v31, 16  ;;  %v5640_v47 = vrot.slane %v5638_v8, 4  ;;  %v5657_v18 = vshll.u32 %v5276_v10, 16 }
 0x3db   : > { %v6424_v42 = vor.u32 %v6423_v20, %v6419_v13  ;;  %v9553_v38 = vrot.slane %v6791_v0, 9  ;;  %v5643_v43 = vrot.slane %v5641_v28, 5  ;;  %v5649_v15 = vrot.slane %v5647_v41, 5  ;;  %v6792_v41 = vld [vmem:[#allocation2 + $0x18] sm:$0xe] }
 0x3dc   : > { %v6415_v24 = vrot.slane %v6414_v7, 4  ;;  %v5653_v61 = vrot.slane %v5651_v53, 4  ;;  %v5659_v1 = vrot.slane %v5657_v18, 5  ;;  %v6857_v36 = vrot.slane %v6360_v22, 5 }
 0x3dd   : > { %v6425_v34 = vrot.slane %v6424_v42, 4  ;;  %v6860_v25 = vrot.slane %v6391_v56, 5  ;;  %v5644_v59 = vor.u32 %v5643_v43, %v5640_v47  ;;  %v9485_v21 = vrot.slane %v5676_v11, 9 }
 0x3de   : > { %6055 = vrot.lane.b32.xlu1 %v9531_v45, %s10649_s25  ;;  %v6420_v16 = vsel %vm10762_vm15, %v6415_v24, %v6419_v13  ;;  %v5654_v44 = vor.u32 %v5653_v61, %v5649_v15  ;;  %v6858_v12 = vsel %vm10737_vm10, %v9553_v38, %v6857_v36  ;;  %v6859_v60 = vrot.slane %v6857_v36, 4  ;;  %v6793_v13 = vld [vmem:[#allocation2 + $0x24] sm:$0xe] }
 0x3df   : > { %v6430_v54 = vsel %vm10762_vm15, %v6425_v34, %v6429_v58  ;;  %v5832_v57 = vrot.slane %v5260_v31, 5  ;;  %v5645_v33 = vrot.slane %v5644_v59, 4  ;;  %v5835_v55 = vrot.slane %v5276_v10, 5 }
 0x3e0   : > { %v9585_v50 = vcombine.low %v6420_v16, %v6430_v54  ;;  %v5655_v19 = vrot.slane %v5654_v44, 4  ;;  %v6861_v6 = vsel %vm10737_vm10, %v6859_v60, %v6860_v25  ;;  %v6456_v32 = vshrl.u32 %v6363_v3, 16 }
 0x3e1   : > { %v5833_v22 = vsel %vm10737_vm10, %v9485_v21, %v5832_v57  ;;  %v5834_v63 = vrot.slane %v5832_v57, 4  ;;  %v5650_v5 = vsel %vm10762_vm15, %v5645_v33, %v5649_v15  ;;  %v9601_v40 = vcombine.low %v6858_v12, %v6861_v6  ;;  %v6367_v15 = vld [vmem:[#allocation2 + $0x3c] sm:$0xf]  ;;  %v6368_v12 = vld [vmem:[#allocation2 + $0x40] sm:$0xf] }
 0x3e2   : > { %7079 = vrot.lane.b32.xlu0 %v9585_v50, %s10647_s15  ;;  %v5660_v56 = vsel %vm10762_vm15, %v5655_v19, %v5659_v1  ;;  %v6459_v51 = vshll.u32 %v6363_v3, 16  ;;  %v6458_v2 = vrot.slane %v6456_v32, 4  ;;  %v6465_v37 = vshll.u32 %v6364_v52, 16 }
 0x3e3   : > { %v9517_v30 = vcombine.low %v5650_v5, %v5660_v56  ;;  %v5836_v26 = vsel %vm10737_vm10, %v5834_v63, %v5835_v55  ;;  %v6469_v39 = vshrl.u32 %v6364_v52, 16  ;;  %v6475_v9 = vshll.u32 %v6393_v46, 16  ;;  %v6395_v55 = vld [vmem:[#allocation2 + $0x44] sm:$0x1] }
 0x3e4   : > { %v9533_v27 = vcombine.low %v5833_v22, %v5836_v26  ;;  %v6461_v49 = vrot.slane %v6459_v51, 5  ;;  %v6467_v31 = vrot.slane %v6465_v37, 5  ;;  %v6432_v17 = vshrl.u32 %v6361_v4, 16  ;;  %v6366_v51 = vld [vmem:[#allocation2 + $0x34] sm:$0xf] }
 0x3e5   : > { %5979 = vrot.lane.b32.xlu1 %v9517_v30, %s10647_s15  ;;  %v6435_v14 = vshll.u32 %v6361_v4, 16  ;;  %v6441_v62 = vshll.u32 %v6362_v35, 16  ;;  %v6471_v0 = vrot.slane %v6469_v39, 4  ;;  %v6477_v45 = vrot.slane %v6475_v9, 5  ;;  %v6394_v30 = vld [vmem:[#allocation2 + $0x38] sm:$0x1] }
 0x3e6   : > { %7159 = vrot.lane.b32.xlu0 %v9601_v40, %s10649_s25  ;;  %v6462_v10 = vor.u32 %v6461_v49, %v6458_v2  ;;  %v6445_v20 = vshrl.u32 %v6362_v35, 16  ;;  %v6434_v58 = vrot.slane %v6432_v17, 4  ;;  %v6451_v28 = vshll.u32 %v6392_v23, 16  ;;  %v6795_v9 = vld [vmem:[#allocation2 + $0x3c] sm:$0xe] }
 0x3e7   : > { %v6437_v8 = vrot.slane %v6435_v14, 5  ;;  %v6443_v7 = vrot.slane %v6441_v62, 5  ;;  %v6472_v42 = vor.u32 %v6471_v0, %v6467_v31  ;;  %v9555_v18 = vrot.slane %v6793_v13, 9 }
 0x3e8   : > { %v6463_v53 = vrot.slane %v6462_v10, 4  ;;  %v6447_v47 = vrot.slane %v6445_v20, 4  ;;  %v6453_v11 = vrot.slane %v6451_v28, 5  ;;  %v6871_v24 = vrot.slane %v6364_v52, 5  ;;  %v6365_v52 = vld [vmem:[#allocation2 + $0x30] sm:$0xf] }
 0x3e9   : > { %6059 = vrot.lane.b32.xlu1 %v9533_v27, %s10649_s25  ;;  %v6438_v38 = vor.u32 %v6437_v8, %v6434_v58  ;;  %v6874_v43 = vrot.slane %v6393_v46, 5  ;;  %v6473_v34 = vrot.slane %v6472_v42, 4  ;;  %v9554_v36 = vrot.slane %v6792_v41, 9 }
 0x3ea   : > { %v6468_v61 = vsel %vm10762_vm15, %v6463_v53, %v6467_v31  ;;  %v6448_v1 = vor.u32 %v6447_v47, %v6443_v7  ;;  %v6872_v16 = vsel %vm10737_vm10, %v9555_v18, %v6871_v24  ;;  %v6873_v59 = vrot.slane %v6871_v24, 4  ;;  %v6371_v24 = vld [vmem:[#allocation2 + $0x54] sm:$0xf] }
 0x3eb   : > { %v6439_v25 = vrot.slane %v6438_v38, 4  ;;  %v6864_v44 = vrot.slane %v6362_v35, 5  ;;  %v6478_v21 = vsel %vm10762_vm15, %v6473_v34, %v6477_v45  ;;  %v6867_v54 = vrot.slane %v6392_v23, 5 }
 0x3ec   : > { %v6449_v3 = vrot.slane %v6448_v1, 4  ;;  %v6504_v60 = vshrl.u32 %v6367_v15, 16  ;;  %v9587_v57 = vcombine.low %v6468_v61, %v6478_v21  ;;  %v6875_v33 = vsel %vm10737_vm10, %v6873_v59, %v6874_v43  ;;  %v6372_v1 = vld [vmem:[#allocation2 + $0x58] sm:$0xf] }
 0x3ed   : > { %v6444_v50 = vsel %vm10762_vm15, %v6439_v25, %v6443_v7  ;;  %v6865_v19 = vsel %vm10737_vm10, %v9554_v36, %v6864_v44  ;;  %v9603_v22 = vcombine.low %v6872_v16, %v6875_v33  ;;  %v6866_v63 = vrot.slane %v6864_v44, 4  ;;  %v6794_v7 = vld [vmem:[#allocation2 + $0x30] sm:$0xe]  ;;  %v13602_v44 = vld [vmem:[#allocation2 + $0x5c] sm:$0x1] }
 0x3ee   : > { %v6454_v6 = vsel %vm10762_vm15, %v6449_v3, %v6453_v11  ;;  %v6506_v46 = vrot.slane %v6504_v60, 4  ;;  %7083 = vrot.lane.b32.xlu0 %v9587_v57, %s10647_s15  ;;  %v6507_v5 = vshll.u32 %v6367_v15, 16  ;;  %v6513_v56 = vshll.u32 %v6368_v12, 16 }
 0x3ef   : > { %v9586_v32 = vcombine.low %v6444_v50, %v6454_v6  ;;  %v6517_v40 = vshrl.u32 %v6368_v12, 16  ;;  %v6868_v4 = vsel %vm10737_vm10, %v6866_v63, %v6867_v54  ;;  %v6523_v35 = vshll.u32 %v6395_v55, 16  ;;  %v6370_v63 = vld [vmem:[#allocation2 + $0x4c] sm:$0xf] }
 0x3f0   : > { %v6480_v26 = vshrl.u32 %v6365_v52, 16  ;;  %v6483_v2 = vshll.u32 %v6365_v52, 16  ;;  %v9602_v37 = vcombine.low %v6865_v19, %v6868_v4  ;;  %v6509_v27 = vrot.slane %v6507_v5, 5  ;;  %v6369_v19 = vld [vmem:[#allocation2 + $0x48] sm:$0xf] }
 0x3f1   : > { %7081 = vrot.lane.b32.xlu1 %v9586_v32, %s10647_s15  ;;  %v6515_v49 = vrot.slane %v6513_v56, 5  ;;  %v6519_v39 = vrot.slane %v6517_v40, 4  ;;  %v6525_v23 = vrot.slane %v6523_v35, 5  ;;  %v6489_v14 = vshll.u32 %v6366_v51, 16  ;;  %v6396_v40 = vld [vmem:[#allocation2 + $0x50] sm:$0x1] }
 0x3f2   : > { %v6482_v31 = vrot.slane %v6480_v26, 4  ;;  %v6485_v17 = vrot.slane %v6483_v2, 5  ;;  %7163 = vrot.lane.b32.xlu0 %v9603_v22, %s10649_s25  ;;  %v6510_v62 = vor.u32 %v6509_v27, %v6506_v46  ;;  %v6493_v10 = vshrl.u32 %v6366_v51, 16 }
 0x3f3   : > { %v6520_v13 = vor.u32 %v6519_v39, %v6515_v49  ;;  %v6499_v0 = vshll.u32 %v6394_v30, 16  ;;  %v6491_v20 = vrot.slane %v6489_v14, 5  ;;  %v9557_v58 = vrot.slane %v6795_v9, 9  ;;  %v13614_v14 = vpop.permute.xlu0 %5949 }
 0x3f4   : > { %v6486_v45 = vor.u32 %v6485_v17, %v6482_v31  ;;  %v6885_v8 = vrot.slane %v6368_v12, 5  ;;  %v6511_v28 = vrot.slane %v6510_v62, 4  ;;  %v6495_v53 = vrot.slane %v6493_v10, 4  ;;  %v6796_v17 = vld [vmem:[#allocation2 + $0x48] sm:$0xe] }
 0x3f5   : > { %7161 = vrot.lane.b32.xlu1 %v9602_v37, %s10649_s25  ;;  %v6521_v41 = vrot.slane %v6520_v13, 4  ;;  %v6501_v42 = vrot.slane %v6499_v0, 5  ;;  %v6888_v11 = vrot.slane %v6395_v55, 5  ;;  %v9556_v34 = vrot.slane %v6794_v7, 9 }
 0x3f6   : > { %v6487_v47 = vrot.slane %v6486_v45, 4  ;;  %v6886_v18 = vsel %vm10737_vm10, %v9557_v58, %v6885_v8  ;;  %v6887_v38 = vrot.slane %v6885_v8, 4  ;;  %v6516_v43 = vsel %vm10762_vm15, %v6511_v28, %v6515_v49 }
 0x3f7   : > { %v6526_v15 = vsel %vm10762_vm15, %v6521_v41, %v6525_v23  ;;  %v6496_v61 = vor.u32 %v6495_v53, %v6491_v20  ;;  %v6878_v59 = vrot.slane %v6366_v51, 5  ;;  %v6881_v54 = vrot.slane %v6394_v30, 5  ;;  %v6797_v51 = vld [vmem:[#allocation2 + $0x54] sm:$0xe] }
 0x3f8   : > { %v9589_v36 = vcombine.low %v6516_v43, %v6526_v15  ;;  %v6492_v25 = vsel %vm10762_vm15, %v6487_v47, %v6491_v20  ;;  %v6889_v16 = vsel %vm10737_vm10, %v6887_v38, %v6888_v11  ;;  %v6552_v12 = vshrl.u32 %v6371_v24, 16 }
 0x3f9   : > { %v6497_v21 = vrot.slane %v6496_v61, 4  ;;  %v9605_v3 = vcombine.low %v6886_v18, %v6889_v16  ;;  %v6879_v60 = vsel %vm10737_vm10, %v9556_v34, %v6878_v59  ;;  %v6880_v57 = vrot.slane %v6878_v59, 4  ;;  %v6376_v34 = vld [vmem:[#allocation2 + $0x70] sm:$0xf]  ;;  %v13628_v16 = vld [vmem:[#allocation2 + $0x74] sm:$0x1] }
 0x3fa   : > { %7087 = vrot.lane.b32.xlu0 %v9589_v36, %s10647_s15  ;;  %v6555_v50 = vshll.u32 %v6371_v24, 16  ;;  %v6561_v33 = vshll.u32 %v6372_v1, 16  ;;  %v6554_v52 = vrot.slane %v6552_v12, 4  ;;  %v6565_v6 = vshrl.u32 %v6372_v1, 16 }
 0x3fb   : > { %v6502_v55 = vsel %vm10762_vm15, %v6497_v21, %v6501_v42  ;;  %v6571_v22 = vshll.u32 %v13602_v44, 16  ;;  %v6882_v32 = vsel %vm10737_vm10, %v6880_v57, %v6881_v54  ;;  %v6528_v26 = vshrl.u32 %v6369_v19, 16  ;;  %v6375_v42 = vld [vmem:[#allocation2 + $0x6c] sm:$0xf]  ;;  %v6374_v57 = vld [vmem:[#allocation2 + $0x64] sm:$0xf] }
 0x3fc   : > { %v9588_v46 = vcombine.low %v6492_v25, %v6502_v55  ;;  %v6557_v5 = vrot.slane %v6555_v50, 5  ;;  %v6563_v56 = vrot.slane %v6561_v33, 5  ;;  %v9604_v4 = vcombine.low %v6879_v60, %v6882_v32  ;;  %v6373_v60 = vld [vmem:[#allocation2 + $0x60] sm:$0xf] }
 0x3fd   : > { %v6567_v35 = vrot.slane %v6565_v6, 4  ;;  %v6573_v30 = vrot.slane %v6571_v22, 5  ;;  %v6531_v37 = vshll.u32 %v6369_v19, 16  ;;  %v6537_v27 = vshll.u32 %v6370_v63, 16 }
 0x3fe   : > { %7085 = vrot.lane.b32.xlu1 %v9588_v46, %s10647_s15  ;;  %7167 = vrot.lane.b32.xlu0 %v9605_v3, %s10649_s25  ;;  %v6558_v2 = vor.u32 %v6557_v5, %v6554_v52  ;;  %v6541_v49 = vshrl.u32 %v6370_v63, 16  ;;  %v6530_v9 = vrot.slane %v6528_v26, 4  ;;  %v6547_v23 = vshll.u32 %v6396_v40, 16  ;;  %v6398_v46 = vld [vmem:[#allocation2 + $0x68] sm:$0x1] }
 0x3ff   : > { %v6568_v39 = vor.u32 %v6567_v35, %v6563_v56  ;;  %v9559_v31 = vrot.slane %v6797_v51, 9  ;;  %v6533_v13 = vrot.slane %v6531_v37, 5  ;;  %v6539_v10 = vrot.slane %v6537_v27, 5  ;;  %v6799_v51 = vld [vmem:[#allocation2 + $0x6c] sm:$0xe] }
 0x400   : > { %v6559_v62 = vrot.slane %v6558_v2, 4  ;;  %v6543_v0 = vrot.slane %v6541_v49, 4  ;;  %v6549_v20 = vrot.slane %v6547_v23, 5  ;;  %v6899_v58 = vrot.slane %v6372_v1, 5 }
 0x401   : > { %v6569_v45 = vrot.slane %v6568_v39, 4  ;;  %v6902_v8 = vrot.slane %v13602_v44, 5  ;;  %v6534_v28 = vor.u32 %v6533_v13, %v6530_v9  ;;  %v9558_v53 = vrot.slane %v6796_v17, 9  ;;  %v13630_v44 = vpop.permute.xlu0 %6029  ;;  %v6798_v39 = vld [vmem:[#allocation2 + $0x60] sm:$0xe] }
 0x402   : > { %7165 = vrot.lane.b32.xlu1 %v9604_v4, %s10649_s25  ;;  %v6564_v7 = vsel %vm10762_vm15, %v6559_v62, %v6563_v56  ;;  %v6544_v41 = vor.u32 %v6543_v0, %v6539_v10  ;;  %v6900_v18 = vsel %vm10737_vm10, %v9559_v31, %v6899_v58  ;;  %v6901_v38 = vrot.slane %v6899_v58, 4  ;;  %v13646_v58 = vpop.permute.xlu1 %5951 }
 0x403   : > { %v6574_v47 = vsel %vm10762_vm15, %v6569_v45, %v6573_v30  ;;  %v6892_v11 = vrot.slane %v6370_v63, 5  ;;  %v6535_v43 = vrot.slane %v6534_v28, 4  ;;  %v6895_v61 = vrot.slane %v6396_v40, 5 }
 0x404   : > { %v9591_v24 = vcombine.low %v6564_v7, %v6574_v47  ;;  %v6545_v15 = vrot.slane %v6544_v41, 4  ;;  %v6903_v1 = vsel %vm10737_vm10, %v6901_v38, %v6902_v8  ;;  %v6600_v59 = vshrl.u32 %v6375_v42, 16 }
 0x405   : > { %v6893_v36 = vsel %vm10737_vm10, %v9558_v53, %v6892_v11  ;;  %v6894_v25 = vrot.slane %v6892_v11, 4  ;;  %v6540_v21 = vsel %vm10762_vm15, %v6535_v43, %v6539_v10  ;;  %v9607_v54 = vcombine.low %v6900_v18, %v6903_v1  ;;  %v13642_v9 = vpop.permute.xlu0 %5953  ;;  %v6380_v43 = vld [vmem:[#allocation2 + $0x88] sm:$0xf] }
 0x406   : > { %7091 = vrot.lane.b32.xlu0 %v9591_v24, %s10647_s15  ;;  %v6550_v3 = vsel %vm10762_vm15, %v6545_v15, %v6549_v20  ;;  %v6603_v12 = vshll.u32 %v6375_v42, 16  ;;  %v6602_v19 = vrot.slane %v6600_v59, 4  ;;  %v6609_v55 = vshll.u32 %v6376_v34, 16  ;;  %v6379_v20 = vld [vmem:[#allocation2 + $0x84] sm:$0xf] }
 0x407   : > { %v9590_v50 = vcombine.low %v6540_v21, %v6550_v3  ;;  %v6896_v33 = vsel %vm10737_vm10, %v6894_v25, %v6895_v61  ;;  %v6613_v22 = vshrl.u32 %v6376_v34, 16  ;;  %v6619_v63 = vshll.u32 %v13628_v16, 16  ;;  %v6401_v25 = vld [vmem:[#allocation2 + $0x8c] sm:$0x1] }
 0x408   : > { %v9606_v52 = vcombine.low %v6893_v36, %v6896_v33  ;;  %v6605_v6 = vrot.slane %v6603_v12, 5  ;;  %v6611_v32 = vrot.slane %v6609_v55, 5  ;;  %v6576_v5 = vshrl.u32 %v6373_v60, 16  ;;  %v13665_v55 = vpop.permute.xlu1 %6031 }
 0x409   : > { %7089 = vrot.lane.b32.xlu1 %v9590_v50, %s10647_s15  ;;  %v6579_v56 = vshll.u32 %v6373_v60, 16  ;;  %v6585_v40 = vshll.u32 %v6374_v57, 16  ;;  %v6615_v35 = vrot.slane %v6613_v22, 4  ;;  %v6621_v30 = vrot.slane %v6619_v63, 5  ;;  %v13660_v59 = vpop.permute.xlu0 %6033  ;;  %v13669_v22 = vld [vmem:[#allocation2 + $0x80] sm:$0x1] }
 0x40a   : > { %7171 = vrot.lane.b32.xlu0 %v9607_v54, %s10649_s25  ;;  %v6606_v4 = vor.u32 %v6605_v6, %v6602_v19  ;;  %v6589_v26 = vshrl.u32 %v6374_v57, 16  ;;  %v6578_v2 = vrot.slane %v6576_v5, 4  ;;  %v6595_v49 = vshll.u32 %v6398_v46, 16  ;;  %v6378_v19 = vld [vmem:[#allocation2 + $0x7c] sm:$0xf] }
 0x40b   : > { %v6581_v37 = vrot.slane %v6579_v56, 5  ;;  %v6587_v27 = vrot.slane %v6585_v40, 5  ;;  %v6616_v31 = vor.u32 %v6615_v35, %v6611_v32  ;;  %v9561_v62 = vrot.slane %v6799_v51, 9  ;;  %v6801_v51 = vld [vmem:[#allocation2 + $0x84] sm:$0xe] }
 0x40c   : > { %v6607_v23 = vrot.slane %v6606_v4, 4  ;;  %v6591_v17 = vrot.slane %v6589_v26, 4  ;;  %v6597_v10 = vrot.slane %v6595_v49, 5  ;;  %v6913_v0 = vrot.slane %v6376_v34, 5 }
 0x40d   : > { %7169 = vrot.lane.b32.xlu1 %v9606_v52, %s10649_s25  ;;  %v6582_v13 = vor.u32 %v6581_v37, %v6578_v2  ;;  %v6916_v45 = vrot.slane %v13628_v16, 5  ;;  %v6617_v7 = vrot.slane %v6616_v31, 4  ;;  %v9560_v41 = vrot.slane %v6798_v39, 9  ;;  %v6377_v16 = vld [vmem:[#allocation2 + $0x78] sm:$0xf]  ;;  %v13674_v39 = vpop.permute.xlu0 %5957 }
 0x40e   : > { %v6612_v8 = vsel %vm10762_vm15, %v6607_v23, %v6611_v32  ;;  %v6592_v28 = vor.u32 %v6591_v17, %v6587_v27  ;;  %v6914_v42 = vsel %vm10737_vm10, %v9561_v62, %v6913_v0  ;;  %v6915_v47 = vrot.slane %v6913_v0, 4 }
 0x40f   : > { %v6583_v53 = vrot.slane %v6582_v13, 4  ;;  %v6906_v18 = vrot.slane %v6374_v57, 5  ;;  %v6622_v38 = vsel %vm10762_vm15, %v6617_v7, %v6621_v30  ;;  %v6909_v24 = vrot.slane %v6398_v46, 5  ;;  %v6800_v13 = vld [vmem:[#allocation2 + $0x78] sm:$0xe] }
 0x410   : > { %v6593_v11 = vrot.slane %v6592_v28, 4  ;;  %v6648_v15 = vshrl.u32 %v6379_v20, 16  ;;  %v9593_v61 = vcombine.low %v6612_v8, %v6622_v38  ;;  %v6917_v1 = vsel %vm10737_vm10, %v6915_v47, %v6916_v45  ;;  %v13677_v8 = vpop.permute.xlu1 %5955 }
 0x411   : > { %v6588_v34 = vsel %vm10762_vm15, %v6583_v53, %v6587_v27  ;;  %v6907_v36 = vsel %vm10737_vm10, %v9560_v41, %v6906_v18  ;;  %v9609_v3 = vcombine.low %v6914_v42, %v6917_v1  ;;  %v6908_v54 = vrot.slane %v6906_v18, 4  ;;  %v10401_v42 = vld [vmem:[%s14812_s5 + $0x8] ss:$0 sps:$4 sm:$0xff]   ;;  %v13692_v1 = vld [vmem:[#allocation2 + $0xa0] sm:$0xf] }
 0x412   : > { %v6598_v21 = vsel %vm10762_vm15, %v6593_v11, %v6597_v10  ;;  %v6650_v12 = vrot.slane %v6648_v15, 4  ;;  %7095 = vrot.lane.b32.xlu0 %v9593_v61, %s10647_s15  ;;  %v6651_v57 = vshll.u32 %v6379_v20, 16  ;;  %v6657_v50 = vshll.u32 %v6380_v43, 16 }
 0x413   : > { %v9592_v60 = vcombine.low %v6588_v34, %v6598_v21  ;;  %v6661_v33 = vshrl.u32 %v6380_v43, 16  ;;  %v6910_v52 = vsel %vm10737_vm10, %v6908_v54, %v6909_v24  ;;  %v6667_v6 = vshll.u32 %v6401_v25, 16  ;;  %v6383_v24 = vld [vmem:[#allocation2 + $0x9c] sm:$0xf]  ;;  %v13702_v54 = vpop.permute.xlu0 %6037 }
 0x414   : > { %v6624_v63 = vshrl.u32 %v6377_v16, 16  ;;  %v6627_v46 = vshll.u32 %v6377_v16, 16  ;;  %v9608_v32 = vcombine.low %v6907_v36, %v6910_v52  ;;  %v6653_v5 = vrot.slane %v6651_v57, 5  ;;  %v13697_v36 = vld [vmem:[%s14812_s5 + $0xc] sm:$0xff]  }
 0x415   : > { %7093 = vrot.lane.b32.xlu1 %v9592_v60, %s10647_s15  ;;  %v6659_v56 = vrot.slane %v6657_v50, 5  ;;  %v6663_v40 = vrot.slane %v6661_v33, 4  ;;  %v6669_v4 = vrot.slane %v6667_v6, 5  ;;  %v6633_v26 = vshll.u32 %v6378_v19, 16  ;;  %v6381_v33 = vld [vmem:[#allocation2 + $0x90] sm:$0xf] }
 0x416   : > { %v6626_v35 = vrot.slane %v6624_v63, 4  ;;  %v6629_v30 = vrot.slane %v6627_v46, 5  ;;  %7175 = vrot.lane.b32.xlu0 %v9609_v3, %s10649_s25  ;;  %v6654_v2 = vor.u32 %v6653_v5, %v6650_v12  ;;  %v6637_v27 = vshrl.u32 %v6378_v19, 16  ;;  %v13700_v3 = vld [vmem:[#allocation2 + $0xa4] sm:$0x1]  ;;  %v13715_v46 = vpop.permute.xlu1 %6035 }
 0x417   : > { %v6664_v37 = vor.u32 %v6663_v40, %v6659_v56  ;;  %v6643_v49 = vshll.u32 %v13669_v22, 16  ;;  %v6635_v31 = vrot.slane %v6633_v26, 5  ;;  %v9563_v17 = vrot.slane %v6801_v51, 9  ;;  %v13713_v63 = vld [vmem:[#allocation2 + $0x94] sm:$0xf] }
 0x418   : > { %v6630_v23 = vor.u32 %v6629_v30, %v6626_v35  ;;  %v6927_v62 = vrot.slane %v6380_v43, 5  ;;  %v6655_v10 = vrot.slane %v6654_v2, 4  ;;  %v6639_v45 = vrot.slane %v6637_v27, 4  ;;  %v13720_v51 = vld [vmem:[#allocation2 + $0x98] sm:$0x1] }
 0x419   : > { %7173 = vrot.lane.b32.xlu1 %v9608_v32, %s10649_s25  ;;  %v6665_v0 = vrot.slane %v6664_v37, 4  ;;  %v6645_v20 = vrot.slane %v6643_v49, 5  ;;  %v6930_v53 = vrot.slane %v6401_v25, 5  ;;  %v9562_v11 = vrot.slane %v6800_v13, 9  ;;  %v6803_v13 = vld [vmem:[#allocation2 + $0x9c] sm:$0xe] }
 0x41a   : > { %v6631_v7 = vrot.slane %v6630_v23, 4  ;;  %v6928_v28 = vsel %vm10737_vm10, %v9563_v17, %v6927_v62  ;;  %v6929_v41 = vrot.slane %v6927_v62, 4  ;;  %v6660_v47 = vsel %vm10762_vm15, %v6655_v10, %v6659_v56  ;;  %v13728_v10 = vpop.permute.xlu0 %5961 }
 0x41b   : > { %v6670_v18 = vsel %vm10762_vm15, %v6665_v0, %v6669_v4  ;;  %v6640_v38 = vor.u32 %v6639_v45, %v6635_v31  ;;  %v6920_v34 = vrot.slane %v6378_v19, 5  ;;  %v6923_v21 = vrot.slane %v13669_v22, 5 }
 0x41c   : > { %v9595_v43 = vcombine.low %v6660_v47, %v6670_v18  ;;  %v6636_v15 = vsel %vm10762_vm15, %v6631_v7, %v6635_v31  ;;  %v6931_v61 = vsel %vm10737_vm10, %v6929_v41, %v6930_v53  ;;  %vm6194_vm3 = vcmask 1043456   ;;  %v10528_v7 = vld [vmem:[#allocation2] sm:$0xf] }
 0x41d   : > { %v6641_v25 = vrot.slane %v6640_v38, 4  ;;  %v9611_v16 = vcombine.low %v6928_v28, %v6931_v61  ;;  %v6921_v12 = vsel %vm10737_vm10, %v9562_v11, %v6920_v34  ;;  %v6922_v60 = vrot.slane %v6920_v34, 4  ;;  %10356 = vmatprep.subr.msk.bf16.mxu1 %vm6194_vm3, %v10401_v42  ;;  %v10529_v28 = vld [vmem:[#allocation2 + $0x4] sm:$0xf]  ;;  %v13730_v38 = vpop.permute.xlu1 %5959  ;;  %v6802_v61 = vld [vmem:[#allocation2 + $0x90] sm:$0xe] }
 0x41e   : > { %7099 = vrot.lane.b32.xlu0 %v9595_v43, %s10647_s15  ;;  %v6196_v57 = vsel %vm6194_vm3, %v10401_v42, 0  ;;  %v6696_v50 = vshrl.u32 %v6383_v24, 16  ;;  %v6699_v52 = vshll.u32 %v6383_v24, 16  ;;  %v6705_v6 = vshll.u32 %v13692_v1, 16 }
 0x41f   : > { %v6646_v19 = vsel %vm10762_vm15, %v6641_v25, %v6645_v20  ;;  %10019 = vmatpush3.bf16.msra.mxu1 %v6196_v57  ;;  %v6709_v22 = vshrl.u32 %v13692_v1, 16  ;;  %v6924_v5 = vsel %vm10737_vm10, %v6922_v60, %v6923_v21  ;;  %v6715_v40 = vshll.u32 %v13700_v3, 16 }
 0x420   : > { %v9594_v32 = vcombine.low %v6636_v15, %v6646_v19  ;;  %v6698_v56 = vrot.slane %v6696_v50, 4  ;;  %10052 = vmatprep.subr.bf16.mxu1 %v13697_v36  ;;  %v9610_v4 = vcombine.low %v6921_v12, %v6924_v5  ;;  %v6701_v35 = vrot.slane %v6699_v52, 5  ;;  %v6387_v12 = vld [vmem:[#allocation2 + $0xb4] sm:$0xf]  ;;  %v13754_v5 = vld [vmem:[#allocation2 + $0xbc] sm:$0x1] }
 0x421   : > { %v6707_v30 = vrot.slane %v6705_v6, 5  ;;  %v6711_v26 = vrot.slane %v6709_v22, 4  ;;  %v6717_v2 = vrot.slane %v6715_v40, 5  ;;  %v6672_v37 = vshrl.u32 %v6381_v33, 16  ;;  %v13745_v6 = vpop.permute.xlu0 %6041 }
 0x422   : > { %7097 = vrot.lane.b32.xlu1 %v9594_v32, %s10647_s15  ;;  %7179 = vrot.lane.b32.xlu0 %v9611_v16, %s10649_s25  ;;  %v6675_v27 = vshll.u32 %v6381_v33, 16  ;;  %v6681_v49 = vshll.u32 %v13713_v63, 16  ;;  %v6702_v23 = vor.u32 %v6701_v35, %v6698_v56  ;;  %v6685_v17 = vshrl.u32 %v13713_v63, 16  ;;  %v13752_v32 = vld [vmem:[#allocation2 + $0xb8] sm:$0xf] }
 0x423   : > { %v6712_v31 = vor.u32 %v6711_v26, %v6707_v30  ;;  %v6691_v62 = vshll.u32 %v13720_v51, 16  ;;  %v6674_v0 = vrot.slane %v6672_v37, 4  ;;  %v9486_v41 = vcombine.low %v10528_v7, %v10529_v28  ;;  %v6385_v35 = vld [vmem:[#allocation2 + $0xa8] sm:$0xf] }
 0x424   : > { %v6677_v45 = vrot.slane %v6675_v27, 5  ;;  %v6683_v20 = vrot.slane %v6681_v49, 5  ;;  %v6703_v53 = vrot.slane %v6702_v23, 4  ;;  %v6687_v47 = vrot.slane %v6685_v17, 4  ;;  %v13766_v49 = vld [vmem:[#allocation2 + $0xac] sm:$0xf] }
 0x425   : > { %v6713_v42 = vrot.slane %v6712_v31, 4  ;;  %v6693_v18 = vrot.slane %v6691_v62, 5  ;;  %vm15039_vm13 = vcmask 64512   ;;  %v9565_v43 = vrot.slane %v6803_v13, 9 }
 0x426   : > { %7177 = vrot.lane.b32.xlu1 %v9610_v4, %s10649_s25  ;;  %v6678_v11 = vor.u32 %v6677_v45, %v6674_v0  ;;  %v6063_v24 = vsel %vm15039_vm13, %v9486_v41, %v13614_v14  ;;  %v6941_v15 = vrot.slane %v13692_v1, 5  ;;  %v6708_v34 = vsel %vm10762_vm15, %v6703_v53, %v6707_v30  ;;  %v13760_v30 = vpop.permute.xlu1 %6039  ;;  %v13775_v0 = vld [vmem:[#allocation2 + $0xb0] sm:$0x1]  ;;  %vm15040_vm7 = vmmov %vm15039_vm13 }
 0x427   : > { %v6718_v25 = vsel %vm10762_vm15, %v6713_v42, %v6717_v2  ;;  %v6688_v16 = vor.u32 %v6687_v47, %v6683_v20  ;;  %v6944_v21 = vrot.slane %v13700_v3, 5  ;;  %v9564_v19 = vrot.slane %v6802_v61, 9  ;;  %v13778_v42 = vpop.permute.xlu0 %5965  ;;  %vm15041_vm2 = vmmov %vm15040_vm7 }
 0x428   : > { %v9597_v60 = vcombine.low %v6708_v34, %v6718_v25  ;;  %v6679_v57 = vrot.slane %v6678_v11, 4  ;;  %v6942_v50 = vsel %vm10737_vm10, %v9565_v43, %v6941_v15  ;;  %v6943_v14 = vrot.slane %v6941_v15, 4  ;;  %v6805_v43 = vld [vmem:[#allocation2 + $0xb4] sm:$0xe]  ;;  %v10530_v25 = vld [vmem:[#allocation2 + $0xc] sm:$0xf]  ;;  %vm15042_vm14 = vmmov %vm15041_vm2 }
 0x429   : > { %v6689_v33 = vrot.slane %v6688_v16, 4  ;;  %v6934_v1 = vrot.slane %v13713_v63, 5  ;;  %v6937_v52 = vrot.slane %v13720_v51, 5  ;;  %vm6109_vm4 = vcmask 130048   ;;  %v10531_v16 = vld [vmem:[#allocation2 + $0x10] sm:$0xf]  ;;  %vm15043_vm6 = vmmov %vm15041_vm2 }
 0x42a   : > { %7103 = vrot.lane.b32.xlu0 %v9597_v60, %s10647_s15  ;;  %v6684_v3 = vsel %vm10762_vm15, %v6679_v57, %v6683_v20  ;;  %v6945_v22 = vsel %vm10737_vm10, %v6943_v14, %v6944_v21  ;;  %v6744_v56 = vshrl.u32 %v6387_v12, 16  ;;  %v13764_v2 = vsel %vm6109_vm4, %v6063_v24, %v13630_v44  ;;  %v10532_v14 = vld [vmem:[#allocation2 + $0x18] sm:$0xf]  ;;  %vm15044_vm8 = vmmov %vm15041_vm2 }
 0x42b   : > { %v6694_v63 = vsel %vm10762_vm15, %v6689_v33, %v6693_v18  ;;  %v9613_v40 = vcombine.low %v6942_v50, %v6945_v22  ;;  %v6935_v51 = vsel %vm10737_vm10, %v9564_v19, %v6934_v1  ;;  %v6936_v4 = vrot.slane %v6934_v1, 4  ;;  %v10533_v33 = vld [vmem:[#allocation2 + $0x1c] sm:$0xf]  ;;  %v6804_v1 = vld [vmem:[#allocation2 + $0xa8] sm:$0xe]  ;;  %vm15045_vm0 = vmmov %vm15041_vm2 }
 0x42c   : > { %v9596_v26 = vcombine.low %v6684_v3, %v6694_v63  ;;  %v6746_v37 = vrot.slane %v6744_v56, 4  ;;  %v6747_v27 = vshll.u32 %v6387_v12, 16  ;;  %v6753_v31 = vshll.u32 %v13752_v32, 16  ;;  %v13782_v12 = vpop.permute.xlu1 %5963  ;;  %vm15046_vm5 = vmmov %vm15045_vm0 }
 0x42d   : > { %v6938_v23 = vsel %vm10737_vm10, %v6936_v4, %v6937_v52  ;;  %v6757_v17 = vshrl.u32 %v13752_v32, 16  ;;  %v6763_v62 = vshll.u32 %v13754_v5, 16  ;;  %v6720_v45 = vshrl.u32 %v6385_v35, 16  ;;  %vm15047_vm1 = vmmov %vm15045_vm0 }
 0x42e   : > { %7101 = vrot.lane.b32.xlu1 %v9596_v26, %s10647_s15  ;;  %7183 = vrot.lane.b32.xlu0 %v9613_v40, %s10649_s25  ;;  %v9612_v13 = vcombine.low %v6935_v51, %v6938_v23  ;;  %v6749_v44 = vrot.slane %v6747_v27, 5  ;;  %v6723_v20 = vshll.u32 %v6385_v35, 16  ;;  %v6755_v7 = vrot.slane %v6753_v31, 5  ;;  %v13795_v23 = vpop.permute.xlu0 %6045  ;;  %vm15048_vm11 = vmmov %vm15045_vm0 }
 0x42f   : > { %v6759_v28 = vrot.slane %v6757_v17, 4  ;;  %v6765_v41 = vrot.slane %v6763_v62, 5  ;;  %v6729_v53 = vshll.u32 %v13766_v49, 16  ;;  %v6722_v18 = vrot.slane %v6720_v45, 4  ;;  %vm15049_vm12 = vmmov %vm15045_vm0 }
 0x430   : > { %v6750_v47 = vor.u32 %v6749_v44, %v6746_v37  ;;  %v6725_v11 = vrot.slane %v6723_v20, 5  ;;  %v6733_v24 = vshrl.u32 %v13766_v49, 16  ;;  %v6739_v34 = vshll.u32 %v13775_v0, 16  ;;  %v13800_v44 = vld [vmem:[#allocation2 + $0x1c] sm:$0xf]  ;;  %vm15053_vm13 = vmmov %vm15045_vm0 }
 0x431   : > { %v6760_v15 = vor.u32 %v6759_v28, %v6755_v7  ;;  %v6731_v61 = vrot.slane %v6729_v53, 5  ;;  %v9487_v21 = vcombine.low %v10530_v25, %v10531_v16  ;;  %v9488_v19 = vcombine.low %v10532_v14, %v10533_v33  ;;  %v13810_v20 = vld [vmem:[%s14812_s5 + $0x14] ss:$0 sps:$4 sm:$0xff]  }
 0x432   : > { %7181 = vrot.lane.b32.xlu1 %v9612_v13, %s10649_s25  ;;  %v6751_v60 = vrot.slane %v6750_v47, 4  ;;  %v6726_v57 = vor.u32 %v6725_v11, %v6722_v18  ;;  %v6735_v50 = vrot.slane %v6733_v24, 4  ;;  %v6741_v3 = vrot.slane %v6739_v34, 5  ;;  %v7512_v13 = vld [vmem:[#allocation2 + $0x18] sm:$0xf] }
 0x433   : > { %v6761_v52 = vrot.slane %v6760_v15, 4  ;;  %v6066_v22 = vsel %vm15040_vm7, %v9487_v21, %v13646_v58  ;;  %v9567_v56 = vrot.slane %v6805_v43, 9  ;;  %v6069_v4 = vsel %vm15041_vm2, %v9488_v19, %v13642_v9  ;;  %v6389_v24 = vld [vmem:[#allocation2 + $0xc0] sm:$0xf]  ;;  %v13838_v21 = vld [vmem:[#allocation2 + $0xc8] sm:$0x1]  ;;  %vm15054_vm7 = vmmov %vm15045_vm0 }
 0x434   : > { %v6756_v63 = vsel %vm10762_vm15, %v6751_v60, %v6755_v7  ;;  %v6727_v40 = vrot.slane %v6726_v57, 4  ;;  %v6736_v51 = vor.u32 %v6735_v50, %v6731_v61  ;;  %v6955_v26 = vrot.slane %v13752_v32, 5  ;;  %v13840_v60 = vpop.permute.xlu0 %5969  ;;  %vm15055_vm2 = vmmov %vm15045_vm0 }
 0x435   : > { %v6766_v35 = vsel %vm10762_vm15, %v6761_v52, %v6765_v41  ;;  %v6958_v37 = vrot.slane %v13754_v5, 5  ;;  %v9566_v27 = vrot.slane %v6804_v1, 9  ;;  %v6948_v62 = vrot.slane %v13766_v49, 5  ;;  %v13805_v5 = vpop.permute.xlu1 %6043  ;;  %v13821_v41 = vld [vmem:[#allocation2 + $0x20] sm:$0x1] }
 0x436   : > { %v9599_v58 = vcombine.low %v6756_v63, %v6766_v35  ;;  %v6732_v31 = vsel %vm10762_vm15, %v6727_v40, %v6731_v61  ;;  %v6737_v17 = vrot.slane %v6736_v51, 4  ;;  %v6956_v9 = vsel %vm10737_vm10, %v9567_v56, %v6955_v26  ;;  %v13831_v61 = vld [vmem:[#allocation2 + $0xc4] sm:$0xf]  ;;  %v7944_v51 = vld [vmem:[#allocation2 + $0x18] sm:$0xe] }
 0x437   : > { %v6957_v45 = vrot.slane %v6955_v26, 4  ;;  %v6951_v32 = vrot.slane %v13775_v0, 5  ;;  %vm6161_vm9 = vcmask 195584   ;;  %v6949_v7 = vsel %vm10737_vm10, %v9566_v27, %v6948_v62  ;;  %v10535_v27 = vld [vmem:[#allocation2 + $0x28] sm:$0xf] }
 0x438   : > { %7107 = vrot.lane.b32.xlu0 %v9599_v58, %s10647_s15  ;;  %v6742_v49 = vsel %vm10762_vm15, %v6737_v17, %v6741_v3  ;;  %v6950_v28 = vrot.slane %v6948_v62, 4  ;;  %10020 = vmatprep.mubr.msk.bf16.mxu1 %vm6161_vm9, %v13764_v2  ;;  %v6113_v0 = vsel %vm6109_vm4, %v6066_v22, %v13665_v55  ;;  %v6115_v18 = vsel %vm6109_vm4, %v6069_v4, %v13660_v59 }
 0x439   : > { %v9598_v53 = vcombine.low %v6732_v31, %v6742_v49  ;;  %v6959_v47 = vsel %vm10737_vm10, %v6957_v45, %v6958_v37  ;;  %v7561_v11 = vshrl.u32 %v7512_v13, 16  ;;  %10021 = vmatmul.mubr.msk.bf16.vlgmr.msra.gmra.mrb[16].mxu1 %vm6161_vm9, %v6113_v0  ;;  %v7564_v15 = vshll.u32 %v7512_v13, 16  ;;  %v13847_v3 = vpop.permute.xlu1 %5967  ;;  %v10534_v37 = vld [vmem:[#allocation2 + $0x24] sm:$0xf]  ;;  %v10536_v13 = vld [vmem:[#allocation2 + $0x30] sm:$0xf] }
 0x43a   : > { %v9615_v43 = vcombine.low %v6956_v9, %v6959_v47  ;;  %v6952_v2 = vsel %vm10737_vm10, %v6950_v28, %v6951_v32  ;;  %v7570_v55 = vshll.u32 %v13800_v44, 16  ;;  %10053 = vmatpush3.bf16.msra.mxu1 %v13697_v36  ;;  %10024 = vmatprep.mubr.msk.bf16.mxu1 %vm6161_vm9, %v6115_v18  ;;  %v7574_v25 = vshrl.u32 %v13800_v44, 16  ;;  %v10537_v9 = vld [vmem:[#allocation2 + $0x34] sm:$0xf]  ;;  %v6806_v32 = vld [vmem:[#allocation2 + $0xc0] sm:$0xe] }
 0x43b   : > { %7105 = vrot.lane.b32.xlu1 %v9598_v53, %s10647_s15  ;;  %v9614_v59 = vcombine.low %v6949_v7, %v6952_v2  ;;  %v7563_v34 = vrot.slane %v7561_v11, 4  ;;  %v7580_v16 = vshll.u32 %v13821_v41, 16  ;;  %10357 = vmatprep.subr.msk.bf16.mxu1 %vm6194_vm3, %v13810_v20  ;;  %v7566_v36 = vrot.slane %v7564_v15, 5  ;;  %v13853_v53 = vpop.permute.xlu0 %6049 }
 0x43c   : > { %7187 = vrot.lane.b32.xlu0 %v9615_v43, %s10649_s25  ;;  %v7572_v57 = vrot.slane %v7570_v55, 5  ;;  %v6768_v50 = vshrl.u32 %v6389_v24, 16  ;;  %v6771_v14 = vshll.u32 %v6389_v24, 16  ;;  %v7576_v33 = vrot.slane %v7574_v25, 4 }
 0x43d   : > { %v7582_v19 = vrot.slane %v7580_v16, 5  ;;  %v6777_v1 = vshll.u32 %v13831_v61, 16  ;;  %v6781_v52 = vshrl.u32 %v13831_v61, 16  ;;  %v7567_v22 = vor.u32 %v7566_v36, %v7563_v34 }
 0x43e   : > { %v6770_v56 = vrot.slane %v6768_v50, 4  ;;  %v6773_v63 = vrot.slane %v6771_v14, 5  ;;  %v6787_v40 = vshll.u32 %v13838_v21, 16  ;;  %v7577_v4 = vor.u32 %v7576_v33, %v7572_v57  ;;  %v13875_v50 = vld [vmem:[#allocation2 + $0x34] sm:$0xf] }
 0x43f   : > { %7185 = vrot.lane.b32.xlu1 %v9614_v59, %s10649_s25  ;;  %v6779_v35 = vrot.slane %v6777_v1, 5  ;;  %v6783_v26 = vrot.slane %v6781_v52, 4  ;;  %v9489_v58 = vcombine.low %v10534_v37, %v10535_v27  ;;  %v7568_v31 = vrot.slane %v7567_v22, 4  ;;  %v13863_v59 = vpop.permute.xlu1 %6047  ;;  %v13877_v14 = vld [vmem:[#allocation2 + $0x38] sm:$0x1] }
 0x440   : > { %v6774_v17 = vor.u32 %v6773_v63, %v6770_v56  ;;  %v6789_v62 = vrot.slane %v6787_v40, 5  ;;  %v9490_v45 = vcombine.low %v10536_v13, %v10537_v9  ;;  %v7578_v49 = vrot.slane %v7577_v4, 4  ;;  %v13888_v63 = vpop.permute.xlu0 %5973  ;;  %v13896_v27 = vld [vmem:[#allocation2 + $0x2c] sm:$0x1] }
 0x441   : > { %v6784_v7 = vor.u32 %v6783_v26, %v6779_v35  ;;  %v6072_v28 = vsel %vm15042_vm14, %v9489_v58, %v13677_v8  ;;  %v9638_v0 = vrot.slane %v7944_v51, 9  ;;  %v7573_v47 = vsel %vm10762_vm15, %v7568_v31, %v7572_v57  ;;  %v7516_v8 = vld [vmem:[#allocation2 + $0x30] sm:$0xf]  ;;  %vm15056_vm14 = vmmov %vm15045_vm0 }
 0x442   : > { %v6775_v18 = vrot.slane %v6774_v17, 4  ;;  %v6075_v11 = vsel %vm15043_vm6, %v9490_v45, %v13674_v39  ;;  %v8010_v24 = vrot.slane %v13800_v44, 5  ;;  %v7583_v43 = vsel %vm10762_vm15, %v7578_v49, %v7582_v19  ;;  %vm15057_vm6 = vmmov %vm15045_vm0 }
 0x443   : > { %v6785_v2 = vrot.slane %v6784_v7, 4  ;;  %v8013_v15 = vrot.slane %v13821_v41, 5  ;;  %v9568_v55 = vrot.slane %v6806_v32, 9  ;;  %v9670_v34 = vcombine.low %v7573_v47, %v7583_v43  ;;  %v13898_v17 = vpop.permute.xlu1 %5971 }
 0x444   : > { %v6780_v25 = vsel %vm10762_vm15, %v6775_v18, %v6779_v35  ;;  %v8011_v16 = vsel %vm10737_vm10, %v9638_v0, %v8010_v24  ;;  %v8012_v39 = vrot.slane %v8010_v24, 4  ;;  %v6962_v36 = vrot.slane %v13831_v61, 5  ;;  %v7514_v61 = vld [vmem:[#allocation2 + $0x24] sm:$0xf]  ;;  %v7515_v35 = vld [vmem:[#allocation2 + $0x28] sm:$0xf] }
 0x445   : > { %v6790_v44 = vsel %vm10762_vm15, %v6785_v2, %v6789_v62  ;;  %v6965_v57 = vrot.slane %v13838_v21, 5  ;;  %v6117_v41 = vsel %vm6109_vm4, %v6072_v28, %v13715_v46  ;;  %8232 = vrot.lane.b32.xlu0 %v9670_v34, %s10647_s15  ;;  %v6119_v1 = vsel %vm6109_vm4, %v6075_v11, %v13702_v54  ;;  %v10538_v11 = vld [vmem:[#allocation2 + $0x40] sm:$0xf]  ;;  %v10539_v24 = vld [vmem:[#allocation2 + $0x3c] sm:$0xf] }
 0x446   : > { %v9600_v33 = vcombine.low %v6780_v25, %v6790_v44  ;;  %v8014_v19 = vsel %vm10737_vm10, %v8012_v39, %v8013_v15  ;;  %v7609_v52 = vshrl.u32 %v7516_v8, 16  ;;  %10025 = vmatmul.mubr.msk.bf16.gmra.mrb[20].mxu1 %vm6161_vm9, %v6117_v41  ;;  %v6963_v46 = vsel %vm10737_vm10, %v9568_v55, %v6962_v36  ;;  %v7946_v2 = vld [vmem:[#allocation2 + $0x30] sm:$0xe]  ;;  %v10540_v34 = vld [vmem:[#allocation2 + $0x48] sm:$0xf]  ;;  %v13903_v39 = vpop.permute.xlu0 %6053 }
 0x447   : > { %v9686_v21 = vcombine.low %v8011_v16, %v8014_v19  ;;  %v6964_v22 = vrot.slane %v6962_v36, 4  ;;  %v7612_v56 = vshll.u32 %v7516_v8, 16  ;;  %10028 = vmatprep.mubr.msk.bf16.mxu1 %vm6161_vm9, %v6119_v1  ;;  %v7618_v51 = vshll.u32 %v13875_v50, 16  ;;  %v10541_v25 = vld [vmem:[#allocation2 + $0x4c] sm:$0xf] }
 0x448   : > { %7109 = vrot.lane.b32.xlu1 %v9600_v33, %s10647_s15  ;;  %v7611_v40 = vrot.slane %v7609_v52, 4  ;;  %v7622_v54 = vshrl.u32 %v13875_v50, 16  ;;  %v7628_v4 = vshll.u32 %v13877_v14, 16  ;;  %v7585_v58 = vshrl.u32 %v7514_v61, 16  ;;  %v7945_v33 = vld [vmem:[#allocation2 + $0x24] sm:$0xe] }
 0x449   : > { %v6966_v26 = vsel %vm10737_vm10, %v6964_v22, %v6965_v57  ;;  %v7614_v37 = vrot.slane %v7612_v56, 5  ;;  %v7588_v31 = vshll.u32 %v7514_v61, 16  ;;  %8312 = vrot.lane.b32.xlu0 %v9686_v21, %s10649_s25  ;;  %v7620_v13 = vrot.slane %v7618_v51, 5  ;;  %v13911_v21 = vpop.permute.xlu1 %6051 }
 0x44a   : > { %v9616_v62 = vcombine.low %v6963_v46, %v6966_v26  ;;  %v7624_v9 = vrot.slane %v7622_v54, 4  ;;  %v7630_v45 = vrot.slane %v7628_v4, 5  ;;  %v7587_v49 = vrot.slane %v7585_v58, 4  ;;  %v7520_v26 = vld [vmem:[#allocation2 + $0x48] sm:$0xf] }
 0x44b   : > { %v7615_v32 = vor.u32 %v7614_v37, %v7611_v40  ;;  %v7590_v7 = vrot.slane %v7588_v31, 5  ;;  %v7594_v28 = vshll.u32 %v7515_v35, 16  ;;  %v7598_v47 = vshrl.u32 %v7515_v35, 16 }
 0x44c   : > { %7189 = vrot.lane.b32.xlu1 %v9616_v62, %s10649_s25  ;;  %v7625_v0 = vor.u32 %v7624_v9, %v7620_v13  ;;  %v7604_v18 = vshll.u32 %v13896_v27, 16  ;;  %v9491_v43 = vcombine.low %v10539_v24, %v10538_v11  ;;  %v9492_v16 = vcombine.low %v10540_v34, %v10541_v25  ;;  %v13922_v62 = vld [vmem:[#allocation2 + $0x4c] sm:$0xf]  ;;  %v13931_v9 = vpop.permute.xlu0 %5977 }
 0x44d   : > { %v7616_v15 = vrot.slane %v7615_v32, 4  ;;  %v7591_v55 = vor.u32 %v7590_v7, %v7587_v49  ;;  %v7596_v8 = vrot.slane %v7594_v28, 5  ;;  %v7600_v36 = vrot.slane %v7598_v47, 4  ;;  %v13937_v32 = vld [vmem:[#allocation2 + $0x50] sm:$0x1]  ;;  %v13946_v11 = vpop.permute.xlu1 %5975 }
 0x44e   : > { %v7626_v44 = vrot.slane %v7625_v0, 4  ;;  %v7606_v57 = vrot.slane %v7604_v18, 5  ;;  %v6078_v41 = vsel %vm15044_vm8, %v9491_v43, %v13730_v38  ;;  %v6081_v52 = vsel %vm15045_vm0, %v9492_v16, %v13728_v10  ;;  %v7518_v28 = vld [vmem:[#allocation2 + $0x3c] sm:$0xf]  ;;  %v13943_v18 = vld [vmem:[#allocation2 + $0x40] sm:$0xf]  ;;  %vm15058_vm8 = vmmov %vm15045_vm0 }
 0x44f   : > { %v7621_v19 = vsel %vm10762_vm15, %v7616_v15, %v7620_v13  ;;  %v7592_v1 = vrot.slane %v7591_v55, 4  ;;  %v9640_v61 = vrot.slane %v7946_v2, 9  ;;  %v7601_v22 = vor.u32 %v7600_v36, %v7596_v8  ;;  %v13949_v55 = vld [vmem:[#allocation2 + $0x44] sm:$0x1] }
 0x450   : > { %v7631_v46 = vsel %vm10762_vm15, %v7626_v44, %v7630_v45  ;;  %v8024_v56 = vrot.slane %v13875_v50, 5  ;;  %v8027_v40 = vrot.slane %v13877_v14, 5  ;;  %v9639_v54 = vrot.slane %v7945_v33, 9 }
 0x451   : > { %v9672_v38 = vcombine.low %v7621_v19, %v7631_v46  ;;  %v7597_v51 = vsel %vm10762_vm15, %v7592_v1, %v7596_v8  ;;  %v8017_v4 = vrot.slane %v7515_v35, 5  ;;  %v7602_v37 = vrot.slane %v7601_v22, 4  ;;  %v13957_v46 = vpop.permute.xlu0 %6057 }
 0x452   : > { %v8025_v10 = vsel %vm10737_vm10, %v9640_v61, %v8024_v56  ;;  %v8026_v58 = vrot.slane %v8024_v56, 4  ;;  %v8020_v31 = vrot.slane %v13896_v27, 5  ;;  %v6121_v13 = vsel %vm6109_vm4, %v6078_v41, %v13760_v30  ;;  %v7948_v61 = vld [vmem:[#allocation2 + $0x48] sm:$0xe] }
 0x453   : > { %8236 = vrot.lane.b32.xlu0 %v9672_v38, %s10647_s15  ;;  %v8018_v50 = vsel %vm10737_vm10, %v9639_v54, %v8017_v4  ;;  %v8019_v14 = vrot.slane %v8017_v4, 4  ;;  %v6123_v35 = vsel %vm6109_vm4, %v6081_v52, %v13745_v6  ;;  %v7607_v45 = vsel %vm10762_vm15, %v7602_v37, %v7606_v57  ;;  %10029 = vmatmul.mubr.msk.bf16.gmra.mrb[24].mxu1 %vm6161_vm9, %v6121_v13  ;;  %v10542_v4 = vld [vmem:[#allocation2 + $0x54] sm:$0xf] }
 0x454   : > { %v8028_v27 = vsel %vm10737_vm10, %v8026_v58, %v8027_v40  ;;  %v7657_v49 = vshrl.u32 %v7520_v26, 16  ;;  %v7660_v7 = vshll.u32 %v7520_v26, 16  ;;  %v9671_v0 = vcombine.low %v7597_v51, %v7607_v45  ;;  %10032 = vmatprep.mubr.msk.bf16.mxu1 %vm6161_vm9, %v6123_v35  ;;  %v10543_v26 = vld [vmem:[#allocation2 + $0x58] sm:$0xf]  ;;  %v10545_v58 = vld [vmem:[#allocation2 + $0x64] sm:$0xf] }
 0x455   : > { %v9688_v30 = vcombine.low %v8025_v10, %v8028_v27  ;;  %v8021_v6 = vsel %vm10737_vm10, %v8019_v14, %v8020_v31  ;;  %v7666_v47 = vshll.u32 %v13922_v62, 16  ;;  %v7670_v15 = vshrl.u32 %v13922_v62, 16  ;;  %v10544_v10 = vld [vmem:[#allocation2 + $0x60] sm:$0xf]  ;;  %v13960_v14 = vpop.permute.xlu1 %6055 }
 0x456   : > { %v9687_v24 = vcombine.low %v8018_v50, %v8021_v6  ;;  %v7659_v43 = vrot.slane %v7657_v49, 4  ;;  %v7662_v2 = vrot.slane %v7660_v7, 5  ;;  %8234 = vrot.lane.b32.xlu1 %v9671_v0, %s10647_s15  ;;  %v7676_v34 = vshll.u32 %v13937_v32, 16  ;;  %v7947_v50 = vld [vmem:[#allocation2 + $0x3c] sm:$0xe] }
 0x457   : > { %8316 = vrot.lane.b32.xlu0 %v9688_v30, %s10649_s25  ;;  %v7668_v8 = vrot.slane %v7666_v47, 5  ;;  %v7633_v25 = vshrl.u32 %v7518_v28, 16  ;;  %v7636_v16 = vshll.u32 %v7518_v28, 16  ;;  %v7672_v36 = vrot.slane %v7670_v15, 4 }
 0x458   : > { %v7663_v44 = vor.u32 %v7662_v2, %v7659_v43  ;;  %v7642_v57 = vshll.u32 %v13943_v18, 16  ;;  %v7646_v41 = vshrl.u32 %v13943_v18, 16  ;;  %v7678_v33 = vrot.slane %v7676_v34, 5  ;;  %v7524_v43 = vld [vmem:[#allocation2 + $0x60] sm:$0xf]  ;;  %v13976_v34 = vpop.permute.xlu0 %7079 }
 0x459   : > { %v7635_v19 = vrot.slane %v7633_v25, 4  ;;  %v7638_v1 = vrot.slane %v7636_v16, 5  ;;  %v7652_v52 = vshll.u32 %v13949_v55, 16  ;;  %v7673_v56 = vor.u32 %v7672_v36, %v7668_v8  ;;  %v13984_v16 = vld [vmem:[#allocation2 + $0x64] sm:$0xf] }
 0x45a   : > { %v7664_v22 = vrot.slane %v7663_v44, 4  ;;  %v7644_v40 = vrot.slane %v7642_v57, 5  ;;  %v7648_v38 = vrot.slane %v7646_v41, 4  ;;  %8314 = vrot.lane.b32.xlu1 %v9687_v24, %s10649_s25  ;;  %v9493_v37 = vcombine.low %v10542_v4, %v10543_v26  ;;  %v13986_v44 = vld [vmem:[#allocation2 + $0x68] sm:$0x1] }
 0x45b   : > { %v7639_v51 = vor.u32 %v7638_v1, %v7635_v19  ;;  %v7654_v54 = vrot.slane %v7652_v52, 5  ;;  %v9494_v31 = vcombine.low %v10544_v10, %v10545_v58  ;;  %v7674_v35 = vrot.slane %v7673_v56, 4 }
 0x45c   : > { %v7669_v13 = vsel %vm10762_vm15, %v7664_v22, %v7668_v8  ;;  %v7649_v45 = vor.u32 %v7648_v38, %v7644_v40  ;;  %v9642_v27 = vrot.slane %v7948_v61, 9  ;;  %v6084_v7 = vsel %vm15046_vm5, %v9493_v37, %v13782_v12  ;;  %vm15059_vm5 = vmmov %vm15045_vm0 }
 0x45d   : > { %v7640_v49 = vrot.slane %v7639_v51, 4  ;;  %v6087_v28 = vsel %vm15047_vm1, %v9494_v31, %v13778_v42  ;;  %v8038_v0 = vrot.slane %v13922_v62, 5  ;;  %v7679_v30 = vsel %vm10762_vm15, %v7674_v35, %v7678_v33 }
 0x45e   : > { %v7650_v6 = vrot.slane %v7649_v45, 4  ;;  %v8041_v47 = vrot.slane %v13937_v32, 5  ;;  %v9641_v24 = vrot.slane %v7947_v50, 9  ;;  %v9674_v2 = vcombine.low %v7669_v13, %v7679_v30  ;;  %v14008_v50 = vpop.permute.xlu0 %7159  ;;  %v10547_v30 = vld [vmem:[#allocation2 + $0x70] sm:$0xf] }
 0x45f   : > { %v7645_v15 = vsel %vm10762_vm15, %v7640_v49, %v7644_v40  ;;  %v8039_v12 = vsel %vm10737_vm10, %v9642_v27, %v8038_v0  ;;  %v8040_v8 = vrot.slane %v8038_v0, 4  ;;  %v8031_v62 = vrot.slane %v13943_v18, 5  ;;  %v7522_v18 = vld [vmem:[#allocation2 + $0x54] sm:$0xf]  ;;  %v7523_v40 = vld [vmem:[#allocation2 + $0x58] sm:$0xf] }
 0x460   : > { %v7655_v42 = vsel %vm10762_vm15, %v7650_v6, %v7654_v54  ;;  %v8034_v25 = vrot.slane %v13949_v55, 5  ;;  %v6125_v32 = vsel %vm6109_vm4, %v6084_v7, %v13805_v5  ;;  %8240 = vrot.lane.b32.xlu0 %v9674_v2, %s10647_s15  ;;  %v6127_v41 = vsel %vm6109_vm4, %v6087_v28, %v13795_v23  ;;  %v13994_v55 = vpop.permute.xlu1 %5979  ;;  %v14005_v54 = vld [vmem:[#allocation2 + $0x5c] sm:$0x1]  ;;  %v10546_v0 = vld [vmem:[#allocation2 + $0x6c] sm:$0xf] }
 0x461   : > { %v9673_v36 = vcombine.low %v7645_v15, %v7655_v42  ;;  %v8042_v57 = vsel %vm10737_vm10, %v8040_v8, %v8041_v47  ;;  %v7705_v33 = vshrl.u32 %v7524_v43, 16  ;;  %10033 = vmatmul.mubr.msk.bf16.gmra.mrb[28].mxu1 %vm6161_vm9, %v6125_v32  ;;  %v8032_v19 = vsel %vm10737_vm10, %v9641_v24, %v8031_v62  ;;  %v7950_v47 = vld [vmem:[#allocation2 + $0x60] sm:$0xe]  ;;  %v10549_v8 = vld [vmem:[#allocation2 + $0x7c] sm:$0xf] }
 0x462   : > { %v9690_v5 = vcombine.low %v8039_v12, %v8042_v57  ;;  %v8033_v1 = vrot.slane %v8031_v62, 4  ;;  %v7708_v52 = vshll.u32 %v7524_v43, 16  ;;  %10036 = vmatprep.mubr.msk.bf16.mxu1 %vm6161_vm9, %v6127_v41  ;;  %v7714_v22 = vshll.u32 %v13984_v16, 16  ;;  %v10548_v12 = vld [vmem:[#allocation2 + $0x78] sm:$0xf] }
 0x463   : > { %8238 = vrot.lane.b32.xlu1 %v9673_v36, %s10647_s15  ;;  %v7707_v61 = vrot.slane %v7705_v33, 4  ;;  %v7718_v23 = vshrl.u32 %v13984_v16, 16  ;;  %v7724_v56 = vshll.u32 %v13986_v44, 16  ;;  %v7681_v4 = vshrl.u32 %v7522_v18, 16  ;;  %v7949_v57 = vld [vmem:[#allocation2 + $0x54] sm:$0xe] }
 0x464   : > { %v8035_v38 = vsel %vm10737_vm10, %v8033_v1, %v8034_v25  ;;  %v7710_v51 = vrot.slane %v7708_v52, 5  ;;  %v7684_v26 = vshll.u32 %v7522_v18, 16  ;;  %8320 = vrot.lane.b32.xlu0 %v9690_v5, %s10649_s25  ;;  %v7716_v10 = vrot.slane %v7714_v22, 5  ;;  %v14012_v24 = vpop.permute.xlu1 %6059  ;;  %v14024_v22 = vpop.permute.xlu0 %7083 }
 0x465   : > { %v9689_v37 = vcombine.low %v8032_v19, %v8035_v38  ;;  %v7720_v58 = vrot.slane %v7718_v23, 4  ;;  %v7726_v31 = vrot.slane %v7724_v56, 5  ;;  %v7683_v35 = vrot.slane %v7681_v4, 4 }
 0x466   : > { %v7711_v13 = vor.u32 %v7710_v51, %v7707_v61  ;;  %v7686_v45 = vrot.slane %v7684_v26, 5  ;;  %v7690_v27 = vshll.u32 %v7523_v40, 16  ;;  %v7694_v7 = vshrl.u32 %v7523_v40, 16  ;;  %v14028_v51 = vld [vmem:[#allocation2 + $0x78] sm:$0xf] }
 0x467   : > { %8318 = vrot.lane.b32.xlu1 %v9689_v37, %s10649_s25  ;;  %v7721_v49 = vor.u32 %v7720_v58, %v7716_v10  ;;  %v7700_v28 = vshll.u32 %v14005_v54, 16  ;;  %v9495_v6 = vcombine.low %v10546_v0, %v10547_v30  ;;  %v9496_v42 = vcombine.low %v10548_v12, %v10549_v8  ;;  %15050 = vst [vmem:[#allocation13_spill] sm:$0xff] %v14028_v51  ;;  %v14058_v0 = vld [vmem:[#allocation2 + $0x70] sm:$0xf] }
 0x468   : > { %v7712_v43 = vrot.slane %v7711_v13, 4  ;;  %v7687_v2 = vor.u32 %v7686_v45, %v7683_v35  ;;  %v7692_v15 = vrot.slane %v7690_v27, 5  ;;  %v7696_v25 = vrot.slane %v7694_v7, 4  ;;  %v14048_v35 = vld [vmem:[#allocation2 + $0x80] sm:$0x1] }
 0x469   : > { %v7722_v62 = vrot.slane %v7721_v49, 4  ;;  %v7702_v32 = vrot.slane %v7700_v28, 5  ;;  %v6090_v36 = vsel %vm15048_vm11, %v9495_v6, %v13847_v3  ;;  %v6093_v18 = vsel %vm15049_vm12, %v9496_v42, %v13840_v60  ;;  %v14052_v49 = vld [vmem:[#allocation2 + $0x6c] sm:$0xf]  ;;  %vm15060_vm11 = vmmov %vm15045_vm0 }
 0x46a   : > { %v7717_v41 = vsel %vm10762_vm15, %v7712_v43, %v7716_v10  ;;  %v7688_v33 = vrot.slane %v7687_v2, 4  ;;  %v9644_v5 = vrot.slane %v7950_v47, 9  ;;  %v7697_v1 = vor.u32 %v7696_v25, %v7692_v15  ;;  %15052 = vst [vmem:[#allocation3_spill] sm:$0xff] %v14052_v49  ;;  %v14062_v2 = vld [vmem:[#allocation2 + $0x74] sm:$0x1]  ;;  %vm15061_vm12 = vmmov %vm15045_vm0 }
 0x46b   : > { %v7727_v19 = vsel %vm10762_vm15, %v7722_v62, %v7726_v31  ;;  %v8052_v52 = vrot.slane %v13984_v16, 5  ;;  %v8055_v61 = vrot.slane %v13986_v44, 5  ;;  %v9643_v56 = vrot.slane %v7949_v57, 9  ;;  %v14033_v16 = vld [vmem:[#allocation2 + $0x7c] sm:$0xf]  ;;  %v14035_v44 = vpop.permute.xlu1 %7081 }
 0x46c   : > { %v9676_v3 = vcombine.low %v7717_v41, %v7727_v19  ;;  %v7693_v23 = vsel %vm10762_vm15, %v7688_v33, %v7692_v15  ;;  %v8045_v38 = vrot.slane %v7523_v40, 5  ;;  %v7698_v60 = vrot.slane %v7697_v1, 4  ;;  %15051 = vst [vmem:[#allocation6_spill] sm:$0xff] %v14033_v16  ;;  %v14064_v15 = vpop.permute.xlu0 %7163  ;;  %v14079_v1 = vld [vmem:[%s14812_s5 + $0x18] sm:$0xff]  }
 0x46d   : > { %v8053_v4 = vsel %vm10737_vm10, %v9644_v5, %v8052_v52  ;;  %v8054_v26 = vrot.slane %v8052_v52, 4  ;;  %v8048_v37 = vrot.slane %v14005_v54, 5  ;;  %v6129_v40 = vsel %vm6109_vm4, %v6090_v36, %v13863_v59 }
 0x46e   : > { %8244 = vrot.lane.b32.xlu0 %v9676_v3, %s10647_s15  ;;  %v8046_v10 = vsel %vm10737_vm10, %v9643_v56, %v8045_v38  ;;  %v8047_v58 = vrot.slane %v8045_v38, 4  ;;  %v6131_v31 = vsel %vm6109_vm4, %v6093_v18, %v13853_v53  ;;  %v7703_v13 = vsel %vm10762_vm15, %v7698_v60, %v7702_v32  ;;  %10037 = vmatmul.mubr.msk.bf16.gmra.mrb[32].mxu1 %vm6161_vm9, %v6129_v40  ;;  %v7952_v56 = vld [vmem:[#allocation2 + $0x78] sm:$0xe] }
 0x46f   : > { %v8056_v54 = vsel %vm10737_vm10, %v8054_v26, %v8055_v61  ;;  %v7753_v45 = vshrl.u32 %v14028_v51, 16  ;;  %v7756_v27 = vshll.u32 %v14028_v51, 16  ;;  %v9675_v59 = vcombine.low %v7693_v23, %v7703_v13  ;;  %10040 = vmatprep.mubr.msk.bf16.mxu1 %vm6161_vm9, %v6131_v31  ;;  %v14073_v41 = vpop.permute.xlu1 %7161  ;;  %v10550_v26 = vld [vmem:[#allocation2 + $0x84] sm:$0xf]  ;;  %v10552_v13 = vld [vmem:[#allocation2 + $0x90] sm:$0xf] }
 0x470   : > { %v9692_v7 = vcombine.low %v8053_v4, %v8056_v54  ;;  %v8049_v53 = vsel %vm10737_vm10, %v8047_v58, %v8048_v37  ;;  %v7762_v28 = vshll.u32 %v14033_v16, 16  ;;  %v7766_v43 = vshrl.u32 %v14033_v16, 16  ;;  %v10551_v37 = vld [vmem:[#allocation2 + $0x88] sm:$0xf]  ;;  %v10553_v54 = vld [vmem:[#allocation2 + $0x94] sm:$0xf] }
 0x471   : > { %v9691_v30 = vcombine.low %v8046_v10, %v8049_v53  ;;  %v7755_v6 = vrot.slane %v7753_v45, 4  ;;  %v7758_v47 = vrot.slane %v7756_v27, 5  ;;  %8242 = vrot.lane.b32.xlu1 %v9675_v59, %s10647_s15  ;;  %v7772_v8 = vshll.u32 %v14048_v35, 16  ;;  %v14086_v27 = vpop.permute.xlu0 %7087 }
 0x472   : > { %8324 = vrot.lane.b32.xlu0 %v9692_v7, %s10649_s25  ;;  %v7764_v12 = vrot.slane %v7762_v28, 5  ;;  %v7729_v42 = vshrl.u32 %v14052_v49, 16  ;;  %v7732_v62 = vshll.u32 %v14052_v49, 16  ;;  %v7768_v32 = vrot.slane %v7766_v43, 4  ;;  %v7951_v28 = vld [vmem:[#allocation2 + $0x6c] sm:$0xe] }
 0x473   : > { %v7759_v25 = vor.u32 %v7758_v47, %v7755_v6  ;;  %v7738_v36 = vshll.u32 %v14058_v0, 16  ;;  %v7742_v57 = vshrl.u32 %v14058_v0, 16  ;;  %v7774_v33 = vrot.slane %v7772_v8, 5  ;;  %v7957_v49 = vld [vmem:[#allocation2 + $0xb4] sm:$0xe] }
 0x474   : > { %v7731_v18 = vrot.slane %v7729_v42, 4  ;;  %v7734_v5 = vrot.slane %v7732_v62, 5  ;;  %v7748_v19 = vshll.u32 %v14062_v2, 16  ;;  %v7769_v61 = vor.u32 %v7768_v32, %v7764_v12  ;;  %v14105_v32 = vld [vmem:[#allocation2 + $0x94] sm:$0xf] }
 0x475   : > { %v7760_v52 = vrot.slane %v7759_v25, 4  ;;  %v7740_v3 = vrot.slane %v7738_v36, 5  ;;  %v7744_v23 = vrot.slane %v7742_v57, 4  ;;  %8322 = vrot.lane.b32.xlu1 %v9691_v30, %s10649_s25  ;;  %v7317_v4 = vsel %vm6194_vm3, %v13810_v20, 0  ;;  %v14103_v25 = vld [vmem:[#allocation2 + $0x90] sm:$0xf] }
 0x476   : > { %v7735_v38 = vor.u32 %v7734_v5, %v7731_v18  ;;  %v7750_v60 = vrot.slane %v7748_v19, 5  ;;  %v9497_v10 = vcombine.low %v10550_v26, %v10551_v37  ;;  %v7770_v40 = vrot.slane %v7769_v61, 4  ;;  %10055 = vmatpush3.bf16.msra.mxu1 %v7317_v4  ;;  %v14120_v61 = vld [vmem:[#allocation2 + $0x84] sm:$0xf]  ;;  %v14133_v26 = vld [vmem:[#allocation2 + $0x88] sm:$0xf] }
 0x477   : > { %v7765_v58 = vsel %vm10762_vm15, %v7760_v52, %v7764_v12  ;;  %v7745_v31 = vor.u32 %v7744_v23, %v7740_v3  ;;  %v9498_v45 = vcombine.low %v10552_v13, %v10553_v54  ;;  %v9646_v53 = vrot.slane %v7952_v56, 9  ;;  %10088 = vmatprep.subr.bf16.mxu1 %v14079_v1  ;;  %v14097_v12 = vpop.permute.xlu1 %7085 }
 0x478   : > { %v7736_v59 = vrot.slane %v7735_v38, 4  ;;  %v6096_v7 = vsel %vm15053_vm13, %v9497_v10, %v13898_v17  ;;  %v8066_v20 = vrot.slane %v14033_v16, 5  ;;  %v7775_v30 = vsel %vm10762_vm15, %v7770_v40, %v7774_v33  ;;  %v14111_v33 = vld [vmem:[#allocation2 + $0x98] sm:$0x1]  ;;  %v14126_v38 = vpop.permute.xlu0 %7167  ;;  %vm15062_vm13 = vmmov %vm15045_vm0 }
 0x479   : > { %v7746_v6 = vrot.slane %v7745_v31, 4  ;;  %v6099_v47 = vsel %vm15054_vm7, %v9498_v45, %v13888_v63  ;;  %v8069_v43 = vrot.slane %v14048_v35, 5  ;;  %v9678_v8 = vcombine.low %v7765_v58, %v7775_v30  ;;  %v14138_v58 = vld [vmem:[#allocation2 + $0x8c] sm:$0x1]  ;;  %vm15066_vm7 = vmmov %vm15045_vm0 }
 0x47a   : > { %v7741_v17 = vsel %vm10762_vm15, %v7736_v59, %v7740_v3  ;;  %v8067_v42 = vsel %vm10737_vm10, %v9646_v53, %v8066_v20  ;;  %v8068_v62 = vrot.slane %v8066_v20, 4  ;;  %v9645_v63 = vrot.slane %v7951_v28, 9 }
 0x47b   : > { %v7751_v36 = vsel %vm10762_vm15, %v7746_v6, %v7750_v60  ;;  %v8059_v35 = vrot.slane %v14058_v0, 5  ;;  %v8062_v57 = vrot.slane %v14062_v2, 5  ;;  %8248 = vrot.lane.b32.xlu0 %v9678_v8, %s10647_s15  ;;  %v6133_v19 = vsel %vm6109_vm4, %v6096_v7, %v13911_v21  ;;  %v14142_v13 = vpop.permute.xlu1 %7165  ;;  %v7954_v8 = vld [vmem:[#allocation2 + $0x90] sm:$0xe] }
 0x47c   : > { %v9677_v18 = vcombine.low %v7741_v17, %v7751_v36  ;;  %v8070_v5 = vsel %vm10737_vm10, %v8068_v62, %v8069_v43  ;;  %v6135_v52 = vsel %vm6109_vm4, %v6099_v47, %v13903_v39  ;;  %v7801_v56 = vshrl.u32 %v14103_v25, 16  ;;  %10041 = vmatmul.mubr.msk.bf16.gmra.mrb[36].mxu1 %vm6161_vm9, %v6133_v19  ;;  %v10554_v36 = vld [vmem:[#allocation2 + $0x9c] sm:$0xf] }
 0x47d   : > { %v9694_v3 = vcombine.low %v8067_v42, %v8070_v5  ;;  %v8060_v2 = vsel %vm10737_vm10, %v9645_v63, %v8059_v35  ;;  %v8061_v23 = vrot.slane %v8059_v35, 4  ;;  %v7804_v21 = vshll.u32 %v14103_v25, 16  ;;  %10044 = vmatprep.mubr.msk.bf16.mxu1 %vm6161_vm9, %v6135_v52  ;;  %v10555_v63 = vld [vmem:[#allocation2 + $0xa0] sm:$0xf]  ;;  %v10556_v52 = vld [vmem:[#allocation2 + $0xa8] sm:$0xf] }
 0x47e   : > { %8246 = vrot.lane.b32.xlu1 %v9677_v18, %s10647_s15  ;;  %v7810_v60 = vshll.u32 %v14105_v32, 16  ;;  %v7814_v39 = vshrl.u32 %v14105_v32, 16  ;;  %v7820_v4 = vshll.u32 %v14111_v33, 16  ;;  %v7803_v10 = vrot.slane %v7801_v56, 4 }
 0x47f   : > { %v8063_v37 = vsel %vm10737_vm10, %v8061_v23, %v8062_v57  ;;  %v7777_v40 = vshrl.u32 %v14120_v61, 16  ;;  %v7780_v31 = vshll.u32 %v14120_v61, 16  ;;  %8328 = vrot.lane.b32.xlu0 %v9694_v3, %s10649_s25  ;;  %v7806_v45 = vrot.slane %v7804_v21, 5  ;;  %v14149_v57 = vpop.permute.xlu0 %7091  ;;  %v10557_v3 = vld [vmem:[#allocation2 + $0xac] sm:$0xf] }
 0x480   : > { %v9693_v54 = vcombine.low %v8060_v2, %v8063_v37  ;;  %v7812_v59 = vrot.slane %v7810_v60, 5  ;;  %v7816_v7 = vrot.slane %v7814_v39, 4  ;;  %v7786_v28 = vshll.u32 %v14133_v26, 16  ;;  %v7953_v39 = vld [vmem:[#allocation2 + $0x84] sm:$0xe] }
 0x481   : > { %v7779_v53 = vrot.slane %v7777_v40, 4  ;;  %v7782_v20 = vrot.slane %v7780_v31, 5  ;;  %v7807_v30 = vor.u32 %v7806_v45, %v7803_v10  ;;  %v7790_v47 = vshrl.u32 %v14133_v26, 16 }
 0x482   : > { %8326 = vrot.lane.b32.xlu1 %v9693_v54, %s10649_s25  ;;  %v7817_v6 = vor.u32 %v7816_v7, %v7812_v59  ;;  %v7796_v43 = vshll.u32 %v14138_v58, 16  ;;  %v7822_v17 = vrot.slane %v7820_v4, 5  ;;  %v7788_v62 = vrot.slane %v7786_v28, 5  ;;  %v14153_v4 = vpop.permute.xlu1 %7089  ;;  %v14160_v54 = vld [vmem:[#allocation2 + $0xa8] sm:$0xf] }
 0x483   : > { %v7783_v42 = vor.u32 %v7782_v20, %v7779_v53  ;;  %v9499_v35 = vcombine.low %v10554_v36, %v10555_v63  ;;  %v7808_v18 = vrot.slane %v7807_v30, 4  ;;  %v7792_v19 = vrot.slane %v7790_v47, 4  ;;  %v14187_v63 = vld [vmem:[#allocation2 + $0x9c] sm:$0xf] }
 0x484   : > { %v7818_v5 = vrot.slane %v7817_v6, 4  ;;  %v9500_v2 = vcombine.low %v10556_v52, %v10557_v3  ;;  %v7798_v56 = vrot.slane %v7796_v43, 5  ;;  %v9648_v60 = vrot.slane %v7954_v8, 9  ;;  %v14175_v8 = vld [vmem:[#allocation2 + $0xac] sm:$0xf] }
 0x485   : > { %v7784_v23 = vrot.slane %v7783_v42, 4  ;;  %v6102_v21 = vsel %vm15055_vm2, %v9499_v35, %v13946_v11  ;;  %v7813_v37 = vsel %vm10762_vm15, %v7808_v18, %v7812_v59  ;;  %v7793_v40 = vor.u32 %v7792_v19, %v7788_v62  ;;  %v14191_v19 = vld [vmem:[#allocation2 + $0xa0] sm:$0xf] }
 0x486   : > { %v7823_v10 = vsel %vm10762_vm15, %v7818_v5, %v7822_v17  ;;  %v8080_v31 = vrot.slane %v14105_v32, 5  ;;  %v6105_v11 = vsel %vm15056_vm14, %v9500_v2, %v13931_v9  ;;  %v8083_v53 = vrot.slane %v14111_v33, 5  ;;  %v14177_v9 = vld [vmem:[#allocation2 + $0xb0] sm:$0x1]  ;;  %v14180_v17 = vpop.permute.xlu0 %7171  ;;  %v14194_v52 = vpop.permute.xlu1 %7169 }
 0x487   : > { %v9680_v45 = vcombine.low %v7813_v37, %v7823_v10  ;;  %v7789_v7 = vsel %vm10762_vm15, %v7784_v23, %v7788_v62  ;;  %v7794_v20 = vrot.slane %v7793_v40, 4  ;;  %v9647_v59 = vrot.slane %v7953_v39, 9 }
 0x488   : > { %v8082_v28 = vrot.slane %v8080_v31, 4  ;;  %v8073_v30 = vrot.slane %v14133_v26, 5  ;;  %v8081_v6 = vsel %vm10737_vm10, %v9648_v60, %v8080_v31  ;;  %v6137_v47 = vsel %vm6109_vm4, %v6102_v21, %v13960_v14  ;;  %v14205_v60 = vld [vmem:[#allocation2 + $0xa4] sm:$0x1] }
 0x489   : > { %8252 = vrot.lane.b32.xlu0 %v9680_v45, %s10647_s15  ;;  %v6139_v43 = vsel %vm6109_vm4, %v6105_v11, %v13957_v46  ;;  %v7849_v33 = vshrl.u32 %v14160_v54, 16  ;;  %v7799_v42 = vsel %vm10762_vm15, %v7794_v20, %v7798_v56  ;;  %v8076_v14 = vrot.slane %v14138_v58, 5  ;;  %10045 = vmatmul.mubr.msk.bf16.gmra.mrb[40].mxu1 %vm6161_vm9, %v6137_v47 }
 0x48a   : > { %v8084_v62 = vsel %vm10737_vm10, %v8082_v28, %v8083_v53  ;;  %v8075_v36 = vrot.slane %v8073_v30, 4  ;;  %v9679_v46 = vcombine.low %v7789_v7, %v7799_v42  ;;  %v7852_v5 = vshll.u32 %v14160_v54, 16  ;;  %10048 = vmatprep.mubr.msk.bf16.mxu1 %vm6161_vm9, %v6139_v43  ;;  %v7956_v28 = vld [vmem:[#allocation2 + $0xa8] sm:$0xe] }
 0x48b   : > { %v9696_v35 = vcombine.low %v8081_v6, %v8084_v62  ;;  %v7851_v18 = vrot.slane %v7849_v33, 4  ;;  %v7858_v58 = vshll.u32 %v14175_v8, 16  ;;  %v7862_v2 = vshrl.u32 %v14175_v8, 16  ;;  %v14211_v6 = vpop.permute.xlu0 %7095 }
 0x48c   : > { %v8077_v3 = vsel %vm10737_vm10, %v8075_v36, %v8076_v14  ;;  %v7868_v23 = vshll.u32 %v14177_v9, 16  ;;  %8250 = vrot.lane.b32.xlu1 %v9679_v46, %s10647_s15  ;;  %v8074_v56 = vsel %vm10737_vm10, %v9647_v59, %v8073_v30  ;;  %v7854_v21 = vrot.slane %v7852_v5, 5  ;;  %v10558_v36 = vld [vmem:[#allocation2 + $0xb4] sm:$0xf]  ;;  %v10559_v14 = vld [vmem:[#allocation2 + $0xb8] sm:$0xf] }
 0x48d   : > { %8332 = vrot.lane.b32.xlu0 %v9696_v35, %s10649_s25  ;;  %v7825_v39 = vshrl.u32 %v14187_v63, 16  ;;  %v7828_v37 = vshll.u32 %v14187_v63, 16  ;;  %v9695_v10 = vcombine.low %v8074_v56, %v8077_v3  ;;  %v7860_v40 = vrot.slane %v7858_v58, 5  ;;  %v14215_v35 = vpop.permute.xlu1 %7093  ;;  %v10560_v3 = vld [vmem:[#allocation2 + $0xc] sm:$0xf] }
 0x48e   : > { %v7864_v31 = vrot.slane %v7862_v2, 4  ;;  %v7834_v45 = vshll.u32 %v14191_v19, 16  ;;  %v7855_v7 = vor.u32 %v7854_v21, %v7851_v18  ;;  %v7838_v20 = vshrl.u32 %v14191_v19, 16  ;;  %v10561_v58 = vld [vmem:[#allocation2 + $0x10] sm:$0xf] }
 0x48f   : > { %v7827_v11 = vrot.slane %v7825_v39, 4  ;;  %v7830_v53 = vrot.slane %v7828_v37, 5  ;;  %v7870_v30 = vrot.slane %v7868_v23, 5  ;;  %v7844_v43 = vshll.u32 %v14205_v60, 16 }
 0x490   : > { %v7865_v59 = vor.u32 %v7864_v31, %v7860_v40  ;;  %v7836_v47 = vrot.slane %v7834_v45, 5  ;;  %8330 = vrot.lane.b32.xlu1 %v9695_v10, %s10649_s25  ;;  %v7856_v33 = vrot.slane %v7855_v7, 4  ;;  %v7840_v62 = vrot.slane %v7838_v20, 4  ;;  %v7955_v10 = vld [vmem:[#allocation2 + $0x9c] sm:$0xe] }
 0x491   : > { %v7831_v42 = vor.u32 %v7830_v53, %v7827_v11  ;;  %v9501_v46 = vcombine.low %v10558_v36, %v10559_v14  ;;  %v7846_v5 = vrot.slane %v7844_v43, 5  ;;  %v9569_v2 = vcombine.low %v10560_v3, %v10561_v58  ;;  %v14246_v14 = vld [vmem:[#allocation2 + $0xc8] sm:$0x1]  ;;  %v14255_v58 = vld [vmem:[#allocation2 + $0xb4] sm:$0xf] }
 0x492   : > { %v7866_v18 = vrot.slane %v7865_v59, 4  ;;  %v9650_v56 = vrot.slane %v7956_v28, 9  ;;  %v7861_v23 = vsel %vm10762_vm15, %v7856_v33, %v7860_v40  ;;  %v7841_v39 = vor.u32 %v7840_v62, %v7836_v47  ;;  %v14230_v59 = vld [vmem:[#allocation2 + $0xc0] sm:$0xf] }
 0x493   : > { %v7832_v21 = vrot.slane %v7831_v42, 4  ;;  %v6108_v37 = vsel %vm15057_vm6, %v9501_v46, %v13994_v55  ;;  %v7193_v45 = vsel %vm15058_vm8, %v9569_v2, %v13976_v34  ;;  %v8094_v7 = vrot.slane %v14175_v8, 5  ;;  %v14232_v55 = vpop.permute.xlu0 %7175  ;;  %v14249_v46 = vpop.permute.xlu1 %7173  ;;  %vm15069_vm6 = vmmov %vm15045_vm0 }
 0x494   : > { %v7871_v31 = vsel %vm10762_vm15, %v7866_v18, %v7870_v30  ;;  %v8097_v11 = vrot.slane %v14177_v9, 5  ;;  %v7842_v20 = vrot.slane %v7841_v39, 4  ;;  %v8087_v28 = vrot.slane %v14191_v19, 5  ;;  %v14238_v9 = vld [vmem:[#allocation2 + $0xc4] sm:$0xf]  ;;  %vm15070_vm8 = vmmov %vm15045_vm0 }
 0x495   : > { %v9682_v53 = vcombine.low %v7861_v23, %v7871_v31  ;;  %v7837_v40 = vsel %vm10762_vm15, %v7832_v21, %v7836_v47  ;;  %v8095_v30 = vsel %vm10737_vm10, %v9650_v56, %v8094_v7  ;;  %v8096_v43 = vrot.slane %v8094_v7, 4  ;;  %v14262_v23 = vld [vmem:[#allocation2 + $0xb8] sm:$0xf]  ;;  %v14268_v31 = vld [vmem:[#allocation2 + $0xbc] sm:$0x1] }
 0x496   : > { %v9649_v34 = vrot.slane %v7955_v10, 9  ;;  %v6141_v33 = vsel %vm6109_vm4, %v6108_v37, %v14012_v24  ;;  %v7847_v47 = vsel %vm10762_vm15, %v7842_v20, %v7846_v5  ;;  %v8089_v42 = vrot.slane %v8087_v28, 4 }
 0x497   : > { %8256 = vrot.lane.b32.xlu0 %v9682_v53, %s10647_s15  ;;  %v8090_v62 = vrot.slane %v14205_v60, 5  ;;  %v7240_v36 = vsel %vm6109_vm4, %v7193_v45, %v14008_v50  ;;  %10049 = vmatmul.mubr.msk.bf16.gmra.mrb[44].mxu1 %vm6161_vm9, %v6141_v33  ;;  %v9681_v24 = vcombine.low %v7837_v40, %v7847_v47  ;;  %v8098_v18 = vsel %vm10737_vm10, %v8096_v43, %v8097_v11  ;;  %v14273_v40 = vpop.permute.xlu0 %7099 }
 0x498   : > { %v7897_v3 = vshrl.u32 %v14230_v59, 16  ;;  %v7900_v5 = vshll.u32 %v14230_v59, 16  ;;  %10056 = vmatprep.mubr.msk.bf16.mxu1 %vm6161_vm9, %v7240_v36  ;;  %v9698_v60 = vcombine.low %v8095_v30, %v8098_v18  ;;  %v7906_v2 = vshll.u32 %v14238_v9, 16  ;;  %v14278_v36 = vpop.permute.xlu1 %7097 }
 0x499   : > { %v8091_v50 = vsel %vm10737_vm10, %v8089_v42, %v8090_v62  ;;  %v7910_v56 = vshrl.u32 %v14238_v9, 16  ;;  %8254 = vrot.lane.b32.xlu1 %v9681_v24, %s10647_s15  ;;  %v8088_v21 = vsel %vm10737_vm10, %v9649_v34, %v8087_v28  ;;  %v7916_v10 = vshll.u32 %v14246_v14, 16  ;;  %v7958_v62 = vld [vmem:[#allocation2 + $0xc0] sm:$0xe] }
 0x49a   : > { %v7899_v39 = vrot.slane %v7897_v3, 4  ;;  %v7902_v37 = vrot.slane %v7900_v5, 5  ;;  %v7908_v45 = vrot.slane %v7906_v2, 5  ;;  %v7873_v11 = vshrl.u32 %v14255_v58, 16 }
 0x49b   : > { %8336 = vrot.lane.b32.xlu0 %v9698_v60, %s10649_s25  ;;  %v7912_v7 = vrot.slane %v7910_v56, 4  ;;  %v7876_v53 = vshll.u32 %v14255_v58, 16  ;;  %v9697_v20 = vcombine.low %v8088_v21, %v8091_v50  ;;  %v7882_v28 = vshll.u32 %v14262_v23, 16  ;;  %v10562_v56 = vld [vmem:[#allocation2 + $0x18] sm:$0xf] }
 0x49c   : > { %v7903_v30 = vor.u32 %v7902_v37, %v7899_v39  ;;  %v7886_v43 = vshrl.u32 %v14262_v23, 16  ;;  %v7875_v33 = vrot.slane %v7873_v11, 4  ;;  %v7892_v42 = vshll.u32 %v14268_v31, 16  ;;  %v10563_v21 = vld [vmem:[#allocation2 + $0x1c] sm:$0xf] }
 0x49d   : > { %v7913_v34 = vor.u32 %v7912_v7, %v7908_v45  ;;  %v7878_v47 = vrot.slane %v7876_v53, 5  ;;  %8334 = vrot.lane.b32.xlu1 %v9697_v20, %s10649_s25  ;;  %v7918_v18 = vrot.slane %v7916_v10, 5  ;;  %v7884_v3 = vrot.slane %v7882_v28, 5  ;;  %v10564_v11 = vld [vmem:[#allocation2 + $0x24] sm:$0xf] }
 0x49e   : > { %v7904_v24 = vrot.slane %v7903_v30, 4  ;;  %v7888_v5 = vrot.slane %v7886_v43, 4  ;;  %v7894_v2 = vrot.slane %v7892_v42, 5  ;;  %v9570_v39 = vcombine.low %v10562_v56, %v10563_v21  ;;  %v10565_v53 = vld [vmem:[#allocation2 + $0x28] sm:$0xf]  ;;  %v14288_v43 = vpop.permute.xlu0 %7179 }
 0x49f   : > { %v7914_v60 = vrot.slane %v7913_v34, 4  ;;  %v7879_v50 = vor.u32 %v7878_v47, %v7875_v33  ;;  %v9571_v51 = vcombine.low %v10564_v11, %v10565_v53  ;;  %v9652_v16 = vrot.slane %v7958_v62, 9  ;;  %v14293_v42 = vld [vmem:[#allocation2 + $0xcc] sm:$0xf]  ;;  %v14295_v62 = vld [vmem:[#allocation2 + $0xd0] sm:$0xf] }
 0x4a0   : > { %v7909_v37 = vsel %vm10762_vm15, %v7904_v24, %v7908_v45  ;;  %v7889_v7 = vor.u32 %v7888_v5, %v7884_v3  ;;  %v7196_v30 = vsel %vm15045_vm0, %v9570_v39, %v14035_v44  ;;  %v8108_v28 = vrot.slane %v14238_v9, 5 }
 0x4a1   : > { %v7919_v10 = vsel %vm10762_vm15, %v7914_v60, %v7918_v18  ;;  %v7880_v20 = vrot.slane %v7879_v50, 4  ;;  %v7199_v45 = vsel %vm15059_vm5, %v9571_v51, %v14024_v22  ;;  %v8111_v47 = vrot.slane %v14246_v14, 5  ;;  %v14300_v60 = vpop.permute.xlu1 %7177  ;;  %v14305_v50 = vld [vmem:[%s14812_s5 + $0x20] ss:$0 sps:$4 sm:$0xff]  }
 0x4a2   : > { %v9684_v34 = vcombine.low %v7909_v37, %v7919_v10  ;;  %v7890_v33 = vrot.slane %v7889_v7, 4  ;;  %v8110_v18 = vrot.slane %v8108_v28, 4  ;;  %v9651_v44 = vrot.slane %v7957_v49, 9  ;;  %v14334_v10 = vpop.permute.xlu0 %7103 }
 0x4a3   : > { %v7885_v24 = vsel %vm10762_vm15, %v7880_v20, %v7884_v3  ;;  %v8101_v5 = vrot.slane %v14262_v23, 5  ;;  %v8109_v51 = vsel %vm10737_vm10, %v9652_v16, %v8108_v28  ;;  %v7242_v49 = vsel %vm6109_vm4, %v7196_v30, %v14073_v41  ;;  %v7559_v3 = vld [vmem:[#allocation2 + $0xd4] sm:$0x1]  ;;  %v8761_v16 = vld [vmem:[%s14814_s7] sm:$0x3] }
 0x4a4   : > { %8260 = vrot.lane.b32.xlu0 %v9684_v34, %s10647_s15  ;;  %v7895_v22 = vsel %vm10762_vm15, %v7890_v33, %v7894_v2  ;;  %v7244_v14 = vsel %vm6109_vm4, %v7199_v45, %v14064_v15  ;;  %v8112_v21 = vsel %vm10737_vm10, %v8110_v18, %v8111_v47  ;;  %v8104_v37 = vrot.slane %v14268_v31, 5  ;;  %10057 = vmatmul.mubr.msk.bf16.vlgmr.msra.gmra.mrb[16].mxu1 %vm6161_vm9, %v7242_v49  ;;  %v7959_v34 = vld [vmem:[#allocation2 + $0xcc] sm:$0xe]  ;;  %v10567_v18 = vld [vmem:[#allocation2 + $0x34] sm:$0xf] }
 0x4a5   : > { %v9683_v56 = vcombine.low %v7885_v24, %v7895_v22  ;;  %v8103_v39 = vrot.slane %v8101_v5, 4  ;;  %v9700_v2 = vcombine.low %v8109_v51, %v8112_v21  ;;  %v7921_v41 = vshrl.u32 %v14293_v42, 16  ;;  %10089 = vmatpush3.bf16.msra.mxu1 %v14079_v1  ;;  %10060 = vmatprep.mubr.msk.bf16.mxu1 %vm6161_vm9, %v7244_v14  ;;  %v10566_v24 = vld [vmem:[#allocation2 + $0x30] sm:$0xf]  ;;  %v14340_v51 = vpop.permute.xlu1 %7101  ;;  %v10568_v14 = vld [vmem:[#allocation2 + $0x3c] sm:$0xf] }
 0x4a6   : > { %v7924_v7 = vshll.u32 %v14293_v42, 16  ;;  %v7930_v15 = vshll.u32 %v14295_v62, 16  ;;  %v7934_v11 = vshrl.u32 %v14295_v62, 16  ;;  %v7940_v53 = vshll.u32 %v7559_v3, 16  ;;  %10358 = vmatprep.subr.msk.bf16.mxu1 %vm6194_vm3, %v14305_v50 }
 0x4a7   : > { %8258 = vrot.lane.b32.xlu1 %v9683_v56, %s10647_s15  ;;  %v8105_v31 = vsel %vm10737_vm10, %v8103_v39, %v8104_v37  ;;  %vm8897_vm1 = vcmask 1041408   ;;  %v8102_v1 = vsel %vm10737_vm10, %v9651_v44, %v8101_v5  ;;  %v7923_v20 = vrot.slane %v7921_v41, 4  ;;  %v10569_v56 = vld [vmem:[#allocation2 + $0x40] sm:$0xf] }
 0x4a8   : > { %8340 = vrot.lane.b32.xlu0 %v9700_v2, %s10649_s25  ;;  %v7926_v30 = vrot.slane %v7924_v7, 5  ;;  %v7932_v28 = vrot.slane %v7930_v15, 5  ;;  %10359 = vmatprep.subr.msk.bf16.mxu0 %vm8897_vm1, %v8761_v16  ;;  %v9699_v33 = vcombine.low %v8102_v1, %v8105_v31  ;;  %v7936_v45 = vrot.slane %v7934_v11, 4  ;;  %v14354_v1 = vpop.permute.xlu0 %7183 }
 0x4a9   : > { %v7942_v47 = vrot.slane %v7940_v53, 5  ;;  %v9572_v22 = vcombine.low %v10566_v24, %v10567_v18  ;;  %v9573_v21 = vcombine.low %v10568_v14, %v10569_v56  ;;  %v8899_v44 = vsel %vm8897_vm1, %v8761_v16, 0  ;;  %v10573_v24 = vld [vmem:[#allocation2 + $0x58] sm:$0xf]  ;;  %v10576_v56 = vld [vmem:[%s10744_s14] sm:$0xf]  ;;  %vm15073_vm1 = vmmov %vm15069_vm6 }
 0x4aa   : > { %v7927_v49 = vor.u32 %v7926_v30, %v7923_v20  ;;  %v8115_v5 = vrot.slane %v14295_v62, 5  ;;  %v7937_v39 = vor.u32 %v7936_v45, %v7932_v28  ;;  %10125 = vmatpush3.bf16.msra.mxu0 %v8899_v44  ;;  %v9653_v2 = vrot.slane %v7959_v34, 9  ;;  %v10570_v20 = vld [vmem:[#allocation2 + $0x48] sm:$0xf]  ;;  %v14365_v34 = vpop.permute.xlu1 %7181  ;;  %v10572_v45 = vld [vmem:[#allocation2 + $0x54] sm:$0xf] }
 0x4ab   : > { %8338 = vrot.lane.b32.xlu1 %v9699_v33, %s10649_s25  ;;  %v7202_v37 = vsel %vm15060_vm11, %v9572_v22, %v14097_v12  ;;  %v8118_v41 = vrot.slane %v7559_v3, 5  ;;  %v7205_v15 = vsel %vm15061_vm12, %v9573_v21, %v14086_v27  ;;  %v8470_v22 = vsel %vm6194_vm3, %v14305_v50, 0  ;;  %v10578_v44 = vld [vmem:[#allocation2 + $0x6c] sm:$0xf]  ;;  %vm15074_vm11 = vmmov %vm15073_vm1 }
 0x4ac   : > { %v7928_v7 = vrot.slane %v7927_v49, 4  ;;  %v8117_v31 = vrot.slane %v8115_v5, 4  ;;  %v7246_v11 = vsel %vm6109_vm4, %v7202_v37, %v14142_v13  ;;  %v7938_v16 = vrot.slane %v7937_v39, 4  ;;  %10091 = vmatpush3.bf16.msra.mxu1 %v8470_v22  ;;  %v10580_v37 = vld [vmem:[%s10744_s14 + $0x8] sm:$0xf] }
 0x4ad   : > { %v7248_v53 = vsel %vm6109_vm4, %v7205_v15, %v14126_v38  ;;  %10061 = vmatmul.mubr.msk.bf16.gmra.mrb[20].mxu1 %vm6161_vm9, %v7246_v11  ;;  %v8116_v3 = vsel %vm10737_vm10, %v9653_v2, %v8115_v5  ;;  %v10571_v38 = vld [vmem:[#allocation2 + $0x4c] sm:$0xf]  ;;  %v10579_v5 = vld [vmem:[#allocation2 + $0x70] sm:$0xf]  ;;  %v10583_v15 = vld [vmem:[%s10744_s14 + $0x14] sm:$0xf]  ;;  %v9669_v22 = vcombine.low %v14293_v42, %v14295_v62 }
 0x4ae   : > { %v7933_v12 = vsel %vm10762_vm15, %v7928_v7, %v7932_v28  ;;  %10064 = vmatprep.mubr.msk.bf16.mxu1 %vm6161_vm9, %v7248_v53  ;;  %v7943_v27 = vsel %vm10762_vm15, %v7938_v16, %v7942_v47  ;;  %v8119_v13 = vsel %vm10737_vm10, %v8117_v31, %v8118_v41  ;;  %v9574_v30 = vcombine.low %v10570_v20, %v10571_v38  ;;  %vm15063_vm15 = vmmov %vm15045_vm0  ;;  %v14381_v14 = vpop.permute.xlu1 %7105  ;;  %v10581_v2 = vld [vmem:[%s10744_s14 + $0xc] sm:$0xf]  ;;  %v10582_v7 = vld [vmem:[%s10744_s14 + $0x10] sm:$0xf] }
 0x4af   : > { %v9685_v33 = vcombine.low %v7933_v12, %v7943_v27  ;;  %v9575_v28 = vcombine.low %v10572_v45, %v10573_v24  ;;  %v9701_v48 = vcombine.low %v8116_v3, %v8119_v13  ;;  %v9577_v39 = vcombine.low %v10578_v44, %v10579_v5  ;;  %vm15064_vm10 = vmmov %vm15045_vm0  ;;  %v10584_v13 = vld [vmem:[%s10744_s14 + $0x18] sm:$0xf]  ;;  %v10585_v20 = vld [vmem:[%s10744_s14 + $0x1c] sm:$0xf] }
 0x4b0   : > { %v7208_v18 = vsel %vm15062_vm13, %v9574_v30, %v14153_v4  ;;  %v14378_v4 = vpop.permute.xlu0 %7107  ;;  %v9725_v41 = vcombine.low %v10580_v37, %v10581_v2  ;;  %v9726_v31 = vcombine.low %v10582_v7, %v10583_v15  ;;  %vm15065_vm3 = vcmask 31744   ;;  %v10586_v45 = vld [vmem:[#allocation2 + $0x78] sm:$0xf]  ;;  %v10587_v24 = vld [vmem:[#allocation2 + $0x7c] sm:$0xf] }
 0x4b1   : > { %8262 = vrot.lane.b32.xlu1 %v9685_v33, %s10647_s15  ;;  %v7211_v29 = vsel %vm15063_vm15, %v9575_v28, %v14149_v57  ;;  %v7250_v47 = vsel %vm6109_vm4, %v7208_v18, %v14194_v52  ;;  %v10574_v57 = vld [vmem:[#allocation2 + $0x60] sm:$0xf]  ;;  %v10575_v52 = vld [vmem:[#allocation2 + $0x64] sm:$0xf]  ;;  %v7217_v53 = vsel %vm15066_vm7, %v9577_v39, %v14211_v6  ;;  %vm15067_vm2 = vmmov %vm15065_vm3  ;;  %v9664_v6 = vcombine.low %v14103_v25, %v14105_v32 }
 0x4b2   : > { %v7252_v49 = vsel %vm6109_vm4, %v7211_v29, %v14180_v17  ;;  %v9576_v50 = vcombine.low %v10574_v57, %v10575_v52  ;;  %v10577_v17 = vld [vmem:[%s10744_s14 + $0x4] sm:$0xf]  ;;  %v7256_v27 = vsel %vm6109_vm4, %v7217_v53, %v14232_v55  ;;  %v14403_v3 = vpop.permute.xlu1 %7185  ;;  %vm15068_vm14 = vmmov %vm15067_vm2  ;;  %v9666_v55 = vcombine.low %v14160_v54, %v14175_v8  ;;  %v10591_v57 = vld [vmem:[#allocation2 + $0x88] sm:$0xf] }
 0x4b3   : > { %v9724_v21 = vcombine.low %v10576_v56, %v10577_v17  ;;  %v9727_v38 = vcombine.low %v10584_v13, %v10585_v20  ;;  %v9667_v30 = vcombine.low %v14255_v58, %v14262_v23  ;;  %v9668_v33 = vcombine.low %v14230_v59, %v14238_v9  ;;  %v10589_v29 = vld [vmem:[%s10744_s14 + $0x24] sm:$0xf]  ;;  %vm15071_vm0 = vmmov %vm15067_vm2  ;;  %v10592_v5 = vld [vmem:[%s10744_s14 + $0x28] sm:$0xf] }
 0x4b4   : > { %v7214_v11 = vsel %vm15064_vm10, %v9576_v50, %v14215_v35  ;;  %v14393_v16 = vpop.permute.xlu0 %7187  ;;  %v9663_v35 = vcombine.low %v14120_v61, %v14133_v26  ;;  %v9578_v28 = vcombine.low %v10586_v45, %v10587_v24  ;;  %vm15072_vm5 = vmmov %vm15071_vm0  ;;  %v10593_v39 = vld [vmem:[%s10744_s14 + $0x2c] sm:$0xf]  ;;  %v10594_v37 = vld [vmem:[#allocation2 + $0x90] sm:$0xf] }
 0x4b5   : > { %10065 = vmatmul.mubr.msk.bf16.gmra.mrb[24].mxu1 %vm6161_vm9, %v7250_v47  ;;  %8342 = vrot.lane.b32.xlu1 %v9701_v48, %s10649_s25  ;;  %v7254_v12 = vsel %vm6109_vm4, %v7214_v11, %v14249_v46  ;;  %v9665_v46 = vcombine.low %v14187_v63, %v14191_v19  ;;  %v10588_v48 = vld [vmem:[%s10744_s14 + $0x20] sm:$0xf]  ;;  %v10595_v2 = vld [vmem:[#allocation2 + $0x94] sm:$0xf]  ;;  %v10596_v7 = vld [vmem:[%s10744_s14 + $0x30] sm:$0xf] }
 0x4b6   : > { %10068 = vmatprep.mubr.msk.bf16.mxu1 %vm6161_vm9, %v7252_v49  ;;  %10126 = vmatprep.mubr.msk.bf16.mxu0 %vm15065_vm3, %v9724_v21  ;;  %v9728_v47 = vcombine.low %v10588_v48, %v10589_v29  ;;  %v10590_v49 = vld [vmem:[#allocation2 + $0x84] sm:$0xf]  ;;  %v7220_v50 = vsel %vm15069_vm6, %v9578_v28, %v14278_v36  ;;  %v10597_v15 = vld [vmem:[%s10744_s14 + $0x34] sm:$0xf]  ;;  %v10599_v11 = vld [vmem:[#allocation2 + $0xa0] sm:$0xf] }
 0x4b7   : > { %10127 = vmatmul.mubr.msk.bf16.vlgmr.msra.gmra.mrb[32].mxu0 %vm15067_vm2, %v9725_v41  ;;  %v9579_v52 = vcombine.low %v10590_v49, %v10591_v57  ;;  %v7258_v21 = vsel %vm6109_vm4, %v7220_v50, %v14300_v60  ;;  %v9580_v41 = vcombine.low %v10594_v37, %v10595_v2  ;;  %vm15075_vm12 = vmmov %vm15071_vm0  ;;  %v10600_v45 = vld [vmem:[%s10744_s14 + $0x38] sm:$0xf]  ;;  %v10602_v28 = vld [vmem:[#allocation2 + $0xa8] sm:$0xf] }
 0x4b8   : > { %10130 = vmatprep.mubr.msk.bf16.mxu0 %vm15068_vm14, %v9726_v31  ;;  %v14422_v18 = vpop.permute.xlu0 %8232  ;;  %v10598_v31 = vld [vmem:[#allocation2 + $0x9c] sm:$0xf]  ;;  %vm15076_vm13 = vmmov %vm15071_vm0  ;;  %v10603_v48 = vld [vmem:[#allocation2 + $0xac] sm:$0xf] }
 0x4b9   : > { %v7223_v17 = vsel %vm15070_vm8, %v9579_v52, %v14273_v40  ;;  %v9729_v40 = vcombine.low %v10592_v5, %v10593_v39  ;;  %v9581_v53 = vcombine.low %v10598_v31, %v10599_v11  ;;  %v10604_v29 = vld [vmem:[%s10744_s14 + $0x40] sm:$0xf]  ;;  %v10606_v49 = vld [vmem:[#allocation2 + $0xb4] sm:$0xf]  ;;  %v10607_v57 = vld [vmem:[#allocation2 + $0xb8] sm:$0xf] }
 0x4ba   : > { %v14430_v56 = vpop.permute.xlu1 %7109  ;;  %v7260_v44 = vsel %vm6109_vm4, %v7223_v17, %v14288_v43  ;;  %v9730_v43 = vcombine.low %v10596_v7, %v10597_v15  ;;  %v9583_v52 = vcombine.low %v10606_v49, %v10607_v57  ;;  %vm15077_vm15 = vmmov %vm15073_vm1  ;;  %v10611_v2 = vld [vmem:[#allocation2 + $0xc4] sm:$0xf]  ;;  %v10613_v15 = vld [vmem:[%s10744_s14 + $0x54] sm:$0xf] }
 0x4bb   : > { %vm15078_vm10 = vmmov %vm15073_vm1  ;;  %v10615_v31 = vld [vmem:[#allocation2 + $0x1c] sm:$0xf] }
 0x4bc   : > { %v14441_v36 = vpop.permute.xlu0 %8312  ;;  %vm15079_vm3 = vmmov %vm15071_vm0 }
 0x4bd   : > { %10069 = vmatmul.mubr.msk.bf16.gmra.mrb[28].mxu1 %vm6161_vm9, %v7254_v12  ;;  %v7226_v12 = vsel %vm15073_vm1, %v9580_v41, %v14340_v51  ;;  %vm15080_vm7 = vmmov %vm15071_vm0 }
 0x4be   : > { %10072 = vmatprep.mubr.msk.bf16.mxu1 %vm6161_vm9, %v7256_v27  ;;  %v7190_v60 = vpop.permute.xlu1 %7189  ;;  %v7229_v27 = vsel %vm15074_vm11, %v9581_v53, %v14334_v10  ;;  %v7262_v13 = vsel %vm6109_vm4, %v7226_v12, %v14365_v34  ;;  %v10601_v10 = vld [vmem:[%s10744_s14 + $0x3c] sm:$0xf]  ;;  %v9582_v34 = vcombine.low %v10602_v28, %v10603_v48  ;;  %vm15081_vm2 = vmmov %vm15073_vm1  ;;  %v10618_v28 = vld [vmem:[#allocation2 + $0x24] sm:$0xf] }
 0x4bf   : > { %10131 = vmatmul.mubr.msk.bf16.gmra.mrb[36].mxu0 %vm15071_vm0, %v9727_v38  ;;  %v7264_v20 = vsel %vm6109_vm4, %v7229_v27, %v14354_v1  ;;  %v9731_v24 = vcombine.low %v10600_v45, %v10601_v10  ;;  %vm15082_vm14 = vmmov %vm15073_vm1  ;;  %v10617_v10 = vld [vmem:[%s10744_s14 + $0x5c] sm:$0xf] }
 0x4c0   : > { %10134 = vmatprep.mubr.msk.bf16.mxu0 %vm15072_vm5, %v9728_v47  ;;  %v10605_v47 = vld [vmem:[%s10744_s14 + $0x44] sm:$0xf]  ;;  %v7232_v50 = vsel %vm15077_vm15, %v9582_v34, %v14381_v14  ;;  %v10608_v14 = vld [vmem:[%s10744_s14 + $0x48] sm:$0xf]  ;;  %vm15083_vm6 = vmmov %vm15071_vm0 }
 0x4c1   : > { %v9732_v1 = vcombine.low %v10604_v29, %v10605_v47  ;;  %vm15084_vm8 = vmmov %vm15071_vm0  ;;  %v10621_v29 = vld [vmem:[%s10744_s14 + $0x64] sm:$0xf] }
 0x4c2   : > { %vm15085_vm0 = vmmov %vm15073_vm1 }
 0x4c3   : > { %vm15086_vm5 = vmmov %vm15085_vm0 }
 0x4c4   : > { %vm15087_vm1 = vmmov %vm15079_vm3 }
 0x4c5   : > { %10073 = vmatmul.mubr.msk.bf16.gmra.mrb[32].mxu1 %vm6161_vm9, %v7258_v21  ;;  %v14457_v38 = vpop.permute.xlu0 %8236  ;;  %v7235_v21 = vsel %vm15078_vm10, %v9583_v52, %v14378_v4  ;;  %v10610_v4 = vld [vmem:[#allocation2 + $0xc0] sm:$0xf]  ;;  %vm15088_vm11 = vmmov %vm15087_vm1 }
 0x4c6   : > { %10076 = vmatprep.mubr.msk.bf16.mxu1 %vm6161_vm9, %v7260_v44  ;;  %v7266_v44 = vsel %vm6109_vm4, %v7232_v50, %v14403_v3  ;;  %v7268_v5 = vsel %vm6109_vm4, %v7235_v21, %v14393_v16  ;;  %v9584_v41 = vcombine.low %v10610_v4, %v10611_v2  ;;  %v10612_v3 = vld [vmem:[%s10744_s14 + $0x50] sm:$0xf]  ;;  %v10614_v16 = vld [vmem:[#allocation2 + $0x18] sm:$0xf]  ;;  %vm15091_vm15 = vmmov %vm15087_vm1 }
 0x4c7   : > { %10135 = vmatmul.mubr.msk.bf16.gmra.mrb[40].mxu0 %vm15075_vm12, %v9729_v40  ;;  %v10609_v40 = vld [vmem:[%s10744_s14 + $0x4c] sm:$0xf]  ;;  %v9654_v11 = vcombine.low %v10614_v16, %v10615_v31  ;;  %v10628_v2 = vld [vmem:[%s10744_s14 + $0x70] sm:$0xf]  ;;  %vm15089_vm12 = vmmov %vm15085_vm0 }
 0x4c8   : > { %10138 = vmatprep.mubr.msk.bf16.mxu0 %vm15076_vm13, %v9730_v43  ;;  %v8235_v51 = vpop.permute.xlu1 %8234  ;;  %v9733_v37 = vcombine.low %v10608_v14, %v10609_v40  ;;  %v9734_v43 = vcombine.low %v10612_v3, %v10613_v15  ;;  %v7238_v53 = vsel %vm15081_vm2, %v9584_v41, %v14430_v56  ;;  %v10616_v56 = vld [vmem:[%s10744_s14 + $0x58] sm:$0xf]  ;;  %v10625_v14 = vld [vmem:[%s10744_s14 + $0x6c] sm:$0xf]  ;;  %vm15090_vm13 = vmmov %vm15085_vm0 }
 0x4c9   : > { %v8317_v17 = vpop.permute.xlu0 %8316  ;;  %v8346_v27 = vsel %vm15082_vm14, %v9654_v11, %v14422_v18  ;;  %v10619_v18 = vld [vmem:[#allocation2 + $0x28] sm:$0xf]  ;;  %v10631_v3 = vld [vmem:[#allocation2 + $0x4c] sm:$0xf]  ;;  %vm15092_vm10 = vmmov %vm15087_vm1 }
 0x4ca   : > { %v9655_v48 = vcombine.low %v10618_v28, %v10619_v18  ;;  %v10636_v28 = vld [vmem:[#allocation2 + $0x60] sm:$0xf]  ;;  %v10637_v18 = vld [vmem:[#allocation2 + $0x64] sm:$0xf]  ;;  %vm15095_vm2 = vmmov %vm15087_vm1 }
 0x4cb   : > { %vm15099_vm14 = vmmov %vm15085_vm0 }
 0x4cc   : > { %v8315_v39 = vpop.permute.xlu1 %8314  ;;  %v8349_v57 = vsel %vm15085_vm0, %v9655_v48, %v8235_v51  ;;  %v10624_v51 = vld [vmem:[%s10744_s14 + $0x68] sm:$0xf]  ;;  %v9660_v48 = vcombine.low %v10636_v28, %v10637_v18 }
 0x4cd   : > { %10077 = vmatmul.mubr.msk.bf16.gmra.mrb[36].mxu1 %vm6161_vm9, %v7262_v13  ;;  %v7270_v13 = vsel %vm6109_vm4, %v7238_v53, %v7190_v60  ;;  %v10620_v60 = vld [vmem:[%s10744_s14 + $0x60] sm:$0xf]  ;;  %v8395_v50 = vsel %vm6109_vm4, %v8349_v57, %v8315_v39  ;;  %v9737_v40 = vcombine.low %v10624_v51, %v10625_v14  ;;  %v10629_v39 = vld [vmem:[%s10744_s14 + $0x74] sm:$0xf] }
 0x4ce   : > { %10080 = vmatprep.mubr.msk.bf16.mxu1 %vm6161_vm9, %v7264_v20  ;;  %v8393_v20 = vsel %vm6109_vm4, %v8346_v27, %v14441_v36  ;;  %v9736_v47 = vcombine.low %v10620_v60, %v10621_v29  ;;  %v10622_v36 = vld [vmem:[#allocation2 + $0x30] sm:$0xf]  ;;  %v9738_v41 = vcombine.low %v10628_v2, %v10629_v39 }
 0x4cf   : > { %10139 = vmatmul.mubr.msk.bf16.gmra.mrb[44].mxu0 %vm15079_vm3, %v9731_v24  ;;  %v9735_v24 = vcombine.low %v10616_v56, %v10617_v10  ;;  %v10635_v10 = vld [vmem:[#allocation2 + $0x58] sm:$0xf]  ;;  %vm15093_vm3 = vmmov %vm15085_vm0 }
 0x4d0   : > { %10142 = vmatprep.mubr.msk.bf16.mxu0 %vm15080_vm7, %v9732_v1  ;;  %v10623_v1 = vld [vmem:[#allocation2 + $0x34] sm:$0xf]  ;;  %vm15094_vm7 = vmmov %vm15085_vm0 }
 0x4d1   : > { %v9656_v49 = vcombine.low %v10622_v36, %v10623_v1  ;;  %v15096_v1 = vld [vmem:[#allocation3_spill] sm:$0xff] }
 0x4d2   : > { %v8241_v7 = vpop.permute.xlu0 %8240 }
 0x4d3   : > { %v8352_v52 = vsel %vm15086_vm5, %v9656_v49, %v14457_v38  ;;  %v10627_v38 = vld [vmem:[#allocation2 + $0x40] sm:$0xf]  ;;  %v9661_v49 = vcombine.low %v15096_v1, %v14058_v0  ;;  %vm15102_vm5 = vmmov %vm15085_vm0 }
 0x4d4   : > { %v8397_v21 = vsel %vm6109_vm4, %v8352_v52, %v8317_v17  ;;  %v10630_v17 = vld [vmem:[#allocation2 + $0x48] sm:$0xf]  ;;  %v15097_v52 = vld [vmem:[#allocation6_spill] sm:$0xff] }
 0x4d5   : > { %10081 = vmatmul.mubr.msk.bf16.gmra.mrb[40].mxu1 %vm6161_vm9, %v7266_v44  ;;  %v8239_v12 = vpop.permute.xlu1 %8238  ;;  %v9658_v15 = vcombine.low %v10630_v17, %v10631_v3 }
 0x4d6   : > { %10084 = vmatprep.mubr.msk.bf16.mxu1 %vm6161_vm9, %v7268_v5  ;;  %v8321_v45 = vpop.permute.xlu0 %8320 }
 0x4d7   : > { %10143 = vmatmul.mubr.msk.bf16.gmra.mrb[48].mxu0 %vm15083_vm6, %v9733_v37  ;;  %v10626_v37 = vld [vmem:[#allocation2 + $0x3c] sm:$0xf]  ;;  %v8358_v31 = vsel %vm15090_vm13, %v9658_v15, %v8241_v7  ;;  %vm15100_vm6 = vmmov %vm15085_vm0 }
 0x4d8   : > { %10146 = vmatprep.mubr.msk.bf16.mxu0 %vm15084_vm8, %v9734_v43  ;;  %v9657_v4 = vcombine.low %v10626_v37, %v10627_v38  ;;  %v8401_v53 = vsel %vm6109_vm4, %v8358_v31, %v8321_v45  ;;  %vm15101_vm8 = vmmov %vm15085_vm0 }
 0x4d9   : > { %v8319_v34 = vpop.permute.xlu1 %8318  ;;  %vm15106_vm13 = vmmov %vm15085_vm0 }
 0x4da   : > { %v8355_v43 = vsel %vm15089_vm12, %v9657_v4, %v8239_v12  ;;  %v10634_v12 = vld [vmem:[#allocation2 + $0x54] sm:$0xf]  ;;  %vm15105_vm12 = vmmov %vm15085_vm0 }
 0x4db   : > { %v8399_v11 = vsel %vm6109_vm4, %v8355_v43, %v8319_v34 }
 0x4dd   : > { %10085 = vmatmul.mubr.msk.bf16.gmra.mrb[44].mxu1 %vm6161_vm9, %v7270_v13  ;;  %v10632_v13 = vld [vmem:[%s10744_s14 + $0x78] sm:$0xf] }
 0x4de   : > { %10092 = vmatprep.mubr.msk.bf16.mxu1 %vm6161_vm9, %v8393_v20  ;;  %v10633_v20 = vld [vmem:[%s10744_s14 + $0x7c] sm:$0xf] }
 0x4df   : > { %10147 = vmatmul.mubr.msk.bf16.gmra.mrb[52].mxu0 %vm15087_vm1, %v9735_v24  ;;  %v9739_v56 = vcombine.low %v10632_v13, %v10633_v20  ;;  %v9659_v24 = vcombine.low %v10634_v12, %v10635_v10  ;;  %vm15103_vm1 = vmmov %vm15085_vm0 }
 0x4e0   : > { %v8245_v44 = vpop.permute.xlu0 %8244  ;;  %10150 = vmatprep.mubr.msk.bf16.mxu0 %vm15088_vm11, %v9736_v47  ;;  %vm15104_vm11 = vmmov %vm15085_vm0 }
 0x4e1   : > { %v8364_v60 = vsel %vm15094_vm7, %v9660_v48, %v8245_v44  ;;  %vm15108_vm7 = vmmov %vm15085_vm0 }
 0x4e3   : > { %v8243_v5 = vpop.permute.xlu1 %8242 }
 0x4e4   : > { %v8325_v16 = vpop.permute.xlu0 %8324  ;;  %v8361_v34 = vsel %vm15093_vm3, %v9659_v24, %v8243_v5  ;;  %vm15107_vm3 = vmmov %vm15085_vm0 }
 0x4e5   : > { %10093 = vmatmul.mubr.msk.bf16.vlgmr.msra.gmra.mrb[16].mxu1 %vm6161_vm9, %v8395_v50  ;;  %v8405_v47 = vsel %vm6109_vm4, %v8364_v60, %v8325_v16  ;;  %v15098_v50 = vld [vmem:[#allocation13_spill] sm:$0xff] }
 0x4e6   : > { %10096 = vmatprep.mubr.msk.bf16.mxu1 %vm6161_vm9, %v8397_v21  ;;  %v9662_v21 = vcombine.low %v15098_v50, %v15097_v52 }
 0x4e7   : > { %10151 = vmatmul.mubr.msk.bf16.gmra.mrb[56].mxu0 %vm15091_vm15, %v9737_v40  ;;  %v8323_v27 = vpop.permute.xlu1 %8322 }
 0x4e8   : > { %10154 = vmatprep.mubr.msk.bf16.mxu0 %vm15092_vm10, %v9738_v41  ;;  %v8403_v29 = vsel %vm6109_vm4, %v8361_v34, %v8323_v27 }
 0x4ed   : > { %10097 = vmatmul.mubr.msk.bf16.gmra.mrb[20].mxu1 %vm6161_vm9, %v8399_v11  ;;  %v8249_v7 = vpop.permute.xlu0 %8248 }
 0x4ee   : > { %10100 = vmatprep.mubr.msk.bf16.mxu1 %vm6161_vm9, %v8401_v53  ;;  %v8370_v5 = vsel %vm15100_vm6, %v9662_v21, %v8249_v7 }
 0x4ef   : > { %10155 = vmatmul.mubr.msk.bf16.gmra.mrb[60].mxu0 %vm15095_vm2, %v9739_v56  ;;  %vm15109_vm2 = vmmov %vm15085_vm0 }
 0x4f0   : > { %v8247_v45 = vpop.permute.xlu1 %8246 }
 0x4f1   : > { %v8329_v36 = vpop.permute.xlu0 %8328  ;;  %v8367_v44 = vsel %vm15099_vm14, %v9661_v49, %v8247_v45  ;;  %v14614_v45 = vld [vmem:[%s14813_s6] ss:$0 sm:$0xff]  ;;  %vm15110_vm14 = vmmov %vm15085_vm0 }
 0x4f2   : > { %v8409_v14 = vsel %vm6109_vm4, %v8370_v5, %v8329_v36 }
 0x4f4   : > { %v8327_v57 = vpop.permute.xlu1 %8326 }
 0x4f5   : > { %10101 = vmatmul.mubr.msk.bf16.gmra.mrb[24].mxu1 %vm6161_vm9, %v8403_v29  ;;  %v8407_v51 = vsel %vm6109_vm4, %v8367_v44, %v8327_v57  ;;  %v14621_v29 = vld [vmem:[%s14815_s8] ss:$0 sm:$0xff] }
 0x4f6   : > { %10104 = vmatprep.mubr.msk.bf16.mxu1 %vm6161_vm9, %v8405_v47 }
 0x4fb   : > { %v8253_v40 = vpop.permute.xlu0 %8252 }
 0x4fc   : > { %v8376_v0 = vsel %vm15101_vm8, %v9664_v6, %v8253_v40 }
 0x4fd   : > { %10105 = vmatmul.mubr.msk.bf16.gmra.mrb[28].mxu1 %vm6161_vm9, %v8407_v51 }
 0x4fe   : > { %10108 = vmatprep.mubr.msk.bf16.mxu1 %vm6161_vm9, %v8409_v14  ;;  %v8251_v37 = vpop.permute.xlu1 %8250 }
 0x4ff   : > { %v8333_v38 = vpop.permute.xlu0 %8332  ;;  %v8373_v4 = vsel %vm15085_vm0, %v9663_v35, %v8251_v37 }
 0x500   : > { %v8413_v39 = vsel %vm6109_vm4, %v8376_v0, %v8333_v38 }
 0x502   : > { %v8331_v2 = vpop.permute.xlu1 %8330 }
 0x503   : > { %v8411_v41 = vsel %vm6109_vm4, %v8373_v4, %v8331_v2 }
 0x505   : > { %10109 = vmatmul.mubr.msk.bf16.gmra.mrb[32].mxu1 %vm6161_vm9, %v8411_v41 }
 0x506   : > { %10112 = vmatprep.mubr.msk.bf16.mxu1 %vm6161_vm9, %v8413_v39 }
 0x509   : > { %v8257_v17 = vpop.permute.xlu0 %8256 }
 0x50a   : > { %v8382_v25 = vsel %vm15102_vm5, %v9666_v55, %v8257_v17 }
 0x50b   : > { %v8255_v3 = vpop.permute.xlu1 %8254 }
 0x50c   : > { %v8379_v32 = vsel %vm15103_vm1, %v9665_v46, %v8255_v3 }
 0x50d   : > { %v8337_v15 = vpop.permute.xlu0 %8336 }
 0x50e   : > { %v8417_v26 = vsel %vm6109_vm4, %v8382_v25, %v8337_v15 }
 0x50f   : > { %v8335_v61 = vpop.permute.xlu1 %8334 }
 0x510   : > { %v8415_v35 = vsel %vm6109_vm4, %v8379_v32, %v8335_v61 }
 0x511   : > { %10113 = vmatmul.mubr.msk.bf16.gmra.mrb[36].mxu1 %vm6161_vm9, %v8415_v35 }
 0x512   : > { %10116 = vmatprep.mubr.msk.bf16.mxu1 %vm6161_vm9, %v8417_v26 }
 0x516   : > { %v8261_v6 = vpop.permute.xlu0 %8260 }
 0x517   : > { %v8388_v54 = vsel %vm15104_vm11, %v9668_v33, %v8261_v6  ;;  %vm15111_vm11 = vmmov %vm15103_vm1 }
 0x519   : > { %v8259_v43 = vpop.permute.xlu1 %8258 }
 0x51a   : > { %v8341_v16 = vpop.permute.xlu0 %8340  ;;  %v8385_v8 = vsel %vm15105_vm12, %v9667_v30, %v8259_v43  ;;  %vm15112_vm12 = vmmov %vm15103_vm1 }
 0x51b   : > { %v8421_v19 = vsel %vm6109_vm4, %v8388_v54, %v8341_v16 }
 0x51d   : > { %v8339_v63 = vpop.permute.xlu1 %8338 }
 0x51e   : > { %v8419_v46 = vsel %vm6109_vm4, %v8385_v8, %v8339_v63 }
 0x51f   : > { %10117 = vmatmul.mubr.msk.bf16.gmra.mrb[40].mxu1 %vm6161_vm9, %v8419_v46 }
 0x520   : > { %10120 = vmatprep.mubr.msk.bf16.mxu1 %vm6161_vm9, %v8421_v19 }
 0x523   : > { %v8263_v55 = vpop.permute.xlu1 %8262 }
 0x524   : > { %v8391_v59 = vsel %vm15106_vm13, %v9669_v22, %v8263_v55  ;;  %vm15113_vm13 = vmmov %vm15103_vm1 }
 0x527   : > { %v8343_v9 = vpop.permute.xlu1 %8342 }
 0x528   : > { %v8423_v58 = vsel %vm6109_vm4, %v8391_v59, %v8343_v9 }
 0x529   : > { %10121 = vmatmul.mubr.msk.bf16.gmra.mrb[44].mxu1 %vm6161_vm9, %v8423_v58 }
 0x58a   : > { %v10128_v23 = vpop.f32.mrb[32].mxu0 }
 0x58b   : > { %v8935_v30 = vpop.f32.mrb[33].mxu0  ;;  %v8944_v52 = vadd.f32 %v10128_v23, %v14621_v29 }
 0x58c   : > { %v10129_v33 = vpop.f32.mrb[34].mxu0  ;;  %v8936_v5 = vadd.f32 %v14621_v29, %v8935_v30 }
 0x58d   : > { %v8938_v31 = vpop.f32.mrb[35].mxu0  ;;  %v8947_v4 = vadd.f32 %v10129_v33, %v14621_v29 }
 0x58e   : > { %v8939_v32 = vadd.f32 %v14621_v29, %v8938_v31 }
 0x592   : > { %v10132_v11 = vpop.f32.mrb[36].mxu0 }
 0x593   : > { %v14579_v53 = vpop.f32.mrb[37].mxu0  ;;  %v8960_v63 = vadd.f32 %v10132_v11, %v14621_v29 }
 0x594   : > { %v14581_v27 = vpop.f32.mrb[38].mxu0  ;;  %v8952_v59 = vadd.f32 %v14621_v29, %v14579_v53 }
 0x595   : > { %v14583_v13 = vpop.f32.mrb[39].mxu0  ;;  %v8963_v30 = vadd.f32 %v14581_v27, %v14621_v29 }
 0x59a   : > { %v14585_v20 = vpop.f32.mrb[40].mxu0 }
 0x59b   : > { %v14587_v42 = vpop.f32.mrb[41].mxu0 }
 0x59c   : > { %v14589_v62 = vpop.f32.mrb[42].mxu0 }
 0x59d   : > { %v14591_v22 = vpop.f32.mrb[43].mxu0 }
 0x5a2   : > { %v14593_v56 = vpop.f32.mrb[44].mxu0 }
 0x5a3   : > { %v14595_v12 = vpop.f32.mrb[45].mxu0 }
 0x5a4   : > { %v14597_v10 = vpop.f32.mrb[46].mxu0 }
 0x5a5   : > { %v14599_v24 = vpop.f32.mrb[47].mxu0 }
 0x5aa   : > { %v14601_v7 = vpop.f32.mrb[48].mxu0 }
 0x5ab   : > { %v14603_v28 = vpop.f32.mrb[49].mxu0 }
 0x5ac   : > { %v14605_v18 = vpop.f32.mrb[50].mxu0 }
 0x5ad   : > { %v14607_v48 = vpop.f32.mrb[51].mxu0 }
 0x5b2   : > { %v14609_v34 = vpop.f32.mrb[52].mxu0 }
 0x5b3   : > { %v14616_v60 = vpop.f32.mrb[53].mxu0 }
 0x5b4   : > { %v14623_v47 = vpop.f32.mrb[54].mxu0 }
 0x5b5   : > { %v14625_v1 = vpop.f32.mrb[55].mxu0 }
 0x5b8   : > { %v10094_v36 = vpop.f32.mrb[16].mxu1 }
 0x5b9   : > { %v10208_v49 = vadd.f32 %v10094_v36, %v14614_v45  ;;  %v8506_v57 = vpop.f32.mrb[17].mxu1  ;;  %v8955_v36 = vadd.f32 %v14621_v29, %v14583_v13 }
 0x5ba   : > { %v10209_v50 = vadd.f32 %v14614_v45, %v8506_v57  ;;  %v10095_v21 = vpop.f32.mrb[18].mxu1  ;;  %v14640_v2 = vpop.f32.mrb[56].mxu0 }
 0x5bb   : > { %vm8667_vm4 = vcmp.ge.f32.partialorder %v10208_v49, 0.0  ;;  %v8699_v44 = vmul.f32 0.1, %v10208_v49  ;;  %v10210_v51 = vadd.f32 %v10095_v21, %v14614_v45  ;;  %v8509_v14 = vpop.f32.mrb[19].mxu1  ;;  %v14642_v3 = vpop.f32.mrb[57].mxu0 }
 0x5bc   : > { %vm8665_vm9 = vcmp.ge.f32.partialorder %v10209_v50, 0.0  ;;  %v8697_v40 = vmul.f32 0.1, %v10209_v50  ;;  %v10211_v37 = vadd.f32 %v14614_v45, %v8509_v14  ;;  %v14645_v61 = vpop.f32.mrb[58].mxu0 }
 0x5bd   : > { %v8731_v38 = vsel %vm8667_vm4, %v10208_v49, %v8699_v44  ;;  %vm8668_vm15 = vcmp.ge.f32.partialorder %v10210_v51, 0.0  ;;  %v8700_v0 = vmul.f32 0.1, %v10210_v51  ;;  %v14649_v43 = vpop.f32.mrb[59].mxu0 }
 0x5be   : > { %v9064_v39 = vadd.f32 %v8944_v52, %v8731_v38  ;;  %v8729_v41 = vsel %vm8665_vm9, %v10209_v50, %v8697_v40  ;;  %vm8666_vm10 = vcmp.ge.f32.partialorder %v10211_v37, 0.0  ;;  %v8698_v17 = vmul.f32 0.1, %v10211_v37 }
 0x5bf   : > { %v9062_v15 = vadd.f32 %v8936_v5, %v8729_v41  ;;  %v8732_v25 = vsel %vm8668_vm15, %v10210_v51, %v8700_v0 }
 0x5c0   : > { %9096 = vst.msk [vmem:[%s14637_s10 + $0x10] sm:$0xff] %vm15107_vm3, %v9064_v39  ;;  %v9065_v26 = vadd.f32 %v8947_v4, %v8732_v25  ;;  %v8730_v35 = vsel %vm8666_vm10, %v10211_v37, %v8698_v17  ;;  %v10098_v6 = vpop.f32.mrb[20].mxu1  ;;  %v8976_v17 = vadd.f32 %v14585_v20, %v14621_v29  ;;  %vm15114_vm3 = vmmov %vm15103_vm1 }
 0x5c1   : > { %9094 = vst.msk [vmem:[%s14637_s10] sm:$0xff] %vm15108_vm7, %v9062_v15  ;;  %v9063_v16 = vadd.f32 %v8939_v32, %v8730_v35  ;;  %v10212_v54 = vadd.f32 %v10098_v6, %v14614_v45  ;;  %v8522_v8 = vpop.f32.mrb[21].mxu1  ;;  %vm15115_vm7 = vmmov %vm15103_vm1 }
 0x5c2   : > { %9097 = vst.msk [vmem:[%s14637_s10 + $0x18] sm:$0xff] %vm15109_vm2, %v9065_v26  ;;  %v10213_v19 = vadd.f32 %v14614_v45, %v8522_v8  ;;  %v10099_v46 = vpop.f32.mrb[22].mxu1  ;;  %v10156_v49 = vpop.f32.mrb[60].mxu0  ;;  %v8968_v26 = vadd.f32 %v14621_v29, %v14587_v42  ;;  %vm15116_vm2 = vmmov %vm15103_vm1 }
 0x5c3   : > { %9095 = vst.msk [vmem:[%s14637_s10 + $0x8] sm:$0xff] %vm15110_vm14, %v9063_v16  ;;  %vm8671_vm6 = vcmp.ge.f32.partialorder %v10212_v54, 0.0  ;;  %v8703_v55 = vmul.f32 0.1, %v10212_v54  ;;  %v10214_v9 = vadd.f32 %v10099_v46, %v14614_v45  ;;  %v8525_v58 = vpop.f32.mrb[23].mxu1  ;;  %v9047_v50 = vpop.f32.mrb[61].mxu0  ;;  %v14669_v27 = vadd.f32 %v10156_v49, %v14621_v29  ;;  %vm15117_vm14 = vmmov %vm15103_vm1 }
 0x5c4   : > { %vm8669_vm8 = vcmp.ge.f32.partialorder %v10213_v19, 0.0  ;;  %v8701_v23 = vmul.f32 0.1, %v10213_v19  ;;  %v10215_v33 = vadd.f32 %v14614_v45, %v8525_v58  ;;  %v14672_v5 = vadd.f32 %v14621_v29, %v9047_v50  ;;  %v10157_v51 = vpop.f32.mrb[62].mxu0 }
 0x5c5   : > { %v8735_v31 = vsel %vm8671_vm6, %v10212_v54, %v8703_v55  ;;  %vm8672_vm0 = vcmp.ge.f32.partialorder %v10214_v9, 0.0  ;;  %v8704_v11 = vmul.f32 0.1, %v10214_v9  ;;  %v14677_v37 = vadd.f32 %v10157_v51, %v14621_v29  ;;  %v9050_v38 = vpop.f32.mrb[63].mxu0 }
 0x5c6   : > { %v9068_v57 = vadd.f32 %v8960_v63, %v8735_v31  ;;  %v8733_v53 = vsel %vm8669_vm8, %v10213_v19, %v8701_v23  ;;  %vm8670_vm5 = vcmp.ge.f32.partialorder %v10215_v33, 0.0  ;;  %v8702_v52 = vmul.f32 0.1, %v10215_v33 }
 0x5c7   : > { %v9066_v21 = vadd.f32 %v8952_v59, %v8733_v53  ;;  %v8736_v44 = vsel %vm8672_vm0, %v10214_v9, %v8704_v11  ;;  %v14683_v41 = vadd.f32 %v14621_v29, %v9050_v38  ;;  %v8979_v63 = vadd.f32 %v14589_v62, %v14621_v29 }
 0x5c8   : > { %9100 = vst.msk [vmem:[%s14637_s10 + $0x30] sm:$0xff] %vm15103_vm1, %v9068_v57  ;;  %v9069_v13 = vadd.f32 %v8963_v30, %v8736_v44  ;;  %v8734_v14 = vsel %vm8670_vm5, %v10215_v33, %v8702_v52  ;;  %v10102_v40 = vpop.f32.mrb[24].mxu1  ;;  %v8971_v9 = vadd.f32 %v14621_v29, %v14591_v22  ;;  %v8992_v11 = vadd.f32 %v14593_v56, %v14621_v29 }
 0x5c9   : > { %9098 = vst.msk [vmem:[%s14637_s10 + $0x20] sm:$0xff] %vm15111_vm11, %v9066_v21  ;;  %v9067_v0 = vadd.f32 %v8955_v36, %v8734_v14  ;;  %v10216_v4 = vadd.f32 %v10102_v40, %v14614_v45  ;;  %v8538_v39 = vpop.f32.mrb[25].mxu1  ;;  %v8984_v57 = vadd.f32 %v14621_v29, %v14595_v12  ;;  %v8995_v51 = vadd.f32 %v14597_v10, %v14621_v29  ;;  %vm15118_vm11 = vmmov %vm15103_vm1 }
 0x5ca   : > { %9101 = vst.msk [vmem:[%s14637_s10 + $0x38] sm:$0xff] %vm15112_vm12, %v9069_v13  ;;  %v10217_v15 = vadd.f32 %v14614_v45, %v8538_v39  ;;  %v10103_v25 = vpop.f32.mrb[26].mxu1  ;;  %vm15119_vm12 = vmmov %vm15103_vm1 }
 0x5cb   : > { %9099 = vst.msk [vmem:[%s14637_s10 + $0x28] sm:$0xff] %vm15113_vm13, %v9067_v0  ;;  %vm8675_vm4 = vcmp.ge.f32.partialorder %v10216_v4, 0.0  ;;  %v8707_v32 = vmul.f32 0.1, %v10216_v4  ;;  %v10218_v35 = vadd.f32 %v10103_v25, %v14614_v45  ;;  %v8541_v6 = vpop.f32.mrb[27].mxu1  ;;  %v8987_v0 = vadd.f32 %v14621_v29, %v14599_v24  ;;  %vm15120_vm13 = vmmov %vm15103_vm1 }
 0x5cc   : > { %vm8673_vm9 = vcmp.ge.f32.partialorder %v10217_v15, 0.0  ;;  %v8705_v16 = vmul.f32 0.1, %v10217_v15  ;;  %v10219_v54 = vadd.f32 %v14614_v45, %v8541_v6  ;;  %v9000_v6 = vadd.f32 %v14621_v29, %v14603_v28 }
 0x5cd   : > { %v8739_v20 = vsel %vm8675_vm4, %v10216_v4, %v8707_v32  ;;  %vm8676_vm15 = vcmp.ge.f32.partialorder %v10218_v35, 0.0  ;;  %v8708_v8 = vmul.f32 0.1, %v10218_v35  ;;  %v9008_v32 = vadd.f32 %v14601_v7, %v14621_v29 }
 0x5ce   : > { %v9072_v19 = vadd.f32 %v8976_v17, %v8739_v20  ;;  %v8737_v46 = vsel %vm8673_vm9, %v10217_v15, %v8705_v16  ;;  %vm8674_vm10 = vcmp.ge.f32.partialorder %v10219_v54, 0.0  ;;  %v8706_v42 = vmul.f32 0.1, %v10219_v54 }
 0x5cf   : > { %v9070_v55 = vadd.f32 %v8968_v26, %v8737_v46  ;;  %v8740_v59 = vsel %vm8676_vm15, %v10218_v35, %v8708_v8 }
 0x5d0   : > { %9104 = vst.msk [vmem:[%s14637_s10 + $0x50] sm:$0xff] %vm15114_vm3, %v9072_v19  ;;  %v9073_v58 = vadd.f32 %v8979_v63, %v8740_v59  ;;  %v8738_v23 = vsel %vm8674_vm10, %v10219_v54, %v8706_v42  ;;  %v10106_v30 = vpop.f32.mrb[28].mxu1  ;;  %v9011_v19 = vadd.f32 %v14605_v18, %v14621_v29  ;;  %vm15121_vm3 = vmmov %vm15103_vm1 }
 0x5d1   : > { %9102 = vst.msk [vmem:[%s14637_s10 + $0x40] sm:$0xff] %vm15115_vm7, %v9070_v55  ;;  %v9071_v33 = vadd.f32 %v8971_v9, %v8738_v23  ;;  %v10220_v62 = vadd.f32 %v10106_v30, %v14614_v45  ;;  %v8554_v31 = vpop.f32.mrb[29].mxu1  ;;  %v9003_v9 = vadd.f32 %v14621_v29, %v14607_v48  ;;  %vm15122_vm7 = vmmov %vm15103_vm1 }
 0x5d2   : > { %9105 = vst.msk [vmem:[%s14637_s10 + $0x58] sm:$0xff] %vm15116_vm2, %v9073_v58  ;;  %v10221_v36 = vadd.f32 %v14614_v45, %v8554_v31  ;;  %v10107_v49 = vpop.f32.mrb[30].mxu1  ;;  %vm15123_vm2 = vmmov %vm15103_vm1  ;;  %v9024_v31 = vadd.f32 %v14609_v34, %v14621_v29 }
 0x5d3   : > { %9103 = vst.msk [vmem:[%s14637_s10 + $0x48] sm:$0xff] %vm15117_vm14, %v9071_v33  ;;  %vm8679_vm6 = vcmp.ge.f32.partialorder %v10220_v62, 0.0  ;;  %v8711_v22 = vmul.f32 0.1, %v10220_v62  ;;  %v10222_v53 = vadd.f32 %v10107_v49, %v14614_v45  ;;  %v8557_v52 = vpop.f32.mrb[31].mxu1  ;;  %vm15124_vm14 = vmmov %vm15103_vm1  ;;  %v9016_v49 = vadd.f32 %v14621_v29, %v14616_v60 }
 0x5d4   : > { %vm8677_vm8 = vcmp.ge.f32.partialorder %v10221_v36, 0.0  ;;  %v8709_v50 = vmul.f32 0.1, %v10221_v36  ;;  %v10223_v21 = vadd.f32 %v14614_v45, %v8557_v52 }
 0x5d5   : > { %v8743_v56 = vsel %vm8679_vm6, %v10220_v62, %v8711_v22  ;;  %vm8680_vm0 = vcmp.ge.f32.partialorder %v10222_v53, 0.0  ;;  %v8712_v44 = vmul.f32 0.1, %v10222_v53 }
 0x5d6   : > { %v9076_v13 = vadd.f32 %v8992_v11, %v8743_v56  ;;  %v8741_v14 = vsel %vm8677_vm8, %v10221_v36, %v8709_v50  ;;  %vm8678_vm5 = vcmp.ge.f32.partialorder %v10223_v21, 0.0  ;;  %v8710_v12 = vmul.f32 0.1, %v10223_v21 }
 0x5d7   : > { %v9074_v40 = vadd.f32 %v8984_v57, %v8741_v14  ;;  %v8744_v38 = vsel %vm8680_vm0, %v10222_v53, %v8712_v44  ;;  %v9019_v14 = vadd.f32 %v14621_v29, %v14625_v1 }
 0x5d8   : > { %9108 = vst.msk [vmem:[%s14637_s10 + $0x70] sm:$0xff] %vm15103_vm1, %v9076_v13  ;;  %v9077_v4 = vadd.f32 %v8995_v51, %v8744_v38  ;;  %v8742_v39 = vsel %vm8678_vm5, %v10223_v21, %v8710_v12  ;;  %v10110_v17 = vpop.f32.mrb[32].mxu1  ;;  %v9027_v21 = vadd.f32 %v14623_v47, %v14621_v29 }
 0x5d9   : > { %9106 = vst.msk [vmem:[%s14637_s10 + $0x60] sm:$0xff] %vm15118_vm11, %v9074_v40  ;;  %v9075_v15 = vadd.f32 %v8987_v0, %v8742_v39  ;;  %v10224_v10 = vadd.f32 %v10110_v17, %v14614_v45  ;;  %v8570_v25 = vpop.f32.mrb[33].mxu1  ;;  %vm15125_vm11 = vmmov %vm15103_vm1  ;;  %v9040_v39 = vadd.f32 %v14640_v2, %v14621_v29 }
 0x5da   : > { %9109 = vst.msk [vmem:[%s14637_s10 + $0x78] sm:$0xff] %vm15119_vm12, %v9077_v4  ;;  %v10225_v26 = vadd.f32 %v14614_v45, %v8570_v25  ;;  %v10111_v35 = vpop.f32.mrb[34].mxu1  ;;  %vm15126_vm12 = vmmov %vm15103_vm1 }
 0x5db   : > { %9107 = vst.msk [vmem:[%s14637_s10 + $0x68] sm:$0xff] %vm15120_vm13, %v9075_v15  ;;  %vm8683_vm4 = vcmp.ge.f32.partialorder %v10224_v10, 0.0  ;;  %v8715_v24 = vmul.f32 0.1, %v10224_v10  ;;  %v10226_v16 = vadd.f32 %v10111_v35, %v14614_v45  ;;  %v8573_v54 = vpop.f32.mrb[35].mxu1  ;;  %vm15127_vm13 = vmmov %vm15103_vm1 }
 0x5dc   : > { %vm8681_vm9 = vcmp.ge.f32.partialorder %v10225_v26, 0.0  ;;  %v8713_v20 = vmul.f32 0.1, %v10225_v26  ;;  %v10227_v8 = vadd.f32 %v14614_v45, %v8573_v54 }
 0x5dd   : > { %v8747_v7 = vsel %vm8683_vm4, %v10224_v10, %v8715_v24  ;;  %vm8684_vm15 = vcmp.ge.f32.partialorder %v10226_v16, 0.0  ;;  %v8716_v63 = vmul.f32 0.1, %v10226_v16  ;;  %v9032_v10 = vadd.f32 %v14621_v29, %v14642_v3 }
 0x5de   : > { %v9080_v46 = vadd.f32 %v9008_v32, %v8747_v7  ;;  %v8745_v42 = vsel %vm8681_vm9, %v10225_v26, %v8713_v20  ;;  %vm8682_vm10 = vcmp.ge.f32.partialorder %v10227_v8, 0.0  ;;  %v8714_v28 = vmul.f32 0.1, %v10227_v8 }
 0x5df   : > { %v9078_v55 = vadd.f32 %v9000_v6, %v8745_v42  ;;  %v8748_v59 = vsel %vm8684_vm15, %v10226_v16, %v8716_v63  ;;  %v9043_v6 = vadd.f32 %v14645_v61, %v14621_v29  ;;  %v9035_v7 = vadd.f32 %v14621_v29, %v14649_v43 }
 0x5e0   : > { %9112 = vst.msk [vmem:[%s14637_s10 + $0x90] sm:$0xff] %vm15121_vm3, %v9080_v46  ;;  %v9081_v58 = vadd.f32 %v9011_v19, %v8748_v59  ;;  %v8746_v23 = vsel %vm8682_vm10, %v10227_v8, %v8714_v28  ;;  %vm15128_vm3 = vmmov %vm15103_vm1 }
 0x5e1   : > { %9110 = vst.msk [vmem:[%s14637_s10 + $0x80] sm:$0xff] %vm15122_vm7, %v9078_v55  ;;  %v9079_v30 = vadd.f32 %v9003_v9, %v8746_v23  ;;  %vm15129_vm7 = vmmov %vm15103_vm1 }
 0x5e2   : > { %9113 = vst.msk [vmem:[%s14637_s10 + $0x98] sm:$0xff] %vm15123_vm2, %v9081_v58  ;;  %vm15130_vm2 = vmmov %vm15103_vm1 }
 0x5e3   : > { %9111 = vst.msk [vmem:[%s14637_s10 + $0x88] sm:$0xff] %vm15124_vm14, %v9079_v30  ;;  %vm15131_vm14 = vmmov %vm15103_vm1 }
 0x5e4   : > { %v10114_v18 = vpop.f32.mrb[36].mxu1 }
 0x5e5   : > { %v10228_v33 = vadd.f32 %v10114_v18, %v14614_v45  ;;  %v8586_v62 = vpop.f32.mrb[37].mxu1 }
 0x5e6   : > { %v10229_v48 = vadd.f32 %v14614_v45, %v8586_v62  ;;  %v10115_v11 = vpop.f32.mrb[38].mxu1 }
 0x5e7   : > { %vm8687_vm6 = vcmp.ge.f32.partialorder %v10228_v33, 0.0  ;;  %v8719_v36 = vmul.f32 0.1, %v10228_v33  ;;  %v10230_v22 = vadd.f32 %v10115_v11, %v14614_v45  ;;  %v8589_v57 = vpop.f32.mrb[39].mxu1 }
 0x5e8   : > { %vm8685_vm8 = vcmp.ge.f32.partialorder %v10229_v48, 0.0  ;;  %v8717_v53 = vmul.f32 0.1, %v10229_v48  ;;  %v10231_v52 = vadd.f32 %v14614_v45, %v8589_v57 }
 0x5e9   : > { %v8751_v50 = vsel %vm8687_vm6, %v10228_v33, %v8719_v36  ;;  %vm8688_vm0 = vcmp.ge.f32.partialorder %v10230_v22, 0.0  ;;  %v8720_v34 = vmul.f32 0.1, %v10230_v22 }
 0x5ea   : > { %v9084_v56 = vadd.f32 %v9024_v31, %v8751_v50  ;;  %v8749_v44 = vsel %vm8685_vm8, %v10229_v48, %v8717_v53  ;;  %vm8686_vm5 = vcmp.ge.f32.partialorder %v10231_v52, 0.0  ;;  %v8718_v60 = vmul.f32 0.1, %v10231_v52 }
 0x5eb   : > { %v9082_v51 = vadd.f32 %v9016_v49, %v8749_v44  ;;  %v8752_v13 = vsel %vm8688_vm0, %v10230_v22, %v8720_v34 }
 0x5ec   : > { %9116 = vst.msk [vmem:[%s14637_s10 + $0xb0] sm:$0xff] %vm15103_vm1, %v9084_v56  ;;  %v9085_v12 = vadd.f32 %v9027_v21, %v8752_v13  ;;  %v8750_v40 = vsel %vm8686_vm5, %v10231_v52, %v8718_v60 }
 0x5ed   : > { %9114 = vst.msk [vmem:[%s14637_s10 + $0xa0] sm:$0xff] %vm15125_vm11, %v9082_v51  ;;  %v9083_v38 = vadd.f32 %v9019_v14, %v8750_v40  ;;  %vm15132_vm11 = vmmov %vm15103_vm1 }
 0x5ee   : > { %9117 = vst.msk [vmem:[%s14637_s10 + $0xb8] sm:$0xff] %vm15126_vm12, %v9085_v12  ;;  %vm15133_vm12 = vmmov %vm15103_vm1 }
 0x5ef   : > { %9115 = vst.msk [vmem:[%s14637_s10 + $0xa8] sm:$0xff] %vm15127_vm13, %v9083_v38  ;;  %vm15134_vm13 = vmmov %vm15103_vm1 }
 0x5f2   : > { %v10118_v47 = vpop.f32.mrb[40].mxu1 }
 0x5f3   : > { %v10232_v0 = vadd.f32 %v10118_v47, %v14614_v45  ;;  %v8602_v4 = vpop.f32.mrb[41].mxu1 }
 0x5f4   : > { %v10233_v1 = vadd.f32 %v14614_v45, %v8602_v4  ;;  %v10119_v17 = vpop.f32.mrb[42].mxu1 }
 0x5f5   : > { %vm8691_vm4 = vcmp.ge.f32.partialorder %v10232_v0, 0.0  ;;  %v8723_v15 = vmul.f32 0.1, %v10232_v0  ;;  %v10234_v25 = vadd.f32 %v10119_v17, %v14614_v45  ;;  %v8605_v32 = vpop.f32.mrb[43].mxu1 }
 0x5f6   : > { %vm8689_vm9 = vcmp.ge.f32.partialorder %v10233_v1, 0.0  ;;  %v8721_v26 = vmul.f32 0.1, %v10233_v1  ;;  %v10235_v35 = vadd.f32 %v14614_v45, %v8605_v32 }
 0x5f7   : > { %v8755_v24 = vsel %vm8691_vm4, %v10232_v0, %v8723_v15  ;;  %vm8692_vm15 = vcmp.ge.f32.partialorder %v10234_v25, 0.0  ;;  %v8724_v2 = vmul.f32 0.1, %v10234_v25 }
 0x5f8   : > { %v9088_v16 = vadd.f32 %v9040_v39, %v8755_v24  ;;  %v8753_v54 = vsel %vm8689_vm9, %v10233_v1, %v8721_v26  ;;  %vm8690_vm10 = vcmp.ge.f32.partialorder %v10235_v35, 0.0  ;;  %v8722_v3 = vmul.f32 0.1, %v10235_v35 }
 0x5f9   : > { %v9086_v20 = vadd.f32 %v9032_v10, %v8753_v54  ;;  %v8756_v8 = vsel %vm8692_vm15, %v10234_v25, %v8724_v2 }
 0x5fa   : > { %9120 = vst.msk [vmem:[%s14637_s10 + $0xd0] sm:$0xff] %vm15128_vm3, %v9088_v16  ;;  %v9089_v63 = vadd.f32 %v9043_v6, %v8756_v8  ;;  %v8754_v19 = vsel %vm8690_vm10, %v10235_v35, %v8722_v3 }
 0x5fb   : > { %9118 = vst.msk [vmem:[%s14637_s10 + $0xc0] sm:$0xff] %vm15129_vm7, %v9086_v20  ;;  %v9087_v46 = vadd.f32 %v9035_v7, %v8754_v19 }
 0x5fc   : > { %9121 = vst.msk [vmem:[%s14637_s10 + $0xd8] sm:$0xff] %vm15130_vm2, %v9089_v63  ;;  %v10122_v61 = vpop.f32.mrb[44].mxu1 }
 0x5fd   : > { %9119 = vst.msk [vmem:[%s14637_s10 + $0xc8] sm:$0xff] %vm15131_vm14, %v9087_v46  ;;  %v10236_v42 = vadd.f32 %v10122_v61, %v14614_v45  ;;  %v8618_v28 = vpop.f32.mrb[45].mxu1 }
 0x5fe   : > { %v10237_v55 = vadd.f32 %v14614_v45, %v8618_v28  ;;  %v10123_v59 = vpop.f32.mrb[46].mxu1 }
 0x5ff   : > { %vm8695_vm6 = vcmp.ge.f32.partialorder %v10236_v42, 0.0  ;;  %v8727_v29 = vmul.f32 0.1, %v10236_v42  ;;  %v10238_v43 = vadd.f32 %v10123_v59, %v14614_v45  ;;  %v8621_v9 = vpop.f32.mrb[47].mxu1 }
 0x600   : > { %vm8693_vm8 = vcmp.ge.f32.partialorder %v10237_v55, 0.0  ;;  %v8725_v58 = vmul.f32 0.1, %v10237_v55  ;;  %v10239_v23 = vadd.f32 %v14614_v45, %v8621_v9 }
 0x601   : > { %v8759_v30 = vsel %vm8695_vm6, %v10236_v42, %v8727_v29  ;;  %vm8696_vm0 = vcmp.ge.f32.partialorder %v10238_v43, 0.0  ;;  %v8728_v18 = vmul.f32 0.1, %v10238_v43 }
 0x602   : > { %v9092_v33 = vadd.f32 %v14669_v27, %v8759_v30  ;;  %v8757_v62 = vsel %vm8693_vm8, %v10237_v55, %v8725_v58  ;;  %vm8694_vm5 = vcmp.ge.f32.partialorder %v10239_v23, 0.0  ;;  %v8726_v31 = vmul.f32 0.1, %v10239_v23 }
 0x603   : > { %v9090_v48 = vadd.f32 %v14672_v5, %v8757_v62  ;;  %v8760_v11 = vsel %vm8696_vm0, %v10238_v43, %v8728_v18 }
 0x604   : > { %9124 = vst.msk [vmem:[%s14637_s10 + $0xf0] sm:$0xff] %vm15103_vm1, %v9092_v33  ;;  %v9093_v36 = vadd.f32 %v14677_v37, %v8760_v11  ;;  %v8758_v49 = vsel %vm8694_vm5, %v10239_v23, %v8726_v31 }
 0x605   : > { %9122 = vst.msk [vmem:[%s14637_s10 + $0xe0] sm:$0xff] %vm15132_vm11, %v9090_v48  ;;  %v9091_v45 = vadd.f32 %v14683_v41, %v8758_v49 }
 0x606   : > { %9125 = vst.msk [vmem:[%s14637_s10 + $0xf8] sm:$0xff] %vm15133_vm12, %v9093_v36 }
 0x607   : > { %9123 = vst.msk [vmem:[%s14637_s10 + $0xe8] sm:$0xff] %vm15134_vm13, %v9091_v45 }
 0x608 PF: > { %s19_s30 = sadd.s32 1, %s10644_s30  }
 0x609   : > { %p16_p4 = scmp.ge.s32.totalorder %s19_s30, 4  }
 0x60b   :  { %18 = sbr.rel (!%p16_p4) target bundleno = 1 (0x1), region = 93 }

</bundles_post_ra>
